<compile_context>
chip_gen: v6e
topology: v6e:2x2x1
jax: 0.10.0
libtpu: 0.0.40
codegen_flags: <defaults>
</compile_context>

<pallas_src>
import functools

import jax
import jax.numpy as jnp
from jax import lax
from jax.experimental import pallas as pl
from jax.experimental.pallas import tpu as pltpu


# Set True on v6e/v7x to run the big (HW, HW) exp's in bf16 (~2x EUP throughput).
# Default False: v5e has no bf16 EUP and this eats into the accuracy budget.
BF16_EXP = False


# ----------------------------------------------------------------------------
# in-kernel helpers
# ----------------------------------------------------------------------------
def _layer_norm(x, g, b, eps=1e-5):
    mu = jnp.mean(x, axis=-1, keepdims=True)
    var = jnp.mean(jnp.square(x - mu), axis=-1, keepdims=True)
    return (x - mu) * lax.rsqrt(var + eps) * g + b


# ----------------------------------------------------------------------------
# Pallas kernel: one grid step == `bt` batch elements.  Whole forward
# (w_b linear -> dual softmax -> cross-attn vs. memory -> token remix ->
#  4-head self-attn) runs in VMEM.  Matmuls: bf16 operands, f32 accumulation;
# softmax normalization is deferred past the AV matmuls.
# ----------------------------------------------------------------------------
def memory_kernel(x_ref, wb_w_ref, wb_b_ref, bias64_ref, kv_ref, a_w_ref,
                  b_wqkv_ref, b_bqkv_ref, b_wo_ref, o_ref,
                  *, n_head2, d_k2, d_v2, bt, bf16_exp):
    bf16 = jnp.bfloat16
    f32 = jnp.float32

    # unpacked f32 bias / LN slab
    a_bq = bias64_ref[0]
    a_bo = bias64_ref[1]
    a_g = bias64_ref[2]
    a_b = bias64_ref[3]
    b_bo = bias64_ref[4]
    b_g = bias64_ref[5]
    b_b = bias64_ref[6]

    wb_w = wb_w_ref[...]          # (C, K)        bf16
    wb_b = wb_b_ref[...]          # (1, K)        f32
    a_wq = a_w_ref[0]             # (C, Dm)       bf16
    a_wo = a_w_ref[1]             # (C, C)        bf16
    k_pre = kv_ref[0]             # (M, Dm)       bf16 (pre-scaled by 1/sqrt(Dm))
    v_pre = kv_ref[1]             # (M, C)        bf16
    b_wqkv = b_wqkv_ref[...]      # (C, 3*n*dk)   bf16 (Q cols pre-scaled)
    b_bqkv = b_bqkv_ref[...]      # (1, 3*n*dk)   f32
    nk = n_head2 * d_k2

    def one_element(e):
        xT = x_ref[e]                                                       # (C, HW) bf16

        # ---- w_b logits, both orientations (bias cancels in token softmax) ----
        logits = lax.dot_general(xT, wb_w, (((0,), (0,)), ((), ())),
                                 preferred_element_type=f32) + wb_b        # (HW, K)
        logits_t = lax.dot_general(wb_w, xT, (((0,), (0,)), ((), ())),
                                   preferred_element_type=f32)             # (K, HW)

        # token-axis softmax folded into the class_feat1 matmul (deferred norm)
        m2 = jnp.max(logits_t, axis=-1, keepdims=True)
        e2 = jnp.exp(logits_t - m2)                                         # (K, HW)
        r2 = pl.reciprocal(jnp.sum(e2, axis=-1, keepdims=True), approx=True)
        cf1 = lax.dot_general(e2.astype(bf16), xT, (((1,), (1,)), ((), ())),
                              preferred_element_type=f32) * r2              # (K, C)

        # class-axis softmax; normalization deferred past the remix matmul
        m1 = jnp.max(logits, axis=-1, keepdims=True)
        e1 = jnp.exp(logits - m1)                                           # (HW, K)
        r1 = pl.reciprocal(jnp.sum(e1, axis=-1, keepdims=True), approx=True)  # (HW, 1)

        # ---- slf_attn: 1-head cross attention vs. precomputed memory K/V ----
        q = jnp.dot(cf1.astype(bf16), a_wq,
                    preferred_element_type=f32) + a_bq                      # (K, Dm)
        s = lax.dot_general(q.astype(bf16), k_pre, (((1,), (1,)), ((), ())),
                            preferred_element_type=f32)                     # (K, M)
        ms = jnp.max(s, axis=-1, keepdims=True)
        ps = jnp.exp(s - ms)
        rs = pl.reciprocal(jnp.sum(ps, axis=-1, keepdims=True), approx=True)
        cf = jnp.dot(ps.astype(bf16), v_pre, preferred_element_type=f32) * rs  # (K, C)
        cf = jnp.dot(cf.astype(bf16), a_wo, preferred_element_type=f32) + a_bo
        cf = _layer_norm(cf + cf1, a_g, a_b)                                # (K, C)

        # ---- scatter class features back onto the tokens ----
        cf2 = jnp.dot(e1.astype(bf16), cf.astype(bf16),
                      preferred_element_type=f32) * r1                      # (HW, C)
        cf2_bf = cf2.astype(bf16)

        # ---- slf_attn1: 4-head self attention (fused QKV, scale folded in Q) --
        qkv = jnp.dot(cf2_bf, b_wqkv, preferred_element_type=f32) + b_bqkv  # (HW, 3*n*dk)
        qkv_bf = qkv.astype(bf16)                                           # single hoisted cast

        o2 = None
        for h in range(n_head2):                                            # static unroll
            qh = qkv_bf[:, h * d_k2:(h + 1) * d_k2]
            kh = qkv_bf[:, nk + h * d_k2:nk + (h + 1) * d_k2]
            vh = qkv_bf[:, 2 * nk + h * d_v2:2 * nk + (h + 1) * d_v2]
            sh = lax.dot_general(qh, kh, (((1,), (1,)), ((), ())),
                                 preferred_element_type=f32)                # (HW, HW)
            mh = jnp.max(sh, axis=-1, keepdims=True)
            if bf16_exp:
                ph_mm = jnp.exp((sh - mh).astype(bf16))                     # bf16 EUP (v6e/v7x)
                lh = jnp.sum(ph_mm.astype(f32), axis=-1, keepdims=True)
            else:
                ph = jnp.exp(sh - mh)                                       # f32 EUP
                lh = jnp.sum(ph, axis=-1, keepdims=True)
                ph_mm = ph.astype(bf16)
            pv = jnp.dot(ph_mm, vh, preferred_element_type=f32)             # (HW, dv)
            pv = pv * pl.reciprocal(lh, approx=True)                        # deferred norm
            ho = jnp.dot(pv.astype(bf16), b_wo_ref[h],
                         preferred_element_type=f32)                        # (HW, C)
            o2 = (ho + b_bo) if h == 0 else (o2 + ho)
        o2 = _layer_norm(o2 + cf2, b_g, b_b)                                # (HW, C)

        # lane-dense store: (C, HW) so vst's are full 128-lane wide
        o_ref[e] = o2.T

    # TODO(synk): if HW grows well past 256, switch this static unroll (and the
    # head loop) to lax.fori_loop(unroll=True) / query tiling to bound live
    # ranges within v7x's smaller VMEM.
    for e in range(bt):
        one_element(e)


# ----------------------------------------------------------------------------
# parameters (deterministic synthetic init, raw / unfused — reference uses these)
# ----------------------------------------------------------------------------
def make_params(key, *, c=64, num_classes=5, d_mem=64, n_head2=4, d_k2=64, d_v2=64):
    ks = jax.random.split(key, 12)

    def w(k, shape, scale=0.05):
        return (scale * jax.random.normal(k, shape)).astype(jnp.float32)

    z = lambda n: jnp.zeros((1, n), jnp.float32)
    one = lambda n: jnp.ones((1, n), jnp.float32)

    p = {}
    p["wb_w"] = w(ks[0], (c, num_classes))
    p["wb_b"] = w(ks[1], (1, num_classes))
    p["mem"] = w(ks[2], (num_classes, d_mem), 1.0)   # stand-in for read_cache() centers
    # slf_attn: n_head=1, d_model=c, d_input_k=d_k=d_mem, d_v=c
    p["a_wq"], p["a_bq"] = w(ks[3], (c, d_mem)), z(d_mem)
    p["a_wk"], p["a_bk"] = w(ks[4], (d_mem, d_mem)), z(d_mem)
    p["a_wv"], p["a_bv"] = w(ks[5], (d_mem, c)), z(c)
    p["a_wo"], p["a_bo"] = w(ks[6], (c, c)), z(c)
    p["a_g"], p["a_b"] = one(c), z(c)
    # slf_attn1: n_head=4, d_model=c, d_input_k=c, d_k=64, d_v=c
    p["b_wq"], p["b_bq"] = w(ks[7], (c, n_head2 * d_k2)), z(n_head2 * d_k2)
    p["b_wk"], p["b_bk"] = w(ks[8], (c, n_head2 * d_k2)), z(n_head2 * d_k2)
    p["b_wv"], p["b_bv"] = w(ks[9], (c, n_head2 * d_v2)), z(n_head2 * d_v2)
    p["b_wo"], p["b_bo"] = w(ks[10], (n_head2 * d_v2, c)), z(c)
    p["b_g"], p["b_b"] = one(c), z(c)
    return p


# ----------------------------------------------------------------------------
# host-side param packing: fuse / precompute / cast for the kernel
# ----------------------------------------------------------------------------
def pack_params(p, *, n_head2=4, d_k2=64, d_v2=64):
    f32, bf16 = jnp.float32, jnp.bfloat16
    c = p["a_wo"].shape[0]
    d_mem = p["a_wq"].shape[1]

    # batch-invariant cross-attention K/V; fold 1/sqrt(d_mem) into K
    k_pre = (p["mem"] @ p["a_wk"] + p["a_bk"]) * (1.0 / float(d_mem) ** 0.5)
    v_pre = p["mem"] @ p["a_wv"] + p["a_bv"]
    kv = jnp.stack([k_pre, v_pre], axis=0).astype(bf16)        # (2, M, 64)  (d_mem == c)

    # fused QKV for slf_attn1; fold 1/sqrt(d_k2) into the Q columns / bias
    scale = 1.0 / float(d_k2) ** 0.5
    b_wqkv = jnp.concatenate(
        [p["b_wq"] * scale, p["b_wk"], p["b_wv"]], axis=1).astype(bf16)    # (c, 3*n*dk)
    b_bqkv = jnp.concatenate(
        [p["b_bq"] * scale, p["b_bk"], p["b_bv"]], axis=1).astype(f32)     # (1, 3*n*dk)

    a_w = jnp.stack([p["a_wq"], p["a_wo"]], axis=0).astype(bf16)           # (2, c, c)

    bias64 = jnp.concatenate(
        [p["a_bq"], p["a_bo"], p["a_g"], p["a_b"],
         p["b_bo"], p["b_g"], p["b_b"], jnp.zeros((1, c), f32)],
        axis=0).astype(f32)                                                # (8, c)

    b_wo = p["b_wo"].reshape(n_head2, d_v2, c).astype(bf16)                # (n, dv, c)

    return dict(wb_w=p["wb_w"].astype(bf16), wb_b=p["wb_b"].astype(f32),
                bias64=bias64, kv=kv, a_w=a_w,
                b_wqkv=b_wqkv, b_bqkv=b_bqkv, b_wo=b_wo)


# ----------------------------------------------------------------------------
# wrapper
# ----------------------------------------------------------------------------
def _full_spec(arr):
    nd = arr.ndim
    return pl.BlockSpec(arr.shape, lambda i, nd=nd: (0,) * nd)


def _pick_bt(b):
    # Amortize the ~0.35 us per-grid-step overhead when B is large, but keep
    # the grid length even (v7x has 2 TensorCores; an odd / length-1 grid
    # idles one of them).  At B=2 this yields bt=1, grid=(2,).
    for bt in (8, 4, 2):
        if b % bt == 0 and (b // bt) % 2 == 0:
            return bt
    return 1


def memory_forward(x_nchw, params, *, n_head2=4, d_k2=64, d_v2=64):
    b, c, H, W = x_nchw.shape
    hw = H * W
    # No host-side NCHW->NHWC transpose: NCHW -> (B, C, HW) is a free reshape.
    # Stream bf16 so the per-grid-step DMA is half width; the kernel works
    # channel-major throughout and emits a channel-major (C, HW) tile.
    x_chw = x_nchw.reshape(b, c, hw).astype(jnp.bfloat16)

    pk = pack_params(params, n_head2=n_head2, d_k2=d_k2, d_v2=d_v2)
    order = ["wb_w", "wb_b", "bias64", "kv", "a_w", "b_wqkv", "b_bqkv", "b_wo"]
    plist = [pk[k] for k in order]

    bt = _pick_bt(b)
    k_cls = pk["wb_w"].shape[1]

    # advisory cost estimate so XLA can schedule around the custom call
    flops = 2 * b * (2 * hw * c * k_cls                       # logits (both orientations)
                     + hw * c * k_cls                         # class_feat1
                     + k_cls * c * (2 * c + 2 * k_cls)        # cross-attn path
                     + hw * k_cls * c                         # token remix
                     + hw * c * 3 * n_head2 * d_k2            # fused QKV projection
                     + n_head2 * 2 * hw * hw * d_k2           # scores + AV
                     + n_head2 * hw * d_v2 * c)               # per-head output proj
    transcendentals = b * (n_head2 * hw * hw + hw * k_cls + k_cls * hw + k_cls * k_cls)
    bytes_accessed = (x_chw.size * x_chw.dtype.itemsize
                      + sum(a.size * a.dtype.itemsize for a in plist)
                      + b * c * hw * 4)

    out = pl.pallas_call(
        functools.partial(memory_kernel, n_head2=n_head2, d_k2=d_k2, d_v2=d_v2,
                          bt=bt, bf16_exp=BF16_EXP),
        out_shape=jax.ShapeDtypeStruct((b, c, hw), jnp.float32),
        grid=(b // bt,),
        in_specs=[pl.BlockSpec((bt, c, hw), lambda i: (i, 0, 0))]
                 + [_full_spec(a) for a in plist],
        out_specs=pl.BlockSpec((bt, c, hw), lambda i: (i, 0, 0)),
        compiler_params=pltpu.CompilerParams(dimension_semantics=("parallel",)),
        cost_estimate=pl.CostEstimate(flops=int(flops),
                                      transcendentals=int(transcendentals),
                                      bytes_accessed=int(bytes_accessed)),
    )(x_chw, *plist)

    # kernel already emitted channel-major tokens: (B, C, HW) -> free reshape to NCHW
    return out.reshape(b, c, H, W)


# ----------------------------------------------------------------------------
# pure-JAX f32 reference (sanity check)
# ----------------------------------------------------------------------------
def _layer_norm_ref(x, g, b, eps=1e-5):
    mu = jnp.mean(x, axis=-1, keepdims=True)
    var = jnp.mean(jnp.square(x - mu), axis=-1, keepdims=True)
    return (x - mu) * lax.rsqrt(var + eps) * g + b


def reference_forward(x_nchw, params, *, n_head2=4, d_k2=64):
    b, c, H, W = x_nchw.shape
    x = jnp.transpose(x_nchw, (0, 2, 3, 1)).reshape(b, H * W, c)
    logits = x @ params["wb_w"] + params["wb_b"]
    w1 = jax.nn.softmax(logits, axis=-1)
    w2 = jax.nn.softmax(jnp.swapaxes(logits, 1, 2), axis=-1)
    cf1 = w2 @ x

    mem = params["mem"]
    q = cf1 @ params["a_wq"] + params["a_bq"]
    k = mem @ params["a_wk"] + params["a_bk"]
    v = mem @ params["a_wv"] + params["a_bv"]
    s = jnp.einsum('bkd,md->bkm', q, k) / (q.shape[-1] ** 0.5)
    cf = jnp.einsum('bkm,mc->bkc', jax.nn.softmax(s, axis=-1), v)
    cf = cf @ params["a_wo"] + params["a_bo"]
    cf = _layer_norm_ref(cf + cf1, params["a_g"], params["a_b"])

    cf2 = w1 @ cf
    q2 = cf2 @ params["b_wq"] + params["b_bq"]
    k2 = cf2 @ params["b_wk"] + params["b_bk"]
    v2 = cf2 @ params["b_wv"] + params["b_bv"]
    outs = []
    for h in range(n_head2):
        lo, hi = h * d_k2, (h + 1) * d_k2
        sh = jnp.einsum('bqd,bkd->bqk', q2[..., lo:hi], k2[..., lo:hi]) / (d_k2 ** 0.5)
        outs.append(jnp.einsum('bqk,bkd->bqd', jax.nn.softmax(sh, axis=-1), v2[..., lo:hi]))
    o2 = jnp.concatenate(outs, axis=-1) @ params["b_wo"] + params["b_bo"]
    o2 = _layer_norm_ref(o2 + cf2, params["b_g"], params["b_b"])
    return jnp.transpose(o2, (0, 2, 1)).reshape(b, c, H, W)


if __name__ == "__main__":
    key = jax.random.PRNGKey(0)
    k_x, k_p = jax.random.split(key)

    B, C, H, W = 2, 64, 16, 16      # feats_channels must be 64 (w_b: Linear(64, 5))
    x = jax.random.normal(k_x, (B, C, H, W), dtype=jnp.float32)
    params = make_params(k_p, c=C)

    out = jax.jit(lambda xx: memory_forward(xx, params))(x)
    out = jax.block_until_ready(out)

    ref = reference_forward(x, params)
    assert out.shape == (B, C, H, W), out.shape
    assert bool(jnp.all(jnp.isfinite(out)))
    max_err = float(jnp.max(jnp.abs(out - ref)))
    # bf16 MXU operands + approx reciprocals vs. an all-f32 reference
    assert max_err < 5e-2, f"max abs err {max_err}"
    print("KERNEL_OK")
</pallas_src>

<mosaic_0001>
module attributes {stable_mosaic.version = 11 : i64} {
  func.func @memory_kernel(%arg0: i32, %arg1: memref<1x64x256xbf16, #tpu.memory_space<vmem>>, %arg2: memref<64x5xbf16, #tpu.memory_space<vmem>>, %arg3: memref<1x5xf32, #tpu.memory_space<vmem>>, %arg4: memref<8x64xf32, #tpu.memory_space<vmem>>, %arg5: memref<2x5x64xbf16, #tpu.memory_space<vmem>>, %arg6: memref<2x64x64xbf16, #tpu.memory_space<vmem>>, %arg7: memref<64x768xbf16, #tpu.memory_space<vmem>>, %arg8: memref<1x768xf32, #tpu.memory_space<vmem>>, %arg9: memref<4x64x64xbf16, #tpu.memory_space<vmem>>, %arg10: memref<1x64x256xf32, #tpu.memory_space<vmem>>) attributes {dimension_semantics = [#tpu.dimension_semantics<parallel>], iteration_bounds = array<i64: 2>, scalar_prefetch = 0 : i64, scratch_operands = 0 : i64, tpu.core_type = #tpu.core_type<tc>, window_params = [{transform_indices = @transform_0, window_bounds = array<i64: 1, 64, 256>}, {pipeline_mode = #tpu.pipeline_mode<synchronous>, transform_indices = @transform_1, window_bounds = array<i64: 64, 5>}, {pipeline_mode = #tpu.pipeline_mode<synchronous>, transform_indices = @transform_2, window_bounds = array<i64: 1, 5>}, {pipeline_mode = #tpu.pipeline_mode<synchronous>, transform_indices = @transform_3, window_bounds = array<i64: 8, 64>}, {pipeline_mode = #tpu.pipeline_mode<synchronous>, transform_indices = @transform_4, window_bounds = array<i64: 2, 5, 64>}, {pipeline_mode = #tpu.pipeline_mode<synchronous>, transform_indices = @transform_5, window_bounds = array<i64: 2, 64, 64>}, {pipeline_mode = #tpu.pipeline_mode<synchronous>, transform_indices = @transform_6, window_bounds = array<i64: 64, 768>}, {pipeline_mode = #tpu.pipeline_mode<synchronous>, transform_indices = @transform_7, window_bounds = array<i64: 1, 768>}, {pipeline_mode = #tpu.pipeline_mode<synchronous>, transform_indices = @transform_8, window_bounds = array<i64: 4, 64, 64>}, {transform_indices = @transform_9, window_bounds = array<i64: 1, 64, 256>}]} {
    %c0 = arith.constant 0 : index
    %c0_0 = arith.constant 0 : index
    %0 = vector.load %arg4[%c0, %c0_0] : memref<8x64xf32, #tpu.memory_space<vmem>>, vector<1x64xf32>
    %1 = vector.shape_cast %0 : vector<1x64xf32> to vector<64xf32>
    %c1 = arith.constant 1 : index
    %c0_1 = arith.constant 0 : index
    %2 = vector.load %arg4[%c1, %c0_1] : memref<8x64xf32, #tpu.memory_space<vmem>>, vector<1x64xf32>
    %3 = vector.shape_cast %2 : vector<1x64xf32> to vector<64xf32>
    %c2 = arith.constant 2 : index
    %c0_2 = arith.constant 0 : index
    %4 = vector.load %arg4[%c2, %c0_2] : memref<8x64xf32, #tpu.memory_space<vmem>>, vector<1x64xf32>
    %5 = vector.shape_cast %4 : vector<1x64xf32> to vector<64xf32>
    %c3 = arith.constant 3 : index
    %c0_3 = arith.constant 0 : index
    %6 = vector.load %arg4[%c3, %c0_3] : memref<8x64xf32, #tpu.memory_space<vmem>>, vector<1x64xf32>
    %7 = vector.shape_cast %6 : vector<1x64xf32> to vector<64xf32>
    %c4 = arith.constant 4 : index
    %c0_4 = arith.constant 0 : index
    %8 = vector.load %arg4[%c4, %c0_4] : memref<8x64xf32, #tpu.memory_space<vmem>>, vector<1x64xf32>
    %9 = vector.shape_cast %8 : vector<1x64xf32> to vector<64xf32>
    %c5 = arith.constant 5 : index
    %c0_5 = arith.constant 0 : index
    %10 = vector.load %arg4[%c5, %c0_5] : memref<8x64xf32, #tpu.memory_space<vmem>>, vector<1x64xf32>
    %11 = vector.shape_cast %10 : vector<1x64xf32> to vector<64xf32>
    %c6 = arith.constant 6 : index
    %c0_6 = arith.constant 0 : index
    %12 = vector.load %arg4[%c6, %c0_6] : memref<8x64xf32, #tpu.memory_space<vmem>>, vector<1x64xf32>
    %13 = vector.shape_cast %12 : vector<1x64xf32> to vector<64xf32>
    %c0_7 = arith.constant 0 : index
    %c0_8 = arith.constant 0 : index
    %14 = vector.load %arg2[%c0_7, %c0_8] : memref<64x5xbf16, #tpu.memory_space<vmem>>, vector<64x5xbf16>
    %c0_9 = arith.constant 0 : index
    %c0_10 = arith.constant 0 : index
    %15 = vector.load %arg3[%c0_9, %c0_10] : memref<1x5xf32, #tpu.memory_space<vmem>>, vector<1x5xf32>
    %c0_11 = arith.constant 0 : index
    %c0_12 = arith.constant 0 : index
    %c0_13 = arith.constant 0 : index
    %16 = vector.load %arg6[%c0_11, %c0_12, %c0_13] : memref<2x64x64xbf16, #tpu.memory_space<vmem>>, vector<1x64x64xbf16>
    %17 = vector.shape_cast %16 : vector<1x64x64xbf16> to vector<64x64xbf16>
    %c1_14 = arith.constant 1 : index
    %c0_15 = arith.constant 0 : index
    %c0_16 = arith.constant 0 : index
    %18 = vector.load %arg6[%c1_14, %c0_15, %c0_16] : memref<2x64x64xbf16, #tpu.memory_space<vmem>>, vector<1x64x64xbf16>
    %19 = vector.shape_cast %18 : vector<1x64x64xbf16> to vector<64x64xbf16>
    %c0_17 = arith.constant 0 : index
    %c0_18 = arith.constant 0 : index
    %c0_19 = arith.constant 0 : index
    %20 = vector.load %arg5[%c0_17, %c0_18, %c0_19] : memref<2x5x64xbf16, #tpu.memory_space<vmem>>, vector<1x5x64xbf16>
    %21 = vector.shape_cast %20 : vector<1x5x64xbf16> to vector<5x64xbf16>
    %c1_20 = arith.constant 1 : index
    %c0_21 = arith.constant 0 : index
    %c0_22 = arith.constant 0 : index
    %22 = vector.load %arg5[%c1_20, %c0_21, %c0_22] : memref<2x5x64xbf16, #tpu.memory_space<vmem>>, vector<1x5x64xbf16>
    %23 = vector.shape_cast %22 : vector<1x5x64xbf16> to vector<5x64xbf16>
    %c0_23 = arith.constant 0 : index
    %c0_24 = arith.constant 0 : index
    %24 = vector.load %arg7[%c0_23, %c0_24] : memref<64x768xbf16, #tpu.memory_space<vmem>>, vector<64x768xbf16>
    %c0_25 = arith.constant 0 : index
    %c0_26 = arith.constant 0 : index
    %25 = vector.load %arg8[%c0_25, %c0_26] : memref<1x768xf32, #tpu.memory_space<vmem>>, vector<1x768xf32>
    %c0_27 = arith.constant 0 : index
    %c0_28 = arith.constant 0 : index
    %c0_29 = arith.constant 0 : index
    %26 = vector.load %arg1[%c0_27, %c0_28, %c0_29] : memref<1x64x256xbf16, #tpu.memory_space<vmem>>, vector<1x64x256xbf16>
    %27 = vector.shape_cast %26 : vector<1x64x256xbf16> to vector<64x256xbf16>
    %cst = arith.constant dense<0.000000e+00> : vector<256x5xf32>
    %28 = tpu.matmul %27, %14, %cst {dimension_numbers = #tpu.dot_dimension_numbers<[0], [0], [1], [1], [0, 1, 1, 1], [], []>} : vector<64x256xbf16>, vector<64x5xbf16>, vector<256x5xf32> -> vector<256x5xf32>
    %29 = vector.broadcast %15 : vector<1x5xf32> to vector<256x5xf32>
    %30 = arith.addf %28, %29 : vector<256x5xf32>
    %cst_30 = arith.constant dense<0.000000e+00> : vector<5x256xf32>
    %31 = tpu.matmul %14, %27, %cst_30 {dimension_numbers = #tpu.dot_dimension_numbers<[0], [0], [1], [1], [0, 1, 1, 1], [], []>} : vector<64x5xbf16>, vector<64x256xbf16>, vector<5x256xf32> -> vector<5x256xf32>
    %cst_31 = arith.constant dense<0xFF800000> : vector<5xf32>
    %32 = vector.multi_reduction <maximumf>, %31, %cst_31 [1] : vector<5x256xf32> to vector<5xf32>
    %33 = vector.shape_cast %32 : vector<5xf32> to vector<5x1xf32>
    %34 = vector.broadcast %33 : vector<5x1xf32> to vector<5x256xf32>
    %35 = arith.subf %31, %34 : vector<5x256xf32>
    %36 = math.exp %35 : vector<5x256xf32>
    %cst_32 = arith.constant dense<0.000000e+00> : vector<5xf32>
    %37 = vector.multi_reduction <add>, %36, %cst_32 [1] : vector<5x256xf32> to vector<5xf32>
    %38 = vector.shape_cast %37 : vector<5xf32> to vector<5x1xf32>
    %39 = tpu.reciprocal %38 {approx = true} : vector<5x1xf32> -> vector<5x1xf32>
    %40 = arith.truncf %36 : vector<5x256xf32> to vector<5x256xbf16>
    %cst_33 = arith.constant dense<0.000000e+00> : vector<5x64xf32>
    %41 = tpu.matmul %40, %27, %cst_33 {dimension_numbers = #tpu.dot_dimension_numbers<[1], [1], [0], [0], [0, 0, 1, 0], [], []>} : vector<5x256xbf16>, vector<64x256xbf16>, vector<5x64xf32> -> vector<5x64xf32>
    %42 = vector.broadcast %39 : vector<5x1xf32> to vector<5x64xf32>
    %43 = arith.mulf %41, %42 : vector<5x64xf32>
    %cst_34 = arith.constant dense<0xFF800000> : vector<256xf32>
    %44 = vector.multi_reduction <maximumf>, %30, %cst_34 [1] : vector<256x5xf32> to vector<256xf32>
    %45 = vector.shape_cast %44 : vector<256xf32> to vector<256x1xf32>
    %46 = vector.broadcast %45 : vector<256x1xf32> to vector<256x5xf32>
    %47 = arith.subf %30, %46 : vector<256x5xf32>
    %48 = math.exp %47 : vector<256x5xf32>
    %cst_35 = arith.constant dense<0.000000e+00> : vector<256xf32>
    %49 = vector.multi_reduction <add>, %48, %cst_35 [1] : vector<256x5xf32> to vector<256xf32>
    %50 = vector.shape_cast %49 : vector<256xf32> to vector<256x1xf32>
    %51 = tpu.reciprocal %50 {approx = true} : vector<256x1xf32> -> vector<256x1xf32>
    %52 = arith.truncf %43 : vector<5x64xf32> to vector<5x64xbf16>
    %cst_36 = arith.constant dense<0.000000e+00> : vector<5x64xf32>
    %53 = tpu.matmul %52, %17, %cst_36 {dimension_numbers = #tpu.dot_dimension_numbers<[1], [0], [0], [1], [0, 0, 1, 1], [], []>} : vector<5x64xbf16>, vector<64x64xbf16>, vector<5x64xf32> -> vector<5x64xf32>
    %54 = vector.shape_cast %1 : vector<64xf32> to vector<1x64xf32>
    %55 = vector.broadcast %54 : vector<1x64xf32> to vector<5x64xf32>
    %56 = arith.addf %53, %55 : vector<5x64xf32>
    %57 = arith.truncf %56 : vector<5x64xf32> to vector<5x64xbf16>
    %cst_37 = arith.constant dense<0.000000e+00> : vector<5x5xf32>
    %58 = tpu.matmul %57, %21, %cst_37 {dimension_numbers = #tpu.dot_dimension_numbers<[1], [1], [0], [0], [0, 0, 1, 0], [], []>} : vector<5x64xbf16>, vector<5x64xbf16>, vector<5x5xf32> -> vector<5x5xf32>
    %cst_38 = arith.constant dense<0xFF800000> : vector<5xf32>
    %59 = vector.multi_reduction <maximumf>, %58, %cst_38 [1] : vector<5x5xf32> to vector<5xf32>
    %60 = vector.shape_cast %59 : vector<5xf32> to vector<5x1xf32>
    %61 = vector.broadcast %60 : vector<5x1xf32> to vector<5x5xf32>
    %62 = arith.subf %58, %61 : vector<5x5xf32>
    %63 = math.exp %62 : vector<5x5xf32>
    %cst_39 = arith.constant dense<0.000000e+00> : vector<5xf32>
    %64 = vector.multi_reduction <add>, %63, %cst_39 [1] : vector<5x5xf32> to vector<5xf32>
    %65 = vector.shape_cast %64 : vector<5xf32> to vector<5x1xf32>
    %66 = tpu.reciprocal %65 {approx = true} : vector<5x1xf32> -> vector<5x1xf32>
    %67 = arith.truncf %63 : vector<5x5xf32> to vector<5x5xbf16>
    %cst_40 = arith.constant dense<0.000000e+00> : vector<5x64xf32>
    %68 = tpu.matmul %67, %23, %cst_40 {dimension_numbers = #tpu.dot_dimension_numbers<[1], [0], [0], [1], [0, 0, 1, 1], [], []>} : vector<5x5xbf16>, vector<5x64xbf16>, vector<5x64xf32> -> vector<5x64xf32>
    %69 = vector.broadcast %66 : vector<5x1xf32> to vector<5x64xf32>
    %70 = arith.mulf %68, %69 : vector<5x64xf32>
    %71 = arith.truncf %70 : vector<5x64xf32> to vector<5x64xbf16>
    %cst_41 = arith.constant dense<0.000000e+00> : vector<5x64xf32>
    %72 = tpu.matmul %71, %19, %cst_41 {dimension_numbers = #tpu.dot_dimension_numbers<[1], [0], [0], [1], [0, 0, 1, 1], [], []>} : vector<5x64xbf16>, vector<64x64xbf16>, vector<5x64xf32> -> vector<5x64xf32>
    %73 = vector.shape_cast %3 : vector<64xf32> to vector<1x64xf32>
    %74 = vector.broadcast %73 : vector<1x64xf32> to vector<5x64xf32>
    %75 = arith.addf %72, %74 : vector<5x64xf32>
    %76 = arith.addf %75, %43 : vector<5x64xf32>
    %cst_42 = arith.constant dense<0.000000e+00> : vector<5xf32>
    %77 = vector.multi_reduction <add>, %76, %cst_42 [1] : vector<5x64xf32> to vector<5xf32>
    %78 = vector.shape_cast %77 : vector<5xf32> to vector<5x1xf32>
    %cst_43 = arith.constant 6.400000e+01 : f32
    %79 = vector.broadcast %cst_43 : f32 to vector<5x1xf32>
    %80 = arith.divf %78, %79 : vector<5x1xf32>
    %81 = vector.broadcast %80 : vector<5x1xf32> to vector<5x64xf32>
    %82 = arith.subf %76, %81 : vector<5x64xf32>
    %83 = arith.mulf %82, %82 : vector<5x64xf32>
    %cst_44 = arith.constant dense<0.000000e+00> : vector<5xf32>
    %84 = vector.multi_reduction <add>, %83, %cst_44 [1] : vector<5x64xf32> to vector<5xf32>
    %85 = vector.shape_cast %84 : vector<5xf32> to vector<5x1xf32>
    %cst_45 = arith.constant 6.400000e+01 : f32
    %86 = vector.broadcast %cst_45 : f32 to vector<5x1xf32>
    %87 = arith.divf %85, %86 : vector<5x1xf32>
    %88 = vector.broadcast %80 : vector<5x1xf32> to vector<5x64xf32>
    %89 = arith.subf %76, %88 : vector<5x64xf32>
    %cst_46 = arith.constant 9.99999974E-6 : f32
    %90 = vector.broadcast %cst_46 : f32 to vector<5x1xf32>
    %91 = arith.addf %87, %90 : vector<5x1xf32>
    %92 = math.rsqrt %91 : vector<5x1xf32>
    %93 = vector.broadcast %92 : vector<5x1xf32> to vector<5x64xf32>
    %94 = arith.mulf %89, %93 : vector<5x64xf32>
    %95 = vector.shape_cast %5 : vector<64xf32> to vector<1x64xf32>
    %96 = vector.broadcast %95 : vector<1x64xf32> to vector<5x64xf32>
    %97 = arith.mulf %94, %96 : vector<5x64xf32>
    %98 = vector.shape_cast %7 : vector<64xf32> to vector<1x64xf32>
    %99 = vector.broadcast %98 : vector<1x64xf32> to vector<5x64xf32>
    %100 = arith.addf %97, %99 : vector<5x64xf32>
    %101 = arith.truncf %48 : vector<256x5xf32> to vector<256x5xbf16>
    %102 = arith.truncf %100 : vector<5x64xf32> to vector<5x64xbf16>
    %cst_47 = arith.constant dense<0.000000e+00> : vector<256x64xf32>
    %103 = tpu.matmul %101, %102, %cst_47 {dimension_numbers = #tpu.dot_dimension_numbers<[1], [0], [0], [1], [0, 0, 1, 1], [], []>} : vector<256x5xbf16>, vector<5x64xbf16>, vector<256x64xf32> -> vector<256x64xf32>
    %104 = vector.broadcast %51 : vector<256x1xf32> to vector<256x64xf32>
    %105 = arith.mulf %103, %104 : vector<256x64xf32>
    %106 = arith.truncf %105 : vector<256x64xf32> to vector<256x64xbf16>
    %cst_48 = arith.constant dense<0.000000e+00> : vector<256x768xf32>
    %107 = tpu.matmul %106, %24, %cst_48 {dimension_numbers = #tpu.dot_dimension_numbers<[1], [0], [0], [1], [0, 0, 1, 1], [], []>} : vector<256x64xbf16>, vector<64x768xbf16>, vector<256x768xf32> -> vector<256x768xf32>
    %108 = vector.broadcast %25 : vector<1x768xf32> to vector<256x768xf32>
    %109 = arith.addf %107, %108 : vector<256x768xf32>
    %110 = arith.truncf %109 : vector<256x768xf32> to vector<256x768xbf16>
    %111 = vector.extract_strided_slice %110 {offsets = [0, 0], sizes = [256, 64], strides = [1, 1]} : vector<256x768xbf16> to vector<256x64xbf16>
    %112 = vector.extract_strided_slice %110 {offsets = [0, 256], sizes = [256, 64], strides = [1, 1]} : vector<256x768xbf16> to vector<256x64xbf16>
    %113 = vector.extract_strided_slice %110 {offsets = [0, 512], sizes = [256, 64], strides = [1, 1]} : vector<256x768xbf16> to vector<256x64xbf16>
    %cst_49 = arith.constant dense<0.000000e+00> : vector<256x256xf32>
    %114 = tpu.matmul %111, %112, %cst_49 {dimension_numbers = #tpu.dot_dimension_numbers<[1], [1], [0], [0], [0, 0, 1, 0], [], []>} : vector<256x64xbf16>, vector<256x64xbf16>, vector<256x256xf32> -> vector<256x256xf32>
    %cst_50 = arith.constant dense<0xFF800000> : vector<256xf32>
    %115 = vector.multi_reduction <maximumf>, %114, %cst_50 [1] : vector<256x256xf32> to vector<256xf32>
    %116 = vector.shape_cast %115 : vector<256xf32> to vector<256x1xf32>
    %117 = vector.broadcast %116 : vector<256x1xf32> to vector<256x256xf32>
    %118 = arith.subf %114, %117 : vector<256x256xf32>
    %119 = math.exp %118 : vector<256x256xf32>
    %cst_51 = arith.constant dense<0.000000e+00> : vector<256xf32>
    %120 = vector.multi_reduction <add>, %119, %cst_51 [1] : vector<256x256xf32> to vector<256xf32>
    %121 = vector.shape_cast %120 : vector<256xf32> to vector<256x1xf32>
    %122 = arith.truncf %119 : vector<256x256xf32> to vector<256x256xbf16>
    %cst_52 = arith.constant dense<0.000000e+00> : vector<256x64xf32>
    %123 = tpu.matmul %122, %113, %cst_52 {dimension_numbers = #tpu.dot_dimension_numbers<[1], [0], [0], [1], [0, 0, 1, 1], [], []>} : vector<256x256xbf16>, vector<256x64xbf16>, vector<256x64xf32> -> vector<256x64xf32>
    %124 = tpu.reciprocal %121 {approx = true} : vector<256x1xf32> -> vector<256x1xf32>
    %125 = vector.broadcast %124 : vector<256x1xf32> to vector<256x64xf32>
    %126 = arith.mulf %123, %125 : vector<256x64xf32>
    %127 = arith.truncf %126 : vector<256x64xf32> to vector<256x64xbf16>
    %c0_53 = arith.constant 0 : index
    %c0_54 = arith.constant 0 : index
    %c0_55 = arith.constant 0 : index
    %128 = vector.load %arg9[%c0_53, %c0_54, %c0_55] : memref<4x64x64xbf16, #tpu.memory_space<vmem>>, vector<1x64x64xbf16>
    %129 = vector.shape_cast %128 : vector<1x64x64xbf16> to vector<64x64xbf16>
    %cst_56 = arith.constant dense<0.000000e+00> : vector<256x64xf32>
    %130 = tpu.matmul %127, %129, %cst_56 {dimension_numbers = #tpu.dot_dimension_numbers<[1], [0], [0], [1], [0, 0, 1, 1], [], []>} : vector<256x64xbf16>, vector<64x64xbf16>, vector<256x64xf32> -> vector<256x64xf32>
    %131 = vector.shape_cast %9 : vector<64xf32> to vector<1x64xf32>
    %132 = vector.broadcast %131 : vector<1x64xf32> to vector<256x64xf32>
    %133 = arith.addf %130, %132 : vector<256x64xf32>
    %134 = vector.extract_strided_slice %110 {offsets = [0, 64], sizes = [256, 64], strides = [1, 1]} : vector<256x768xbf16> to vector<256x64xbf16>
    %135 = vector.extract_strided_slice %110 {offsets = [0, 320], sizes = [256, 64], strides = [1, 1]} : vector<256x768xbf16> to vector<256x64xbf16>
    %136 = vector.extract_strided_slice %110 {offsets = [0, 576], sizes = [256, 64], strides = [1, 1]} : vector<256x768xbf16> to vector<256x64xbf16>
    %cst_57 = arith.constant dense<0.000000e+00> : vector<256x256xf32>
    %137 = tpu.matmul %134, %135, %cst_57 {dimension_numbers = #tpu.dot_dimension_numbers<[1], [1], [0], [0], [0, 0, 1, 0], [], []>} : vector<256x64xbf16>, vector<256x64xbf16>, vector<256x256xf32> -> vector<256x256xf32>
    %cst_58 = arith.constant dense<0xFF800000> : vector<256xf32>
    %138 = vector.multi_reduction <maximumf>, %137, %cst_58 [1] : vector<256x256xf32> to vector<256xf32>
    %139 = vector.shape_cast %138 : vector<256xf32> to vector<256x1xf32>
    %140 = vector.broadcast %139 : vector<256x1xf32> to vector<256x256xf32>
    %141 = arith.subf %137, %140 : vector<256x256xf32>
    %142 = math.exp %141 : vector<256x256xf32>
    %cst_59 = arith.constant dense<0.000000e+00> : vector<256xf32>
    %143 = vector.multi_reduction <add>, %142, %cst_59 [1] : vector<256x256xf32> to vector<256xf32>
    %144 = vector.shape_cast %143 : vector<256xf32> to vector<256x1xf32>
    %145 = arith.truncf %142 : vector<256x256xf32> to vector<256x256xbf16>
    %cst_60 = arith.constant dense<0.000000e+00> : vector<256x64xf32>
    %146 = tpu.matmul %145, %136, %cst_60 {dimension_numbers = #tpu.dot_dimension_numbers<[1], [0], [0], [1], [0, 0, 1, 1], [], []>} : vector<256x256xbf16>, vector<256x64xbf16>, vector<256x64xf32> -> vector<256x64xf32>
    %147 = tpu.reciprocal %144 {approx = true} : vector<256x1xf32> -> vector<256x1xf32>
    %148 = vector.broadcast %147 : vector<256x1xf32> to vector<256x64xf32>
    %149 = arith.mulf %146, %148 : vector<256x64xf32>
    %150 = arith.truncf %149 : vector<256x64xf32> to vector<256x64xbf16>
    %c1_61 = arith.constant 1 : index
    %c0_62 = arith.constant 0 : index
    %c0_63 = arith.constant 0 : index
    %151 = vector.load %arg9[%c1_61, %c0_62, %c0_63] : memref<4x64x64xbf16, #tpu.memory_space<vmem>>, vector<1x64x64xbf16>
    %152 = vector.shape_cast %151 : vector<1x64x64xbf16> to vector<64x64xbf16>
    %cst_64 = arith.constant dense<0.000000e+00> : vector<256x64xf32>
    %153 = tpu.matmul %150, %152, %cst_64 {dimension_numbers = #tpu.dot_dimension_numbers<[1], [0], [0], [1], [0, 0, 1, 1], [], []>} : vector<256x64xbf16>, vector<64x64xbf16>, vector<256x64xf32> -> vector<256x64xf32>
    %154 = arith.addf %133, %153 : vector<256x64xf32>
    %155 = vector.extract_strided_slice %110 {offsets = [0, 128], sizes = [256, 64], strides = [1, 1]} : vector<256x768xbf16> to vector<256x64xbf16>
    %156 = vector.extract_strided_slice %110 {offsets = [0, 384], sizes = [256, 64], strides = [1, 1]} : vector<256x768xbf16> to vector<256x64xbf16>
    %157 = vector.extract_strided_slice %110 {offsets = [0, 640], sizes = [256, 64], strides = [1, 1]} : vector<256x768xbf16> to vector<256x64xbf16>
    %cst_65 = arith.constant dense<0.000000e+00> : vector<256x256xf32>
    %158 = tpu.matmul %155, %156, %cst_65 {dimension_numbers = #tpu.dot_dimension_numbers<[1], [1], [0], [0], [0, 0, 1, 0], [], []>} : vector<256x64xbf16>, vector<256x64xbf16>, vector<256x256xf32> -> vector<256x256xf32>
    %cst_66 = arith.constant dense<0xFF800000> : vector<256xf32>
    %159 = vector.multi_reduction <maximumf>, %158, %cst_66 [1] : vector<256x256xf32> to vector<256xf32>
    %160 = vector.shape_cast %159 : vector<256xf32> to vector<256x1xf32>
    %161 = vector.broadcast %160 : vector<256x1xf32> to vector<256x256xf32>
    %162 = arith.subf %158, %161 : vector<256x256xf32>
    %163 = math.exp %162 : vector<256x256xf32>
    %cst_67 = arith.constant dense<0.000000e+00> : vector<256xf32>
    %164 = vector.multi_reduction <add>, %163, %cst_67 [1] : vector<256x256xf32> to vector<256xf32>
    %165 = vector.shape_cast %164 : vector<256xf32> to vector<256x1xf32>
    %166 = arith.truncf %163 : vector<256x256xf32> to vector<256x256xbf16>
    %cst_68 = arith.constant dense<0.000000e+00> : vector<256x64xf32>
    %167 = tpu.matmul %166, %157, %cst_68 {dimension_numbers = #tpu.dot_dimension_numbers<[1], [0], [0], [1], [0, 0, 1, 1], [], []>} : vector<256x256xbf16>, vector<256x64xbf16>, vector<256x64xf32> -> vector<256x64xf32>
    %168 = tpu.reciprocal %165 {approx = true} : vector<256x1xf32> -> vector<256x1xf32>
    %169 = vector.broadcast %168 : vector<256x1xf32> to vector<256x64xf32>
    %170 = arith.mulf %167, %169 : vector<256x64xf32>
    %171 = arith.truncf %170 : vector<256x64xf32> to vector<256x64xbf16>
    %c2_69 = arith.constant 2 : index
    %c0_70 = arith.constant 0 : index
    %c0_71 = arith.constant 0 : index
    %172 = vector.load %arg9[%c2_69, %c0_70, %c0_71] : memref<4x64x64xbf16, #tpu.memory_space<vmem>>, vector<1x64x64xbf16>
    %173 = vector.shape_cast %172 : vector<1x64x64xbf16> to vector<64x64xbf16>
    %cst_72 = arith.constant dense<0.000000e+00> : vector<256x64xf32>
    %174 = tpu.matmul %171, %173, %cst_72 {dimension_numbers = #tpu.dot_dimension_numbers<[1], [0], [0], [1], [0, 0, 1, 1], [], []>} : vector<256x64xbf16>, vector<64x64xbf16>, vector<256x64xf32> -> vector<256x64xf32>
    %175 = arith.addf %154, %174 : vector<256x64xf32>
    %176 = vector.extract_strided_slice %110 {offsets = [0, 192], sizes = [256, 64], strides = [1, 1]} : vector<256x768xbf16> to vector<256x64xbf16>
    %177 = vector.extract_strided_slice %110 {offsets = [0, 448], sizes = [256, 64], strides = [1, 1]} : vector<256x768xbf16> to vector<256x64xbf16>
    %178 = vector.extract_strided_slice %110 {offsets = [0, 704], sizes = [256, 64], strides = [1, 1]} : vector<256x768xbf16> to vector<256x64xbf16>
    %cst_73 = arith.constant dense<0.000000e+00> : vector<256x256xf32>
    %179 = tpu.matmul %176, %177, %cst_73 {dimension_numbers = #tpu.dot_dimension_numbers<[1], [1], [0], [0], [0, 0, 1, 0], [], []>} : vector<256x64xbf16>, vector<256x64xbf16>, vector<256x256xf32> -> vector<256x256xf32>
    %cst_74 = arith.constant dense<0xFF800000> : vector<256xf32>
    %180 = vector.multi_reduction <maximumf>, %179, %cst_74 [1] : vector<256x256xf32> to vector<256xf32>
    %181 = vector.shape_cast %180 : vector<256xf32> to vector<256x1xf32>
    %182 = vector.broadcast %181 : vector<256x1xf32> to vector<256x256xf32>
    %183 = arith.subf %179, %182 : vector<256x256xf32>
    %184 = math.exp %183 : vector<256x256xf32>
    %cst_75 = arith.constant dense<0.000000e+00> : vector<256xf32>
    %185 = vector.multi_reduction <add>, %184, %cst_75 [1] : vector<256x256xf32> to vector<256xf32>
    %186 = vector.shape_cast %185 : vector<256xf32> to vector<256x1xf32>
    %187 = arith.truncf %184 : vector<256x256xf32> to vector<256x256xbf16>
    %cst_76 = arith.constant dense<0.000000e+00> : vector<256x64xf32>
    %188 = tpu.matmul %187, %178, %cst_76 {dimension_numbers = #tpu.dot_dimension_numbers<[1], [0], [0], [1], [0, 0, 1, 1], [], []>} : vector<256x256xbf16>, vector<256x64xbf16>, vector<256x64xf32> -> vector<256x64xf32>
    %189 = tpu.reciprocal %186 {approx = true} : vector<256x1xf32> -> vector<256x1xf32>
    %190 = vector.broadcast %189 : vector<256x1xf32> to vector<256x64xf32>
    %191 = arith.mulf %188, %190 : vector<256x64xf32>
    %192 = arith.truncf %191 : vector<256x64xf32> to vector<256x64xbf16>
    %c3_77 = arith.constant 3 : index
    %c0_78 = arith.constant 0 : index
    %c0_79 = arith.constant 0 : index
    %193 = vector.load %arg9[%c3_77, %c0_78, %c0_79] : memref<4x64x64xbf16, #tpu.memory_space<vmem>>, vector<1x64x64xbf16>
    %194 = vector.shape_cast %193 : vector<1x64x64xbf16> to vector<64x64xbf16>
    %cst_80 = arith.constant dense<0.000000e+00> : vector<256x64xf32>
    %195 = tpu.matmul %192, %194, %cst_80 {dimension_numbers = #tpu.dot_dimension_numbers<[1], [0], [0], [1], [0, 0, 1, 1], [], []>} : vector<256x64xbf16>, vector<64x64xbf16>, vector<256x64xf32> -> vector<256x64xf32>
    %196 = arith.addf %175, %195 : vector<256x64xf32>
    %197 = arith.addf %196, %105 : vector<256x64xf32>
    %cst_81 = arith.constant dense<0.000000e+00> : vector<256xf32>
    %198 = vector.multi_reduction <add>, %197, %cst_81 [1] : vector<256x64xf32> to vector<256xf32>
    %199 = vector.shape_cast %198 : vector<256xf32> to vector<256x1xf32>
    %cst_82 = arith.constant 6.400000e+01 : f32
    %200 = vector.broadcast %cst_82 : f32 to vector<256x1xf32>
    %201 = arith.divf %199, %200 : vector<256x1xf32>
    %202 = vector.broadcast %201 : vector<256x1xf32> to vector<256x64xf32>
    %203 = arith.subf %197, %202 : vector<256x64xf32>
    %204 = arith.mulf %203, %203 : vector<256x64xf32>
    %cst_83 = arith.constant dense<0.000000e+00> : vector<256xf32>
    %205 = vector.multi_reduction <add>, %204, %cst_83 [1] : vector<256x64xf32> to vector<256xf32>
    %206 = vector.shape_cast %205 : vector<256xf32> to vector<256x1xf32>
    %cst_84 = arith.constant 6.400000e+01 : f32
    %207 = vector.broadcast %cst_84 : f32 to vector<256x1xf32>
    %208 = arith.divf %206, %207 : vector<256x1xf32>
    %209 = vector.broadcast %201 : vector<256x1xf32> to vector<256x64xf32>
    %210 = arith.subf %197, %209 : vector<256x64xf32>
    %cst_85 = arith.constant 9.99999974E-6 : f32
    %211 = vector.broadcast %cst_85 : f32 to vector<256x1xf32>
    %212 = arith.addf %208, %211 : vector<256x1xf32>
    %213 = math.rsqrt %212 : vector<256x1xf32>
    %214 = vector.broadcast %213 : vector<256x1xf32> to vector<256x64xf32>
    %215 = arith.mulf %210, %214 : vector<256x64xf32>
    %216 = vector.shape_cast %11 : vector<64xf32> to vector<1x64xf32>
    %217 = vector.broadcast %216 : vector<1x64xf32> to vector<256x64xf32>
    %218 = arith.mulf %215, %217 : vector<256x64xf32>
    %219 = vector.shape_cast %13 : vector<64xf32> to vector<1x64xf32>
    %220 = vector.broadcast %219 : vector<1x64xf32> to vector<256x64xf32>
    %221 = arith.addf %218, %220 : vector<256x64xf32>
    %222 = tpu.transpose %221, [1, 0] : vector<256x64xf32> -> vector<64x256xf32>
    %c0_86 = arith.constant 0 : index
    %c0_87 = arith.constant 0 : index
    %c0_88 = arith.constant 0 : index
    %223 = vector.load %arg10[%c0_86, %c0_87, %c0_88] : memref<1x64x256xf32, #tpu.memory_space<vmem>>, vector<1x64x256xf32>
    %224 = vector.shape_cast %223 : vector<1x64x256xf32> to vector<64x256xf32>
    %225 = vector.shape_cast %222 : vector<64x256xf32> to vector<1x64x256xf32>
    tpu.vector_store %arg10[%c0_86, %c0_87, %c0_88], %225 {strides = array<i32>} : memref<1x64x256xf32, #tpu.memory_space<vmem>>, vector<1x64x256xf32>,
    return
  }
  func.func @transform_0(%arg0: i32) -> (i32, i32, i32) {
    %c0_i32 = arith.constant 0 : i32
    %c0_i32_0 = arith.constant 0 : i32
    %c0_i32_1 = arith.constant 0 : i32
    return %arg0, %c0_i32, %c0_i32_0 : i32, i32, i32
  }
  func.func @transform_1(%arg0: i32) -> (i32, i32) {
    %c0_i32 = arith.constant 0 : i32
    %c0_i32_0 = arith.constant 0 : i32
    %c0_i32_1 = arith.constant 0 : i32
    return %c0_i32, %c0_i32_0 : i32, i32
  }
  func.func @transform_2(%arg0: i32) -> (i32, i32) {
    %c0_i32 = arith.constant 0 : i32
    %c0_i32_0 = arith.constant 0 : i32
    %c0_i32_1 = arith.constant 0 : i32
    return %c0_i32, %c0_i32_0 : i32, i32
  }
  func.func @transform_3(%arg0: i32) -> (i32, i32) {
    %c0_i32 = arith.constant 0 : i32
    %c0_i32_0 = arith.constant 0 : i32
    %c0_i32_1 = arith.constant 0 : i32
    return %c0_i32, %c0_i32_0 : i32, i32
  }
  func.func @transform_4(%arg0: i32) -> (i32, i32, i32) {
    %c0_i32 = arith.constant 0 : i32
    %c0_i32_0 = arith.constant 0 : i32
    %c0_i32_1 = arith.constant 0 : i32
    %c0_i32_2 = arith.constant 0 : i32
    return %c0_i32, %c0_i32_0, %c0_i32_1 : i32, i32, i32
  }
  func.func @transform_5(%arg0: i32) -> (i32, i32, i32) {
    %c0_i32 = arith.constant 0 : i32
    %c0_i32_0 = arith.constant 0 : i32
    %c0_i32_1 = arith.constant 0 : i32
    %c0_i32_2 = arith.constant 0 : i32
    return %c0_i32, %c0_i32_0, %c0_i32_1 : i32, i32, i32
  }
  func.func @transform_6(%arg0: i32) -> (i32, i32) {
    %c0_i32 = arith.constant 0 : i32
    %c0_i32_0 = arith.constant 0 : i32
    %c0_i32_1 = arith.constant 0 : i32
    return %c0_i32, %c0_i32_0 : i32, i32
  }
  func.func @transform_7(%arg0: i32) -> (i32, i32) {
    %c0_i32 = arith.constant 0 : i32
    %c0_i32_0 = arith.constant 0 : i32
    %c0_i32_1 = arith.constant 0 : i32
    return %c0_i32, %c0_i32_0 : i32, i32
  }
  func.func @transform_8(%arg0: i32) -> (i32, i32, i32) {
    %c0_i32 = arith.constant 0 : i32
    %c0_i32_0 = arith.constant 0 : i32
    %c0_i32_1 = arith.constant 0 : i32
    %c0_i32_2 = arith.constant 0 : i32
    return %c0_i32, %c0_i32_0, %c0_i32_1 : i32, i32, i32
  }
  func.func @transform_9(%arg0: i32) -> (i32, i32, i32) {
    %c0_i32 = arith.constant 0 : i32
    %c0_i32_0 = arith.constant 0 : i32
    %c0_i32_1 = arith.constant 0 : i32
    return %arg0, %c0_i32, %c0_i32_0 : i32, i32, i32
  }
}

</mosaic_0001>

<bundles_post_ra>
// kernel: _lambda_.1
= control target key start
LH: loop header
LB: loop body
LE: loop exit
PB: predicated region body
PF: predicated region fallthrough
CT: control target
= control target key end

     0   :  { %s10948_s30 = smov 0   ;;  %s15707_s0 = inlined_call_operand.vmem [shape: bf16[2,64,256], index: 0, kind: input, shape index: {}]   ;;  %s15708_s1 = inlined_call_operand.vmem [shape: bf16[64,5], index: 1, kind: input, shape index: {}]   ;;  %s15709_s2 = inlined_call_operand.vmem [shape: f32[1,5], index: 2, kind: input, shape index: {}]   ;;  %s15710_s3 = inlined_call_operand.vmem [shape: f32[8,64], index: 3, kind: input, shape index: {}]   ;;  %s15711_s4 = inlined_call_operand.vmem [shape: bf16[2,5,64], index: 4, kind: input, shape index: {}]   ;;  %s15712_s5 = inlined_call_operand.vmem [shape: bf16[2,64,64], index: 5, kind: input, shape index: {}]   ;;  %s15713_s6 = inlined_call_operand.vmem [shape: bf16[64,768], index: 6, kind: input, shape index: {}]   ;;  %s15714_s7 = inlined_call_operand.vmem [shape: f32[1,768], index: 7, kind: input, shape index: {}]   ;;  %s15715_s8 = inlined_call_operand.vmem [shape: bf16[4,64,64], index: 8, kind: input, shape index: {}]   ;;  %s15716_s9 = inlined_call_operand.vmem [shape: f32[2,64,256], index: 9, kind: output, shape index: {}]  }
   0x1 LB: > { %s8414_s10 = sadd.s32 4294967295, %s10891_s30   ;;  %p8418_p0 = scmp.ge.s32.totalorder %s10891_s30, 1  ;;  %s10891_s30 = sphi %s10948_s30, %s19_s30  }
   0x2   : > { %p287_p1 = scmp.lt.s32.totalorder %s10891_s30, 3 }
   0x4   : > { %p288_p2 = pnand %p8418_p0, %p287_p1 }
   0x6   : > { %291 = sbr.rel (%p288_p2) target bundleno = 5698 (0x1642), region = 56 }
   0xb   : > { %p323_p3 = scmp.lt.s32.totalorder %s8414_s10, 1  ;;  %v9847_v0 = vld [vmem:[%s15708_s1] sm:$0xff]   ;;  %v9848_v1 = vld [vmem:[%s15708_s1 + $0x8] sm:$0xff]   ;;  %v9849_v2 = vld [vmem:[%s15708_s1 + $0x10] sm:$0xff]   ;;  %vm505_vm0 = vcmask 523264   ;;  %v15717_v20 = vmov 0  }
   0xc   : > { %715 = vxpose.xlu1.c.b16.start [1/4] (short) (narrow) %v9847_v0, 16  ;;  %v9850_v3 = vld [vmem:[%s15708_s1 + $0x18] sm:$0xff]   ;;  %vm775_vm1 = vcmask 1044480   ;;  %v10894_v54 = vmov 0.0   ;;  %v9852_v55 = vld [vmem:[%s15712_s5 + $0x10] sm:$0xff]   ;;  %v9853_v56 = vld [vmem:[%s15712_s5 + $0x8] sm:$0xff]  }
   0xd   : > { %s16632_s10 = smov (!%p323_p3, %s8414_s10), 1  ;;  %9782 = vmatprep.subr.bf16.mxu1 %v9850_v3  ;;  %9512 = vmatprep.subr.bf16.mxu0 %v9850_v3  ;;  %v9851_v53 = vld [vmem:[%s15712_s5 + $0x18] sm:$0xff]   ;;  %v9854_v57 = vld [vmem:[%s15712_s5] sm:$0xff]   ;;  %vm10895_vm2 = vmmov 0   ;;  %vm1276_vm3 = vcmask 36864   ;;  %vm1291_vm4 = vcmask 1041408  }
   0xe   : > { %s8739_s15 = sshll.u32 %s16632_s10, 6  ;;  %9786 = vmatpush3.bf16.msra.mxu1 %v9850_v3  ;;  %9513 = vmatpush3.bf16.msra.mxu0 %v9850_v3  ;;  %v367_v61 = vld [vmem:[%s15711_s4] sm:$0x7]  ;;  %vm1292_vm5 = vcmask 1042432   ;;  %vm836_vm6 = vcmask 39936   ;;  %vm1412_vm7 = vcmask 520192  }
   0xf   : > { %s10974_s22 = scalar_lea.vmem %s15707_s0, %s8739_s15  ;;  %9783 = vmatprep.subr.bf16.mxu1 %v9849_v2  ;;  %9514 = vmatprep.subr.bf16.mxu0 %v9849_v2  ;;  %s10897_s16 = smov 64  }
  0x10   : > { %v10977_v4 = vld [vmem:[%s10974_s22 + $0x4] ss:$8 sps:$4 sm:$0xff]   ;;  %716 = vxpose.xlu1.c.b16.cont [2/4] (short) (narrow) %v9848_v1, 16  ;;  %v9840_v5 = vld [vmem:[%s10974_s22 + $0x14] ss:$8 sps:$4 sm:$0xff]   ;;  %s8740_s13 = sshll.u32 %s16632_s10, 7 }
  0x11   : > { %465 = vxpose.xlu0.c.b16.start [1/4] (short) %v10977_v4, 128  ;;  %v9843_v6 = vld [vmem:[%s10974_s22 + $0x24] ss:$8 sps:$4 sm:$0xff]   ;;  %v9846_v7 = vld [vmem:[%s10974_s22 + $0x34] ss:$8 sps:$4 sm:$0xff]   ;;  %v10989_v11 = vld [vmem:[%s10974_s22 + $0x30] ss:$8 sps:$4 sm:$0xff]   ;;  %s15686_s17 = scalar_lea.vmem %s15716_s9, %s8740_s13 }
  0x12   : > { %9787 = vmatpush3.bf16.msra.mxu1 %v9849_v2  ;;  %9515 = vmatpush3.bf16.msra.mxu0 %v9849_v2  ;;  %v10993_v13 = vld [vmem:[%s10974_s22 + $0x20] ss:$8 sps:$4 sm:$0xff]   ;;  %v10998_v15 = vld [vmem:[%s10974_s22 + $0x10] ss:$8 sps:$4 sm:$0xff]  }
  0x13   : > { %9784 = vmatprep.subr.bf16.mxu1 %v9848_v1  ;;  %9516 = vmatprep.subr.bf16.mxu0 %v9848_v1  ;;  %v11003_v17 = vld [vmem:[%s10974_s22] ss:$8 sps:$4 sm:$0xff]  }
  0x14   : > { %717 = vxpose.xlu1.c.b16.cont [3/4] (short) (narrow) %v9849_v2, 16 }
  0x15   : > { %466 = vxpose.xlu0.c.b16.cont [2/4] (short) %v9840_v5, 128 }
  0x16   : > { %9788 = vmatpush3.bf16.msra.mxu1 %v9848_v1  ;;  %9517 = vmatpush3.bf16.msra.mxu0 %v9848_v1  ;;  %v1234_v1 = vsel %vm505_vm0, %v367_v61, 0 }
  0x17   : > { %9785 = vmatprep.subr.bf16.mxu1 %v9847_v0  ;;  %9518 = vmatprep.subr.bf16.mxu0 %v9847_v0 }
  0x18   : > { %718 = vxpose.xlu1.c.b16.end [4/4] (short) (narrow) %v9850_v3, 16 }
  0x19   : > { %467 = vxpose.xlu0.c.b16.cont [3/4] (short) %v9843_v6, 128 }
  0x1a   : > { %9789 = vmatpush3.bf16.msra.mxu1 %v9847_v0  ;;  %9519 = vmatpush3.bf16.msra.mxu0 %v9847_v0 }
  0x1b   : > { %742 = vmatprep.subr.bf16.mxu1 %v9846_v7  ;;  %9570 = vmatprep.subr.bf16.mxu0 %v10894_v54 }
  0x1d   : > { %468 = vxpose.xlu0.c.b16.end [4/4] (short) %v9846_v7, 128 }
  0x6e   : > { %v723_v21 = vpop.trf.xlu1 }
  0x73   : > { %v10983_v8 = vpop.trf.xlu0 }
  0x77   : > { %v10985_v9 = vpop.trf.xlu0 }
  0x7b   : > { %v475_v10 = vpop.trf.xlu0 }
  0x7c   : > { %9540 = vmatprep.mubr.msk.bf16.mxu1 %vm505_vm0, %v475_v10 }
  0x7f   : > { %v476_v12 = vpop.trf.xlu0 }
  0x80   : > { %9541 = vmatmul.mubr.msk.bf16.vlgmr.msra.gmra.mxu1 %vm505_vm0, %v476_v12 }
  0x81   : > { %743 = vmatpush1.bf16.msra.mxu1 %v10989_v11 }
  0x82   : > { %744 = vmatprep.subr.bf16.mxu1 %v9843_v6 }
  0x83   : > { %v477_v14 = vpop.trf.xlu0 }
  0x84   : > { %9544 = vmatprep.mubr.msk.bf16.mxu1 %vm505_vm0, %v477_v14 }
  0x85   : > { %745 = vmatpush1.bf16.msra.mxu1 %v10993_v13 }
  0x86   : > { %746 = vmatprep.subr.bf16.mxu1 %v9840_v5 }
  0x87   : > { %v478_v16 = vpop.trf.xlu0 }
  0x88   : > { %9545 = vmatmul.mubr.msk.bf16.gmra.mxu1 %vm505_vm0, %v478_v16 }
  0x89   : > { %747 = vmatpush1.bf16.msra.mxu1 %v10998_v15 }
  0x8a   : > { %748 = vmatprep.subr.bf16.mxu1 %v10977_v4 }
  0x8b   : > { %v479_v18 = vpop.trf.xlu0 }
  0x8c   : > { %9548 = vmatprep.mubr.msk.bf16.mxu1 %vm505_vm0, %v479_v18 }
  0x8d   : > { %749 = vmatpush1.bf16.msra.mxu1 %v11003_v17 }
  0x8e   : > { %803 = vmatprep.subr.bf16.mxu1 %v9846_v7 }
  0x8f   : > { %v480_v19 = vpop.trf.xlu0 }
  0x90   : > { %9549 = vmatmul.mubr.msk.bf16.gmra.mxu1 %vm505_vm0, %v480_v19 }
  0x91   : > { %766 = vmatprep.mubr.bf16.mxu1 %v15717_v20 }
  0x98   : > { %8461 = vmatmul.mubr.msk.bf16.vlgmr.msra.gmra.mxu1 %vm505_vm0, %v723_v21 }
  0x99   : > { %804 = vmatpush1.bf16.xpose.msra.mxu1 %v10989_v11 }
  0x9a   : > { %805 = vmatprep.subr.bf16.mxu1 %v9843_v6 }
  0xa1   : > { %806 = vmatpush1.bf16.xpose.msra.mxu1 %v10993_v13 }
  0xa2   : > { %807 = vmatprep.subr.bf16.mxu1 %v9840_v5 }
  0xa9   : > { %808 = vmatpush1.bf16.xpose.msra.mxu1 %v10998_v15 }
  0xaa   : > { %809 = vmatprep.subr.bf16.mxu1 %v10977_v4  ;;  %v8462_v4 = vld [vmem:[%s15710_s3] ss:$0 sm:$0xff] }
  0xb1   : > { %810 = vmatpush1.bf16.xpose.msra.mxu1 %v11003_v17 }
  0xb2   : > { %9552 = vmatprep.subr.bf16.mxu1 %v10894_v54 }
 0x140   : > { %v11017_v22 = vpop.f32.mrf.mxu1 }
 0x142   : > { %v11019_v23 = vpop.f32.mrf.mxu1 }
 0x144   : > { %v11021_v24 = vpop.f32.mrf.mxu1 }
 0x146   : > { %v11023_v25 = vpop.f32.mrf.mxu1 }
 0x148   : > { %v11025_v26 = vpop.f32.mrf.mxu1 }
 0x14a   : > { %v11027_v27 = vpop.f32.mrf.mxu1 }
 0x14c   : > { %v11029_v28 = vpop.f32.mrf.mxu1 }
 0x14e   : > { %v11031_v29 = vpop.f32.mrf.mxu1 }
 0x150   : > { %v11033_v30 = vpop.f32.mrf.mxu1 }
 0x152   : > { %v11035_v31 = vpop.f32.mrf.mxu1 }
 0x154   : > { %v11037_v32 = vpop.f32.mrf.mxu1 }
 0x156   : > { %v11039_v33 = vpop.f32.mrf.mxu1 }
 0x158   : > { %v768_v34 = vpop.f32.mrf.mxu1 }
 0x159   : > { %v776_v36 = vsel %vm775_vm1, %v768_v34, -inf }
 0x15a   : > { %v770_v35 = vpop.f32.mrf.mxu1 }
 0x15b   : > { %v777_v37 = vsel %vm775_vm1, %v770_v35, -inf }
 0x15c   : > { %v772_v38 = vpop.f32.mrf.mxu1  ;;  %v778_v39 = vmax.f32 %v776_v36, %v777_v37  ;;  %v10896_v37 = vmov 65535  }
 0x15d   : > { %v1293_v38 = vsel %vm1291_vm4, 4294967295, %v10896_v37 }
 0x15e   : > { %779 = vmax.xlane.f32.xlu0 %v778_v39  ;;  %v773_v40 = vpop.f32.mrf.mxu1 }
 0x15f   : > { %v8431_v40 = vld [vmem:[%s15711_s4 + $0x4] sm:$0x7] }
 0x1e7   : > { %v780_v41 = vpop.xlane.xlu0 %779 }
 0x1e8   : > { %v781_v42 = vsub.f32 %v768_v34, %v780_v41  ;;  %v782_v43 = vsub.f32 %v770_v35, %v780_v41  ;;  %v11091_v41 = vsel %vm1292_vm5, %v1293_v38, 0 }
 0x1ea   : > { %v783_v44 = vmul.f32 1.442695, %v781_v42  ;;  %v785_v45 = vmul.f32 1.442695, %v782_v43 }
 0x1ec   : > { %9911 = vpow2.f32 %v783_v44 }
 0x1ed   : > { %9913 = vpow2.f32 %v785_v45 }
 0x1f9   : > { %v9912_v46 = vpop.eup %9911 }
 0x1fa   : > { %v9914_v47 = vpop.eup %9913  ;;  %v793_v48 = vpack.c.bf16 %v9912_v46, %v9912_v46  ;;  %v787_v49 = vsel %vm775_vm1, %v9912_v46, 0.0 }
 0x1fb   : > { %v794_v50 = vpack.c.bf16 %v9914_v47, %v9914_v47  ;;  %v788_v51 = vsel %vm775_vm1, %v9914_v47, 0.0 }
 0x1fc   : > { %v789_v52 = vadd.f32 %v788_v51, %v787_v49  ;;  %v9858_v51 = vld [vmem:[%s15712_s5 + $0x20] sm:$0xff]  }
 0x1fd   : > { %827 = vmatprep.mubr.bf16.mxu1 %v794_v50  ;;  %v9855_v50 = vld [vmem:[%s15712_s5 + $0x38] sm:$0xff]  }
 0x1fe   : > { %828 = vmatmul.mubr.bf16.vlgmr.msra.gmra.mxu1 %v793_v48  ;;  %790 = vadd.xlane.f32.xlu1 %v789_v52 }
 0x1ff   : > { %9553 = vmatpush3.bf16.msra.mxu1 %v9851_v53  ;;  %9560 = vmatprep.mubr.msk.bf16.mxu1 %vm10895_vm2, %v10894_v54 }
 0x200   : > { %9554 = vmatprep.subr.bf16.mxu1 %v10894_v54 }
 0x203   : > { %9555 = vmatpush3.bf16.msra.mxu1 %v9852_v55 }
 0x204   : > { %9556 = vmatprep.subr.bf16.mxu1 %v10894_v54 }
 0x207   : > { %9557 = vmatpush3.bf16.msra.mxu1 %v9853_v56 }
 0x208   : > { %9558 = vmatprep.subr.bf16.mxu1 %v10894_v54 }
 0x20b   : > { %9559 = vmatpush3.bf16.msra.mxu1 %v9854_v57 }
 0x20c   : > { %9564 = vmatprep.subr.bf16.mxu1 %v10894_v54 }
 0x287   : > { %v791_v58 = vpop.xlane.xlu1 %790 }
 0x288   : > { %9915 = vrcp.f32 %v791_v58 }
 0x295   : > { %v9916_v59 = vpop.eup %9915 }
 0x2be   : > { %v829_v60 = vpop.f32.mrf.mxu1 }
 0x2bf   : > { %v11068_v62 = vmul.f32 %v9916_v59, %v829_v60 }
 0x2c0   : > { %v831_v63 = vpop.f32.mrf.mxu1 }
 0x2c1   : > { %v1157_v0 = vpack.c.bf16 %v11068_v62, %v11068_v62 }
 0x2c2   : > { %v832_v2 = vpop.f32.mrf.mxu1 }
 0x2c3   : > { %9561 = vmatmul.mubr.msk.bf16.vlgmr.msra.gmra.mxu1 %vm505_vm0, %v1157_v0  ;;  %v11150_v0 = vld [vmem:[%s15709_s2] ss:$0 sm:$0xff] }
 0x2c4   : > { %v833_v3 = vpop.f32.mrf.mxu1  ;;  %9565 = vmatpush3.bf16.xpose.msra.mxu1 %v1234_v1  ;;  %9566 = vmatprep.mubr.msk.bf16.mxu1 %vm10895_vm2, %v10894_v54 }
 0x2c5   : > { %9576 = vmatprep.subr.bf16.mxu1 %v10894_v54 }
 0x383   : > { %v1223_v5 = vpop.f32.mrf.mxu1 }
 0x384   : > { %v1224_v6 = vadd.f32 %v8462_v4, %v1223_v5 }
 0x385   : > { %v9562_v7 = vpop.f32.mrf.mxu1 }
 0x386   : > { %v1229_v10 = vpack.c.bf16 %v1224_v6, %v1224_v6 }
 0x387   : > { %v1226_v12 = vpop.f32.mrf.mxu1 }
 0x388   : > { %9567 = vmatmul.mubr.msk.bf16.vlgmr.msra.gmra.mxu1 %vm505_vm0, %v1229_v10 }
 0x389   : > { %v9563_v14 = vpop.f32.mrf.mxu1  ;;  %9584 = vmatprep.mubr.msk.bf16.mxu1 %vm10895_vm2, %v10894_v54  ;;  %9577 = vmatpush3.bf16.msra.mxu1 %v9855_v50 }
 0x38a   : > { %9578 = vmatprep.subr.bf16.mxu1 %v10894_v54 }
 0x448   : > { %v1270_v16 = vpop.f32.mrf.mxu1 }
 0x449   : > { %v1277_v18 = vsel %vm1276_vm3, %v1270_v16, -inf }
 0x44a   : > { %1278 = vmax.xlane.f32.xlu1 %v1277_v18  ;;  %v9568_v19 = vpop.f32.mrf.mxu1 }
 0x44c   : > { %v1273_v21 = vpop.f32.mrf.mxu1 }
 0x44e   : > { %v9569_v34 = vpop.f32.mrf.mxu1 }
 0x477   : > { %449 = vxpose.xlu1.c.b16.start [1/4] (short) %v11003_v17, 128 }
 0x47b   : > { %450 = vxpose.xlu1.c.b16.cont [2/4] (short) %v10998_v15, 128 }
 0x47f   : > { %451 = vxpose.xlu1.c.b16.cont [3/4] (short) %v10993_v13, 128  ;;  %v1296_v13 = vand.u32 %v8431_v40, %v11091_v41 }
 0x483   : > { %452 = vxpose.xlu1.c.b16.end [4/4] (short) %v10989_v11, 128 }
 0x4d3   : > { %v1279_v35 = vpop.xlane.xlu1 %1278 }
 0x4d4   : > { %v1280_v36 = vsub.f32 %v1270_v16, %v1279_v35 }
 0x4d6   : > { %v1281_v39 = vmul.f32 1.442695, %v1280_v36 }
 0x4d8   : > { %9917 = vpow2.f32 %v1281_v39 }
 0x4d9   : > { %v457_v17 = vpop.trf.xlu1 }
 0x4da   : > { %9520 = vmatprep.mubr.msk.bf16.mxu0 %vm505_vm0, %v457_v17  ;;  %v11179_v17 = vadd.f32 %v11150_v0, %v11023_v25  ;;  %v11193_v25 = vadd.f32 %v11150_v0, %v11031_v29 }
 0x4dd   : > { %v458_v11 = vpop.trf.xlu1 }
 0x4de   : > { %9521 = vmatmul.mubr.msk.bf16.vlgmr.msra.gmra.mxu0 %vm505_vm0, %v458_v11 }
 0x4df   : > { %9571 = vmatpush3.bf16.msra.mxu0 %v1296_v13 }
 0x4e1   : > { %v459_v15 = vpop.trf.xlu1 }
 0x4e2   : > { %9524 = vmatprep.mubr.msk.bf16.mxu0 %vm505_vm0, %v459_v15  ;;  %v11187_v15 = vadd.f32 %v11021_v24, %v11150_v0  ;;  %v912_v24 = vsel %vm836_vm6, %v11193_v25, -inf }
 0x4e5   : > { %v9918_v42 = vpop.eup %9917  ;;  %v460_v43 = vpop.trf.xlu1 }
 0x4e6   : > { %9525 = vmatmul.mubr.msk.bf16.gmra.mxu0 %vm505_vm0, %v460_v43  ;;  %v1283_v44 = vsel %vm1276_vm3, %v9918_v42, 0.0  ;;  %v1287_v49 = vpack.c.bf16 %v9918_v42, %v9918_v42  ;;  %v900_v42 = vsel %vm836_vm6, %v11179_v17, -inf  ;;  %v906_v43 = vsel %vm836_vm6, %v11187_v15, -inf }
 0x4e7   : > { %1284 = vadd.xlane.f32.xlu0 %v1283_v44  ;;  %v11199_v44 = vadd.f32 %v11029_v28, %v11150_v0 }
 0x4e9   : > { %v461_v45 = vpop.trf.xlu1  ;;  %v918_v29 = vsel %vm836_vm6, %v11199_v44, -inf }
 0x4ea   : > { %9528 = vmatprep.mubr.msk.bf16.mxu0 %vm505_vm0, %v461_v45  ;;  %v11205_v45 = vadd.f32 %v11150_v0, %v11039_v33  ;;  %v8470_v33 = vld [vmem:[%s15710_s3 + $0x1] ss:$0 sm:$0xff] }
 0x4ec   : > { %v924_v28 = vsel %vm836_vm6, %v11205_v45, -inf }
 0x4ed   : > { %v462_v46 = vpop.trf.xlu1 }
 0x4ee   : > { %9529 = vmatmul.mubr.msk.bf16.gmra.mxu0 %vm505_vm0, %v462_v46  ;;  %v11211_v46 = vadd.f32 %v11037_v32, %v11150_v0 }
 0x4f1   : > { %v463_v47 = vpop.trf.xlu1 }
 0x4f2   : > { %9532 = vmatprep.mubr.msk.bf16.mxu0 %vm505_vm0, %v463_v47  ;;  %v930_v47 = vsel %vm836_vm6, %v11211_v46, -inf }
 0x4f5   : > { %v464_v48 = vpop.trf.xlu1 }
 0x4f6   : > { %9533 = vmatmul.mubr.msk.bf16.gmra.mxu0 %vm505_vm0, %v464_v48 }
 0x4f7   : > { %9536 = vmatprep.mubr.msk.bf16.mxu0 %vm505_vm0, %v10983_v8  ;;  %v9856_v8 = vld [vmem:[%s15712_s5 + $0x30] sm:$0xff]  }
 0x4f8   : > { %9579 = vmatpush3.bf16.msra.mxu1 %v9856_v8 }
 0x4f9   : > { %9580 = vmatprep.subr.bf16.mxu1 %v10894_v54 }
 0x4fe   : > { %9537 = vmatmul.mubr.msk.bf16.gmra.mxu0 %vm505_vm0, %v10985_v9  ;;  %v9857_v9 = vld [vmem:[%s15712_s5 + $0x28] sm:$0xff]  }
 0x4ff   : > { %9572 = vmatprep.mubr.msk.bf16.mxu0 %vm10895_vm2, %v10894_v54  ;;  %9581 = vmatpush3.bf16.msra.mxu1 %v9857_v9 }
 0x500   : > { %9582 = vmatprep.subr.bf16.mxu1 %v10894_v54 }
 0x503   : > { %9583 = vmatpush3.bf16.msra.mxu1 %v9858_v51 }
 0x506   : > { %9573 = vmatmul.mubr.msk.bf16.vlgmr.msra.gmra.mxu0 %vm836_vm6, %v1287_v49 }
 0x570   : > { %v1285_v3 = vpop.xlane.xlu0 %1284 }
 0x571   : > { %9919 = vrcp.f32 %v1285_v3 }
 0x57e   : > { %v9920_v21 = vpop.eup %9919 }
 0x59e   : > { %v11125_v52 = vpop.f32.mrf.mxu0 }
 0x5a0   : > { %v11127_v53 = vpop.f32.mrf.mxu0 }
 0x5a1   : > { %v11223_v9 = vadd.f32 %v11150_v0, %v11127_v53 }
 0x5a2   : > { %v11129_v55 = vpop.f32.mrf.mxu0 }
 0x5a3   : > { %v837_v3 = vsel %vm836_vm6, %v11223_v9, -inf }
 0x5a4   : > { %v11131_v56 = vpop.f32.mrf.mxu0 }
 0x5a6   : > { %v11133_v57 = vpop.f32.mrf.mxu0 }
 0x5a8   : > { %v11135_v58 = vpop.f32.mrf.mxu0 }
 0x5aa   : > { %v11137_v59 = vpop.f32.mrf.mxu0 }
 0x5ac   : > { %v11139_v54 = vpop.f32.mrf.mxu0 }
 0x5ae   : > { %v11141_v60 = vpop.f32.mrf.mxu0 }
 0x5b0   : > { %v11143_v61 = vpop.f32.mrf.mxu0 }
 0x5b2   : > { %v11145_v63 = vpop.f32.mrf.mxu0 }
 0x5b4   : > { %v623_v1 = vpop.f32.mrf.mxu0 }
 0x5b5   : > { %v11153_v2 = vadd.f32 %v11150_v0, %v623_v1 }
 0x5b6   : > { %v11155_v4 = vpop.f32.mrf.mxu0 }
 0x5b7   : > { %v864_v5 = vsel %vm836_vm6, %v11153_v2, -inf }
 0x5b8   : > { %865 = vmax.xlane.f32.xlu1 %v864_v5  ;;  %v11159_v6 = vpop.f32.mrf.mxu0 }
 0x5ba   : > { %v11161_v7 = vpop.f32.mrf.mxu0 }
 0x5bc   : > { %v11163_v10 = vpop.f32.mrf.mxu0 }
 0x5be   : > { %v11165_v12 = vpop.f32.mrf.mxu0 }
 0x5c0   : > { %v11167_v14 = vpop.f32.mrf.mxu0 }
 0x5c2   : > { %v9539_v16 = vpop.f32.mrf.mxu0 }
 0x5c3   : > { %v11173_v35 = vadd.f32 %v9539_v16, %v11150_v0 }
 0x5c4   : > { %v655_v18 = vpop.f32.mrf.mxu0 }
 0x5c5   : > { %v11170_v19 = vadd.f32 %v11150_v0, %v655_v18  ;;  %v894_v13 = vsel %vm836_vm6, %v11173_v35, -inf }
 0x5c6   : > { %v1332_v34 = vpop.f32.mrf.mxu0 }
 0x5c7   : > { %v1338_v36 = vmul.f32 %v9920_v21, %v1332_v34  ;;  %v888_v37 = vsel %vm836_vm6, %v11170_v19, -inf  ;;  %v11237_v34 = vadd.f32 %v11125_v52, %v11150_v0 }
 0x5c8   : > { %v9574_v38 = vpop.f32.mrf.mxu0  ;;  %889 = vmax.xlane.f32.xlu1 %v888_v37  ;;  %v11243_v37 = vadd.f32 %v11129_v55, %v11150_v0 }
 0x5c9   : > { %v1339_v39 = vpack.c.bf16 %v1338_v36, %v1338_v36  ;;  %v843_v38 = vsel %vm836_vm6, %v11237_v34, -inf }
 0x5ca   : > { %v1335_v40 = vpop.f32.mrf.mxu0  ;;  %v846_v52 = vsel %vm836_vm6, %v11243_v37, -inf }
 0x5cb   : > { %9585 = vmatmul.mubr.msk.bf16.vlgmr.msra.gmra.mxu1 %vm505_vm0, %v1339_v39  ;;  %v11255_v39 = vadd.f32 %v11150_v0, %v11139_v54  ;;  %v11261_v40 = vadd.f32 %v11133_v57, %v11150_v0 }
 0x5cc   : > { %v9575_v11 = vpop.f32.mrf.mxu0  ;;  %895 = vmax.xlane.f32.xlu1 %v894_v13  ;;  %1945 = vmatprep.mubr.bf16.mxu1 %v15717_v20  ;;  %v11267_v13 = vadd.f32 %v11137_v59, %v11150_v0 }
 0x5cd   : > { %v855_v54 = vsel %vm836_vm6, %v11261_v40, -inf  ;;  %v11273_v11 = vadd.f32 %v11150_v0, %v11143_v61 }
 0x5ce   : > { %v858_v57 = vsel %vm836_vm6, %v11267_v13, -inf }
 0x5cf   : > { %v861_v59 = vsel %vm836_vm6, %v11273_v11, -inf }
 0x5d0   : > { %901 = vmax.xlane.f32.xlu1 %v900_v42  ;;  %v11279_v42 = vadd.f32 %v11141_v60, %v11150_v0 }
 0x5d2   : > { %v867_v61 = vsel %vm836_vm6, %v11279_v42, -inf }
 0x5d4   : > { %907 = vmax.xlane.f32.xlu1 %v906_v43  ;;  %v11285_v43 = vadd.f32 %v11145_v63, %v11150_v0 }
 0x5d6   : > { %v870_v60 = vsel %vm836_vm6, %v11285_v43, -inf }
 0x5d8   : > { %913 = vmax.xlane.f32.xlu1 %v912_v24  ;;  %v11291_v24 = vadd.f32 %v11150_v0, %v11159_v6 }
 0x5da   : > { %v873_v63 = vsel %vm836_vm6, %v11291_v24, -inf }
 0x5dc   : > { %919 = vmax.xlane.f32.xlu1 %v918_v29  ;;  %v11297_v29 = vadd.f32 %v11150_v0, %v11163_v10 }
 0x5de   : > { %v876_v6 = vsel %vm836_vm6, %v11297_v29, -inf }
 0x5e0   : > { %925 = vmax.xlane.f32.xlu1 %v924_v28  ;;  %v11303_v28 = vadd.f32 %v11155_v4, %v11150_v0 }
 0x5e2   : > { %v879_v10 = vsel %vm836_vm6, %v11303_v28, -inf }
 0x5e4   : > { %931 = vmax.xlane.f32.xlu1 %v930_v47  ;;  %v11309_v47 = vadd.f32 %v11161_v7, %v11150_v0 }
 0x5e6   : > { %v882_v4 = vsel %vm836_vm6, %v11309_v47, -inf }
 0x68b   : > { %v1405_v48 = vpop.f32.mrf.mxu1 }
 0x68c   : > { %v1406_v49 = vadd.f32 %v8470_v33, %v1405_v48  ;;  %v11315_v33 = vadd.f32 %v11150_v0, %v11167_v14  ;;  %v11321_v48 = vadd.f32 %v11165_v12, %v11150_v0 }
 0x68d   : > { %v9586_v50 = vpop.f32.mrf.mxu1 }
 0x68e   : > { %v1411_v8 = vadd.f32 %v1406_v49, %v11068_v62  ;;  %v11233_v62 = vadd.f32 %v11150_v0, %v11131_v56  ;;  %v11249_v56 = vadd.f32 %v11150_v0, %v11135_v58  ;;  %v852_v58 = vsel %vm836_vm6, %v11255_v39, -inf }
 0x68f   : > { %v1408_v32 = vpop.f32.mrf.mxu1  ;;  %v885_v7 = vsel %vm836_vm6, %v11315_v33, -inf  ;;  %v11327_v49 = vadd.f32 %v11150_v0, %v11019_v23  ;;  %v891_v14 = vsel %vm836_vm6, %v11321_v48, -inf }
 0x690   : > { %v1413_v51 = vsel %vm1412_vm7, %v1411_v8, 0.0  ;;  %v840_v36 = vsel %vm836_vm6, %v11233_v62, -inf  ;;  %v849_v55 = vsel %vm836_vm6, %v11249_v56, -inf }
 0x691   : > { %1414 = vadd.xlane.f32.xlu0 %v1413_v51  ;;  %v9587_v1 = vpop.f32.mrf.mxu1  ;;  %v897_v32 = vsel %vm836_vm6, %v11327_v49, -inf  ;;  %v11340_v51 = vadd.f32 %v11150_v0, %v11027_v27 }
 0x695   : > { %838 = vmax.xlane.f32.xlu0 %v837_v3  ;;  %v11346_v3 = vadd.f32 %v11025_v26, %v11150_v0 }
 0x697   : > { %v915_v27 = vsel %vm836_vm6, %v11346_v3, -inf }
 0x71a   : > { %v1415_v5 = vpop.xlane.xlu0 %1414 }
 0x71b   : > { %v1417_v16 = vmul.f32 0.015625, %v1415_v5  ;;  %v11358_v5 = vadd.f32 %v11033_v30, %v11150_v0 }
 0x71d   : > { %v11227_v18 = vsub.f32 %v1411_v8, %v1417_v16  ;;  %v11333_v8 = vadd.f32 %v11017_v22, %v11150_v0  ;;  %v909_v22 = vsel %vm836_vm6, %v11340_v51, -inf  ;;  %v927_v16 = vsel %vm836_vm6, %v11358_v5, -inf }
 0x71e   : > { %v839_v50 = vpop.xlane.xlu0 %838 }
 0x71f   : > { %v1419_v21 = vmul.f32 %v11227_v18, %v11227_v18  ;;  %v933_v12 = vsub.f32 %v11223_v9, %v839_v50  ;;  %v903_v1 = vsel %vm836_vm6, %v11333_v8, -inf  ;;  %v11352_v9 = vadd.f32 %v11150_v0, %v11035_v31 }
 0x721   : > { %v1420_v53 = vsel %vm1412_vm7, %v1419_v21, 0.0  ;;  %v965_v23 = vmul.f32 1.442695, %v933_v12  ;;  %v921_v26 = vsel %vm836_vm6, %v11352_v9, -inf }
 0x722   : > { %1421 = vadd.xlane.f32.xlu0 %v1420_v53 }
 0x723   : > { %9921 = vpow2.f32 %v965_v23 }
 0x726   : > { %841 = vmax.xlane.f32.xlu0 %v840_v36 }
 0x72a   : > { %844 = vmax.xlane.f32.xlu0 %v843_v38 }
 0x72e   : > { %847 = vmax.xlane.f32.xlu0 %v846_v52 }
 0x730   : > { %v9922_v21 = vpop.eup %9921 }
 0x731   : > { %v1029_v31 = vsel %vm836_vm6, %v9922_v21, 0.0 }
 0x732   : > { %850 = vmax.xlane.f32.xlu0 %v849_v55 }
 0x736   : > { %853 = vmax.xlane.f32.xlu0 %v852_v58 }
 0x73a   : > { %856 = vmax.xlane.f32.xlu0 %v855_v54 }
 0x73e   : > { %859 = vmax.xlane.f32.xlu0 %v858_v57 }
 0x742   : > { %862 = vmax.xlane.f32.xlu0 %v861_v59 }
 0x746   : > { %868 = vmax.xlane.f32.xlu0 %v867_v61 }
 0x74a   : > { %871 = vmax.xlane.f32.xlu0 %v870_v60 }
 0x74e   : > { %874 = vmax.xlane.f32.xlu0 %v873_v63 }
 0x752   : > { %877 = vmax.xlane.f32.xlu0 %v876_v6 }
 0x756   : > { %880 = vmax.xlane.f32.xlu0 %v879_v10 }
 0x75a   : > { %883 = vmax.xlane.f32.xlu0 %v882_v4 }
 0x75e   : > { %886 = vmax.xlane.f32.xlu0 %v885_v7 }
 0x762   : > { %892 = vmax.xlane.f32.xlu0 %v891_v14 }
 0x766   : > { %898 = vmax.xlane.f32.xlu0 %v897_v32 }
 0x76a   : > { %904 = vmax.xlane.f32.xlu0 %v903_v1  ;;  %v866_v1 = vpop.xlane.xlu1 %865 }
 0x76e   : > { %910 = vmax.xlane.f32.xlu0 %v909_v22 }
 0x772   : > { %916 = vmax.xlane.f32.xlu0 %v915_v27 }
 0x776   : > { %922 = vmax.xlane.f32.xlu0 %v921_v26 }
 0x77a   : > { %928 = vmax.xlane.f32.xlu0 %v927_v16  ;;  %v942_v16 = vsub.f32 %v11153_v2, %v866_v1 }
 0x77e   : > { %1030 = vadd.xlane.f32.xlu0 %v1029_v31 }
 0x7ab   : > { %v1422_v53 = vpop.xlane.xlu0 %1421 }
 0x7ac   : > { %v1423_v36 = vmul.f32 0.015625, %v1422_v53 }
 0x7ae   : > { %v1424_v38 = vadd.f32 1e-05, %v1423_v36 }
 0x7af   : > { %v842_v52 = vpop.xlane.xlu0 %841 }
 0x7b0   : > { %9923 = vrsqrt.f32 %v1424_v38  ;;  %v934_v30 = vsub.f32 %v11233_v62, %v842_v52  ;;  %v8476_v62 = vld [vmem:[%s15710_s3 + $0x2] ss:$0 sm:$0xff] }
 0x7b2   : > { %v967_v0 = vmul.f32 1.442695, %v934_v30 }
 0x7b3   : > { %v845_v55 = vpop.xlane.xlu0 %844 }
 0x7b4   : > { %9925 = vpow2.f32 %v967_v0  ;;  %v935_v58 = vsub.f32 %v11237_v34, %v845_v55  ;;  %v8477_v34 = vld [vmem:[%s15710_s3 + $0x3] ss:$0 sm:$0xff] }
 0x7b6   : > { %v969_v54 = vmul.f32 1.442695, %v935_v58 }
 0x7b7   : > { %v848_v57 = vpop.xlane.xlu0 %847 }
 0x7b8   : > { %9927 = vpow2.f32 %v969_v54  ;;  %v936_v59 = vsub.f32 %v11243_v37, %v848_v57 }
 0x7ba   : > { %v971_v61 = vmul.f32 1.442695, %v936_v59 }
 0x7bb   : > { %v851_v60 = vpop.xlane.xlu0 %850 }
 0x7bc   : > { %9929 = vpow2.f32 %v971_v61  ;;  %v937_v63 = vsub.f32 %v11249_v56, %v851_v60  ;;  %v890_v61 = vpop.xlane.xlu1 %889 }
 0x7bd   : > { %v9924_v6 = vpop.eup %9923 }
 0x7be   : > { %v973_v10 = vmul.f32 1.442695, %v937_v63  ;;  %v1426_v4 = vmul.f32 %v9924_v6, %v11227_v18 }
 0x7bf   : > { %v854_v7 = vpop.xlane.xlu0 %853 }
 0x7c0   : > { %9931 = vpow2.f32 %v973_v10  ;;  %v938_v37 = vsub.f32 %v11255_v39, %v854_v7  ;;  %v1431_v14 = vmul.f32 %v8476_v62, %v1426_v4 }
 0x7c1   : > { %v9926_v50 = vpop.eup %9925 }
 0x7c2   : > { %v975_v12 = vmul.f32 1.442695, %v938_v37  ;;  %v1032_v56 = vsel %vm836_vm6, %v9926_v50, 0.0  ;;  %v1437_v32 = vpack.c.bf16 %v9926_v50, %v9922_v21  ;;  %v1436_v23 = vadd.f32 %v8477_v34, %v1431_v14  ;;  %v896_v34 = vpop.xlane.xlu1 %895 }
 0x7c3   : > { %1033 = vadd.xlane.f32.xlu1 %v1032_v56  ;;  %v857_v22 = vpop.xlane.xlu0 %856 }
 0x7c4   : > { %9933 = vpow2.f32 %v975_v12  ;;  %v939_v18 = vsub.f32 %v11261_v40, %v857_v22  ;;  %9590 = vmatprep.mubr.msk.bf16.mxu0 %vm836_vm6, %v1437_v32  ;;  %v1453_v27 = vpack.c.bf16 %v1436_v23, %v1436_v23  ;;  %v983_v40 = vmul.f32 1.442695, %v942_v16 }
 0x7c5   : > { %v9928_v26 = vpop.eup %9927 }
 0x7c6   : > { %v977_v39 = vmul.f32 1.442695, %v939_v18  ;;  %v1035_v31 = vsel %vm836_vm6, %v9928_v26, 0.0  ;;  %v1503_v53 = vand.u32 %v1453_v27, %v11091_v41  ;;  %v902_v22 = vpop.xlane.xlu1 %901 }
 0x7c7   : > { %1036 = vadd.xlane.f32.xlu0 %v1035_v31  ;;  %v860_v21 = vpop.xlane.xlu0 %859 }
 0x7c8   : > { %9935 = vpow2.f32 %v977_v39  ;;  %v940_v36 = vsub.f32 %v11267_v13, %v860_v21  ;;  %9588 = vmatprep.subr.bf16.mxu0 %v1503_v53 }
 0x7c9   : > { %v9930_v38 = vpop.eup %9929  ;;  %9589 = vmatpush3.bf16.msra.mxu0 %v1503_v53 }
 0x7ca   : > { %v979_v52 = vmul.f32 1.442695, %v940_v36  ;;  %v1038_v30 = vsel %vm836_vm6, %v9930_v38, 0.0  ;;  %v1438_v0 = vpack.c.bf16 %v9930_v38, %v9928_v26  ;;  %v908_v36 = vpop.xlane.xlu1 %907 }
 0x7cb   : > { %1039 = vadd.xlane.f32.xlu1 %v1038_v30  ;;  %v863_v2 = vpop.xlane.xlu0 %862 }
 0x7cc   : > { %9937 = vpow2.f32 %v979_v52  ;;  %v941_v55 = vsub.f32 %v11273_v11, %v863_v2  ;;  %9591 = vmatmul.mubr.msk.bf16.vlgmr.msra.gmra.mxu0 %vm836_vm6, %v1438_v0  ;;  %v952_v0 = vsub.f32 %v11173_v35, %v896_v34 }
 0x7cd   : > { %v9932_v41 = vpop.eup %9931  ;;  %9939 = vpow2.f32 %v983_v40 }
 0x7ce   : > { %v981_v58 = vmul.f32 1.442695, %v941_v55  ;;  %v1041_v13 = vsel %vm836_vm6, %v9932_v41, 0.0 }
 0x7cf   : > { %1042 = vadd.xlane.f32.xlu0 %v1041_v13  ;;  %v869_v54 = vpop.xlane.xlu0 %868  ;;  %v1003_v13 = vmul.f32 1.442695, %v952_v0 }
 0x7d0   : > { %9941 = vpow2.f32 %v981_v58  ;;  %v943_v57 = vsub.f32 %v11279_v42, %v869_v54  ;;  %v914_v54 = vpop.xlane.xlu1 %913 }
 0x7d1   : > { %v9934_v59 = vpop.eup %9933  ;;  %v958_v34 = vsub.f32 %v11193_v25, %v914_v54 }
 0x7d2   : > { %v985_v60 = vmul.f32 1.442695, %v943_v57  ;;  %v1044_v63 = vsel %vm836_vm6, %v9934_v59, 0.0  ;;  %v1439_v6 = vpack.c.bf16 %v9934_v59, %v9932_v41 }
 0x7d3   : > { %1045 = vadd.xlane.f32.xlu1 %v1044_v63  ;;  %v872_v11 = vpop.xlane.xlu0 %871 }
 0x7d4   : > { %9943 = vpow2.f32 %v985_v60  ;;  %v944_v62 = vsub.f32 %v11285_v43, %v872_v11  ;;  %9594 = vmatprep.mubr.msk.bf16.mxu0 %vm836_vm6, %v1439_v6 }
 0x7d5   : > { %v9936_v10 = vpop.eup %9935 }
 0x7d6   : > { %v987_v4 = vmul.f32 1.442695, %v944_v62  ;;  %v1047_v7 = vsel %vm836_vm6, %v9936_v10, 0.0 }
 0x7d7   : > { %1048 = vadd.xlane.f32.xlu0 %v1047_v7  ;;  %v875_v42 = vpop.xlane.xlu0 %874 }
 0x7d8   : > { %9945 = vpow2.f32 %v987_v4  ;;  %v945_v37 = vsub.f32 %v11291_v24, %v875_v42 }
 0x7d9   : > { %v9938_v14 = vpop.eup %9937 }
 0x7da   : > { %v989_v50 = vmul.f32 1.442695, %v945_v37  ;;  %v1050_v12 = vsel %vm836_vm6, %v9938_v14, 0.0  ;;  %v1440_v56 = vpack.c.bf16 %v9938_v14, %v9936_v10  ;;  %v9940_v32 = vpop.eup %9939  ;;  %v920_v10 = vpop.xlane.xlu1 %919 }
 0x7db   : > { %1051 = vadd.xlane.f32.xlu1 %v1050_v12  ;;  %v878_v43 = vpop.xlane.xlu0 %877  ;;  %v1056_v27 = vsel %vm836_vm6, %v9940_v32, 0.0  ;;  %v960_v12 = vsub.f32 %v11199_v44, %v920_v10 }
 0x7dc   : > { %9947 = vpow2.f32 %v989_v50  ;;  %v946_v23 = vsub.f32 %v11297_v29, %v878_v43  ;;  %9595 = vmatmul.mubr.msk.bf16.gmra.mxu0 %vm836_vm6, %v1440_v56  ;;  %v950_v29 = vsub.f32 %v11170_v19, %v890_v61 }
 0x7dd   : > { %v9942_v1 = vpop.eup %9941 }
 0x7de   : > { %v991_v18 = vmul.f32 1.442695, %v946_v23  ;;  %v1053_v24 = vsel %vm836_vm6, %v9942_v1, 0.0  ;;  %v1441_v26 = vpack.c.bf16 %v9940_v32, %v9942_v1  ;;  %v999_v30 = vmul.f32 1.442695, %v950_v29 }
 0x7df   : > { %1057 = vadd.xlane.f32.xlu1 %v1056_v27  ;;  %1054 = vadd.xlane.f32.xlu0 %v1053_v24  ;;  %v881_v16 = vpop.xlane.xlu0 %880  ;;  %v1015_v32 = vmul.f32 1.442695, %v958_v34  ;;  %v9870_v34 = vld [vmem:[%s15713_s6 + $0x6c] ss:$24 sps:$4 sm:$0xff]  }
 0x7e0   : > { %9949 = vpow2.f32 %v991_v18  ;;  %v947_v39 = vsub.f32 %v11303_v28, %v881_v16  ;;  %9598 = vmatprep.mubr.msk.bf16.mxu0 %vm836_vm6, %v1441_v26 }
 0x7e1   : > { %v9944_v31 = vpop.eup %9943 }
 0x7e2   : > { %v993_v53 = vmul.f32 1.442695, %v947_v39  ;;  %v1059_v21 = vsel %vm836_vm6, %v9944_v31, 0.0 }
 0x7e3   : > { %1060 = vadd.xlane.f32.xlu0 %v1059_v21  ;;  %v884_v38 = vpop.xlane.xlu0 %883 }
 0x7e4   : > { %9951 = vpow2.f32 %v993_v53  ;;  %v948_v40 = vsub.f32 %v11309_v47, %v884_v38  ;;  %v954_v47 = vsub.f32 %v11179_v17, %v902_v22 }
 0x7e5   : > { %v9946_v52 = vpop.eup %9945 }
 0x7e6   : > { %v995_v2 = vmul.f32 1.442695, %v948_v40  ;;  %v1062_v28 = vsel %vm836_vm6, %v9946_v52, 0.0  ;;  %v1442_v55 = vpack.c.bf16 %v9946_v52, %v9944_v31  ;;  %v1007_v63 = vmul.f32 1.442695, %v954_v47 }
 0x7e7   : > { %1063 = vadd.xlane.f32.xlu1 %v1062_v28  ;;  %v887_v41 = vpop.xlane.xlu0 %886 }
 0x7e8   : > { %9953 = vpow2.f32 %v995_v2  ;;  %v949_v19 = vsub.f32 %v11315_v33, %v887_v41  ;;  %9599 = vmatmul.mubr.msk.bf16.gmra.mxu0 %vm836_vm6, %v1442_v55  ;;  %v956_v33 = vsub.f32 %v11187_v15, %v908_v36 }
 0x7e9   : > { %v9948_v58 = vpop.eup %9947  ;;  %9955 = vpow2.f32 %v999_v30 }
 0x7ea   : > { %v997_v57 = vmul.f32 1.442695, %v949_v19  ;;  %v1065_v35 = vsel %vm836_vm6, %v9948_v58, 0.0 }
 0x7eb   : > { %1066 = vadd.xlane.f32.xlu0 %v1065_v35  ;;  %v893_v59 = vpop.xlane.xlu0 %892 }
 0x7ec   : > { %9957 = vpow2.f32 %v997_v57  ;;  %v951_v61 = vsub.f32 %v11321_v48, %v893_v59  ;;  %v1011_v48 = vmul.f32 1.442695, %v956_v33  ;;  %v9864_v33 = vld [vmem:[%s15713_s6 + $0x9c] ss:$24 sps:$4 sm:$0xff]  }
 0x7ed   : > { %v9950_v60 = vpop.eup %9949  ;;  %9959 = vpow2.f32 %v1003_v13  ;;  %2114 = vmatprep.subr.bf16.mxu0 %v9864_v33 }
 0x7ee   : > { %v1001_v6 = vmul.f32 1.442695, %v951_v61  ;;  %v1068_v11 = vsel %vm836_vm6, %v9950_v60, 0.0  ;;  %v1443_v62 = vpack.c.bf16 %v9950_v60, %v9948_v58  ;;  %v9859_v61 = vld [vmem:[%s15713_s6 + $0x90] ss:$24 sps:$4 sm:$0xff]  }
 0x7ef   : > { %1069 = vadd.xlane.f32.xlu1 %v1068_v11  ;;  %v899_v17 = vpop.xlane.xlu0 %898 }
 0x7f0   : > { %9961 = vpow2.f32 %v1001_v6  ;;  %v953_v4 = vsub.f32 %v11327_v49, %v899_v17  ;;  %9602 = vmatprep.mubr.msk.bf16.mxu0 %vm836_vm6, %v1443_v62  ;;  %v926_v49 = vpop.xlane.xlu1 %925 }
 0x7f1   : > { %v9952_v7 = vpop.eup %9951  ;;  %9963 = vpow2.f32 %v1007_v63  ;;  %v962_v27 = vsub.f32 %v11205_v45, %v926_v49  ;;  %v9862_v63 = vld [vmem:[%s15713_s6 + $0x98] ss:$24 sps:$4 sm:$0xff]   ;;  %v9876_v49 = vld [vmem:[%s15713_s6 + $0x3c] ss:$24 sps:$4 sm:$0xff]  }
 0x7f2   : > { %v1005_v42 = vmul.f32 1.442695, %v953_v4  ;;  %v1071_v15 = vsel %vm836_vm6, %v9952_v7, 0.0  ;;  %2115 = vmatpush1.bf16.msra.mxu0 %v9862_v63  ;;  %v9865_v4 = vld [vmem:[%s15713_s6 + $0x60] ss:$24 sps:$4 sm:$0xff]  }
 0x7f3   : > { %1072 = vadd.xlane.f32.xlu0 %v1071_v15  ;;  %v905_v37 = vpop.xlane.xlu0 %904  ;;  %v1023_v45 = vmul.f32 1.442695, %v962_v27  ;;  %2116 = vmatprep.subr.bf16.mxu0 %v9870_v34  ;;  %v9877_v27 = vld [vmem:[%s15713_s6] ss:$24 sps:$4 sm:$0xff]   ;;  %v9894_v63 = vld [vmem:[%s15713_s6 + $0x14] ss:$24 sps:$4 sm:$0xff]  }
 0x7f4   : > { %9965 = vpow2.f32 %v1005_v42  ;;  %v955_v14 = vsub.f32 %v11333_v8, %v905_v37  ;;  %v1019_v8 = vmul.f32 1.442695, %v960_v12  ;;  %v932_v31 = vpop.xlane.xlu1 %931  ;;  %v9873_v12 = vld [vmem:[%s15713_s6 + $0x34] ss:$24 sps:$4 sm:$0xff]  }
 0x7f5   : > { %v9954_v50 = vpop.eup %9953  ;;  %9967 = vpow2.f32 %v1011_v48  ;;  %v964_v38 = vsub.f32 %v11211_v46, %v932_v31  ;;  %v9868_v48 = vld [vmem:[%s15713_s6 + $0x68] ss:$24 sps:$4 sm:$0xff]  }
 0x7f6   : > { %v9956_v56 = vpop.eup %9955  ;;  %v1009_v43 = vmul.f32 1.442695, %v955_v14  ;;  %v1074_v23 = vsel %vm836_vm6, %v9954_v50, 0.0  ;;  %v1444_v1 = vpack.c.bf16 %v9954_v50, %v9952_v7  ;;  %v9867_v7 = vld [vmem:[%s15713_s6 + $0x64] ss:$24 sps:$4 sm:$0xff]   ;;  %2117 = vmatpush1.bf16.msra.mxu0 %v9868_v48 }
 0x7f7   : > { %1075 = vadd.xlane.f32.xlu1 %v1074_v23  ;;  %v911_v25 = vpop.xlane.xlu0 %910  ;;  %v1080_v44 = vsel %vm836_vm6, %v9956_v56, 0.0  ;;  %v1027_v41 = vmul.f32 1.442695, %v964_v38  ;;  %2118 = vmatprep.subr.bf16.mxu0 %v9876_v49 }
 0x7f8   : > { %9969 = vpow2.f32 %v1009_v43  ;;  %v957_v22 = vsub.f32 %v11340_v51, %v911_v25  ;;  %9603 = vmatmul.mubr.msk.bf16.gmra.mxu0 %vm836_vm6, %v1444_v1 }
 0x7f9   : > { %v9958_v18 = vpop.eup %9957  ;;  %9971 = vpow2.f32 %v1015_v32  ;;  %v9874_v32 = vld [vmem:[%s15713_s6 + $0x38] ss:$24 sps:$4 sm:$0xff]  }
 0x7fa   : > { %v9960_v24 = vpop.eup %9959  ;;  %v1013_v26 = vmul.f32 1.442695, %v957_v22  ;;  %v1077_v16 = vsel %vm836_vm6, %v9958_v18, 0.0  ;;  %v1445_v39 = vpack.c.bf16 %v9956_v56, %v9958_v18  ;;  %v9871_v56 = vld [vmem:[%s15713_s6 + $0x30] ss:$24 sps:$4 sm:$0xff]   ;;  %2119 = vmatpush1.bf16.msra.mxu0 %v9874_v32 }
 0x7fb   : > { %1081 = vadd.xlane.f32.xlu1 %v1080_v44  ;;  %1078 = vadd.xlane.f32.xlu0 %v1077_v16  ;;  %v917_v29 = vpop.xlane.xlu0 %916  ;;  %v1086_v21 = vsel %vm836_vm6, %v9960_v24, 0.0  ;;  %v9879_v22 = vld [vmem:[%s15713_s6 + $0x4] ss:$24 sps:$4 sm:$0xff]   ;;  %v9880_v44 = vld [vmem:[%s15713_s6 + $0x8] ss:$24 sps:$4 sm:$0xff]  }
 0x7fc   : > { %9973 = vpow2.f32 %v1013_v26  ;;  %v959_v51 = vsub.f32 %v11346_v3, %v917_v29  ;;  %9606 = vmatprep.mubr.msk.bf16.mxu0 %vm836_vm6, %v1445_v39  ;;  %v9882_v18 = vld [vmem:[%s15713_s6 + $0xc] ss:$24 sps:$4 sm:$0xff]  }
 0x7fd   : > { %v9962_v53 = vpop.eup %9961  ;;  %9975 = vpow2.f32 %v1019_v8  ;;  %2120 = vmatprep.subr.bf16.mxu0 %v9882_v18 }
 0x7fe   : > { %v9964_v36 = vpop.eup %9963  ;;  %v1017_v40 = vmul.f32 1.442695, %v959_v51  ;;  %v1083_v52 = vsel %vm836_vm6, %v9962_v53, 0.0  ;;  %v1446_v30 = vpack.c.bf16 %v9960_v24, %v9962_v53  ;;  %2121 = vmatpush1.bf16.msra.mxu0 %v9880_v44  ;;  %v9885_v51 = vld [vmem:[%s15713_s6 + $0xa4] ss:$24 sps:$4 sm:$0xff]  }
 0x7ff   : > { %1087 = vadd.xlane.f32.xlu1 %v1086_v21  ;;  %1084 = vadd.xlane.f32.xlu0 %v1083_v52  ;;  %v923_v0 = vpop.xlane.xlu0 %922  ;;  %v1092_v28 = vsel %vm836_vm6, %v9964_v36, 0.0 }
 0x800   : > { %9977 = vpow2.f32 %v1017_v40  ;;  %v961_v3 = vsub.f32 %v11352_v9, %v923_v0  ;;  %9607 = vmatmul.mubr.msk.bf16.gmra.mxu0 %vm836_vm6, %v1446_v30 }
 0x801   : > { %v9966_v2 = vpop.eup %9965  ;;  %9979 = vpow2.f32 %v1023_v45 }
 0x802   : > { %v9968_v55 = vpop.eup %9967  ;;  %v1021_v19 = vmul.f32 1.442695, %v961_v3  ;;  %v1089_v46 = vsel %vm836_vm6, %v9966_v2, 0.0  ;;  %v1447_v58 = vpack.c.bf16 %v9964_v36, %v9966_v2 }
 0x803   : > { %1093 = vadd.xlane.f32.xlu1 %v1092_v28  ;;  %1090 = vadd.xlane.f32.xlu0 %v1089_v46  ;;  %v929_v13 = vpop.xlane.xlu0 %928  ;;  %v1098_v54 = vsel %vm836_vm6, %v9968_v55, 0.0 }
 0x804   : > { %9981 = vpow2.f32 %v1021_v19  ;;  %v963_v47 = vsub.f32 %v11358_v5, %v929_v13  ;;  %9610 = vmatprep.mubr.msk.bf16.mxu0 %vm836_vm6, %v1447_v58  ;;  %v9861_v5 = vld [vmem:[%s15713_s6 + $0x94] ss:$24 sps:$4 sm:$0xff]  }
 0x805   : > { %v9970_v9 = vpop.eup %9969  ;;  %9983 = vpow2.f32 %v1027_v41  ;;  %1921 = vmatprep.subr.bf16.mxu1 %v9861_v5  ;;  %v9883_v41 = vld [vmem:[%s15713_s6 + $0xa0] ss:$24 sps:$4 sm:$0xff]   ;;  %v9888_v19 = vld [vmem:[%s15713_s6 + $0x74] ss:$24 sps:$4 sm:$0xff]  }
 0x806   : > { %v1025_v57 = vmul.f32 1.442695, %v963_v47  ;;  %v1095_v35 = vsel %vm836_vm6, %v9970_v9, 0.0  ;;  %v1448_v59 = vpack.c.bf16 %v9968_v55, %v9970_v9  ;;  %v9972_v60 = vpop.eup %9971  ;;  %1922 = vmatpush1.bf16.msra.mxu1 %v9859_v61  ;;  %v9886_v47 = vld [vmem:[%s15713_s6 + $0x70] ss:$24 sps:$4 sm:$0xff]  }
 0x807   : > { %1099 = vadd.xlane.f32.xlu1 %v1098_v54  ;;  %1096 = vadd.xlane.f32.xlu0 %v1095_v35  ;;  %v1104_v62 = vsel %vm836_vm6, %v9972_v60, 0.0  ;;  %v1031_v31 = vpop.xlane.xlu0 %1030 }
 0x808   : > { %9985 = vpow2.f32 %v1025_v57  ;;  %9611 = vmatmul.mubr.msk.bf16.gmra.mxu0 %vm836_vm6, %v1448_v59  ;;  %1923 = vmatprep.subr.bf16.mxu1 %v9867_v7  ;;  %v9891_v57 = vld [vmem:[%s15713_s6 + $0x44] ss:$24 sps:$4 sm:$0xff]  }
 0x809   : > { %v9974_v6 = vpop.eup %9973  ;;  %9987 = vrcp.f32 %v1031_v31 }
 0x80a   : > { %v9976_v11 = vpop.eup %9975  ;;  %v1101_v10 = vsel %vm836_vm6, %v9974_v6, 0.0  ;;  %v1449_v17 = vpack.c.bf16 %v9972_v60, %v9974_v6  ;;  %1924 = vmatpush1.bf16.msra.mxu1 %v9865_v4  ;;  %v9889_v60 = vld [vmem:[%s15713_s6 + $0x40] ss:$24 sps:$4 sm:$0xff]  }
 0x80b   : > { %1105 = vadd.xlane.f32.xlu1 %v1104_v62  ;;  %1102 = vadd.xlane.f32.xlu0 %v1101_v10  ;;  %v1110_v37 = vsel %vm836_vm6, %v9976_v11, 0.0  ;;  %v9892_v62 = vld [vmem:[%s15713_s6 + $0x10] ss:$24 sps:$4 sm:$0xff]  }
 0x80c   : > { %9614 = vmatprep.mubr.msk.bf16.mxu0 %vm836_vm6, %v1449_v17  ;;  %1925 = vmatprep.subr.bf16.mxu1 %v9873_v12 }
 0x80d   : > { %v9978_v42 = vpop.eup %9977 }
 0x80e   : > { %v9980_v15 = vpop.eup %9979  ;;  %v1107_v14 = vsel %vm836_vm6, %v9978_v42, 0.0  ;;  %v1450_v50 = vpack.c.bf16 %v9976_v11, %v9978_v42  ;;  %1926 = vmatpush1.bf16.msra.mxu1 %v9871_v56 }
 0x80f   : > { %1111 = vadd.xlane.f32.xlu1 %v1110_v37  ;;  %1108 = vadd.xlane.f32.xlu0 %v1107_v14  ;;  %v1116_v23 = vsel %vm836_vm6, %v9980_v15, 0.0 }
 0x810   : > { %9615 = vmatmul.mubr.msk.bf16.gmra.mxu0 %vm836_vm6, %v1450_v50  ;;  %1927 = vmatprep.subr.bf16.mxu1 %v9879_v22 }
 0x811   : > { %v9982_v43 = vpop.eup %9981 }
 0x812   : > { %v1113_v1 = vsel %vm836_vm6, %v9982_v43, 0.0  ;;  %v1451_v25 = vpack.c.bf16 %v9980_v15, %v9982_v43  ;;  %v9984_v8 = vpop.eup %9983  ;;  %1928 = vmatpush1.bf16.msra.mxu1 %v9877_v27 }
 0x813   : > { %1117 = vadd.xlane.f32.xlu1 %v1116_v23  ;;  %1114 = vadd.xlane.f32.xlu0 %v1113_v1  ;;  %v1122_v26 = vsel %vm836_vm6, %v9984_v8, 0.0 }
 0x814   : > { %9618 = vmatprep.mubr.msk.bf16.mxu0 %vm836_vm6, %v1451_v25  ;;  %2307 = vmatprep.subr.bf16.mxu1 %v9885_v51 }
 0x815   : > { %v9986_v24 = vpop.eup %9985 }
 0x816   : > { %v1119_v16 = vsel %vm836_vm6, %v9986_v24, 0.0  ;;  %v1452_v39 = vpack.c.bf16 %v9984_v8, %v9986_v24  ;;  %v9988_v40 = vpop.eup %9987 }
 0x817   : > { %1123 = vadd.xlane.f32.xlu1 %v1122_v26  ;;  %1120 = vadd.xlane.f32.xlu0 %v1119_v16 }
 0x818   : > { %9619 = vmatmul.mubr.msk.bf16.gmra.mxu0 %vm836_vm6, %v1452_v39 }
 0x819   : > { %2138 = vmatprep.mubr.bf16.mxu0 %v15717_v20 }
 0x84c   : > { %v1034_v29 = vpop.xlane.xlu1 %1033 }
 0x84d   : > { %9989 = vrcp.f32 %v1034_v29 }
 0x850   : > { %v1037_v45 = vpop.xlane.xlu0 %1036 }
 0x854   : > { %v1040_v53 = vpop.xlane.xlu1 %1039 }
 0x855   : > { %9991 = vrcp.f32 %v1040_v53 }
 0x856   : > { %9993 = vrcp.f32 %v1037_v45 }
 0x858   : > { %v1043_v52 = vpop.xlane.xlu0 %1042 }
 0x859   : > { %9995 = vrcp.f32 %v1043_v52 }
 0x85a   : > { %v9990_v30 = vpop.eup %9989 }
 0x85c   : > { %v1046_v0 = vpop.xlane.xlu1 %1045 }
 0x85d   : > { %9997 = vrcp.f32 %v1046_v0 }
 0x860   : > { %v1049_v54 = vpop.xlane.xlu0 %1048 }
 0x862   : > { %v9992_v46 = vpop.eup %9991 }
 0x863   : > { %v9994_v9 = vpop.eup %9993 }
 0x864   : > { %v1052_v58 = vpop.xlane.xlu1 %1051 }
 0x865   : > { %9999 = vrcp.f32 %v1052_v58 }
 0x866   : > { %10001 = vrcp.f32 %v1049_v54  ;;  %v9996_v11 = vpop.eup %9995 }
 0x868   : > { %v1058_v33 = vpop.xlane.xlu1 %1057  ;;  %v1055_v17 = vpop.xlane.xlu0 %1054 }
 0x869   : > { %10003 = vrcp.f32 %v1058_v33 }
 0x86a   : > { %v9998_v10 = vpop.eup %9997  ;;  %10005 = vrcp.f32 %v1055_v17 }
 0x86c   : > { %v1061_v12 = vpop.xlane.xlu0 %1060 }
 0x870   : > { %v1064_v15 = vpop.xlane.xlu1 %1063 }
 0x871   : > { %10007 = vrcp.f32 %v1064_v15 }
 0x872   : > { %v10000_v42 = vpop.eup %9999  ;;  %10009 = vrcp.f32 %v1061_v12 }
 0x873   : > { %v10002_v50 = vpop.eup %10001 }
 0x874   : > { %v1067_v8 = vpop.xlane.xlu0 %1066 }
 0x876   : > { %v10004_v1 = vpop.eup %10003 }
 0x877   : > { %v10006_v18 = vpop.eup %10005 }
 0x878   : > { %v1070_v25 = vpop.xlane.xlu1 %1069 }
 0x879   : > { %10011 = vrcp.f32 %v1070_v25 }
 0x87a   : > { %10013 = vrcp.f32 %v1067_v8 }
 0x87c   : > { %v1073_v29 = vpop.xlane.xlu0 %1072 }
 0x87e   : > { %v10008_v24 = vpop.eup %10007 }
 0x87f   : > { %v10010_v31 = vpop.eup %10009 }
 0x880   : > { %v1076_v26 = vpop.xlane.xlu1 %1075 }
 0x881   : > { %10015 = vrcp.f32 %v1076_v26 }
 0x882   : > { %10017 = vrcp.f32 %v1073_v29 }
 0x884   : > { %v1079_v0 = vpop.xlane.xlu0 %1078 }
 0x88c   : > { %v9592_v21 = vpop.f32.mrf.mxu0 }
 0x88d   : > { %v11531_v35 = vmul.f32 %v9994_v9, %v9592_v21 }
 0x88e   : > { %v1539_v36 = vpop.f32.mrf.mxu0 }
 0x88f   : > { %v11503_v2 = vmul.f32 %v9988_v40, %v1539_v36  ;;  %15924 = vst [vmem:[#allocation5_spill] sm:$0xff] %v11531_v35  ;;  %v1082_v40 = vpop.xlane.xlu1 %1081 }
 0x890   : > { %v9593_v38 = vpop.f32.mrf.mxu0  ;;  %10019 = vrcp.f32 %v1082_v40 }
 0x891   : > { %15921 = vst [vmem:[#allocation2_spill] sm:$0xff] %v11503_v2  ;;  %v11523_v13 = vmul.f32 %v9992_v46, %v9593_v38  ;;  %v10012_v38 = vpop.eup %10011  ;;  %10021 = vrcp.f32 %v1079_v0 }
 0x892   : > { %v1542_v3 = vpop.f32.mrf.mxu0 }
 0x893   : > { %v11505_v28 = vmul.f32 %v9990_v30, %v1542_v3  ;;  %15923 = vst [vmem:[#allocation4_spill] sm:$0xff] %v11523_v13  ;;  %v11535_v61 = vpack.c.bf16 %v11523_v13, %v11531_v35  ;;  %v10014_v30 = vpop.eup %10013 }
 0x894   : > { %v10016_v58 = vpop.eup %10015 }
 0x895   : > { %15922 = vst [vmem:[#allocation3_spill] sm:$0xff] %v11505_v28  ;;  %v11509_v55 = vpack.c.bf16 %v11505_v28, %v11503_v2  ;;  %v10018_v54 = vpop.eup %10017 }
 0x897   : > { %8518 = vmatmul.mubr.msk.bf16.vlgmr.msra.gmra.mxu1 %vm505_vm0, %v11509_v55  ;;  %8534 = vmatmul.mubr.msk.bf16.vlgmr.msra.gmra.mxu0 %vm505_vm0, %v11509_v55 }
 0x898   : > { %1955 = vmatprep.mubr.bf16.mxu1 %v15717_v20  ;;  %2148 = vmatprep.mubr.bf16.mxu0 %v15717_v20 }
 0x899   : > { %2308 = vmatpush1.bf16.msra.mxu1 %v9883_v41 }
 0x89a   : > { %2309 = vmatprep.subr.bf16.mxu1 %v9888_v19 }
 0x89c   : > { %v9596_v59 = vpop.f32.mrf.mxu0 }
 0x89d   : > { %2310 = vmatpush1.bf16.msra.mxu1 %v9886_v47  ;;  %v11568_v56 = vmul.f32 %v10002_v50, %v9596_v59  ;;  %v1088_v47 = vpop.xlane.xlu1 %1087  ;;  %v10020_v33 = vpop.eup %10019 }
 0x89e   : > { %v1555_v5 = vpop.f32.mrf.mxu0  ;;  %2311 = vmatprep.subr.bf16.mxu1 %v9891_v57  ;;  %v1085_v57 = vpop.xlane.xlu0 %1084  ;;  %10023 = vrcp.f32 %v1088_v47 }
 0x89f   : > { %8519 = vmatmul.mubr.msk.bf16.gmra.mxu1 %vm505_vm0, %v11535_v61  ;;  %8535 = vmatmul.mubr.msk.bf16.gmra.mxu0 %vm505_vm0, %v11535_v61  ;;  %v11552_v7 = vmul.f32 %v9996_v11, %v1555_v5  ;;  %15928 = vst [vmem:[#allocation9_spill] sm:$0xff] %v11568_v56  ;;  %10025 = vrcp.f32 %v1085_v57 }
 0x8a0   : > { %v9597_v6 = vpop.f32.mrf.mxu0  ;;  %1965 = vmatprep.mubr.bf16.mxu1 %v15717_v20  ;;  %2158 = vmatprep.mubr.bf16.mxu0 %v15717_v20 }
 0x8a1   : > { %2312 = vmatpush1.bf16.msra.mxu1 %v9889_v60  ;;  %15925 = vst [vmem:[#allocation6_spill] sm:$0xff] %v11552_v7  ;;  %v11566_v14 = vmul.f32 %v10000_v42, %v9597_v6  ;;  %v1094_v6 = vpop.xlane.xlu1 %1093 }
 0x8a2   : > { %v1558_v4 = vpop.f32.mrf.mxu0  ;;  %2313 = vmatprep.subr.bf16.mxu1 %v9894_v63  ;;  %10027 = vrcp.f32 %v1094_v6 }
 0x8a3   : > { %v11554_v48 = vmul.f32 %v9998_v10, %v1558_v4  ;;  %15927 = vst [vmem:[#allocation8_spill] sm:$0xff] %v11566_v14  ;;  %v11572_v43 = vpack.c.bf16 %v11566_v14, %v11568_v56  ;;  %v1091_v10 = vpop.xlane.xlu0 %1090 }
 0x8a4   : > { %10029 = vrcp.f32 %v1091_v10 }
 0x8a5   : > { %15926 = vst [vmem:[#allocation7_spill] sm:$0xff] %v11554_v48  ;;  %v11558_v34 = vpack.c.bf16 %v11554_v48, %v11552_v7  ;;  %2314 = vmatpush1.bf16.msra.mxu1 %v9892_v62  ;;  %v10022_v62 = vpop.eup %10021  ;;  %v1100_v50 = vpop.xlane.xlu1 %1099 }
 0x8a6   : > { %10031 = vrcp.f32 %v1100_v50 }
 0x8a7   : > { %8520 = vmatmul.mubr.msk.bf16.gmra.mxu1 %vm505_vm0, %v11558_v34  ;;  %8536 = vmatmul.mubr.msk.bf16.gmra.mxu0 %vm505_vm0, %v11558_v34 }
 0x8a8   : > { %v9600_v37 = vpop.f32.mrf.mxu0  ;;  %1975 = vmatprep.mubr.bf16.mxu1 %v15717_v20  ;;  %2168 = vmatprep.mubr.bf16.mxu0 %v15717_v20 }
 0x8a9   : > { %v11596_v53 = vmul.f32 %v10010_v31, %v9600_v37 }
 0x8aa   : > { %v1571_v49 = vpop.f32.mrf.mxu0 }
 0x8ab   : > { %v11582_v27 = vmul.f32 %v10006_v18, %v1571_v49  ;;  %15932 = vst [vmem:[#allocation13_spill] sm:$0xff] %v11596_v53  ;;  %v10024_v37 = vpop.eup %10023 }
 0x8ac   : > { %v9601_v32 = vpop.f32.mrf.mxu0  ;;  %v10026_v49 = vpop.eup %10025 }
 0x8ad   : > { %15930 = vst [vmem:[#allocation11_spill] sm:$0xff] %v11582_v27  ;;  %v11594_v39 = vmul.f32 %v10008_v24, %v9601_v32  ;;  %v1097_v32 = vpop.xlane.xlu0 %1096  ;;  %v1106_v24 = vpop.xlane.xlu1 %1105 }
 0x8ae   : > { %v1574_v23 = vpop.f32.mrf.mxu0  ;;  %10033 = vrcp.f32 %v1097_v32 }
 0x8af   : > { %8521 = vmatmul.mubr.msk.bf16.gmra.mxu1 %vm505_vm0, %v11572_v43  ;;  %8537 = vmatmul.mubr.msk.bf16.gmra.mxu0 %vm505_vm0, %v11572_v43  ;;  %v11580_v22 = vmul.f32 %v10004_v1, %v1574_v23  ;;  %15931 = vst [vmem:[#allocation12_spill] sm:$0xff] %v11594_v39  ;;  %v11600_v21 = vpack.c.bf16 %v11594_v39, %v11596_v53  ;;  %v10028_v8 = vpop.eup %10027  ;;  %10035 = vrcp.f32 %v1106_v24 }
 0x8b0   : > { %1985 = vmatprep.mubr.bf16.mxu1 %v15717_v20  ;;  %2178 = vmatprep.mubr.bf16.mxu0 %v15717_v20 }
 0x8b1   : > { %15929 = vst [vmem:[#allocation10_spill] sm:$0xff] %v11580_v22  ;;  %v11586_v44 = vpack.c.bf16 %v11580_v22, %v11582_v27  ;;  %v1103_v31 = vpop.xlane.xlu0 %1102  ;;  %v1112_v40 = vpop.xlane.xlu1 %1111 }
 0x8b2   : > { %10037 = vrcp.f32 %v1103_v31 }
 0x8b3   : > { %10039 = vrcp.f32 %v1112_v40 }
 0x8b7   : > { %8522 = vmatmul.mubr.msk.bf16.gmra.mxu1 %vm505_vm0, %v11586_v44  ;;  %8538 = vmatmul.mubr.msk.bf16.gmra.mxu0 %vm505_vm0, %v11586_v44 }
 0x8b8   : > { %v9604_v16 = vpop.f32.mrf.mxu0  ;;  %1995 = vmatprep.mubr.bf16.mxu1 %v15717_v20  ;;  %2188 = vmatprep.mubr.bf16.mxu0 %v15717_v20 }
 0x8b9   : > { %v11624_v60 = vmul.f32 %v10018_v54, %v9604_v16  ;;  %v10030_v16 = vpop.eup %10029 }
 0x8ba   : > { %v1587_v51 = vpop.f32.mrf.mxu0 }
 0x8bb   : > { %v11610_v41 = vmul.f32 %v10014_v30, %v1587_v51  ;;  %15936 = vst [vmem:[#allocation17_spill] sm:$0xff] %v11624_v60 }
 0x8bc   : > { %v9605_v45 = vpop.f32.mrf.mxu0 }
 0x8bd   : > { %15934 = vst [vmem:[#allocation15_spill] sm:$0xff] %v11610_v41  ;;  %v11622_v9 = vmul.f32 %v10016_v58, %v9605_v45 }
 0x8be   : > { %v1590_v36 = vpop.f32.mrf.mxu0 }
 0x8bf   : > { %8523 = vmatmul.mubr.msk.bf16.gmra.mxu1 %vm505_vm0, %v11600_v21  ;;  %8539 = vmatmul.mubr.msk.bf16.gmra.mxu0 %vm505_vm0, %v11600_v21  ;;  %v11608_v52 = vmul.f32 %v10012_v38, %v1590_v36  ;;  %15935 = vst [vmem:[#allocation16_spill] sm:$0xff] %v11622_v9  ;;  %v11628_v5 = vpack.c.bf16 %v11622_v9, %v11624_v60  ;;  %v10032_v38 = vpop.eup %10031 }
 0x8c0   : > { %2005 = vmatprep.mubr.bf16.mxu1 %v15717_v20  ;;  %2198 = vmatprep.mubr.bf16.mxu0 %v15717_v20  ;;  %v9608_v3 = vpop.f32.mrf.mxu0  ;;  %v10034_v0 = vpop.eup %10033 }
 0x8c1   : > { %15933 = vst [vmem:[#allocation14_spill] sm:$0xff] %v11608_v52  ;;  %v11614_v19 = vpack.c.bf16 %v11608_v52, %v11610_v41  ;;  %v11652_v1 = vmul.f32 %v10026_v49, %v9608_v3  ;;  %v1109_v3 = vpop.xlane.xlu0 %1108  ;;  %v10036_v57 = vpop.eup %10035 }
 0x8c2   : > { %v1603_v46 = vpop.f32.mrf.mxu0  ;;  %10041 = vrcp.f32 %v1109_v3 }
 0x8c3   : > { %v11638_v4 = vmul.f32 %v10022_v62, %v1603_v46  ;;  %15940 = vst [vmem:[#allocation21_spill] sm:$0xff] %v11652_v1 }
 0x8c4   : > { %v9609_v59 = vpop.f32.mrf.mxu0 }
 0x8c5   : > { %15938 = vst [vmem:[#allocation19_spill] sm:$0xff] %v11638_v4  ;;  %v11650_v12 = vmul.f32 %v10024_v37, %v9609_v59  ;;  %v1118_v59 = vpop.xlane.xlu1 %1117  ;;  %v1115_v6 = vpop.xlane.xlu0 %1114 }
 0x8c6   : > { %v1606_v63 = vpop.f32.mrf.mxu0  ;;  %10043 = vrcp.f32 %v1118_v59 }
 0x8c7   : > { %8524 = vmatmul.mubr.msk.bf16.gmra.mxu1 %vm505_vm0, %v11614_v19  ;;  %8540 = vmatmul.mubr.msk.bf16.gmra.mxu0 %vm505_vm0, %v11614_v19  ;;  %v11636_v11 = vmul.f32 %v10020_v33, %v1606_v63  ;;  %15939 = vst [vmem:[#allocation20_spill] sm:$0xff] %v11650_v12  ;;  %v11656_v25 = vpack.c.bf16 %v11650_v12, %v11652_v1  ;;  %v10038_v33 = vpop.eup %10037  ;;  %10045 = vrcp.f32 %v1115_v6 }
 0x8c8   : > { %2015 = vmatprep.mubr.bf16.mxu1 %v15717_v20  ;;  %2208 = vmatprep.mubr.bf16.mxu0 %v15717_v20  ;;  %v9612_v17 = vpop.f32.mrf.mxu0  ;;  %v10040_v37 = vpop.eup %10039 }
 0x8c9   : > { %15937 = vst [vmem:[#allocation18_spill] sm:$0xff] %v11636_v11  ;;  %v11642_v42 = vpack.c.bf16 %v11636_v11, %v11638_v4  ;;  %v11680_v58 = vmul.f32 %v10034_v0, %v9612_v17  ;;  %v1124_v50 = vpop.xlane.xlu1 %1123 }
 0x8ca   : > { %v1619_v15 = vpop.f32.mrf.mxu0  ;;  %10047 = vrcp.f32 %v1124_v50 }
 0x8cb   : > { %v11666_v51 = vmul.f32 %v10030_v16, %v1619_v15  ;;  %15944 = vst [vmem:[#allocation25_spill] sm:$0xff] %v11680_v58 }
 0x8cc   : > { %v9613_v23 = vpop.f32.mrf.mxu0 }
 0x8cd   : > { %15942 = vst [vmem:[#allocation23_spill] sm:$0xff] %v11666_v51  ;;  %v11678_v30 = vmul.f32 %v10032_v38, %v9613_v23  ;;  %v1121_v23 = vpop.xlane.xlu0 %1120 }
 0x8ce   : > { %v1622_v18 = vpop.f32.mrf.mxu0  ;;  %10049 = vrcp.f32 %v1121_v23 }
 0x8cf   : > { %8525 = vmatmul.mubr.msk.bf16.gmra.mxu1 %vm505_vm0, %v11628_v5  ;;  %8541 = vmatmul.mubr.msk.bf16.gmra.mxu0 %vm505_vm0, %v11628_v5  ;;  %v11664_v26 = vmul.f32 %v10028_v8, %v1622_v18  ;;  %15943 = vst [vmem:[#allocation24_spill] sm:$0xff] %v11678_v30  ;;  %v11684_v47 = vpack.c.bf16 %v11678_v30, %v11680_v58  ;;  %v10042_v32 = vpop.eup %10041 }
 0x8d0   : > { %2025 = vmatprep.mubr.bf16.mxu1 %v15717_v20  ;;  %2218 = vmatprep.mubr.bf16.mxu0 %v15717_v20  ;;  %v9616_v29 = vpop.f32.mrf.mxu0 }
 0x8d1   : > { %15941 = vst [vmem:[#allocation22_spill] sm:$0xff] %v11664_v26  ;;  %v11670_v45 = vpack.c.bf16 %v11664_v26, %v11666_v51  ;;  %v11708_v8 = vmul.f32 %v10042_v32, %v9616_v29 }
 0x8d2   : > { %v1635_v36 = vpop.f32.mrf.mxu0 }
 0x8d3   : > { %v11694_v10 = vmul.f32 %v10038_v33, %v1635_v36  ;;  %15948 = vst [vmem:[#allocation29_spill] sm:$0xff] %v11708_v8  ;;  %v10044_v31 = vpop.eup %10043 }
 0x8d4   : > { %v9617_v46 = vpop.f32.mrf.mxu0  ;;  %v10046_v29 = vpop.eup %10045 }
 0x8d5   : > { %15946 = vst [vmem:[#allocation27_spill] sm:$0xff] %v11694_v10  ;;  %v11706_v49 = vmul.f32 %v10040_v37, %v9617_v46 }
 0x8d6   : > { %v1638_v54 = vpop.f32.mrf.mxu0 }
 0x8d7   : > { %8526 = vmatmul.mubr.msk.bf16.gmra.mxu1 %vm505_vm0, %v11642_v42  ;;  %8542 = vmatmul.mubr.msk.bf16.gmra.mxu0 %vm505_vm0, %v11642_v42  ;;  %v11692_v63 = vmul.f32 %v10036_v57, %v1638_v54  ;;  %15947 = vst [vmem:[#allocation28_spill] sm:$0xff] %v11706_v49  ;;  %v11712_v24 = vpack.c.bf16 %v11706_v49, %v11708_v8  ;;  %v10048_v0 = vpop.eup %10047 }
 0x8d8   : > { %2035 = vmatprep.mubr.bf16.mxu1 %v15717_v20  ;;  %2228 = vmatprep.mubr.bf16.mxu0 %v15717_v20  ;;  %v9620_v62 = vpop.f32.mrf.mxu0 }
 0x8d9   : > { %15945 = vst [vmem:[#allocation26_spill] sm:$0xff] %v11692_v63  ;;  %v11698_v17 = vpack.c.bf16 %v11692_v63, %v11694_v10 }
 0x8da   : > { %v1651_v15 = vpop.f32.mrf.mxu0 }
 0x8db   : > { %v11722_v38 = vmul.f32 %v10046_v29, %v1651_v15  ;;  %v10050_v46 = vpop.eup %10049 }
 0x8dc   : > { %v9621_v18 = vpop.f32.mrf.mxu0  ;;  %v11736_v54 = vmul.f32 %v10050_v46, %v9620_v62 }
 0x8dd   : > { %15950 = vst [vmem:[#allocation31_spill] sm:$0xff] %v11722_v38  ;;  %v11734_v3 = vmul.f32 %v10048_v0, %v9621_v18 }
 0x8de   : > { %v1654_v16 = vpop.f32.mrf.mxu0  ;;  %15952 = vst [vmem:[#allocation33_spill] sm:$0xff] %v11736_v54 }
 0x8df   : > { %8527 = vmatmul.mubr.msk.bf16.gmra.mxu1 %vm505_vm0, %v11656_v25  ;;  %8543 = vmatmul.mubr.msk.bf16.gmra.mxu0 %vm505_vm0, %v11656_v25  ;;  %v11720_v36 = vmul.f32 %v10044_v31, %v1654_v16  ;;  %15951 = vst [vmem:[#allocation32_spill] sm:$0xff] %v11734_v3  ;;  %v11740_v57 = vpack.c.bf16 %v11734_v3, %v11736_v54 }
 0x8e0   : > { %2045 = vmatprep.mubr.bf16.mxu1 %v15717_v20  ;;  %2238 = vmatprep.mubr.bf16.mxu0 %v15717_v20 }
 0x8e1   : > { %15949 = vst [vmem:[#allocation30_spill] sm:$0xff] %v11720_v36  ;;  %v11726_v40 = vpack.c.bf16 %v11720_v36, %v11722_v38 }
 0x8e7   : > { %8528 = vmatmul.mubr.msk.bf16.gmra.mxu1 %vm505_vm0, %v11670_v45  ;;  %8544 = vmatmul.mubr.msk.bf16.gmra.mxu0 %vm505_vm0, %v11670_v45 }
 0x8e8   : > { %2055 = vmatprep.mubr.bf16.mxu1 %v15717_v20  ;;  %2248 = vmatprep.mubr.bf16.mxu0 %v15717_v20 }
 0x8ef   : > { %8529 = vmatmul.mubr.msk.bf16.gmra.mxu1 %vm505_vm0, %v11684_v47  ;;  %8545 = vmatmul.mubr.msk.bf16.gmra.mxu0 %vm505_vm0, %v11684_v47 }
 0x8f0   : > { %2065 = vmatprep.mubr.bf16.mxu1 %v15717_v20  ;;  %2258 = vmatprep.mubr.bf16.mxu0 %v15717_v20 }
 0x8f7   : > { %8530 = vmatmul.mubr.msk.bf16.gmra.mxu1 %vm505_vm0, %v11698_v17  ;;  %8546 = vmatmul.mubr.msk.bf16.gmra.mxu0 %vm505_vm0, %v11698_v17 }
 0x8f8   : > { %2075 = vmatprep.mubr.bf16.mxu1 %v15717_v20  ;;  %2268 = vmatprep.mubr.bf16.mxu0 %v15717_v20 }
 0x8ff   : > { %8531 = vmatmul.mubr.msk.bf16.gmra.mxu1 %vm505_vm0, %v11712_v24  ;;  %8547 = vmatmul.mubr.msk.bf16.gmra.mxu0 %vm505_vm0, %v11712_v24 }
 0x900   : > { %2085 = vmatprep.mubr.bf16.mxu1 %v15717_v20  ;;  %2278 = vmatprep.mubr.bf16.mxu0 %v15717_v20 }
 0x907   : > { %8532 = vmatmul.mubr.msk.bf16.gmra.mxu1 %vm505_vm0, %v11726_v40  ;;  %8548 = vmatmul.mubr.msk.bf16.gmra.mxu0 %vm505_vm0, %v11726_v40 }
 0x908   : > { %2095 = vmatprep.mubr.bf16.mxu1 %v15717_v20  ;;  %2288 = vmatprep.mubr.bf16.mxu0 %v15717_v20 }
 0x90f   : > { %8533 = vmatmul.mubr.msk.bf16.gmra.mxu1 %vm505_vm0, %v11740_v57  ;;  %8549 = vmatmul.mubr.msk.bf16.gmra.mxu0 %vm505_vm0, %v11740_v57 }
 0x910   : > { %2331 = vmatprep.mubr.bf16.mxu1 %v15717_v20 }
 0x917   : > { %8550 = vmatmul.mubr.msk.bf16.vlgmr.msra.gmra.mxu1 %vm505_vm0, %v11509_v55  ;;  %v1715_v55 = vlaneseq }
 0x918   : > { %2341 = vmatprep.mubr.bf16.mxu1 %v15717_v20 }
 0x91f   : > { %8551 = vmatmul.mubr.msk.bf16.gmra.mxu1 %vm505_vm0, %v11535_v61  ;;  %v11771_v61 = vshrl.u32 %v1715_v55, 7 }
 0x920   : > { %2351 = vmatprep.mubr.bf16.mxu1 %v15717_v20 }
 0x921   : > { %15953 = vst [vmem:[#allocation34_spill] sm:$0xff] %v11771_v61 }
 0x927   : > { %8552 = vmatmul.mubr.msk.bf16.gmra.mxu1 %vm505_vm0, %v11558_v34  ;;  %v1717_v34 = vsub.s32 0, %v11771_v61 }
 0x928   : > { %2361 = vmatprep.mubr.bf16.mxu1 %v15717_v20 }
 0x92f   : > { %8553 = vmatmul.mubr.msk.bf16.gmra.mxu1 %vm505_vm0, %v11572_v43  ;;  %v1725_v43 = vsub.s32 2, %v11771_v61 }
 0x930   : > { %2371 = vmatprep.mubr.bf16.mxu1 %v15717_v20 }
 0x937   : > { %8554 = vmatmul.mubr.msk.bf16.gmra.mxu1 %vm505_vm0, %v11586_v44  ;;  %v11778_v44 = vld [vmem:[%s15714_s7] sm:$0x3f] }
 0x938   : > { %2381 = vmatprep.mubr.bf16.mxu1 %v15717_v20  ;;  %v11787_v33 = vrot.slane %v11778_v44, %v1725_v43 }
 0x93f   : > { %8555 = vmatmul.mubr.msk.bf16.gmra.mxu1 %vm505_vm0, %v11600_v21  ;;  %v1721_v21 = vsub.s32 1, %v11771_v61 }
 0x940   : > { %2391 = vmatprep.mubr.bf16.mxu1 %v15717_v20 }
 0x941   : > { %v11793_v15 = vrot.slane %v11778_v44, %v1721_v21 }
 0x943   : > { %15955 = vst [vmem:[#allocation36_spill] sm:$0xff] %v11793_v15 }
 0x947   : > { %8556 = vmatmul.mubr.msk.bf16.gmra.mxu1 %vm505_vm0, %v11614_v19 }
 0x948   : > { %2401 = vmatprep.mubr.bf16.mxu1 %v15717_v20 }
 0x94f   : > { %8557 = vmatmul.mubr.msk.bf16.gmra.mxu1 %vm505_vm0, %v11628_v5  ;;  %v11784_v5 = vrot.slane %v11778_v44, %v1717_v34 }
 0x950   : > { %2411 = vmatprep.mubr.bf16.mxu1 %v15717_v20 }
 0x957   : > { %v1947_v19 = vpop.f32.mrf.mxu1  ;;  %v2140_v59 = vpop.f32.mrf.mxu0  ;;  %8558 = vmatmul.mubr.msk.bf16.gmra.mxu1 %vm505_vm0, %v11642_v42 }
 0x958   : > { %2421 = vmatprep.mubr.bf16.mxu1 %v15717_v20  ;;  %v1948_v32 = vadd.f32 %v1947_v19, %v11784_v5  ;;  %v2141_v42 = vadd.f32 %v2140_v59, %v11787_v33 }
 0x959   : > { %v1949_v6 = vpop.f32.mrf.mxu1  ;;  %v11790_v62 = vpop.f32.mrf.mxu0 }
 0x95a   : > { %15954 = vst [vmem:[#allocation35_spill] sm:$0xff] %v11790_v62  ;;  %v1950_v29 = vadd.f32 %v1949_v6, %v11793_v15 }
 0x95b   : > { %v1951_v37 = vpop.f32.mrf.mxu1  ;;  %v2144_v50 = vpop.f32.mrf.mxu0 }
 0x95c   : > { %v1952_v23 = vadd.f32 %v1951_v37, %v11784_v5  ;;  %v2145_v18 = vadd.f32 %v2144_v50, %v11787_v33 }
 0x95d   : > { %v1953_v16 = vpop.f32.mrf.mxu1  ;;  %v11799_v31 = vpop.f32.mrf.mxu0 }
 0x95e   : > { %15956 = vst [vmem:[#allocation37_spill] sm:$0xff] %v11799_v31  ;;  %v11802_v0 = vpack.c.bf16 %v1952_v23, %v1948_v32  ;;  %v11804_v46 = vpack.c.bf16 %v2145_v18, %v2141_v42  ;;  %v1954_v55 = vadd.f32 %v1953_v16, %v11793_v15 }
 0x95f   : > { %v1957_v34 = vpop.f32.mrf.mxu1  ;;  %v2150_v43 = vpop.f32.mrf.mxu0  ;;  %8559 = vmatmul.mubr.msk.bf16.gmra.mxu1 %vm505_vm0, %v11656_v25 }
 0x960   : > { %15957 = vst [vmem:[#allocation38_spill] sm:$0xff] %v11802_v0  ;;  %15958 = vst [vmem:[#allocation39_spill] sm:$0xff] %v11804_v46  ;;  %v11809_v21 = vpack.c.bf16 %v1954_v55, %v1950_v29  ;;  %8808 = vmatprep.mubr.msk.bf16.mxu0 %vm505_vm0, %v11802_v0  ;;  %2431 = vmatprep.mubr.bf16.mxu1 %v15717_v20  ;;  %v1958_v50 = vadd.f32 %v1957_v34, %v11784_v5 }
 0x961   : > { %v1959_v19 = vpop.f32.mrf.mxu1  ;;  %v11813_v59 = vpop.f32.mrf.mxu0  ;;  %v2151_v32 = vadd.f32 %v2150_v43, %v11787_v33  ;;  %v15964_v43 = vmov 0  }
 0x962   : > { %15959 = vst [vmem:[#allocation40_spill] sm:$0xff] %v11809_v21  ;;  %15960 = vst [vmem:[#allocation41_spill] sm:$0xff] %v11813_v59  ;;  %v1960_v16 = vadd.f32 %v1959_v19, %v11793_v15 }
 0x963   : > { %v1961_v6 = vpop.f32.mrf.mxu1  ;;  %v2154_v37 = vpop.f32.mrf.mxu0 }
 0x964   : > { %v1962_v42 = vadd.f32 %v1961_v6, %v11784_v5  ;;  %v2155_v25 = vadd.f32 %v2154_v37, %v11787_v33 }
 0x965   : > { %v1963_v23 = vpop.f32.mrf.mxu1  ;;  %v11820_v18 = vpop.f32.mrf.mxu0 }
 0x966   : > { %15961 = vst [vmem:[#allocation42_spill] sm:$0xff] %v11820_v18  ;;  %v11823_v29 = vpack.c.bf16 %v1962_v42, %v1958_v50  ;;  %v11825_v55 = vpack.c.bf16 %v2155_v25, %v2151_v32  ;;  %v1964_v20 = vadd.f32 %v1963_v23, %v11793_v15 }
 0x967   : > { %v1967_v36 = vpop.f32.mrf.mxu1  ;;  %v2160_v3 = vpop.f32.mrf.mxu0  ;;  %8560 = vmatmul.mubr.msk.bf16.gmra.mxu1 %vm505_vm0, %v11670_v45 }
 0x968   : > { %15962 = vst [vmem:[#allocation43_spill] sm:$0xff] %v11823_v29  ;;  %v11830_v34 = vpack.c.bf16 %v1964_v20, %v1960_v16  ;;  %2441 = vmatprep.mubr.bf16.mxu1 %v15964_v43  ;;  %v1968_v50 = vadd.f32 %v1967_v36, %v11784_v5  ;;  %v2161_v32 = vadd.f32 %v2160_v3, %v11787_v33 }
 0x969   : > { %v1969_v6 = vpop.f32.mrf.mxu1  ;;  %v11833_v37 = vpop.f32.mrf.mxu0 }
 0x96a   : > { %15963 = vst [vmem:[#allocation44_spill] sm:$0xff] %v11830_v34  ;;  %15965 = vst [vmem:[#allocation45_spill] sm:$0xff] %v11833_v37  ;;  %v1970_v20 = vadd.f32 %v1969_v6, %v11793_v15 }
 0x96b   : > { %v1971_v38 = vpop.f32.mrf.mxu1  ;;  %v2164_v19 = vpop.f32.mrf.mxu0 }
 0x96c   : > { %v1972_v42 = vadd.f32 %v1971_v38, %v11784_v5  ;;  %v2165_v25 = vadd.f32 %v2164_v19, %v11787_v33 }
 0x96d   : > { %v1973_v23 = vpop.f32.mrf.mxu1  ;;  %v11839_v54 = vpop.f32.mrf.mxu0 }
 0x96e   : > { %15966 = vst [vmem:[#allocation46_spill] sm:$0xff] %v11839_v54  ;;  %v11842_v45 = vpack.c.bf16 %v1972_v42, %v1968_v50  ;;  %v11844_v16 = vpack.c.bf16 %v2165_v25, %v2161_v32  ;;  %v1974_v63 = vadd.f32 %v1973_v23, %v11793_v15 }
 0x96f   : > { %v1977_v49 = vpop.f32.mrf.mxu1  ;;  %v2170_v10 = vpop.f32.mrf.mxu0  ;;  %8561 = vmatmul.mubr.msk.bf16.gmra.mxu1 %vm505_vm0, %v11684_v47 }
 0x970   : > { %15967 = vst [vmem:[#allocation47_spill] sm:$0xff] %v11842_v45  ;;  %v11849_v36 = vpack.c.bf16 %v1974_v63, %v1970_v20  ;;  %2451 = vmatprep.mubr.bf16.mxu1 %v15964_v43  ;;  %v1978_v50 = vadd.f32 %v1977_v49, %v11784_v5  ;;  %v2171_v32 = vadd.f32 %v2170_v10, %v11787_v33 }
 0x971   : > { %v1979_v38 = vpop.f32.mrf.mxu1  ;;  %v11852_v3 = vpop.f32.mrf.mxu0 }
 0x972   : > { %15968 = vst [vmem:[#allocation48_spill] sm:$0xff] %v11849_v36  ;;  %15969 = vst [vmem:[#allocation49_spill] sm:$0xff] %v11852_v3  ;;  %v1980_v47 = vadd.f32 %v1979_v38, %v11793_v15 }
 0x973   : > { %v1981_v19 = vpop.f32.mrf.mxu1  ;;  %v2174_v6 = vpop.f32.mrf.mxu0 }
 0x974   : > { %v1982_v42 = vadd.f32 %v1981_v19, %v11784_v5  ;;  %v2175_v25 = vadd.f32 %v2174_v6, %v11787_v33 }
 0x975   : > { %v1983_v23 = vpop.f32.mrf.mxu1  ;;  %v11858_v8 = vpop.f32.mrf.mxu0 }
 0x976   : > { %15970 = vst [vmem:[#allocation50_spill] sm:$0xff] %v11858_v8  ;;  %v11861_v63 = vpack.c.bf16 %v1982_v42, %v1978_v50  ;;  %v11863_v20 = vpack.c.bf16 %v2175_v25, %v2171_v32  ;;  %v1984_v26 = vadd.f32 %v1983_v23, %v11793_v15 }
 0x977   : > { %v1987_v30 = vpop.f32.mrf.mxu1  ;;  %v2180_v51 = vpop.f32.mrf.mxu0  ;;  %8562 = vmatmul.mubr.msk.bf16.gmra.mxu1 %vm505_vm0, %v11698_v17 }
 0x978   : > { %15971 = vst [vmem:[#allocation51_spill] sm:$0xff] %v11861_v63  ;;  %v11868_v10 = vpack.c.bf16 %v1984_v26, %v1980_v47  ;;  %2461 = vmatprep.mubr.bf16.mxu1 %v15964_v43  ;;  %v1988_v50 = vadd.f32 %v1987_v30, %v11784_v5  ;;  %v2181_v32 = vadd.f32 %v2180_v51, %v11787_v33 }
 0x979   : > { %v11871_v49 = vpop.f32.mrf.mxu1  ;;  %v11873_v19 = vpop.f32.mrf.mxu0 }
 0x97a   : > { %15972 = vst [vmem:[#allocation52_spill] sm:$0xff] %v11868_v10  ;;  %15973 = vst [vmem:[#allocation53_spill] sm:$0xff] %v11871_v49 }
 0x97b   : > { %15974 = vst [vmem:[#allocation54_spill] sm:$0xff] %v11873_v19  ;;  %v1991_v38 = vpop.f32.mrf.mxu1  ;;  %v2184_v6 = vpop.f32.mrf.mxu0 }
 0x97c   : > { %v1992_v42 = vadd.f32 %v1991_v38, %v11784_v5  ;;  %v2185_v25 = vadd.f32 %v2184_v6, %v11787_v33 }
 0x97d   : > { %v11879_v23 = vpop.f32.mrf.mxu1  ;;  %v11881_v26 = vpop.f32.mrf.mxu0 }
 0x97e   : > { %15975 = vst [vmem:[#allocation55_spill] sm:$0xff] %v11879_v23  ;;  %15976 = vst [vmem:[#allocation56_spill] sm:$0xff] %v11881_v26  ;;  %v11883_v17 = vpack.c.bf16 %v1992_v42, %v1988_v50  ;;  %v11885_v47 = vpack.c.bf16 %v2185_v25, %v2181_v32 }
 0x97f   : > { %v1997_v58 = vpop.f32.mrf.mxu1  ;;  %v2190_v11 = vpop.f32.mrf.mxu0  ;;  %8563 = vmatmul.mubr.msk.bf16.gmra.mxu1 %vm505_vm0, %v11712_v24 }
 0x980   : > { %15977 = vst [vmem:[#allocation57_spill] sm:$0xff] %v11883_v17  ;;  %2471 = vmatprep.mubr.bf16.mxu1 %v15964_v43  ;;  %v1998_v12 = vadd.f32 %v1997_v58, %v11784_v5  ;;  %v2191_v50 = vadd.f32 %v2190_v11, %v11787_v33 }
 0x981   : > { %v11890_v51 = vpop.f32.mrf.mxu1  ;;  %v11892_v30 = vpop.f32.mrf.mxu0 }
 0x982   : > { %15978 = vst [vmem:[#allocation58_spill] sm:$0xff] %v11890_v51  ;;  %15979 = vst [vmem:[#allocation59_spill] sm:$0xff] %v11892_v30 }
 0x983   : > { %v2001_v38 = vpop.f32.mrf.mxu1  ;;  %v2194_v6 = vpop.f32.mrf.mxu0 }
 0x984   : > { %v2002_v32 = vadd.f32 %v2001_v38, %v11784_v5  ;;  %v2195_v42 = vadd.f32 %v2194_v6, %v11787_v33 }
 0x985   : > { %v11898_v25 = vpop.f32.mrf.mxu1  ;;  %v11900_v4 = vpop.f32.mrf.mxu0 }
 0x986   : > { %15980 = vst [vmem:[#allocation60_spill] sm:$0xff] %v11898_v25  ;;  %15981 = vst [vmem:[#allocation61_spill] sm:$0xff] %v11900_v4  ;;  %v11902_v24 = vpack.c.bf16 %v2002_v32, %v1998_v12  ;;  %v11904_v1 = vpack.c.bf16 %v2195_v42, %v2191_v50 }
 0x987   : > { %v2007_v9 = vpop.f32.mrf.mxu1  ;;  %v2200_v52 = vpop.f32.mrf.mxu0  ;;  %8564 = vmatmul.mubr.msk.bf16.gmra.mxu1 %vm505_vm0, %v11726_v40 }
 0x988   : > { %15982 = vst [vmem:[#allocation62_spill] sm:$0xff] %v11902_v24  ;;  %2481 = vmatprep.mubr.bf16.mxu1 %v15964_v43  ;;  %v2008_v41 = vadd.f32 %v2007_v9, %v11784_v5  ;;  %v2201_v12 = vadd.f32 %v2200_v52, %v11787_v33 }
 0x989   : > { %v11909_v11 = vpop.f32.mrf.mxu1  ;;  %v11911_v58 = vpop.f32.mrf.mxu0 }
 0x98a   : > { %15983 = vst [vmem:[#allocation63_spill] sm:$0xff] %v11909_v11  ;;  %15984 = vst [vmem:[#allocation64_spill] sm:$0xff] %v11911_v58 }
 0x98b   : > { %v2011_v38 = vpop.f32.mrf.mxu1  ;;  %v2204_v6 = vpop.f32.mrf.mxu0 }
 0x98c   : > { %v2012_v50 = vadd.f32 %v2011_v38, %v11784_v5  ;;  %v2205_v32 = vadd.f32 %v2204_v6, %v11787_v33 }
 0x98d   : > { %v11917_v42 = vpop.f32.mrf.mxu1  ;;  %v11919_v60 = vpop.f32.mrf.mxu0 }
 0x98e   : > { %15985 = vst [vmem:[#allocation65_spill] sm:$0xff] %v11917_v42  ;;  %15986 = vst [vmem:[#allocation66_spill] sm:$0xff] %v11919_v60  ;;  %v11921_v40 = vpack.c.bf16 %v2012_v50, %v2008_v41  ;;  %v11923_v43 = vpack.c.bf16 %v2205_v32, %v2201_v12 }
 0x98f   : > { %v2017_v22 = vpop.f32.mrf.mxu1  ;;  %v2210_v39 = vpop.f32.mrf.mxu0  ;;  %8565 = vmatmul.mubr.msk.bf16.gmra.mxu1 %vm505_vm0, %v11740_v57 }
 0x990   : > { %15987 = vst [vmem:[#allocation67_spill] sm:$0xff] %v11921_v40  ;;  %v2018_v6 = vadd.f32 %v2017_v22, %v11784_v5  ;;  %v2211_v53 = vadd.f32 %v2210_v39, %v11787_v33 }
 0x991   : > { %v11927_v9 = vpop.f32.mrf.mxu1  ;;  %v11929_v52 = vpop.f32.mrf.mxu0 }
 0x992   : > { %15988 = vst [vmem:[#allocation68_spill] sm:$0xff] %v11927_v9  ;;  %15989 = vst [vmem:[#allocation69_spill] sm:$0xff] %v11929_v52 }
 0x993   : > { %v2021_v38 = vpop.f32.mrf.mxu1  ;;  %v2214_v27 = vpop.f32.mrf.mxu0 }
 0x994   : > { %v2022_v41 = vadd.f32 %v2021_v38, %v11784_v5  ;;  %v2215_v12 = vadd.f32 %v2214_v27, %v11787_v33 }
 0x995   : > { %v11935_v50 = vpop.f32.mrf.mxu1  ;;  %v11937_v32 = vpop.f32.mrf.mxu0 }
 0x996   : > { %15990 = vst [vmem:[#allocation70_spill] sm:$0xff] %v11935_v50  ;;  %15991 = vst [vmem:[#allocation71_spill] sm:$0xff] %v11937_v32  ;;  %v11939_v48 = vpack.c.bf16 %v2022_v41, %v2018_v6  ;;  %v11941_v57 = vpack.c.bf16 %v2215_v12, %v2211_v53 }
 0x997   : > { %v2027_v14 = vpop.f32.mrf.mxu1  ;;  %v2220_v7 = vpop.f32.mrf.mxu0 }
 0x998   : > { %15992 = vst [vmem:[#allocation72_spill] sm:$0xff] %v11939_v48  ;;  %v2028_v38 = vadd.f32 %v2027_v14, %v11784_v5  ;;  %v2221_v27 = vadd.f32 %v2220_v7, %v11787_v33 }
 0x999   : > { %v11943_v56 = vpop.f32.mrf.mxu1  ;;  %v11945_v28 = vpop.f32.mrf.mxu0 }
 0x99a   : > { %15993 = vst [vmem:[#allocation73_spill] sm:$0xff] %v11943_v56  ;;  %15994 = vst [vmem:[#allocation74_spill] sm:$0xff] %v11945_v28 }
 0x99b   : > { %v2031_v22 = vpop.f32.mrf.mxu1  ;;  %v2224_v39 = vpop.f32.mrf.mxu0 }
 0x99c   : > { %v2032_v13 = vadd.f32 %v2031_v22, %v11784_v5  ;;  %v2225_v2 = vadd.f32 %v2224_v39, %v11787_v33 }
 0x99d   : > { %v11951_v6 = vpop.f32.mrf.mxu1  ;;  %v11953_v53 = vpop.f32.mrf.mxu0 }
 0x99e   : > { %15995 = vst [vmem:[#allocation75_spill] sm:$0xff] %v11951_v6  ;;  %15996 = vst [vmem:[#allocation76_spill] sm:$0xff] %v11953_v53  ;;  %v11955_v41 = vpack.c.bf16 %v2032_v13, %v2028_v38  ;;  %v11957_v12 = vpack.c.bf16 %v2225_v2, %v2221_v27 }
 0x99f   : > { %v2037_v35 = vpop.f32.mrf.mxu1  ;;  %v2230_v56 = vpop.f32.mrf.mxu0 }
 0x9a0   : > { %15997 = vst [vmem:[#allocation77_spill] sm:$0xff] %v11955_v41  ;;  %15998 = vst [vmem:[#allocation78_spill] sm:$0xff] %v11957_v12  ;;  %v2038_v22 = vadd.f32 %v2037_v35, %v11784_v5  ;;  %v2231_v39 = vadd.f32 %v2230_v56, %v11787_v33 }
 0x9a1   : > { %v11959_v9 = vpop.f32.mrf.mxu1  ;;  %v11961_v50 = vpop.f32.mrf.mxu0 }
 0x9a2   : > { %15999 = vst [vmem:[#allocation79_spill] sm:$0xff] %v11959_v9  ;;  %16000 = vst [vmem:[#allocation80_spill] sm:$0xff] %v11961_v50 }
 0x9a3   : > { %v2041_v14 = vpop.f32.mrf.mxu1  ;;  %v2234_v7 = vpop.f32.mrf.mxu0 }
 0x9a4   : > { %v2042_v6 = vadd.f32 %v2041_v14, %v11784_v5  ;;  %v2235_v11 = vadd.f32 %v2234_v7, %v11787_v33 }
 0x9a5   : > { %v11967_v13 = vpop.f32.mrf.mxu1  ;;  %v11969_v2 = vpop.f32.mrf.mxu0 }
 0x9a6   : > { %16001 = vst [vmem:[#allocation81_spill] sm:$0xff] %v11967_v13  ;;  %16002 = vst [vmem:[#allocation82_spill] sm:$0xff] %v11969_v2  ;;  %v11971_v38 = vpack.c.bf16 %v2042_v6, %v2038_v22  ;;  %v11973_v27 = vpack.c.bf16 %v2235_v11, %v2231_v39 }
 0x9a7   : > { %v2047_v9 = vpop.f32.mrf.mxu1  ;;  %v2240_v42 = vpop.f32.mrf.mxu0 }
 0x9a8   : > { %16003 = vst [vmem:[#allocation83_spill] sm:$0xff] %v11971_v38  ;;  %v2048_v14 = vadd.f32 %v2047_v9, %v11784_v5  ;;  %v2241_v7 = vadd.f32 %v2240_v42, %v11787_v33 }
 0x9a9   : > { %v11975_v51 = vpop.f32.mrf.mxu1  ;;  %v11977_v25 = vpop.f32.mrf.mxu0 }
 0x9aa   : > { %16004 = vst [vmem:[#allocation84_spill] sm:$0xff] %v11975_v51  ;;  %16005 = vst [vmem:[#allocation85_spill] sm:$0xff] %v11977_v25 }
 0x9ab   : > { %v2051_v35 = vpop.f32.mrf.mxu1  ;;  %v2244_v56 = vpop.f32.mrf.mxu0 }
 0x9ac   : > { %v2052_v13 = vadd.f32 %v2051_v35, %v11784_v5  ;;  %v2245_v49 = vadd.f32 %v2244_v56, %v11787_v33 }
 0x9ad   : > { %v11983_v6 = vpop.f32.mrf.mxu1  ;;  %v11985_v11 = vpop.f32.mrf.mxu0 }
 0x9ae   : > { %16006 = vst [vmem:[#allocation86_spill] sm:$0xff] %v11983_v6  ;;  %16007 = vst [vmem:[#allocation87_spill] sm:$0xff] %v11985_v11  ;;  %v11987_v22 = vpack.c.bf16 %v2052_v13, %v2048_v14  ;;  %v11989_v39 = vpack.c.bf16 %v2245_v49, %v2241_v7 }
 0x9af   : > { %v2057_v51 = vpop.f32.mrf.mxu1  ;;  %v11991_v23 = vpop.f32.mrf.mxu0 }
 0x9b0   : > { %16008 = vst [vmem:[#allocation88_spill] sm:$0xff] %v11987_v22  ;;  %v2058_v35 = vadd.f32 %v2057_v51, %v11784_v5 }
 0x9b1   : > { %v11993_v15 = vpop.f32.mrf.mxu1  ;;  %v11995_v9 = vpop.f32.mrf.mxu0 }
 0x9b2   : > { %16009 = vst [vmem:[#allocation89_spill] sm:$0xff] %v11993_v15  ;;  %16010 = vst [vmem:[#allocation90_spill] sm:$0xff] %v11995_v9 }
 0x9b3   : > { %v2061_v42 = vpop.f32.mrf.mxu1  ;;  %v11997_v10 = vpop.f32.mrf.mxu0 }
 0x9b4   : > { %v2062_v56 = vadd.f32 %v2061_v42, %v11784_v5 }
 0x9b5   : > { %v12001_v6 = vpop.f32.mrf.mxu1  ;;  %v12003_v13 = vpop.f32.mrf.mxu0 }
 0x9b6   : > { %16011 = vst [vmem:[#allocation91_spill] sm:$0xff] %v12001_v6  ;;  %16012 = vst [vmem:[#allocation92_spill] sm:$0xff] %v12003_v13  ;;  %v12005_v49 = vpack.c.bf16 %v2062_v56, %v2058_v35 }
 0x9b7   : > { %v2067_v14 = vpop.f32.mrf.mxu1  ;;  %v12007_v7 = vpop.f32.mrf.mxu0 }
 0x9b8   : > { %16013 = vst [vmem:[#allocation93_spill] sm:$0xff] %v12005_v49  ;;  %v2068_v51 = vadd.f32 %v2067_v14, %v11784_v5 }
 0x9b9   : > { %v12009_v36 = vpop.f32.mrf.mxu1  ;;  %v12011_v15 = vpop.f32.mrf.mxu0 }
 0x9ba   : > { %16014 = vst [vmem:[#allocation94_spill] sm:$0xff] %v12009_v36  ;;  %16015 = vst [vmem:[#allocation95_spill] sm:$0xff] %v12011_v15 }
 0x9bb   : > { %v2071_v34 = vpop.f32.mrf.mxu1  ;;  %v12013_v21 = vpop.f32.mrf.mxu0 }
 0x9bc   : > { %v2072_v42 = vadd.f32 %v2071_v34, %v11784_v5 }
 0x9bd   : > { %v12017_v62 = vpop.f32.mrf.mxu1  ;;  %v12019_v6 = vpop.f32.mrf.mxu0 }
 0x9be   : > { %16016 = vst [vmem:[#allocation96_spill] sm:$0xff] %v12017_v62  ;;  %16017 = vst [vmem:[#allocation97_spill] sm:$0xff] %v12019_v6  ;;  %v12021_v35 = vpack.c.bf16 %v2072_v42, %v2068_v51 }
 0x9bf   : > { %v2077_v56 = vpop.f32.mrf.mxu1  ;;  %v2270_v31 = vpop.f32.mrf.mxu0 }
 0x9c0   : > { %16018 = vst [vmem:[#allocation98_spill] sm:$0xff] %v12021_v35  ;;  %v2078_v18 = vadd.f32 %v2077_v56, %v11784_v5 }
 0x9c1   : > { %v12023_v28 = vpop.f32.mrf.mxu1  ;;  %v12025_v36 = vpop.f32.mrf.mxu0 }
 0x9c2   : > { %16019 = vst [vmem:[#allocation99_spill] sm:$0xff] %v12023_v28  ;;  %16020 = vst [vmem:[#allocation100_spill] sm:$0xff] %v12025_v36 }
 0x9c3   : > { %v2081_v53 = vpop.f32.mrf.mxu1  ;;  %v2274_v59 = vpop.f32.mrf.mxu0 }
 0x9c4   : > { %v2082_v14 = vadd.f32 %v2081_v53, %v11784_v5 }
 0x9c5   : > { %v12029_v50 = vpop.f32.mrf.mxu1  ;;  %v12031_v34 = vpop.f32.mrf.mxu0 }
 0x9c6   : > { %16021 = vst [vmem:[#allocation101_spill] sm:$0xff] %v12029_v50  ;;  %16022 = vst [vmem:[#allocation102_spill] sm:$0xff] %v12031_v34  ;;  %v12033_v62 = vpack.c.bf16 %v2082_v14, %v2078_v18 }
 0x9c7   : > { %v2087_v51 = vpop.f32.mrf.mxu1  ;;  %v2280_v42 = vpop.f32.mrf.mxu0 }
 0x9c8   : > { %16023 = vst [vmem:[#allocation103_spill] sm:$0xff] %v12033_v62  ;;  %v2088_v25 = vadd.f32 %v2087_v51, %v11784_v5  ;;  %v1733_v51 = vsub.s32 4, %v11771_v61 }
 0x9c9   : > { %v12035_v2 = vpop.f32.mrf.mxu1  ;;  %v12037_v37 = vpop.f32.mrf.mxu0 }
 0x9ca   : > { %16024 = vst [vmem:[#allocation104_spill] sm:$0xff] %v12035_v2  ;;  %16025 = vst [vmem:[#allocation105_spill] sm:$0xff] %v12037_v37  ;;  %v12067_v4 = vrot.slane %v11778_v44, %v1733_v51  ;;  %v2655_v51 = vsel %vm505_vm0, %v11923_v43, 0 }
 0x9cb   : > { %v2091_v28 = vpop.f32.mrf.mxu1  ;;  %v2284_v54 = vpop.f32.mrf.mxu0 }
 0x9cc   : > { %v2092_v56 = vadd.f32 %v2091_v28, %v11784_v5  ;;  %v2285_v2 = vadd.f32 %v2284_v54, %v11787_v33 }
 0x9cd   : > { %v12041_v11 = vpop.f32.mrf.mxu1  ;;  %v12043_v53 = vpop.f32.mrf.mxu0 }
 0x9ce   : > { %16026 = vst [vmem:[#allocation106_spill] sm:$0xff] %v12041_v11  ;;  %16027 = vst [vmem:[#allocation107_spill] sm:$0xff] %v12043_v53  ;;  %v12045_v50 = vpack.c.bf16 %v2092_v56, %v2088_v25 }
 0x9cf   : > { %v2097_v18 = vpop.f32.mrf.mxu1  ;;  %v2290_v14 = vpop.f32.mrf.mxu0 }
 0x9d0   : > { %16028 = vst [vmem:[#allocation108_spill] sm:$0xff] %v12045_v50  ;;  %v2098_v28 = vadd.f32 %v2097_v18, %v11784_v5  ;;  %v2291_v11 = vadd.f32 %v2290_v14, %v11787_v33 }
 0x9d1   : > { %v12047_v9 = vpop.f32.mrf.mxu1  ;;  %v12049_v13 = vpop.f32.mrf.mxu0 }
 0x9d2   : > { %16029 = vst [vmem:[#allocation109_spill] sm:$0xff] %v12047_v9  ;;  %16030 = vst [vmem:[#allocation110_spill] sm:$0xff] %v12049_v13  ;;  %v2281_v9 = vadd.f32 %v2280_v42, %v11787_v33 }
 0x9d3   : > { %v2101_v19 = vpop.f32.mrf.mxu1  ;;  %v2294_v26 = vpop.f32.mrf.mxu0 }
 0x9d4   : > { %v2102_v3 = vadd.f32 %v2101_v19, %v11784_v5  ;;  %v2295_v25 = vadd.f32 %v2294_v26, %v11787_v33  ;;  %v12064_v15 = vpack.c.bf16 %v2285_v2, %v2281_v9  ;;  %v2658_v5 = vsel %vm505_vm0, %v11941_v57, 0 }
 0x9d5   : > { %v12057_v56 = vpop.f32.mrf.mxu1  ;;  %v2275_v26 = vadd.f32 %v2274_v59, %v11787_v33  ;;  %v2271_v9 = vadd.f32 %v2270_v31, %v11787_v33 }
 0x9d6   : > { %16031 = vst [vmem:[#allocation111_spill] sm:$0xff] %v12057_v56  ;;  %v12060_v30 = vpack.c.bf16 %v2102_v3, %v2098_v28  ;;  %v12062_v8 = vpack.c.bf16 %v2295_v25, %v2291_v11  ;;  %v2265_v25 = vadd.f32 %v12013_v21, %v11787_v33  ;;  %v2649_v56 = vsel %vm505_vm0, %v11885_v47, 0 }
 0x9d7   : > { %v2333_v54 = vpop.f32.mrf.mxu1  ;;  %v12085_v14 = vpack.c.bf16 %v2275_v26, %v2271_v9  ;;  %v2652_v9 = vsel %vm505_vm0, %v11904_v1, 0 }
 0x9d8   : > { %16032 = vst [vmem:[#allocation112_spill] sm:$0xff] %v12060_v30  ;;  %9790 = vmatprep.subr.msk.bf16.mxu0 %vm505_vm0, %v12062_v8  ;;  %v2334_v2 = vadd.f32 %v2333_v54, %v12067_v4 }
 0x9d9   : > { %v12073_v19 = vpop.f32.mrf.mxu1  ;;  %8793 = vmatpush3.bf16.xpose.msra.mxu0 %v2658_v5 }
 0x9da   : > { %16033 = vst [vmem:[#allocation113_spill] sm:$0xff] %v12073_v19  ;;  %9791 = vmatprep.subr.msk.bf16.mxu0 %vm505_vm0, %v12064_v15 }
 0x9db   : > { %v2337_v3 = vpop.f32.mrf.mxu1 }
 0x9dc   : > { %v2338_v44 = vadd.f32 %v2337_v3, %v12067_v4  ;;  %v2261_v3 = vadd.f32 %v12007_v7, %v11787_v33 }
 0x9dd   : > { %v12080_v11 = vpop.f32.mrf.mxu1 }
 0x9de   : > { %16034 = vst [vmem:[#allocation114_spill] sm:$0xff] %v12080_v11  ;;  %v12083_v42 = vpack.c.bf16 %v2338_v44, %v2334_v2  ;;  %v12103_v44 = vpack.c.bf16 %v2265_v25, %v2261_v3  ;;  %v2251_v25 = vadd.f32 %v11991_v23, %v11787_v33 }
 0x9df   : > { %v2343_v18 = vpop.f32.mrf.mxu1 }
 0x9e0   : > { %16035 = vst [vmem:[#allocation115_spill] sm:$0xff] %v12083_v42  ;;  %v2344_v31 = vadd.f32 %v2343_v18, %v12067_v4  ;;  %v2255_v18 = vadd.f32 %v11997_v10, %v11787_v33 }
 0x9e1   : > { %v12089_v28 = vpop.f32.mrf.mxu1  ;;  %8795 = vmatpush3.bf16.xpose.msra.mxu0 %v2655_v51 }
 0x9e2   : > { %16036 = vst [vmem:[#allocation116_spill] sm:$0xff] %v12089_v28  ;;  %9792 = vmatprep.subr.msk.bf16.mxu0 %vm505_vm0, %v12085_v14 }
 0x9e3   : > { %v2347_v59 = vpop.f32.mrf.mxu1 }
 0x9e4   : > { %v2348_v54 = vadd.f32 %v2347_v59, %v12067_v4 }
 0x9e5   : > { %v12097_v5 = vpop.f32.mrf.mxu1 }
 0x9e6   : > { %16037 = vst [vmem:[#allocation117_spill] sm:$0xff] %v12097_v5  ;;  %v12101_v26 = vpack.c.bf16 %v2348_v54, %v2344_v31 }
 0x9e7   : > { %v2353_v2 = vpop.f32.mrf.mxu1 }
 0x9e8   : > { %16038 = vst [vmem:[#allocation118_spill] sm:$0xff] %v12101_v26  ;;  %v2354_v7 = vadd.f32 %v2353_v2, %v12067_v4 }
 0x9e9   : > { %v12107_v51 = vpop.f32.mrf.mxu1  ;;  %8797 = vmatpush3.bf16.xpose.msra.mxu0 %v2652_v9  ;;  %v12121_v9 = vpack.c.bf16 %v2255_v18, %v2251_v25 }
 0x9ea   : > { %16039 = vst [vmem:[#allocation119_spill] sm:$0xff] %v12107_v51  ;;  %9793 = vmatprep.subr.msk.bf16.mxu0 %vm505_vm0, %v12103_v44 }
 0x9eb   : > { %v2357_v21 = vpop.f32.mrf.mxu1 }
 0x9ec   : > { %v2358_v59 = vadd.f32 %v2357_v21, %v12067_v4 }
 0x9ed   : > { %v12115_v31 = vpop.f32.mrf.mxu1 }
 0x9ee   : > { %16040 = vst [vmem:[#allocation120_spill] sm:$0xff] %v12115_v31  ;;  %v12119_v54 = vpack.c.bf16 %v2358_v59, %v2354_v7  ;;  %v2646_v7 = vsel %vm505_vm0, %v11863_v20, 0 }
 0x9ef   : > { %v2363_v3 = vpop.f32.mrf.mxu1 }
 0x9f0   : > { %16041 = vst [vmem:[#allocation121_spill] sm:$0xff] %v12119_v54  ;;  %v2364_v2 = vadd.f32 %v2363_v3, %v12067_v4 }
 0x9f1   : > { %v12125_v19 = vpop.f32.mrf.mxu1  ;;  %8799 = vmatpush3.bf16.xpose.msra.mxu0 %v2649_v56 }
 0x9f2   : > { %16042 = vst [vmem:[#allocation122_spill] sm:$0xff] %v12125_v19  ;;  %9794 = vmatprep.subr.msk.bf16.mxu0 %vm505_vm0, %v12121_v9 }
 0x9f3   : > { %v2367_v10 = vpop.f32.mrf.mxu1 }
 0x9f4   : > { %v2368_v21 = vadd.f32 %v2367_v10, %v12067_v4 }
 0x9f5   : > { %v12131_v33 = vpop.f32.mrf.mxu1 }
 0x9f6   : > { %16043 = vst [vmem:[#allocation123_spill] sm:$0xff] %v12131_v33  ;;  %v12133_v23 = vpack.c.bf16 %v2368_v21, %v2364_v2  ;;  %v2643_v21 = vsel %vm505_vm0, %v11844_v16, 0 }
 0x9f7   : > { %v2373_v18 = vpop.f32.mrf.mxu1 }
 0x9f8   : > { %16044 = vst [vmem:[#allocation124_spill] sm:$0xff] %v12133_v23  ;;  %v2374_v25 = vadd.f32 %v2373_v18, %v12067_v4 }
 0x9f9   : > { %v12137_v59 = vpop.f32.mrf.mxu1  ;;  %8801 = vmatpush3.bf16.xpose.msra.mxu0 %v2646_v7 }
 0x9fa   : > { %16045 = vst [vmem:[#allocation125_spill] sm:$0xff] %v12137_v59  ;;  %9795 = vmatprep.subr.msk.bf16.mxu0 %vm505_vm0, %v11989_v39 }
 0x9fb   : > { %v2377_v56 = vpop.f32.mrf.mxu1 }
 0x9fc   : > { %v2378_v3 = vadd.f32 %v2377_v56, %v12067_v4 }
 0x9fd   : > { %v12143_v10 = vpop.f32.mrf.mxu1 }
 0x9fe   : > { %16046 = vst [vmem:[#allocation126_spill] sm:$0xff] %v12143_v10  ;;  %v12145_v11 = vpack.c.bf16 %v2378_v3, %v2374_v25  ;;  %v2640_v3 = vsel %vm505_vm0, %v11825_v55, 0 }
 0x9ff   : > { %v2383_v2 = vpop.f32.mrf.mxu1 }
 0xa00   : > { %16047 = vst [vmem:[#allocation127_spill] sm:$0xff] %v12145_v11  ;;  %v2384_v5 = vadd.f32 %v2383_v2, %v12067_v4 }
 0xa01   : > { %v12149_v28 = vpop.f32.mrf.mxu1  ;;  %8803 = vmatpush3.bf16.xpose.msra.mxu0 %v2643_v21 }
 0xa02   : > { %16048 = vst [vmem:[#allocation128_spill] sm:$0xff] %v12149_v28  ;;  %9796 = vmatprep.subr.msk.bf16.mxu0 %vm505_vm0, %v11973_v27 }
 0xa03   : > { %v2387_v7 = vpop.f32.mrf.mxu1 }
 0xa04   : > { %v2388_v18 = vadd.f32 %v2387_v7, %v12067_v4 }
 0xa05   : > { %v12155_v56 = vpop.f32.mrf.mxu1 }
 0xa06   : > { %16049 = vst [vmem:[#allocation129_spill] sm:$0xff] %v12155_v56  ;;  %v12157_v51 = vpack.c.bf16 %v2388_v18, %v2384_v5  ;;  %v2637_v18 = vsel %vm505_vm0, %v11804_v46, 0 }
 0xa07   : > { %v2393_v25 = vpop.f32.mrf.mxu1 }
 0xa08   : > { %16050 = vst [vmem:[#allocation130_spill] sm:$0xff] %v12157_v51  ;;  %v2394_v19 = vadd.f32 %v2393_v25, %v12067_v4 }
 0xa09   : > { %v12161_v31 = vpop.f32.mrf.mxu1  ;;  %8805 = vmatpush3.bf16.xpose.msra.mxu0 %v2640_v3 }
 0xa0a   : > { %16051 = vst [vmem:[#allocation131_spill] sm:$0xff] %v12161_v31  ;;  %9797 = vmatprep.subr.msk.bf16.mxu0 %vm505_vm0, %v11957_v12 }
 0xa0b   : > { %v2397_v21 = vpop.f32.mrf.mxu1 }
 0xa0c   : > { %v2398_v2 = vadd.f32 %v2397_v21, %v12067_v4 }
 0xa0d   : > { %v12167_v7 = vpop.f32.mrf.mxu1 }
 0xa0e   : > { %16052 = vst [vmem:[#allocation132_spill] sm:$0xff] %v12167_v7  ;;  %v12169_v33 = vpack.c.bf16 %v2398_v2, %v2394_v19 }
 0xa0f   : > { %v2403_v5 = vpop.f32.mrf.mxu1 }
 0xa10   : > { %16053 = vst [vmem:[#allocation133_spill] sm:$0xff] %v12169_v33  ;;  %v2404_v10 = vadd.f32 %v2403_v5, %v12067_v4 }
 0xa11   : > { %v12173_v59 = vpop.f32.mrf.mxu1  ;;  %8807 = vmatpush3.bf16.xpose.msra.mxu0 %v2637_v18 }
 0xa12   : > { %16054 = vst [vmem:[#allocation134_spill] sm:$0xff] %v12173_v59 }
 0xa13   : > { %v2407_v3 = vpop.f32.mrf.mxu1 }
 0xa14   : > { %v2408_v28 = vadd.f32 %v2407_v3, %v12067_v4 }
 0xa15   : > { %v12177_v56 = vpop.f32.mrf.mxu1 }
 0xa16   : > { %16055 = vst [vmem:[#allocation135_spill] sm:$0xff] %v12177_v56  ;;  %v12179_v25 = vpack.c.bf16 %v2408_v28, %v2404_v10 }
 0xa17   : > { %v2413_v21 = vpop.f32.mrf.mxu1 }
 0xa18   : > { %16056 = vst [vmem:[#allocation136_spill] sm:$0xff] %v12179_v25  ;;  %8809 = vmatmul.mubr.msk.bf16.vlgmr.msra.gmra.mxu0 %vm505_vm0, %v11802_v0  ;;  %v2414_v18 = vadd.f32 %v2413_v21, %v12067_v4 }
 0xa19   : > { %v12183_v19 = vpop.f32.mrf.mxu1  ;;  %8810 = vmatprep.mubr.msk.bf16.mxu0 %vm505_vm0, %v11823_v29 }
 0xa1a   : > { %16057 = vst [vmem:[#allocation137_spill] sm:$0xff] %v12183_v19 }
 0xa1b   : > { %v2417_v2 = vpop.f32.mrf.mxu1 }
 0xa1c   : > { %v2418_v5 = vadd.f32 %v2417_v2, %v12067_v4 }
 0xa1d   : > { %v12189_v31 = vpop.f32.mrf.mxu1 }
 0xa1e   : > { %16058 = vst [vmem:[#allocation138_spill] sm:$0xff] %v12189_v31  ;;  %v12191_v3 = vpack.c.bf16 %v2418_v5, %v2414_v18 }
 0xa1f   : > { %v2423_v28 = vpop.f32.mrf.mxu1 }
 0xa20   : > { %16059 = vst [vmem:[#allocation139_spill] sm:$0xff] %v12191_v3  ;;  %8811 = vmatmul.mubr.msk.bf16.gmra.mxu0 %vm505_vm0, %v11823_v29  ;;  %v2424_v7 = vadd.f32 %v2423_v28, %v12067_v4 }
 0xa21   : > { %v12195_v10 = vpop.f32.mrf.mxu1  ;;  %8812 = vmatprep.mubr.msk.bf16.mxu0 %vm505_vm0, %v11842_v45 }
 0xa22   : > { %16060 = vst [vmem:[#allocation140_spill] sm:$0xff] %v12195_v10 }
 0xa23   : > { %v2427_v19 = vpop.f32.mrf.mxu1 }
 0xa24   : > { %v2428_v21 = vadd.f32 %v2427_v19, %v12067_v4 }
 0xa25   : > { %v12201_v59 = vpop.f32.mrf.mxu1 }
 0xa26   : > { %16061 = vst [vmem:[#allocation141_spill] sm:$0xff] %v12201_v59  ;;  %v12203_v2 = vpack.c.bf16 %v2428_v21, %v2424_v7 }
 0xa27   : > { %v12205_v18 = vpop.f32.mrf.mxu1 }
 0xa28   : > { %16062 = vst [vmem:[#allocation142_spill] sm:$0xff] %v12203_v2  ;;  %8813 = vmatmul.mubr.msk.bf16.gmra.mxu0 %vm505_vm0, %v11842_v45 }
 0xa29   : > { %v12209_v5 = vpop.f32.mrf.mxu1  ;;  %8814 = vmatprep.mubr.msk.bf16.mxu0 %vm505_vm0, %v11861_v63 }
 0xa2a   : > { %16063 = vst [vmem:[#allocation143_spill] sm:$0xff] %v12209_v5 }
 0xa2b   : > { %v2437_v31 = vpop.f32.mrf.mxu1 }
 0xa2d   : > { %v12213_v10 = vpop.f32.mrf.mxu1 }
 0xa2e   : > { %16064 = vst [vmem:[#allocation144_spill] sm:$0xff] %v12213_v10 }
 0xa2f   : > { %v2443_v28 = vpop.f32.mrf.mxu1 }
 0xa30   : > { %8815 = vmatmul.mubr.msk.bf16.gmra.mxu0 %vm505_vm0, %v11861_v63 }
 0xa31   : > { %v12217_v19 = vpop.f32.mrf.mxu1  ;;  %8816 = vmatprep.mubr.msk.bf16.mxu0 %vm505_vm0, %v11883_v17 }
 0xa32   : > { %16065 = vst [vmem:[#allocation145_spill] sm:$0xff] %v12217_v19 }
 0xa33   : > { %v2447_v7 = vpop.f32.mrf.mxu1 }
 0xa35   : > { %v12221_v21 = vpop.f32.mrf.mxu1 }
 0xa36   : > { %16066 = vst [vmem:[#allocation146_spill] sm:$0xff] %v12221_v21 }
 0xa37   : > { %v2453_v59 = vpop.f32.mrf.mxu1 }
 0xa38   : > { %8817 = vmatmul.mubr.msk.bf16.gmra.mxu0 %vm505_vm0, %v11883_v17 }
 0xa39   : > { %v12225_v5 = vpop.f32.mrf.mxu1  ;;  %8818 = vmatprep.mubr.msk.bf16.mxu0 %vm505_vm0, %v11902_v24 }
 0xa3a   : > { %16067 = vst [vmem:[#allocation147_spill] sm:$0xff] %v12225_v5 }
 0xa3b   : > { %v2457_v10 = vpop.f32.mrf.mxu1 }
 0xa3d   : > { %v12229_v56 = vpop.f32.mrf.mxu1 }
 0xa3e   : > { %16068 = vst [vmem:[#allocation148_spill] sm:$0xff] %v12229_v56 }
 0xa3f   : > { %v2463_v6 = vpop.f32.mrf.mxu1 }
 0xa40   : > { %8819 = vmatmul.mubr.msk.bf16.gmra.mxu0 %vm505_vm0, %v11902_v24 }
 0xa41   : > { %v12233_v19 = vpop.f32.mrf.mxu1  ;;  %8820 = vmatprep.mubr.msk.bf16.mxu0 %vm505_vm0, %v11921_v40 }
 0xa42   : > { %16069 = vst [vmem:[#allocation149_spill] sm:$0xff] %v12233_v19 }
 0xa43   : > { %v2467_v21 = vpop.f32.mrf.mxu1 }
 0xa45   : > { %v12237_v58 = vpop.f32.mrf.mxu1 }
 0xa46   : > { %16070 = vst [vmem:[#allocation150_spill] sm:$0xff] %v12237_v58 }
 0xa47   : > { %v2473_v36 = vpop.f32.mrf.mxu1 }
 0xa48   : > { %8821 = vmatmul.mubr.msk.bf16.gmra.mxu0 %vm505_vm0, %v11921_v40  ;;  %v2474_v32 = vadd.f32 %v2473_v36, %v12067_v4 }
 0xa49   : > { %v12241_v5 = vpop.f32.mrf.mxu1  ;;  %8822 = vmatprep.mubr.msk.bf16.mxu0 %vm505_vm0, %v11939_v48 }
 0xa4a   : > { %16071 = vst [vmem:[#allocation151_spill] sm:$0xff] %v12241_v5 }
 0xa4b   : > { %v2477_v56 = vpop.f32.mrf.mxu1 }
 0xa4c   : > { %v2478_v52 = vadd.f32 %v2477_v56, %v12067_v4  ;;  %v2434_v56 = vadd.f32 %v12205_v18, %v12067_v4 }
 0xa4d   : > { %v12245_v60 = vpop.f32.mrf.mxu1 }
 0xa4e   : > { %16072 = vst [vmem:[#allocation152_spill] sm:$0xff] %v12245_v60  ;;  %v2468_v60 = vadd.f32 %v2467_v21, %v12067_v4  ;;  %v12260_v13 = vpack.c.bf16 %v2478_v52, %v2474_v32  ;;  %v2454_v52 = vadd.f32 %v2453_v59, %v12067_v4  ;;  %v2448_v32 = vadd.f32 %v2447_v7, %v12067_v4 }
 0xa4f   : > { %v2483_v34 = vpop.f32.mrf.mxu1 }
 0xa50   : > { %8823 = vmatmul.mubr.msk.bf16.gmra.mxu0 %vm505_vm0, %v11939_v48  ;;  %v2484_v5 = vadd.f32 %v2483_v34, %v12067_v4  ;;  %16075 = vst [vmem:[#allocation155_spill] sm:$0xff] %v12260_v13 }
 0xa51   : > { %v12249_v19 = vpop.f32.mrf.mxu1  ;;  %8824 = vmatprep.mubr.msk.bf16.mxu0 %vm505_vm0, %v11955_v41 }
 0xa52   : > { %16073 = vst [vmem:[#allocation153_spill] sm:$0xff] %v12249_v19 }
 0xa53   : > { %v2487_v58 = vpop.f32.mrf.mxu1 }
 0xa54   : > { %v2488_v37 = vadd.f32 %v2487_v58, %v12067_v4  ;;  %v2464_v58 = vadd.f32 %v2463_v6, %v12067_v4  ;;  %v2438_v6 = vadd.f32 %v2437_v31, %v12067_v4 }
 0xa56   : > { %v12257_v53 = vpack.c.bf16 %v2488_v37, %v2484_v5  ;;  %v2458_v37 = vadd.f32 %v2457_v10, %v12067_v4  ;;  %v12271_v36 = vpack.c.bf16 %v2468_v60, %v2464_v58  ;;  %v2444_v60 = vadd.f32 %v2443_v28, %v12067_v4  ;;  %v12324_v4 = vpop.f32.mrf.mxu0 }
 0xa57   : > { %v12293_v10 = vpack.c.bf16 %v2438_v6, %v2434_v56  ;;  %16080 = vst [vmem:[#allocation160_spill] sm:$0xff] %v12324_v4 }
 0xa58   : > { %16074 = vst [vmem:[#allocation154_spill] sm:$0xff] %v12257_v53  ;;  %8825 = vmatmul.mubr.msk.bf16.gmra.mxu0 %vm505_vm0, %v11955_v41  ;;  %8840 = vmatprep.subr.bf16.mxu1 %v12257_v53  ;;  %16076 = vst [vmem:[#allocation156_spill] sm:$0xff] %v12271_v36  ;;  %v12277_v34 = vpack.c.bf16 %v2458_v37, %v2454_v52  ;;  %v12287_v59 = vpack.c.bf16 %v2448_v32, %v2444_v60 }
 0xa59   : > { %8826 = vmatprep.mubr.msk.bf16.mxu0 %vm505_vm0, %v11971_v38  ;;  %8841 = vmatpush3.bf16.msra.mxu1 %v12179_v25  ;;  %16079 = vst [vmem:[#allocation159_spill] sm:$0xff] %v12293_v10 }
 0xa5a   : > { %8842 = vmatprep.subr.bf16.mxu1 %v12260_v13  ;;  %16077 = vst [vmem:[#allocation157_spill] sm:$0xff] %v12277_v34  ;;  %16078 = vst [vmem:[#allocation158_spill] sm:$0xff] %v12287_v59 }
 0xa5d   : > { %8843 = vmatpush3.bf16.msra.mxu1 %v12169_v33 }
 0xa5e   : > { %8844 = vmatprep.subr.bf16.mxu1 %v12271_v36 }
 0xa60   : > { %8827 = vmatmul.mubr.msk.bf16.gmra.mxu0 %vm505_vm0, %v11971_v38 }
 0xa61   : > { %8828 = vmatprep.mubr.msk.bf16.mxu0 %vm505_vm0, %v11987_v22  ;;  %8845 = vmatpush3.bf16.msra.mxu1 %v12157_v51 }
 0xa62   : > { %8846 = vmatprep.subr.bf16.mxu1 %v12277_v34 }
 0xa65   : > { %8847 = vmatpush3.bf16.msra.mxu1 %v12145_v11 }
 0xa66   : > { %8848 = vmatprep.subr.bf16.mxu1 %v12287_v59 }
 0xa68   : > { %8829 = vmatmul.mubr.msk.bf16.gmra.mxu0 %vm505_vm0, %v11987_v22 }
 0xa69   : > { %8830 = vmatprep.mubr.msk.bf16.mxu0 %vm505_vm0, %v12005_v49  ;;  %8849 = vmatpush3.bf16.msra.mxu1 %v12133_v23 }
 0xa6a   : > { %8850 = vmatprep.subr.bf16.mxu1 %v12293_v10 }
 0xa6d   : > { %8851 = vmatpush3.bf16.msra.mxu1 %v12119_v54 }
 0xa6e   : > { %8852 = vmatprep.subr.bf16.mxu1 %v12203_v2 }
 0xa70   : > { %8831 = vmatmul.mubr.msk.bf16.gmra.mxu0 %vm505_vm0, %v12005_v49 }
 0xa71   : > { %8832 = vmatprep.mubr.msk.bf16.mxu0 %vm505_vm0, %v12021_v35  ;;  %8853 = vmatpush3.bf16.msra.mxu1 %v12101_v26 }
 0xa72   : > { %8854 = vmatprep.subr.bf16.mxu1 %v12191_v3 }
 0xa75   : > { %8855 = vmatpush3.bf16.msra.mxu1 %v12083_v42 }
 0xa78   : > { %8833 = vmatmul.mubr.msk.bf16.gmra.mxu0 %vm505_vm0, %v12021_v35 }
 0xa79   : > { %8834 = vmatprep.mubr.msk.bf16.mxu0 %vm505_vm0, %v12033_v62 }
 0xa80   : > { %8835 = vmatmul.mubr.msk.bf16.gmra.mxu0 %vm505_vm0, %v12033_v62 }
 0xa81   : > { %8836 = vmatprep.mubr.msk.bf16.mxu0 %vm505_vm0, %v12045_v50 }
 0xa88   : > { %8837 = vmatmul.mubr.msk.bf16.gmra.mxu0 %vm505_vm0, %v12045_v50 }
 0xa89   : > { %8838 = vmatprep.mubr.msk.bf16.mxu0 %vm505_vm0, %v12060_v30 }
 0xa90   : > { %8839 = vmatmul.mubr.msk.bf16.gmra.mxu0 %vm505_vm0, %v12060_v30 }
 0xad8   : > { %v12326_v31 = vpop.f32.mrf.mxu0 }
 0xada   : > { %v12328_v18 = vpop.f32.mrf.mxu0 }
 0xadb   : > { %v2877_v5 = vmax.f32 %v12326_v31, %v12328_v18 }
 0xadc   : > { %v12332_v28 = vpop.f32.mrf.mxu0 }
 0xadd   : > { %2878 = vmax.xlane.f32.xlu0 %v2877_v5 }
 0xade   : > { %v12334_v7 = vpop.f32.mrf.mxu0 }
 0xadf   : > { %v2880_v21 = vmax.f32 %v12332_v28, %v12334_v7 }
 0xae0   : > { %v12338_v58 = vpop.f32.mrf.mxu0 }
 0xae1   : > { %2881 = vmax.xlane.f32.xlu1 %v2880_v21 }
 0xae2   : > { %v12340_v37 = vpop.f32.mrf.mxu0 }
 0xae3   : > { %v2883_v52 = vmax.f32 %v12338_v58, %v12340_v37 }
 0xae4   : > { %v12344_v32 = vpop.f32.mrf.mxu0 }
 0xae5   : > { %2884 = vmax.xlane.f32.xlu0 %v2883_v52 }
 0xae6   : > { %v12346_v60 = vpop.f32.mrf.mxu0 }
 0xae7   : > { %v2886_v6 = vmax.f32 %v12344_v32, %v12346_v60 }
 0xae8   : > { %v12350_v56 = vpop.f32.mrf.mxu0 }
 0xae9   : > { %2887 = vmax.xlane.f32.xlu1 %v2886_v6 }
 0xaea   : > { %v12352_v5 = vpop.f32.mrf.mxu0 }
 0xaeb   : > { %v2889_v21 = vmax.f32 %v12350_v56, %v12352_v5 }
 0xaec   : > { %v12356_v4 = vpop.f32.mrf.mxu0 }
 0xaed   : > { %2890 = vmax.xlane.f32.xlu0 %v2889_v21 }
 0xaee   : > { %v12358_v42 = vpop.f32.mrf.mxu0 }
 0xaef   : > { %v2892_v52 = vmax.f32 %v12356_v4, %v12358_v42 }
 0xaf0   : > { %v12362_v3 = vpop.f32.mrf.mxu0 }
 0xaf1   : > { %2893 = vmax.xlane.f32.xlu1 %v2892_v52 }
 0xaf2   : > { %v12364_v19 = vpop.f32.mrf.mxu0 }
 0xaf3   : > { %v2895_v6 = vmax.f32 %v12362_v3, %v12364_v19 }
 0xaf4   : > { %v12368_v61 = vpop.f32.mrf.mxu0 }
 0xaf5   : > { %2896 = vmax.xlane.f32.xlu0 %v2895_v6 }
 0xaf6   : > { %v12370_v2 = vpop.f32.mrf.mxu0 }
 0xaf7   : > { %v2898_v21 = vmax.f32 %v12368_v61, %v12370_v2 }
 0xaf8   : > { %v12374_v26 = vpop.f32.mrf.mxu0 }
 0xaf9   : > { %2899 = vmax.xlane.f32.xlu1 %v2898_v21 }
 0xafa   : > { %v12376_v54 = vpop.f32.mrf.mxu0 }
 0xafb   : > { %v2901_v52 = vmax.f32 %v12374_v26, %v12376_v54 }
 0xafc   : > { %v12380_v10 = vpop.f32.mrf.mxu0 }
 0xafd   : > { %2902 = vmax.xlane.f32.xlu0 %v2901_v52 }
 0xafe   : > { %v12382_v59 = vpop.f32.mrf.mxu0 }
 0xaff   : > { %v2904_v6 = vmax.f32 %v12380_v10, %v12382_v59 }
 0xb00   : > { %v12386_v23 = vpop.f32.mrf.mxu0 }
 0xb01   : > { %2905 = vmax.xlane.f32.xlu1 %v2904_v6 }
 0xb02   : > { %v12388_v11 = vpop.f32.mrf.mxu0 }
 0xb03   : > { %v2907_v21 = vmax.f32 %v12386_v23, %v12388_v11 }
 0xb04   : > { %v12392_v34 = vpop.f32.mrf.mxu0 }
 0xb05   : > { %2908 = vmax.xlane.f32.xlu0 %v2907_v21 }
 0xb06   : > { %v12394_v36 = vpop.f32.mrf.mxu0 }
 0xb07   : > { %v2910_v52 = vmax.f32 %v12392_v34, %v12394_v36 }
 0xb08   : > { %v12398_v51 = vpop.f32.mrf.mxu0 }
 0xb09   : > { %2911 = vmax.xlane.f32.xlu1 %v2910_v52 }
 0xb0a   : > { %v12400_v33 = vpop.f32.mrf.mxu0 }
 0xb0b   : > { %v2913_v6 = vmax.f32 %v12398_v51, %v12400_v33 }
 0xb0c   : > { %v12404_v13 = vpop.f32.mrf.mxu0 }
 0xb0d   : > { %2914 = vmax.xlane.f32.xlu0 %v2913_v6 }
 0xb0e   : > { %v12406_v53 = vpop.f32.mrf.mxu0 }
 0xb0f   : > { %v2916_v21 = vmax.f32 %v12404_v13, %v12406_v53 }
 0xb10   : > { %v12410_v25 = vpop.f32.mrf.mxu0 }
 0xb11   : > { %2917 = vmax.xlane.f32.xlu1 %v2916_v21 }
 0xb12   : > { %v12412_v30 = vpop.f32.mrf.mxu0 }
 0xb13   : > { %v2919_v52 = vmax.f32 %v12410_v25, %v12412_v30 }
 0xb14   : > { %v12416_v50 = vpop.f32.mrf.mxu0 }
 0xb15   : > { %2920 = vmax.xlane.f32.xlu0 %v2919_v52 }
 0xb16   : > { %v12418_v62 = vpop.f32.mrf.mxu0 }
 0xb17   : > { %v2922_v6 = vmax.f32 %v12416_v50, %v12418_v62 }
 0xb18   : > { %v12422_v35 = vpop.f32.mrf.mxu0 }
 0xb19   : > { %2923 = vmax.xlane.f32.xlu1 %v2922_v6 }
 0xb1a   : > { %v12424_v49 = vpop.f32.mrf.mxu0 }
 0xb1b   : > { %v2925_v21 = vmax.f32 %v12422_v35, %v12424_v49 }
 0xb1c   : > { %v12428_v22 = vpop.f32.mrf.mxu0 }
 0xb1d   : > { %2926 = vmax.xlane.f32.xlu0 %v2925_v21 }
 0xb1e   : > { %v12430_v38 = vpop.f32.mrf.mxu0 }
 0xb1f   : > { %v2928_v52 = vmax.f32 %v12428_v22, %v12430_v38 }
 0xb20   : > { %v12434_v41 = vpop.f32.mrf.mxu0 }
 0xb21   : > { %2929 = vmax.xlane.f32.xlu1 %v2928_v52 }
 0xb22   : > { %v12436_v48 = vpop.f32.mrf.mxu0 }
 0xb23   : > { %v2931_v6 = vmax.f32 %v12434_v41, %v12436_v48 }
 0xb24   : > { %v12440_v40 = vpop.f32.mrf.mxu0 }
 0xb25   : > { %2932 = vmax.xlane.f32.xlu0 %v2931_v6 }
 0xb26   : > { %v12442_v24 = vpop.f32.mrf.mxu0 }
 0xb27   : > { %v2934_v21 = vmax.f32 %v12440_v40, %v12442_v24 }
 0xb28   : > { %v12446_v17 = vpop.f32.mrf.mxu0 }
 0xb29   : > { %16081 = vst [vmem:[#allocation161_spill] sm:$0xff] %v12446_v17  ;;  %2935 = vmax.xlane.f32.xlu1 %v2934_v21 }
 0xb2a   : > { %v12448_v63 = vpop.f32.mrf.mxu0 }
 0xb2b   : > { %16082 = vst [vmem:[#allocation162_spill] sm:$0xff] %v12448_v63  ;;  %v2937_v52 = vmax.f32 %v12446_v17, %v12448_v63 }
 0xb2c   : > { %v12452_v45 = vpop.f32.mrf.mxu0 }
 0xb2d   : > { %16083 = vst [vmem:[#allocation163_spill] sm:$0xff] %v12452_v45  ;;  %2938 = vmax.xlane.f32.xlu0 %v2937_v52 }
 0xb2e   : > { %v12454_v29 = vpop.f32.mrf.mxu0 }
 0xb2f   : > { %16084 = vst [vmem:[#allocation164_spill] sm:$0xff] %v12454_v29  ;;  %v2940_v6 = vmax.f32 %v12452_v45, %v12454_v29 }
 0xb30   : > { %v12458_v0 = vpop.f32.mrf.mxu0 }
 0xb31   : > { %16085 = vst [vmem:[#allocation165_spill] sm:$0xff] %v12458_v0  ;;  %2941 = vmax.xlane.f32.xlu1 %v2940_v6 }
 0xb32   : > { %v12460_v12 = vpop.f32.mrf.mxu0 }
 0xb33   : > { %16086 = vst [vmem:[#allocation166_spill] sm:$0xff] %v12460_v12  ;;  %v2943_v21 = vmax.f32 %v12458_v0, %v12460_v12 }
 0xb34   : > { %v12464_v46 = vpop.f32.mrf.mxu0 }
 0xb35   : > { %16087 = vst [vmem:[#allocation167_spill] sm:$0xff] %v12464_v46  ;;  %2944 = vmax.xlane.f32.xlu0 %v2943_v21 }
 0xb36   : > { %v12466_v63 = vpop.f32.mrf.mxu0 }
 0xb37   : > { %16088 = vst [vmem:[#allocation168_spill] sm:$0xff] %v12466_v63  ;;  %v2946_v52 = vmax.f32 %v12464_v46, %v12466_v63 }
 0xb38   : > { %v12470_v17 = vpop.f32.mrf.mxu0 }
 0xb39   : > { %16089 = vst [vmem:[#allocation169_spill] sm:$0xff] %v12470_v17  ;;  %2947 = vmax.xlane.f32.xlu1 %v2946_v52 }
 0xb3a   : > { %v12472_v29 = vpop.f32.mrf.mxu0 }
 0xb3b   : > { %16090 = vst [vmem:[#allocation170_spill] sm:$0xff] %v12472_v29  ;;  %v2949_v6 = vmax.f32 %v12470_v17, %v12472_v29 }
 0xb3c   : > { %v12476_v45 = vpop.f32.mrf.mxu0 }
 0xb3d   : > { %16091 = vst [vmem:[#allocation171_spill] sm:$0xff] %v12476_v45  ;;  %2950 = vmax.xlane.f32.xlu0 %v2949_v6 }
 0xb3e   : > { %v12478_v12 = vpop.f32.mrf.mxu0 }
 0xb3f   : > { %16092 = vst [vmem:[#allocation172_spill] sm:$0xff] %v12478_v12  ;;  %v2952_v21 = vmax.f32 %v12476_v45, %v12478_v12 }
 0xb40   : > { %v12482_v0 = vpop.f32.mrf.mxu0 }
 0xb41   : > { %16093 = vst [vmem:[#allocation173_spill] sm:$0xff] %v12482_v0  ;;  %2953 = vmax.xlane.f32.xlu1 %v2952_v21 }
 0xb42   : > { %v12484_v63 = vpop.f32.mrf.mxu0 }
 0xb43   : > { %16094 = vst [vmem:[#allocation174_spill] sm:$0xff] %v12484_v63  ;;  %v2955_v52 = vmax.f32 %v12482_v0, %v12484_v63 }
 0xb44   : > { %v12488_v46 = vpop.f32.mrf.mxu0 }
 0xb45   : > { %16095 = vst [vmem:[#allocation175_spill] sm:$0xff] %v12488_v46  ;;  %2956 = vmax.xlane.f32.xlu0 %v2955_v52 }
 0xb46   : > { %v12490_v29 = vpop.f32.mrf.mxu0 }
 0xb47   : > { %16096 = vst [vmem:[#allocation176_spill] sm:$0xff] %v12490_v29  ;;  %v2958_v6 = vmax.f32 %v12488_v46, %v12490_v29 }
 0xb48   : > { %v12494_v17 = vpop.f32.mrf.mxu0 }
 0xb49   : > { %16097 = vst [vmem:[#allocation177_spill] sm:$0xff] %v12494_v17  ;;  %2959 = vmax.xlane.f32.xlu1 %v2958_v6 }
 0xb4a   : > { %v12496_v12 = vpop.f32.mrf.mxu0 }
 0xb4b   : > { %16098 = vst [vmem:[#allocation178_spill] sm:$0xff] %v12496_v12  ;;  %v2961_v21 = vmax.f32 %v12494_v17, %v12496_v12 }
 0xb4c   : > { %v12500_v45 = vpop.f32.mrf.mxu0 }
 0xb4d   : > { %16099 = vst [vmem:[#allocation179_spill] sm:$0xff] %v12500_v45  ;;  %2962 = vmax.xlane.f32.xlu0 %v2961_v21 }
 0xb4e   : > { %v12502_v63 = vpop.f32.mrf.mxu0 }
 0xb4f   : > { %16100 = vst [vmem:[#allocation180_spill] sm:$0xff] %v12502_v63  ;;  %v2964_v52 = vmax.f32 %v12500_v45, %v12502_v63  ;;  %v9895_v63 = vld [vmem:[%s15715_s8 + $0x18] sm:$0xff]  }
 0xb50   : > { %v12506_v0 = vpop.f32.mrf.mxu0  ;;  %9622 = vmatprep.subr.bf16.mxu0 %v9895_v63 }
 0xb51   : > { %16101 = vst [vmem:[#allocation181_spill] sm:$0xff] %v12506_v0  ;;  %2965 = vmax.xlane.f32.xlu1 %v2964_v52  ;;  %9623 = vmatpush3.bf16.msra.mxu0 %v9895_v63  ;;  %v9896_v52 = vld [vmem:[%s15715_s8 + $0x10] sm:$0xff]  }
 0xb52   : > { %v12508_v29 = vpop.f32.mrf.mxu0  ;;  %9624 = vmatprep.subr.bf16.mxu0 %v9896_v52 }
 0xb53   : > { %16102 = vst [vmem:[#allocation182_spill] sm:$0xff] %v12508_v29  ;;  %v2967_v6 = vmax.f32 %v12506_v0, %v12508_v29 }
 0xb54   : > { %v12512_v46 = vpop.f32.mrf.mxu0 }
 0xb55   : > { %16103 = vst [vmem:[#allocation183_spill] sm:$0xff] %v12512_v46  ;;  %2968 = vmax.xlane.f32.xlu0 %v2967_v6  ;;  %9625 = vmatpush3.bf16.msra.mxu0 %v9896_v52  ;;  %v9897_v6 = vld [vmem:[%s15715_s8 + $0x8] sm:$0xff]  }
 0xb56   : > { %v12514_v12 = vpop.f32.mrf.mxu0  ;;  %9626 = vmatprep.subr.bf16.mxu0 %v9897_v6 }
 0xb57   : > { %16104 = vst [vmem:[#allocation184_spill] sm:$0xff] %v12514_v12  ;;  %v2970_v21 = vmax.f32 %v12512_v46, %v12514_v12  ;;  %v9898_v12 = vld [vmem:[%s15715_s8] sm:$0xff]  }
 0xb59   : > { %2971 = vmax.xlane.f32.xlu1 %v2970_v21  ;;  %9627 = vmatpush3.bf16.msra.mxu0 %v9897_v6 }
 0xb5a   : > { %9628 = vmatprep.subr.bf16.mxu0 %v9898_v12 }
 0xb5d   : > { %9629 = vmatpush3.bf16.msra.mxu0 %v9898_v12 }
 0xb66   : > { %v2879_v46 = vpop.xlane.xlu0 %2878 }
 0xb67   : > { %v2973_v63 = vsub.f32 %v12326_v31, %v2879_v46  ;;  %v2974_v21 = vsub.f32 %v12328_v18, %v2879_v46 }
 0xb69   : > { %v3037_v29 = vmul.f32 1.442695, %v2973_v63  ;;  %v3039_v0 = vmul.f32 1.442695, %v2974_v21 }
 0xb6a   : > { %v2882_v52 = vpop.xlane.xlu1 %2881  ;;  %3873 = vrot.lane.b32.xlu1 %v12062_v8, %s10897_s16 }
 0xb6b   : > { %v2975_v6 = vsub.f32 %v12332_v28, %v2882_v52  ;;  %v2976_v45 = vsub.f32 %v12334_v7, %v2882_v52  ;;  %3857 = vrot.lane.b32.xlu0 %v11941_v57, %s10897_s16  ;;  %10051 = vpow2.f32 %v3037_v29 }
 0xb6c   : > { %10053 = vpow2.f32 %v3039_v0 }
 0xb6d   : > { %v3041_v17 = vmul.f32 1.442695, %v2975_v6  ;;  %v3043_v31 = vmul.f32 1.442695, %v2976_v45 }
 0xb6e   : > { %v2885_v46 = vpop.xlane.xlu0 %2884  ;;  %3871 = vrot.lane.b32.xlu1 %v12064_v15, %s10897_s16 }
 0xb6f   : > { %10055 = vpow2.f32 %v3041_v17  ;;  %v2977_v12 = vsub.f32 %v12338_v58, %v2885_v46  ;;  %v2978_v8 = vsub.f32 %v12340_v37, %v2885_v46  ;;  %3855 = vrot.lane.b32.xlu0 %v11923_v43, %s10897_s16 }
 0xb70   : > { %10057 = vpow2.f32 %v3043_v31 }
 0xb71   : > { %v3045_v18 = vmul.f32 1.442695, %v2977_v12  ;;  %v3047_v28 = vmul.f32 1.442695, %v2978_v8 }
 0xb72   : > { %v2888_v57 = vpop.xlane.xlu1 %2887  ;;  %3869 = vrot.lane.b32.xlu1 %v12085_v14, %s10897_s16 }
 0xb73   : > { %v2979_v0 = vsub.f32 %v12344_v32, %v2888_v57  ;;  %v2980_v29 = vsub.f32 %v12346_v60, %v2888_v57  ;;  %3853 = vrot.lane.b32.xlu0 %v11904_v1, %s10897_s16  ;;  %10059 = vpow2.f32 %v3045_v18 }
 0xb74   : > { %10061 = vpow2.f32 %v3047_v28 }
 0xb75   : > { %v3049_v15 = vmul.f32 1.442695, %v2979_v0  ;;  %v3051_v45 = vmul.f32 1.442695, %v2980_v29 }
 0xb76   : > { %v2891_v17 = vpop.xlane.xlu0 %2890  ;;  %3867 = vrot.lane.b32.xlu1 %v12103_v44, %s10897_s16 }
 0xb77   : > { %10063 = vpow2.f32 %v3049_v15  ;;  %v2981_v43 = vsub.f32 %v12350_v56, %v2891_v17  ;;  %v2982_v14 = vsub.f32 %v12352_v5, %v2891_v17  ;;  %3851 = vrot.lane.b32.xlu0 %v11885_v47, %s10897_s16 }
 0xb78   : > { %10065 = vpow2.f32 %v3051_v45  ;;  %v12556_v58 = vpop.eup %10051 }
 0xb79   : > { %v3053_v7 = vmul.f32 1.442695, %v2981_v43  ;;  %v3055_v1 = vmul.f32 1.442695, %v2982_v14  ;;  %v12560_v32 = vpop.eup %10053 }
 0xb7a   : > { %v2894_v37 = vpop.xlane.xlu1 %2893  ;;  %3865 = vrot.lane.b32.xlu1 %v12121_v9, %s10897_s16 }
 0xb7b   : > { %v2983_v44 = vsub.f32 %v12356_v4, %v2894_v37  ;;  %v2984_v60 = vsub.f32 %v12358_v42, %v2894_v37  ;;  %3849 = vrot.lane.b32.xlu0 %v11863_v20, %s10897_s16  ;;  %10067 = vpow2.f32 %v3053_v7 }
 0xb7c   : > { %v12566_v56 = vpop.eup %10055  ;;  %10069 = vpow2.f32 %v3055_v1 }
 0xb7d   : > { %v12568_v47 = vpop.eup %10057  ;;  %v3057_v5 = vmul.f32 1.442695, %v2983_v44  ;;  %v3059_v63 = vmul.f32 1.442695, %v2984_v60  ;;  %v3261_v21 = vpack.c.bf16 %v12566_v56, %v12556_v58 }
 0xb7e   : > { %v2897_v9 = vpop.xlane.xlu0 %2896  ;;  %3847 = vrot.lane.b32.xlu1 %v11844_v16, %s10897_s16  ;;  %v3262_v42 = vpack.c.bf16 %v12568_v47, %v12560_v32 }
 0xb7f   : > { %10071 = vpow2.f32 %v3057_v5  ;;  %v2985_v20 = vsub.f32 %v12362_v3, %v2897_v9  ;;  %v2986_v4 = vsub.f32 %v12364_v19, %v2897_v9  ;;  %3863 = vrot.lane.b32.xlu0 %v11989_v39, %s10897_s16 }
 0xb80   : > { %10073 = vpow2.f32 %v3059_v63  ;;  %3325 = vmatprep.mubr.bf16.mxu1 %v3262_v42  ;;  %v12580_v6 = vpop.eup %10059 }
 0xb81   : > { %v3061_v52 = vmul.f32 1.442695, %v2985_v20  ;;  %3326 = vmatmul.mubr.bf16.vlgmr.msra.gmra.mxu1 %v3261_v21  ;;  %v3063_v31 = vmul.f32 1.442695, %v2986_v4  ;;  %v12584_v16 = vpop.eup %10061 }
 0xb82   : > { %v2900_v46 = vpop.xlane.xlu1 %2899  ;;  %3845 = vrot.lane.b32.xlu1 %v11825_v55, %s10897_s16 }
 0xb83   : > { %v2987_v3 = vsub.f32 %v12368_v61, %v2900_v46  ;;  %v2988_v19 = vsub.f32 %v12370_v2, %v2900_v46  ;;  %3861 = vrot.lane.b32.xlu0 %v11973_v27, %s10897_s16  ;;  %10075 = vpow2.f32 %v3061_v52 }
 0xb84   : > { %v12590_v39 = vpop.eup %10063  ;;  %10077 = vpow2.f32 %v3063_v31 }
 0xb85   : > { %v12592_v12 = vpop.eup %10065  ;;  %v3065_v8 = vmul.f32 1.442695, %v2987_v3  ;;  %v3067_v18 = vmul.f32 1.442695, %v2988_v19  ;;  %v3263_v28 = vpack.c.bf16 %v12590_v39, %v12580_v6 }
 0xb86   : > { %v2903_v55 = vpop.xlane.xlu0 %2902  ;;  %v3264_v61 = vpack.c.bf16 %v12592_v12, %v12584_v16 }
 0xb87   : > { %10079 = vpow2.f32 %v3065_v8  ;;  %v2989_v2 = vsub.f32 %v12374_v26, %v2903_v55  ;;  %v2990_v27 = vsub.f32 %v12376_v54, %v2903_v55 }
 0xb88   : > { %10081 = vpow2.f32 %v3067_v18  ;;  %3333 = vmatprep.mubr.bf16.mxu1 %v3264_v61  ;;  %v12600_v0 = vpop.eup %10067 }
 0xb89   : > { %v3069_v57 = vmul.f32 1.442695, %v2989_v2  ;;  %3334 = vmatmul.mubr.bf16.gmra.mxu1 %v3263_v28  ;;  %v3071_v29 = vmul.f32 1.442695, %v2990_v27  ;;  %v12602_v45 = vpop.eup %10069 }
 0xb8a   : > { %v2906_v15 = vpop.xlane.xlu1 %2905 }
 0xb8b   : > { %v2991_v17 = vsub.f32 %v12380_v10, %v2906_v15  ;;  %v2992_v43 = vsub.f32 %v12382_v59, %v2906_v15  ;;  %10083 = vpow2.f32 %v3069_v57 }
 0xb8c   : > { %v12606_v14 = vpop.eup %10071  ;;  %10085 = vpow2.f32 %v3071_v29 }
 0xb8d   : > { %v12608_v7 = vpop.eup %10073  ;;  %v3073_v26 = vmul.f32 1.442695, %v2991_v17  ;;  %v3075_v54 = vmul.f32 1.442695, %v2992_v43  ;;  %v3265_v1 = vpack.c.bf16 %v12606_v14, %v12600_v0  ;;  %v3165_v43 = vadd.f32 %v12560_v32, %v12556_v58 }
 0xb8e   : > { %v2909_v37 = vpop.xlane.xlu0 %2908  ;;  %v3266_v44 = vpack.c.bf16 %v12608_v7, %v12602_v45  ;;  %v3168_v58 = vadd.f32 %v12568_v47, %v12566_v56  ;;  %v3177_v47 = vadd.f32 %v12602_v45, %v12600_v0 }
 0xb8f   : > { %10087 = vpow2.f32 %v3073_v26  ;;  %v2993_v10 = vsub.f32 %v12386_v23, %v2909_v37  ;;  %v2994_v59 = vsub.f32 %v12388_v11, %v2909_v37 }
 0xb90   : > { %10089 = vpow2.f32 %v3075_v54  ;;  %3341 = vmatprep.mubr.bf16.mxu1 %v3266_v44  ;;  %v12616_v5 = vpop.eup %10075 }
 0xb91   : > { %v3077_v60 = vmul.f32 1.442695, %v2993_v10  ;;  %3342 = vmatmul.mubr.bf16.gmra.mxu1 %v3265_v1  ;;  %v3079_v63 = vmul.f32 1.442695, %v2994_v59  ;;  %v12618_v9 = vpop.eup %10077 }
 0xb92   : > { %v2912_v21 = vpop.xlane.xlu1 %2911  ;;  %v3183_v0 = vadd.f32 %v12618_v9, %v12616_v5 }
 0xb93   : > { %v2995_v42 = vsub.f32 %v12392_v34, %v2912_v21  ;;  %v2996_v20 = vsub.f32 %v12394_v36, %v2912_v21  ;;  %10091 = vpow2.f32 %v3077_v60 }
 0xb94   : > { %v12622_v4 = vpop.eup %10079  ;;  %10093 = vpow2.f32 %v3079_v63 }
 0xb95   : > { %v12624_v52 = vpop.eup %10081  ;;  %v3081_v11 = vmul.f32 1.442695, %v2995_v42  ;;  %v3083_v23 = vmul.f32 1.442695, %v2996_v20  ;;  %v3267_v31 = vpack.c.bf16 %v12622_v4, %v12616_v5 }
 0xb96   : > { %v2915_v46 = vpop.xlane.xlu0 %2914  ;;  %v3268_v3 = vpack.c.bf16 %v12624_v52, %v12618_v9 }
 0xb97   : > { %10095 = vpow2.f32 %v3081_v11  ;;  %v2997_v34 = vsub.f32 %v12398_v51, %v2915_v46  ;;  %v2998_v36 = vsub.f32 %v12400_v33, %v2915_v46 }
 0xb98   : > { %10097 = vpow2.f32 %v3083_v23  ;;  %3349 = vmatprep.mubr.bf16.mxu1 %v3268_v3  ;;  %v12632_v8 = vpop.eup %10083 }
 0xb99   : > { %v3085_v19 = vmul.f32 1.442695, %v2997_v34  ;;  %3350 = vmatmul.mubr.bf16.gmra.mxu1 %v3267_v31  ;;  %v3087_v18 = vmul.f32 1.442695, %v2998_v36  ;;  %v12634_v55 = vpop.eup %10085 }
 0xb9a   : > { %v2918_v28 = vpop.xlane.xlu1 %2917 }
 0xb9b   : > { %v2999_v61 = vsub.f32 %v12404_v13, %v2918_v28  ;;  %v3000_v2 = vsub.f32 %v12406_v53, %v2918_v28  ;;  %10099 = vpow2.f32 %v3085_v19 }
 0xb9c   : > { %v12638_v27 = vpop.eup %10087  ;;  %10101 = vpow2.f32 %v3087_v18 }
 0xb9d   : > { %v12640_v57 = vpop.eup %10089  ;;  %v3089_v51 = vmul.f32 1.442695, %v2999_v61  ;;  %v3091_v33 = vmul.f32 1.442695, %v3000_v2  ;;  %v3269_v29 = vpack.c.bf16 %v12638_v27, %v12632_v8 }
 0xb9e   : > { %v2921_v15 = vpop.xlane.xlu0 %2920  ;;  %v3270_v17 = vpack.c.bf16 %v12640_v57, %v12634_v55 }
 0xb9f   : > { %10103 = vpow2.f32 %v3089_v51  ;;  %v3001_v13 = vsub.f32 %v12410_v25, %v2921_v15  ;;  %v3002_v53 = vsub.f32 %v12412_v30, %v2921_v15  ;;  %v3171_v30 = vadd.f32 %v12584_v16, %v12580_v6 }
 0xba0   : > { %10105 = vpow2.f32 %v3091_v33  ;;  %3357 = vmatprep.mubr.bf16.mxu1 %v3270_v17  ;;  %v12650_v54 = vpop.eup %10091  ;;  %v3174_v16 = vadd.f32 %v12592_v12, %v12590_v39  ;;  %v3180_v39 = vadd.f32 %v12608_v7, %v12606_v14  ;;  %v3189_v14 = vadd.f32 %v12634_v55, %v12632_v8 }
 0xba1   : > { %v3093_v26 = vmul.f32 1.442695, %v3001_v13  ;;  %3358 = vmatmul.mubr.bf16.gmra.mxu1 %v3269_v29  ;;  %v3095_v1 = vmul.f32 1.442695, %v3002_v53  ;;  %v12652_v44 = vpop.eup %10093  ;;  %v3186_v7 = vadd.f32 %v12624_v52, %v12622_v4  ;;  %v3192_v4 = vadd.f32 %v12640_v57, %v12638_v27 }
 0xba2   : > { %v2924_v37 = vpop.xlane.xlu1 %2923  ;;  %3166 = vadd.xlane.f32.xlu0 %v3165_v43  ;;  %v3195_v8 = vadd.f32 %v12652_v44, %v12650_v54 }
 0xba3   : > { %v3003_v10 = vsub.f32 %v12416_v50, %v2924_v37  ;;  %v3004_v25 = vsub.f32 %v12418_v62, %v2924_v37  ;;  %10107 = vpow2.f32 %v3093_v26  ;;  %v16107_v37 = vld [vmem:[#allocation163_spill] sm:$0xff] }
 0xba4   : > { %v12656_v59 = vpop.eup %10095  ;;  %10109 = vpow2.f32 %v3095_v1 }
 0xba5   : > { %v12662_v32 = vpop.eup %10097  ;;  %v3097_v60 = vmul.f32 1.442695, %v3003_v10  ;;  %v3099_v63 = vmul.f32 1.442695, %v3004_v25  ;;  %v3271_v21 = vpack.c.bf16 %v12656_v59, %v12650_v54  ;;  %v16108_v10 = vld [vmem:[#allocation164_spill] sm:$0xff] }
 0xba6   : > { %v2927_v50 = vpop.xlane.xlu0 %2926  ;;  %3172 = vadd.xlane.f32.xlu0 %v3171_v30  ;;  %3169 = vadd.xlane.f32.xlu1 %v3168_v58  ;;  %v3272_v62 = vpack.c.bf16 %v12662_v32, %v12652_v44  ;;  %v3198_v43 = vadd.f32 %v12662_v32, %v12656_v59 }
 0xba7   : > { %10111 = vpow2.f32 %v3097_v60  ;;  %v3005_v6 = vsub.f32 %v12422_v35, %v2927_v50  ;;  %v3006_v56 = vsub.f32 %v12424_v49, %v2927_v50 }
 0xba8   : > { %10113 = vpow2.f32 %v3099_v63  ;;  %3365 = vmatprep.mubr.bf16.mxu1 %v3272_v62  ;;  %v10100_v20 = vpop.eup %10099 }
 0xba9   : > { %v3101_v42 = vmul.f32 1.442695, %v3005_v6  ;;  %3366 = vmatmul.mubr.bf16.gmra.mxu1 %v3271_v21  ;;  %v3103_v11 = vmul.f32 1.442695, %v3006_v56  ;;  %v10102_v31 = vpop.eup %10101  ;;  %v16109_v6 = vld [vmem:[#allocation165_spill] sm:$0xff] }
 0xbaa   : > { %v2930_v23 = vpop.xlane.xlu1 %2929  ;;  %3178 = vadd.xlane.f32.xlu0 %v3177_v47  ;;  %3175 = vadd.xlane.f32.xlu1 %v3174_v16  ;;  %v3201_v53 = vadd.f32 %v10102_v31, %v10100_v20  ;;  %v16110_v47 = vld [vmem:[#allocation166_spill] sm:$0xff] }
 0xbab   : > { %v3007_v35 = vsub.f32 %v12428_v22, %v2930_v23  ;;  %v3008_v49 = vsub.f32 %v12430_v38, %v2930_v23  ;;  %10115 = vpow2.f32 %v3101_v42 }
 0xbac   : > { %v12676_v46 = vpop.eup %10103  ;;  %10117 = vpow2.f32 %v3103_v11 }
 0xbad   : > { %v10106_v12 = vpop.eup %10105  ;;  %v3105_v45 = vmul.f32 1.442695, %v3007_v35  ;;  %v3107_v3 = vmul.f32 1.442695, %v3008_v49  ;;  %v3273_v34 = vpack.c.bf16 %v12676_v46, %v10100_v20 }
 0xbae   : > { %v2933_v36 = vpop.xlane.xlu0 %2932  ;;  %3184 = vadd.xlane.f32.xlu0 %v3183_v0  ;;  %3181 = vadd.xlane.f32.xlu1 %v3180_v39  ;;  %v3274_v22 = vpack.c.bf16 %v10106_v12, %v10102_v31  ;;  %v3204_v60 = vadd.f32 %v10106_v12, %v12676_v46  ;;  %v16111_v46 = vld [vmem:[#allocation167_spill] sm:$0xff]  ;;  %v16112_v39 = vld [vmem:[#allocation168_spill] sm:$0xff] }
 0xbaf   : > { %10119 = vpow2.f32 %v3105_v45  ;;  %v3009_v38 = vsub.f32 %v12434_v41, %v2933_v36  ;;  %v3010_v19 = vsub.f32 %v12436_v48, %v2933_v36 }
 0xbb0   : > { %10121 = vpow2.f32 %v3107_v3  ;;  %3373 = vmatprep.mubr.bf16.mxu1 %v3274_v22  ;;  %v10108_v18 = vpop.eup %10107 }
 0xbb1   : > { %v3109_v5 = vmul.f32 1.442695, %v3009_v38  ;;  %v3111_v9 = vmul.f32 1.442695, %v3010_v19  ;;  %3374 = vmatmul.mubr.bf16.gmra.mxu1 %v3273_v34  ;;  %v10110_v61 = vpop.eup %10109 }
 0xbb2   : > { %v2936_v28 = vpop.xlane.xlu1 %2935  ;;  %3190 = vadd.xlane.f32.xlu0 %v3189_v14  ;;  %3187 = vadd.xlane.f32.xlu1 %v3186_v7  ;;  %v3207_v58 = vadd.f32 %v10110_v61, %v10108_v18 }
 0xbb3   : > { %10123 = vpow2.f32 %v3109_v5  ;;  %v3011_v41 = vsub.f32 %v12440_v40, %v2936_v28  ;;  %v3012_v48 = vsub.f32 %v12442_v24, %v2936_v28  ;;  %v16105_v40 = vld [vmem:[#allocation161_spill] sm:$0xff]  ;;  %v16106_v24 = vld [vmem:[#allocation162_spill] sm:$0xff] }
 0xbb4   : > { %v10112_v2 = vpop.eup %10111  ;;  %10125 = vpow2.f32 %v3111_v9  ;;  %v16113_v5 = vld [vmem:[#allocation169_spill] sm:$0xff] }
 0xbb5   : > { %v10114_v52 = vpop.eup %10113  ;;  %v3113_v55 = vmul.f32 1.442695, %v3011_v41  ;;  %v3115_v51 = vmul.f32 1.442695, %v3012_v48  ;;  %v3275_v33 = vpack.c.bf16 %v10112_v2, %v10108_v18  ;;  %v16114_v18 = vld [vmem:[#allocation170_spill] sm:$0xff] }
 0xbb6   : > { %v2939_v29 = vpop.xlane.xlu0 %2938  ;;  %3196 = vadd.xlane.f32.xlu0 %v3195_v8  ;;  %3193 = vadd.xlane.f32.xlu1 %v3192_v4  ;;  %v3276_v15 = vpack.c.bf16 %v10114_v52, %v10110_v61  ;;  %v3210_v11 = vadd.f32 %v10114_v52, %v10112_v2  ;;  %v16115_v52 = vld [vmem:[#allocation171_spill] sm:$0xff] }
 0xbb7   : > { %10127 = vpow2.f32 %v3113_v55  ;;  %v3013_v17 = vsub.f32 %v16105_v40, %v2939_v29  ;;  %v3014_v13 = vsub.f32 %v16106_v24, %v2939_v29 }
 0xbb8   : > { %10129 = vpow2.f32 %v3115_v51  ;;  %3381 = vmatprep.mubr.bf16.mxu1 %v3276_v15  ;;  %v10116_v26 = vpop.eup %10115  ;;  %v16116_v51 = vld [vmem:[#allocation172_spill] sm:$0xff] }
 0xbb9   : > { %v3117_v27 = vmul.f32 1.442695, %v3013_v17  ;;  %v3119_v57 = vmul.f32 1.442695, %v3014_v13  ;;  %3382 = vmatmul.mubr.bf16.gmra.mxu1 %v3275_v33  ;;  %v10118_v1 = vpop.eup %10117 }
 0xbba   : > { %v2942_v54 = vpop.xlane.xlu1 %2941  ;;  %3202 = vadd.xlane.f32.xlu0 %v3201_v53  ;;  %3199 = vadd.xlane.f32.xlu1 %v3198_v43  ;;  %v3213_v34 = vadd.f32 %v10118_v1, %v10116_v26 }
 0xbbb   : > { %10131 = vpow2.f32 %v3117_v27  ;;  %v3015_v44 = vsub.f32 %v16107_v37, %v2942_v54  ;;  %v3016_v25 = vsub.f32 %v16108_v10, %v2942_v54  ;;  %v16118_v54 = vld [vmem:[#allocation174_spill] sm:$0xff] }
 0xbbc   : > { %v10120_v30 = vpop.eup %10119  ;;  %10133 = vpow2.f32 %v3119_v57  ;;  %v16117_v57 = vld [vmem:[#allocation173_spill] sm:$0xff] }
 0xbbd   : > { %v10122_v63 = vpop.eup %10121  ;;  %v3121_v59 = vmul.f32 1.442695, %v3015_v44  ;;  %v3123_v32 = vmul.f32 1.442695, %v3016_v25  ;;  %v3277_v21 = vpack.c.bf16 %v10120_v30, %v10116_v26 }
 0xbbe   : > { %v2945_v50 = vpop.xlane.xlu0 %2944  ;;  %3208 = vadd.xlane.f32.xlu0 %v3207_v58  ;;  %3205 = vadd.xlane.f32.xlu1 %v3204_v60  ;;  %v3278_v62 = vpack.c.bf16 %v10122_v63, %v10118_v1  ;;  %v3216_v20 = vadd.f32 %v10122_v63, %v10120_v30  ;;  %v16119_v60 = vld [vmem:[#allocation175_spill] sm:$0xff] }
 0xbbf   : > { %10135 = vpow2.f32 %v3121_v59  ;;  %v3017_v56 = vsub.f32 %v16109_v6, %v2945_v50  ;;  %v3018_v16 = vsub.f32 %v16110_v47, %v2945_v50  ;;  %v16120_v59 = vld [vmem:[#allocation176_spill] sm:$0xff] }
 0xbc0   : > { %v10124_v42 = vpop.eup %10123  ;;  %10137 = vpow2.f32 %v3123_v32  ;;  %3389 = vmatprep.mubr.bf16.mxu1 %v3278_v62 }
 0xbc1   : > { %v10126_v23 = vpop.eup %10125  ;;  %v3125_v31 = vmul.f32 1.442695, %v3017_v56  ;;  %v3127_v35 = vmul.f32 1.442695, %v3018_v16  ;;  %3390 = vmatmul.mubr.bf16.gmra.mxu1 %v3277_v21 }
 0xbc2   : > { %v2948_v49 = vpop.xlane.xlu1 %2947  ;;  %3217 = vadd.xlane.f32.xlu0 %v3216_v20  ;;  %3211 = vadd.xlane.f32.xlu1 %v3210_v11  ;;  %v3219_v3 = vadd.f32 %v10126_v23, %v10124_v42  ;;  %v16121_v20 = vld [vmem:[#allocation177_spill] sm:$0xff] }
 0xbc3   : > { %10139 = vpow2.f32 %v3125_v31  ;;  %v3019_v0 = vsub.f32 %v16111_v46, %v2948_v49  ;;  %v3020_v12 = vsub.f32 %v16112_v39, %v2948_v49 }
 0xbc4   : > { %v10128_v45 = vpop.eup %10127  ;;  %10141 = vpow2.f32 %v3127_v35 }
 0xbc5   : > { %v10130_v36 = vpop.eup %10129  ;;  %v3129_v22 = vmul.f32 1.442695, %v3019_v0  ;;  %v3131_v38 = vmul.f32 1.442695, %v3020_v12  ;;  %v3279_v19 = vpack.c.bf16 %v10128_v45, %v10124_v42 }
 0xbc6   : > { %v2951_v14 = vpop.xlane.xlu0 %2950  ;;  %3220 = vadd.xlane.f32.xlu0 %v3219_v3  ;;  %3214 = vadd.xlane.f32.xlu1 %v3213_v34  ;;  %v3280_v7 = vpack.c.bf16 %v10130_v36, %v10126_v23  ;;  %v3222_v41 = vadd.f32 %v10130_v36, %v10128_v45  ;;  %v16122_v23 = vld [vmem:[#allocation178_spill] sm:$0xff]  ;;  %v16123_v45 = vld [vmem:[#allocation179_spill] sm:$0xff]  ;;  %v16124_v34 = vld [vmem:[#allocation180_spill] sm:$0xff] }
 0xbc7   : > { %10143 = vpow2.f32 %v3129_v22  ;;  %v3021_v9 = vsub.f32 %v16113_v5, %v2951_v14  ;;  %v3022_v28 = vsub.f32 %v16114_v18, %v2951_v14 }
 0xbc8   : > { %v10132_v61 = vpop.eup %10131  ;;  %10145 = vpow2.f32 %v3131_v38  ;;  %3397 = vmatprep.mubr.bf16.mxu1 %v3280_v7 }
 0xbc9   : > { %v10134_v48 = vpop.eup %10133  ;;  %v3133_v2 = vmul.f32 1.442695, %v3021_v9  ;;  %v3135_v8 = vmul.f32 1.442695, %v3022_v28  ;;  %3398 = vmatmul.mubr.bf16.gmra.mxu1 %v3279_v19  ;;  %v16125_v28 = vld [vmem:[#allocation181_spill] sm:$0xff] }
 0xbca   : > { %v2954_v4 = vpop.xlane.xlu1 %2953  ;;  %3223 = vadd.xlane.f32.xlu1 %v3222_v41  ;;  %v3225_v15 = vadd.f32 %v10134_v48, %v10132_v61  ;;  %v16126_v41 = vld [vmem:[#allocation182_spill] sm:$0xff] }
 0xbcb   : > { %10147 = vpow2.f32 %v3133_v2  ;;  %v3023_v55 = vsub.f32 %v16115_v52, %v2954_v4  ;;  %v3024_v33 = vsub.f32 %v16116_v51, %v2954_v4 }
 0xbcc   : > { %v10136_v29 = vpop.eup %10135  ;;  %10149 = vpow2.f32 %v3135_v8 }
 0xbcd   : > { %v10138_v40 = vpop.eup %10137  ;;  %v3137_v17 = vmul.f32 1.442695, %v3023_v55  ;;  %v3139_v24 = vmul.f32 1.442695, %v3024_v33  ;;  %v3281_v13 = vpack.c.bf16 %v10136_v29, %v10132_v61  ;;  %v16127_v33 = vld [vmem:[#allocation183_spill] sm:$0xff] }
 0xbce   : > { %v2957_v53 = vpop.xlane.xlu0 %2956  ;;  %3226 = vadd.xlane.f32.xlu1 %v3225_v15  ;;  %v3282_v43 = vpack.c.bf16 %v10138_v40, %v10134_v48  ;;  %v3228_v27 = vadd.f32 %v10138_v40, %v10136_v29  ;;  %v16128_v15 = vld [vmem:[#allocation184_spill] sm:$0xff] }
 0xbcf   : > { %10151 = vpow2.f32 %v3137_v17  ;;  %v3025_v26 = vsub.f32 %v16117_v57, %v2957_v53  ;;  %v3026_v1 = vsub.f32 %v16118_v54, %v2957_v53 }
 0xbd0   : > { %v10140_v37 = vpop.eup %10139  ;;  %10153 = vpow2.f32 %v3139_v24  ;;  %3405 = vmatprep.mubr.bf16.mxu1 %v3282_v43  ;;  %3229 = vadd.xlane.f32.xlu0 %v3228_v27 }
 0xbd1   : > { %v10142_v44 = vpop.eup %10141  ;;  %v3141_v10 = vmul.f32 1.442695, %v3025_v26  ;;  %v3143_v25 = vmul.f32 1.442695, %v3026_v1  ;;  %3406 = vmatmul.mubr.bf16.gmra.mxu1 %v3281_v13 }
 0xbd2   : > { %v2960_v30 = vpop.xlane.xlu1 %2959  ;;  %v3231_v58 = vadd.f32 %v10142_v44, %v10140_v37 }
 0xbd3   : > { %10155 = vpow2.f32 %v3141_v10  ;;  %v3027_v63 = vsub.f32 %v16119_v60, %v2960_v30  ;;  %v3028_v32 = vsub.f32 %v16120_v59, %v2960_v30 }
 0xbd4   : > { %v10144_v21 = vpop.eup %10143  ;;  %10157 = vpow2.f32 %v3143_v25  ;;  %3232 = vadd.xlane.f32.xlu0 %v3231_v58 }
 0xbd5   : > { %v10146_v50 = vpop.eup %10145  ;;  %v3145_v62 = vmul.f32 1.442695, %v3027_v63  ;;  %v3147_v6 = vmul.f32 1.442695, %v3028_v32  ;;  %v3283_v56 = vpack.c.bf16 %v10144_v21, %v10140_v37 }
 0xbd6   : > { %v2963_v47 = vpop.xlane.xlu0 %2962  ;;  %v3284_v16 = vpack.c.bf16 %v10146_v50, %v10142_v44  ;;  %v3234_v42 = vadd.f32 %v10146_v50, %v10144_v21 }
 0xbd7   : > { %10159 = vpow2.f32 %v3145_v62  ;;  %v3029_v11 = vsub.f32 %v16121_v20, %v2963_v47  ;;  %v3030_v31 = vsub.f32 %v16122_v23, %v2963_v47  ;;  %v16132_v23 = vld [vmem:[#allocation43_spill] sm:$0xff] }
 0xbd8   : > { %v10148_v35 = vpop.eup %10147  ;;  %10161 = vpow2.f32 %v3147_v6  ;;  %3413 = vmatprep.mubr.bf16.mxu1 %v3284_v16  ;;  %3235 = vadd.xlane.f32.xlu1 %v3234_v42  ;;  %v16129_v16 = vld [vmem:[#allocation39_spill] sm:$0xff]  ;;  %v16130_v42 = vld [vmem:[#allocation78_spill] sm:$0xff] }
 0xbd9   : > { %v10150_v49 = vpop.eup %10149  ;;  %v3149_v46 = vmul.f32 1.442695, %v3029_v11  ;;  %v3151_v0 = vmul.f32 1.442695, %v3030_v31  ;;  %3414 = vmatmul.mubr.bf16.gmra.mxu1 %v3283_v56  ;;  %v16131_v11 = vld [vmem:[#allocation38_spill] sm:$0xff] }
 0xbda   : > { %v2966_v39 = vpop.xlane.xlu1 %2965  ;;  %v3237_v12 = vadd.f32 %v10150_v49, %v10148_v35 }
 0xbdb   : > { %10163 = vpow2.f32 %v3149_v46  ;;  %v3031_v3 = vsub.f32 %v16123_v45, %v2966_v39  ;;  %v3032_v36 = vsub.f32 %v16124_v34, %v2966_v39  ;;  %v16135_v39 = vld [vmem:[#allocation57_spill] sm:$0xff]  ;;  %v16138_v34 = vld [vmem:[#allocation72_spill] sm:$0xff] }
 0xbdc   : > { %v10152_v22 = vpop.eup %10151  ;;  %10165 = vpow2.f32 %v3151_v0  ;;  %3238 = vadd.xlane.f32.xlu1 %v3237_v12  ;;  %v16136_v12 = vld [vmem:[#allocation62_spill] sm:$0xff] }
 0xbdd   : > { %v10154_v38 = vpop.eup %10153  ;;  %v3153_v19 = vmul.f32 1.442695, %v3031_v3  ;;  %v3155_v14 = vmul.f32 1.442695, %v3032_v36  ;;  %v3285_v7 = vpack.c.bf16 %v10152_v22, %v10148_v35  ;;  %v16133_v35 = vld [vmem:[#allocation47_spill] sm:$0xff] }
 0xbde   : > { %v2969_v5 = vpop.xlane.xlu0 %2968  ;;  %v3286_v9 = vpack.c.bf16 %v10154_v38, %v10150_v49  ;;  %v3240_v18 = vadd.f32 %v10154_v38, %v10152_v22  ;;  %v16134_v49 = vld [vmem:[#allocation51_spill] sm:$0xff]  ;;  %v16139_v22 = vld [vmem:[#allocation77_spill] sm:$0xff] }
 0xbdf   : > { %10167 = vpow2.f32 %v3153_v19  ;;  %v3033_v61 = vsub.f32 %v16125_v28, %v2969_v5  ;;  %v3034_v48 = vsub.f32 %v16126_v41, %v2969_v5  ;;  %v16137_v3 = vld [vmem:[#allocation67_spill] sm:$0xff]  ;;  %v16142_v5 = vld [vmem:[#allocation93_spill] sm:$0xff]  ;;  %v16145_v41 = vld [vmem:[#allocation108_spill] sm:$0xff] }
 0xbe0   : > { %v10156_v2 = vpop.eup %10155  ;;  %10169 = vpow2.f32 %v3155_v14  ;;  %3421 = vmatprep.mubr.bf16.mxu1 %v3286_v9  ;;  %3241 = vadd.xlane.f32.xlu0 %v3240_v18  ;;  %v16140_v38 = vld [vmem:[#allocation83_spill] sm:$0xff]  ;;  %v16143_v18 = vld [vmem:[#allocation98_spill] sm:$0xff] }
 0xbe1   : > { %v10158_v8 = vpop.eup %10157  ;;  %v3157_v4 = vmul.f32 1.442695, %v3033_v61  ;;  %v3159_v52 = vmul.f32 1.442695, %v3034_v48  ;;  %3422 = vmatmul.mubr.bf16.gmra.mxu1 %v3285_v7  ;;  %v16141_v7 = vld [vmem:[#allocation88_spill] sm:$0xff]  ;;  %v16144_v28 = vld [vmem:[#allocation103_spill] sm:$0xff] }
 0xbe2   : > { %v2972_v55 = vpop.xlane.xlu1 %2971  ;;  %v3243_v51 = vadd.f32 %v10158_v8, %v10156_v2  ;;  %v12723_v56 = vpop.permute.xlu0 %3857  ;;  %v16146_v48 = vld [vmem:[#allocation112_spill] sm:$0xff] }
 0xbe3   : > { %10171 = vpow2.f32 %v3157_v4  ;;  %v3035_v29 = vsub.f32 %v16127_v33, %v2972_v55  ;;  %v3036_v40 = vsub.f32 %v16128_v15, %v2972_v55  ;;  %v16147_v4 = vld [vmem:[#allocation136_spill] sm:$0xff]  ;;  %v16149_v33 = vld [vmem:[#allocation155_spill] sm:$0xff] }
 0xbe4   : > { %v10160_v17 = vpop.eup %10159  ;;  %10173 = vpow2.f32 %v3159_v52  ;;  %3244 = vadd.xlane.f32.xlu0 %v3243_v51  ;;  %v16148_v52 = vld [vmem:[#allocation154_spill] sm:$0xff] }
 0xbe5   : > { %v10162_v24 = vpop.eup %10161  ;;  %v3161_v13 = vmul.f32 1.442695, %v3035_v29  ;;  %v3163_v53 = vmul.f32 1.442695, %v3036_v40  ;;  %v3287_v43 = vpack.c.bf16 %v10160_v17, %v10156_v2  ;;  %v16150_v29 = vld [vmem:[#allocation133_spill] sm:$0xff]  ;;  %v16151_v40 = vld [vmem:[#allocation130_spill] sm:$0xff] }
 0xbe6   : > { %v3874_v27 = vpop.permute.xlu1 %3873  ;;  %v3288_v57 = vpack.c.bf16 %v10162_v24, %v10158_v8  ;;  %v3246_v26 = vadd.f32 %v10162_v24, %v10160_v17  ;;  %v12725_v47 = vpop.permute.xlu0 %3855  ;;  %v16152_v17 = vld [vmem:[#allocation156_spill] sm:$0xff] }
 0xbe7   : > { %10175 = vpow2.f32 %v3161_v13  ;;  %9798 = vmatprep.subr.msk.bf16.mxu0 %vm505_vm0, %v3874_v27  ;;  %v16153_v13 = vld [vmem:[#allocation157_spill] sm:$0xff] }
 0xbe8   : > { %v10164_v54 = vpop.eup %10163  ;;  %10177 = vpow2.f32 %v3163_v53  ;;  %3429 = vmatprep.mubr.bf16.mxu1 %v3288_v57  ;;  %3247 = vadd.xlane.f32.xlu1 %v3246_v26  ;;  %v16155_v57 = vld [vmem:[#allocation124_spill] sm:$0xff]  ;;  %v16156_v26 = vld [vmem:[#allocation158_spill] sm:$0xff] }
 0xbe9   : > { %v10166_v1 = vpop.eup %10165  ;;  %3430 = vmatmul.mubr.bf16.gmra.mxu1 %v3287_v43  ;;  %v16154_v43 = vld [vmem:[#allocation127_spill] sm:$0xff] }
 0xbea   : > { %v3249_v37 = vadd.f32 %v10166_v1, %v10164_v54  ;;  %v12731_v20 = vpop.permute.xlu1 %3871  ;;  %v12737_v31 = vpop.permute.xlu0 %3853 }
 0xbec   : > { %v10168_v44 = vpop.eup %10167  ;;  %3250 = vadd.xlane.f32.xlu1 %v3249_v37 }
 0xbed   : > { %v10170_v10 = vpop.eup %10169  ;;  %v3289_v25 = vpack.c.bf16 %v10168_v44, %v10164_v54  ;;  %v12805_v54 = vpop.f32.mrf.mxu1 }
 0xbee   : > { %v3290_v30 = vpack.c.bf16 %v10170_v10, %v10166_v1  ;;  %v3252_v58 = vadd.f32 %v10170_v10, %v10168_v44  ;;  %v12743_v46 = vpop.permute.xlu1 %3869  ;;  %v12745_v0 = vpop.permute.xlu0 %3851  ;;  %v16157_v44 = vld [vmem:[#allocation159_spill] sm:$0xff]  ;;  %v16158_v10 = vld [vmem:[#allocation121_spill] sm:$0xff] }
 0xbf0   : > { %v10172_v60 = vpop.eup %10171  ;;  %3437 = vmatprep.mubr.bf16.mxu1 %v3290_v30  ;;  %3253 = vadd.xlane.f32.xlu0 %v3252_v58 }
 0xbf1   : > { %v10174_v63 = vpop.eup %10173  ;;  %3438 = vmatmul.mubr.bf16.gmra.mxu1 %v3289_v25 }
 0xbf2   : > { %v3255_v59 = vadd.f32 %v10174_v63, %v10172_v60  ;;  %v12751_v45 = vpop.permute.xlu1 %3867  ;;  %v12757_v36 = vpop.permute.xlu0 %3849 }
 0xbf4   : > { %v10176_v32 = vpop.eup %10175  ;;  %3256 = vadd.xlane.f32.xlu0 %v3255_v59 }
 0xbf5   : > { %v10178_v21 = vpop.eup %10177  ;;  %v3291_v50 = vpack.c.bf16 %v10176_v32, %v10172_v60  ;;  %v16159_v60 = vld [vmem:[#allocation118_spill] sm:$0xff] }
 0xbf6   : > { %v3292_v62 = vpack.c.bf16 %v10178_v21, %v10174_v63  ;;  %v3258_v6 = vadd.f32 %v10178_v21, %v10176_v32  ;;  %v12763_v19 = vpop.permute.xlu1 %3865  ;;  %v12765_v14 = vpop.permute.xlu0 %3863  ;;  %v16160_v32 = vld [vmem:[#allocation142_spill] sm:$0xff] }
 0xbf8   : > { %3445 = vmatprep.mubr.bf16.mxu1 %v3292_v62  ;;  %3259 = vadd.xlane.f32.xlu1 %v3258_v6 }
 0xbf9   : > { %3446 = vmatmul.mubr.bf16.gmra.mxu1 %v3291_v50 }
 0xbfa   : > { %v12771_v9 = vpop.permute.xlu1 %3847  ;;  %v12777_v61 = vpop.permute.xlu0 %3861 }
 0xbfe   : > { %v12783_v2 = vpop.permute.xlu1 %3845 }
 0xc09   : > { %3843 = vrot.lane.b32.xlu1 %v16129_v16, %s10897_s16 }
 0xc0a   : > { %3859 = vrot.lane.b32.xlu0 %v16130_v42, %s10897_s16 }
 0xc0d   : > { %3795 = vrot.lane.b32.xlu1 %v16131_v11, %s10897_s16 }
 0xc0e   : > { %3797 = vrot.lane.b32.xlu0 %v16132_v23, %s10897_s16 }
 0xc11   : > { %3799 = vrot.lane.b32.xlu1 %v16133_v35, %s10897_s16 }
 0xc12   : > { %3801 = vrot.lane.b32.xlu0 %v16134_v49, %s10897_s16 }
 0xc15   : > { %3803 = vrot.lane.b32.xlu1 %v16135_v39, %s10897_s16 }
 0xc16   : > { %3805 = vrot.lane.b32.xlu0 %v16136_v12, %s10897_s16 }
 0xc19   : > { %3807 = vrot.lane.b32.xlu1 %v16137_v3, %s10897_s16 }
 0xc1a   : > { %3809 = vrot.lane.b32.xlu0 %v16138_v34, %s10897_s16 }
 0xc1d   : > { %3811 = vrot.lane.b32.xlu1 %v16139_v22, %s10897_s16 }
 0xc1e   : > { %3813 = vrot.lane.b32.xlu0 %v16140_v38, %s10897_s16 }
 0xc21   : > { %3815 = vrot.lane.b32.xlu1 %v16141_v7, %s10897_s16 }
 0xc22   : > { %3817 = vrot.lane.b32.xlu0 %v16142_v5, %s10897_s16 }
 0xc25   : > { %3819 = vrot.lane.b32.xlu1 %v16143_v18, %s10897_s16 }
 0xc26   : > { %3821 = vrot.lane.b32.xlu0 %v16144_v28, %s10897_s16 }
 0xc29   : > { %3823 = vrot.lane.b32.xlu1 %v16145_v41, %s10897_s16 }
 0xc2a   : > { %3825 = vrot.lane.b32.xlu0 %v16146_v48, %s10897_s16 }
 0xc2b   : > { %v3167_v8 = vpop.xlane.xlu0 %3166 }
 0xc2c   : > { %10179 = vrcp.f32 %v3167_v8 }
 0xc2d   : > { %4610 = vrot.lane.b32.xlu1 %v16147_v4, %s10897_s16 }
 0xc2e   : > { %4626 = vrot.lane.b32.xlu0 %v16148_v52, %s10897_s16 }
 0xc2f   : > { %v3170_v55 = vpop.xlane.xlu1 %3169  ;;  %v3173_v51 = vpop.xlane.xlu0 %3172 }
 0xc30   : > { %10181 = vrcp.f32 %v3170_v55 }
 0xc31   : > { %4624 = vrot.lane.b32.xlu1 %v16149_v33, %s10897_s16  ;;  %10183 = vrcp.f32 %v3173_v51  ;;  %v3945_v51 = vsel %vm505_vm0, %v12723_v56, 0 }
 0xc32   : > { %4608 = vrot.lane.b32.xlu0 %v16150_v29, %s10897_s16 }
 0xc33   : > { %v3176_v15 = vpop.xlane.xlu1 %3175  ;;  %v3179_v24 = vpop.xlane.xlu0 %3178 }
 0xc34   : > { %10185 = vrcp.f32 %v3176_v15 }
 0xc35   : > { %4606 = vrot.lane.b32.xlu1 %v16151_v40, %s10897_s16  ;;  %10187 = vrcp.f32 %v3179_v24 }
 0xc36   : > { %4622 = vrot.lane.b32.xlu0 %v16152_v17, %s10897_s16 }
 0xc37   : > { %v3182_v53 = vpop.xlane.xlu1 %3181  ;;  %v3185_v27 = vpop.xlane.xlu0 %3184 }
 0xc38   : > { %10189 = vrcp.f32 %v3182_v53 }
 0xc39   : > { %4620 = vrot.lane.b32.xlu1 %v16153_v13, %s10897_s16  ;;  %v10180_v50 = vpop.eup %10179  ;;  %10191 = vrcp.f32 %v3185_v27 }
 0xc3a   : > { %4604 = vrot.lane.b32.xlu0 %v16154_v43, %s10897_s16 }
 0xc3b   : > { %v3188_v1 = vpop.xlane.xlu1 %3187  ;;  %v3191_v25 = vpop.xlane.xlu0 %3190 }
 0xc3c   : > { %10193 = vrcp.f32 %v3188_v1  ;;  %v3942_v1 = vsel %vm505_vm0, %v12725_v47, 0 }
 0xc3d   : > { %4602 = vrot.lane.b32.xlu1 %v16155_v57, %s10897_s16  ;;  %v10182_v6 = vpop.eup %10181  ;;  %10195 = vrcp.f32 %v3191_v25 }
 0xc3e   : > { %4618 = vrot.lane.b32.xlu0 %v16156_v26, %s10897_s16  ;;  %v10184_v38 = vpop.eup %10183 }
 0xc3f   : > { %v3194_v63 = vpop.xlane.xlu1 %3193  ;;  %v3197_v16 = vpop.xlane.xlu0 %3196 }
 0xc40   : > { %10197 = vrcp.f32 %v3194_v63 }
 0xc41   : > { %v8856_v37 = vpop.f32.mrf.mxu1  ;;  %4616 = vrot.lane.b32.xlu1 %v16157_v44, %s10897_s16  ;;  %v10186_v5 = vpop.eup %10185  ;;  %10199 = vrcp.f32 %v3197_v16 }
 0xc42   : > { %4600 = vrot.lane.b32.xlu0 %v16158_v10, %s10897_s16  ;;  %v10188_v15 = vpop.eup %10187 }
 0xc43   : > { %v8857_v30 = vpop.f32.mrf.mxu1  ;;  %v3200_v49 = vpop.xlane.xlu1 %3199 }
 0xc44   : > { %v8858_v59 = vadd.f32 %v8857_v30, %v8856_v37  ;;  %v12816_v34 = vpop.xlane.xlu0 %3202  ;;  %10201 = vrcp.f32 %v3200_v49 }
 0xc45   : > { %v8859_v58 = vpop.f32.mrf.mxu1  ;;  %4598 = vrot.lane.b32.xlu1 %v16159_v60, %s10897_s16  ;;  %v10190_v24 = vpop.eup %10189  ;;  %10203 = vrcp.f32 %v12816_v34 }
 0xc46   : > { %4614 = vrot.lane.b32.xlu0 %v16160_v32, %s10897_s16  ;;  %v3486_v11 = vmul.f32 %v10180_v50, %v8858_v59  ;;  %v10192_v10 = vpop.eup %10191 }
 0xc47   : > { %v8860_v21 = vpop.f32.mrf.mxu1  ;;  %v12818_v28 = vpop.xlane.xlu1 %3205 }
 0xc48   : > { %v8861_v62 = vadd.f32 %v8860_v21, %v8859_v58  ;;  %v12820_v52 = vpop.xlane.xlu0 %3208  ;;  %10205 = vrcp.f32 %v12818_v28 }
 0xc49   : > { %v8862_v42 = vpop.f32.mrf.mxu1  ;;  %v10194_v25 = vpop.eup %10193  ;;  %10207 = vrcp.f32 %v12820_v52 }
 0xc4a   : > { %v3487_v23 = vmul.f32 %v10182_v6, %v8861_v62  ;;  %v3939_v6 = vsel %vm505_vm0, %v12737_v31, 0 }
 0xc4b   : > { %v8863_v35 = vpop.f32.mrf.mxu1  ;;  %v12825_v40 = vpop.xlane.xlu1 %3211 }
 0xc4c   : > { %v3518_v39 = vpack.c.bf16 %v3487_v23, %v3486_v11  ;;  %v8864_v3 = vadd.f32 %v8863_v35, %v8862_v42  ;;  %v12829_v27 = vpop.xlane.xlu0 %3217  ;;  %v10196_v11 = vpop.eup %10195  ;;  %10209 = vrcp.f32 %v12825_v40 }
 0xc4d   : > { %v8865_v12 = vpop.f32.mrf.mxu1  ;;  %v10198_v16 = vpop.eup %10197  ;;  %10211 = vrcp.f32 %v12829_v27 }
 0xc4e   : > { %9630 = vmatprep.mubr.msk.bf16.mxu0 %vm505_vm0, %v3518_v39  ;;  %v3488_v41 = vmul.f32 %v10184_v38, %v8864_v3  ;;  %v10200_v34 = vpop.eup %10199 }
 0xc4f   : > { %v8866_v22 = vpop.f32.mrf.mxu1  ;;  %v12833_v37 = vpop.xlane.xlu1 %3214 }
 0xc50   : > { %v8867_v7 = vadd.f32 %v8866_v22, %v8865_v12  ;;  %v12838_v58 = vpop.xlane.xlu0 %3220  ;;  %10213 = vrcp.f32 %v12833_v37 }
 0xc51   : > { %v8868_v18 = vpop.f32.mrf.mxu1  ;;  %v10202_v28 = vpop.eup %10201  ;;  %10215 = vrcp.f32 %v12838_v58 }
 0xc52   : > { %v3489_v48 = vmul.f32 %v10186_v5, %v8867_v7  ;;  %v3936_v7 = vsel %vm505_vm0, %v12745_v0, 0 }
 0xc53   : > { %v8869_v8 = vpop.f32.mrf.mxu1  ;;  %v12840_v32 = vpop.xlane.xlu1 %3223 }
 0xc54   : > { %v3519_v4 = vpack.c.bf16 %v3489_v48, %v3488_v41  ;;  %v8870_v33 = vadd.f32 %v8869_v8, %v8868_v18  ;;  %10217 = vrcp.f32 %v12840_v32 }
 0xc55   : > { %v8871_v55 = vpop.f32.mrf.mxu1 }
 0xc56   : > { %9631 = vmatmul.mubr.msk.bf16.vlgmr.msra.gmra.mxu0 %vm505_vm0, %v3519_v4  ;;  %v3490_v53 = vmul.f32 %v10188_v15, %v8870_v33 }
 0xc57   : > { %8973 = vmatpush3.bf16.xpose.msra.mxu0 %v3945_v51  ;;  %v8872_v29 = vpop.f32.mrf.mxu1  ;;  %v12849_v49 = vpop.xlane.xlu1 %3226 }
 0xc58   : > { %v8873_v17 = vadd.f32 %v8872_v29, %v8871_v55  ;;  %9799 = vmatprep.subr.msk.bf16.mxu0 %vm505_vm0, %v12731_v20  ;;  %10219 = vrcp.f32 %v12849_v49 }
 0xc59   : > { %v8874_v13 = vpop.f32.mrf.mxu1  ;;  %v12842_v50 = vpop.xlane.xlu0 %3229 }
 0xc5a   : > { %v3491_v43 = vmul.f32 %v10190_v24, %v8873_v17  ;;  %v3933_v17 = vsel %vm505_vm0, %v12757_v36, 0  ;;  %10221 = vrcp.f32 %v12842_v50 }
 0xc5b   : > { %v8875_v56 = vpop.f32.mrf.mxu1 }
 0xc5c   : > { %v3520_v57 = vpack.c.bf16 %v3491_v43, %v3490_v53  ;;  %v8876_v44 = vadd.f32 %v8875_v56, %v8874_v13  ;;  %v10204_v13 = vpop.eup %10203 }
 0xc5d   : > { %v8877_v26 = vpop.f32.mrf.mxu1  ;;  %v12852_v3 = vpop.xlane.xlu0 %3232 }
 0xc5e   : > { %9634 = vmatprep.mubr.msk.bf16.mxu0 %vm505_vm0, %v3520_v57  ;;  %v3492_v63 = vmul.f32 %v10192_v10, %v8876_v44  ;;  %v10206_v40 = vpop.eup %10205  ;;  %v3930_v10 = vsel %vm505_vm0, %v12771_v9, 0  ;;  %10223 = vrcp.f32 %v12852_v3 }
 0xc5f   : > { %8975 = vmatpush3.bf16.xpose.msra.mxu0 %v3942_v1  ;;  %v8878_v20 = vpop.f32.mrf.mxu1 }
 0xc60   : > { %v8879_v30 = vadd.f32 %v8878_v20, %v8877_v26  ;;  %9800 = vmatprep.subr.msk.bf16.mxu0 %vm505_vm0, %v12743_v46 }
 0xc61   : > { %v8880_v60 = vpop.f32.mrf.mxu1  ;;  %v12857_v5 = vpop.xlane.xlu1 %3235 }
 0xc62   : > { %v3493_v59 = vmul.f32 %v10194_v25, %v8879_v30  ;;  %10225 = vrcp.f32 %v12857_v5 }
 0xc63   : > { %v8881_v47 = vpop.f32.mrf.mxu1 }
 0xc64   : > { %v3521_v21 = vpack.c.bf16 %v3493_v59, %v3492_v63  ;;  %v8882_v42 = vadd.f32 %v8881_v47, %v8880_v60  ;;  %v10208_v60 = vpop.eup %10207 }
 0xc65   : > { %v8883_v62 = vpop.f32.mrf.mxu1  ;;  %v12866_v51 = vpop.xlane.xlu1 %3238 }
 0xc66   : > { %9635 = vmatmul.mubr.msk.bf16.gmra.mxu0 %vm505_vm0, %v3521_v21  ;;  %v3494_v39 = vmul.f32 %v10196_v11, %v8882_v42  ;;  %v10210_v27 = vpop.eup %10209  ;;  %v3927_v11 = vsel %vm505_vm0, %v12783_v2, 0  ;;  %10227 = vrcp.f32 %v12866_v51 }
 0xc67   : > { %8977 = vmatpush3.bf16.xpose.msra.mxu0 %v3939_v6  ;;  %v8884_v46 = vpop.f32.mrf.mxu1 }
 0xc68   : > { %v8885_v23 = vadd.f32 %v8884_v46, %v8883_v62  ;;  %9801 = vmatprep.subr.msk.bf16.mxu0 %vm505_vm0, %v12751_v45 }
 0xc69   : > { %v8886_v35 = vpop.f32.mrf.mxu1  ;;  %v12860_v18 = vpop.xlane.xlu0 %3241 }
 0xc6a   : > { %v3495_v12 = vmul.f32 %v10198_v16, %v8885_v23  ;;  %10229 = vrcp.f32 %v12860_v18 }
 0xc6b   : > { %v8887_v31 = vpop.f32.mrf.mxu1 }
 0xc6c   : > { %v3522_v22 = vpack.c.bf16 %v3495_v12, %v3494_v39  ;;  %v8888_v45 = vadd.f32 %v8887_v31, %v8886_v35  ;;  %v10212_v35 = vpop.eup %10211 }
 0xc6d   : > { %v8889_v38 = vpop.f32.mrf.mxu1  ;;  %v12868_v29 = vpop.xlane.xlu0 %3244 }
 0xc6e   : > { %9638 = vmatprep.mubr.msk.bf16.mxu0 %vm505_vm0, %v3522_v22  ;;  %v3496_v4 = vmul.f32 %v10200_v34, %v8888_v45  ;;  %v10214_v58 = vpop.eup %10213  ;;  %v12909_v45 = vld [vmem:[%s15715_s8 + $0x38] sm:$0xff]   ;;  %10231 = vrcp.f32 %v12868_v29 }
 0xc6f   : > { %8979 = vmatpush3.bf16.xpose.msra.mxu0 %v3936_v7  ;;  %v8890_v41 = vpop.f32.mrf.mxu1 }
 0xc70   : > { %v8891_v48 = vadd.f32 %v8890_v41, %v8889_v38  ;;  %9802 = vmatprep.subr.msk.bf16.mxu0 %vm505_vm0, %v12763_v19 }
 0xc71   : > { %v8892_v8 = vpop.f32.mrf.mxu1  ;;  %v12873_v53 = vpop.xlane.xlu1 %3247 }
 0xc72   : > { %v3497_v55 = vmul.f32 %v10202_v28, %v8891_v48  ;;  %10233 = vrcp.f32 %v12873_v53 }
 0xc73   : > { %v8893_v0 = vpop.f32.mrf.mxu1 }
 0xc74   : > { %v3523_v33 = vpack.c.bf16 %v3497_v55, %v3496_v4  ;;  %v8894_v24 = vadd.f32 %v8893_v0, %v8892_v8  ;;  %v10216_v4 = vpop.eup %10215 }
 0xc75   : > { %v8895_v15 = vpop.f32.mrf.mxu1  ;;  %v12885_v30 = vpop.xlane.xlu1 %3250 }
 0xc76   : > { %9639 = vmatmul.mubr.msk.bf16.gmra.mxu0 %vm505_vm0, %v3523_v33  ;;  %v3498_v57 = vmul.f32 %v10204_v13, %v8894_v24  ;;  %v10218_v55 = vpop.eup %10217  ;;  %10235 = vrcp.f32 %v12885_v30 }
 0xc77   : > { %8981 = vmatpush3.bf16.xpose.msra.mxu0 %v3933_v17  ;;  %v8896_v19 = vpop.f32.mrf.mxu1 }
 0xc78   : > { %v8897_v52 = vadd.f32 %v8896_v19, %v8895_v15  ;;  %9803 = vmatprep.subr.msk.bf16.mxu0 %vm505_vm0, %v12765_v14 }
 0xc79   : > { %v8898_v43 = vpop.f32.mrf.mxu1  ;;  %v12877_v56 = vpop.xlane.xlu0 %3253 }
 0xc7a   : > { %v3499_v26 = vmul.f32 %v10206_v40, %v8897_v52  ;;  %10237 = vrcp.f32 %v12877_v56 }
 0xc7b   : > { %v8899_v36 = vpop.f32.mrf.mxu1 }
 0xc7c   : > { %v3524_v1 = vpack.c.bf16 %v3499_v26, %v3498_v57  ;;  %v8900_v14 = vadd.f32 %v8899_v36, %v8898_v43  ;;  %v10220_v36 = vpop.eup %10219 }
 0xc7d   : > { %v8901_v44 = vpop.f32.mrf.mxu1  ;;  %v12881_v20 = vpop.xlane.xlu0 %3256 }
 0xc7e   : > { %9642 = vmatprep.mubr.msk.bf16.mxu0 %vm505_vm0, %v3524_v1  ;;  %v3500_v47 = vmul.f32 %v10208_v60, %v8900_v14  ;;  %10239 = vrcp.f32 %v12881_v20 }
 0xc7f   : > { %8983 = vmatpush3.bf16.xpose.msra.mxu0 %v3930_v10  ;;  %v8902_v25 = vpop.f32.mrf.mxu1 }
 0xc80   : > { %v8903_v63 = vadd.f32 %v8902_v25, %v8901_v44  ;;  %9804 = vmatprep.subr.msk.bf16.mxu0 %vm505_vm0, %v12777_v61  ;;  %v10222_v44 = vpop.eup %10221 }
 0xc81   : > { %v8904_v37 = vpop.f32.mrf.mxu1  ;;  %v3860_v59 = vpop.permute.xlu0 %3859 }
 0xc82   : > { %v3501_v21 = vmul.f32 %v10210_v27, %v8903_v63  ;;  %v12890_v62 = vpop.xlane.xlu1 %3259 }
 0xc83   : > { %v8905_v9 = vpop.f32.mrf.mxu1  ;;  %10241 = vrcp.f32 %v12890_v62 }
 0xc84   : > { %v3525_v6 = vpack.c.bf16 %v3501_v21, %v3500_v47  ;;  %v8906_v61 = vadd.f32 %v8905_v9, %v8904_v37  ;;  %v10224_v9 = vpop.eup %10223 }
 0xc85   : > { %v8907_v42 = vpop.f32.mrf.mxu1  ;;  %v12894_v46 = vpop.permute.xlu0 %3797 }
 0xc86   : > { %v3844_v23 = vpop.permute.xlu1 %3843  ;;  %9643 = vmatmul.mubr.msk.bf16.gmra.mxu0 %vm505_vm0, %v3525_v6  ;;  %v3502_v31 = vmul.f32 %v10214_v58, %v8906_v61 }
 0xc87   : > { %8985 = vmatpush3.bf16.xpose.msra.mxu0 %v3927_v11  ;;  %v8908_v16 = vpop.f32.mrf.mxu1  ;;  %v3924_v48 = vsel %vm505_vm0, %v3844_v23, 0 }
 0xc88   : > { %v8909_v39 = vadd.f32 %v8908_v16, %v8907_v42  ;;  %9805 = vmatprep.subr.msk.bf16.mxu0 %vm505_vm0, %v3860_v59  ;;  %v10226_v42 = vpop.eup %10225 }
 0xc89   : > { %v8910_v12 = vpop.f32.mrf.mxu1  ;;  %v12900_v32 = vpop.permute.xlu0 %3801 }
 0xc8a   : > { %v3503_v22 = vmul.f32 %v10212_v35, %v8909_v39  ;;  %v12902_v38 = vpop.permute.xlu1 %3795 }
 0xc8b   : > { %v8911_v2 = vpop.f32.mrf.mxu1 }
 0xc8c   : > { %v3526_v7 = vpack.c.bf16 %v3503_v22, %v3502_v31  ;;  %v8912_v28 = vadd.f32 %v8911_v2, %v8910_v12  ;;  %v10228_v2 = vpop.eup %10227 }
 0xc8d   : > { %v8913_v41 = vpop.f32.mrf.mxu1  ;;  %v12911_v34 = vpop.permute.xlu0 %3805 }
 0xc8e   : > { %v12914_v8 = vpop.permute.xlu1 %3799  ;;  %9646 = vmatprep.mubr.msk.bf16.mxu0 %vm505_vm0, %v3526_v7  ;;  %v3504_v15 = vmul.f32 %v10216_v4, %v8912_v28 }
 0xc8f   : > { %8987 = vmatpush3.bf16.xpose.msra.mxu0 %v3924_v48  ;;  %v8914_v49 = vpop.f32.mrf.mxu1 }
 0xc90   : > { %v8915_v50 = vadd.f32 %v8914_v49, %v8913_v41  ;;  %9662 = vmatprep.subr.bf16.mxu0 %v12909_v45  ;;  %v10230_v41 = vpop.eup %10229 }
 0xc91   : > { %v8916_v0 = vpop.f32.mrf.mxu1  ;;  %v12918_v33 = vpop.permute.xlu0 %3809 }
 0xc92   : > { %v3505_v17 = vmul.f32 %v10218_v55, %v8915_v50  ;;  %v12920_v24 = vpop.permute.xlu1 %3803 }
 0xc93   : > { %v8917_v19 = vpop.f32.mrf.mxu1 }
 0xc94   : > { %v3527_v13 = vpack.c.bf16 %v3505_v17, %v3504_v15  ;;  %v8918_v43 = vadd.f32 %v8917_v19, %v8916_v0 }
 0xc95   : > { %v8919_v52 = vpop.f32.mrf.mxu1  ;;  %v12924_v40 = vpop.permute.xlu0 %3813 }
 0xc96   : > { %v12926_v57 = vpop.permute.xlu1 %3807  ;;  %9647 = vmatmul.mubr.msk.bf16.gmra.mxu0 %vm505_vm0, %v3527_v13  ;;  %v3506_v3 = vmul.f32 %v10220_v36, %v8918_v43  ;;  %v10232_v13 = vpop.eup %10231 }
 0xc97   : > { %v8920_v26 = vpop.f32.mrf.mxu1  ;;  %v10234_v43 = vpop.eup %10233 }
 0xc98   : > { %v8921_v1 = vadd.f32 %v8920_v26, %v8919_v52 }
 0xc99   : > { %v8922_v10 = vpop.f32.mrf.mxu1  ;;  %v12929_v14 = vpop.permute.xlu0 %3817 }
 0xc9a   : > { %v3507_v25 = vmul.f32 %v10222_v44, %v8921_v1  ;;  %v12931_v60 = vpop.permute.xlu1 %3811 }
 0xc9b   : > { %v8923_v5 = vpop.f32.mrf.mxu1 }
 0xc9c   : > { %v3528_v63 = vpack.c.bf16 %v3507_v25, %v3506_v3  ;;  %v8924_v59 = vadd.f32 %v8923_v5, %v8922_v10 }
 0xc9d   : > { %v8925_v27 = vpop.f32.mrf.mxu1  ;;  %v12935_v37 = vpop.permute.xlu0 %3821 }
 0xc9e   : > { %v12937_v47 = vpop.permute.xlu1 %3815  ;;  %9650 = vmatprep.mubr.msk.bf16.mxu0 %vm505_vm0, %v3528_v63  ;;  %v3508_v51 = vmul.f32 %v10224_v9, %v8924_v59  ;;  %v10236_v59 = vpop.eup %10235 }
 0xc9f   : > { %v8926_v21 = vpop.f32.mrf.mxu1  ;;  %v10238_v9 = vpop.eup %10237 }
 0xca0   : > { %v8927_v6 = vadd.f32 %v8926_v21, %v8925_v27 }
 0xca1   : > { %v8928_v11 = vpop.f32.mrf.mxu1  ;;  %v12940_v61 = vpop.permute.xlu0 %3825 }
 0xca2   : > { %v3509_v23 = vmul.f32 %v10226_v42, %v8927_v6  ;;  %v12942_v16 = vpop.permute.xlu1 %3819 }
 0xca3   : > { %v8929_v18 = vpop.f32.mrf.mxu1 }
 0xca4   : > { %v3529_v35 = vpack.c.bf16 %v3509_v23, %v3508_v51  ;;  %v8930_v12 = vadd.f32 %v8929_v18, %v8928_v11 }
 0xca5   : > { %v8931_v39 = vpop.f32.mrf.mxu1  ;;  %v4627_v58 = vpop.permute.xlu0 %4626 }
 0xca6   : > { %v12946_v31 = vpop.permute.xlu1 %3823  ;;  %9651 = vmatmul.mubr.msk.bf16.gmra.mxu0 %vm505_vm0, %v3529_v35  ;;  %9020 = vmatprep.subr.bf16.mxu1 %v4627_v58  ;;  %v3510_v49 = vmul.f32 %v10228_v2, %v8930_v12  ;;  %v10240_v12 = vpop.eup %10239 }
 0xca7   : > { %v8932_v22 = vpop.f32.mrf.mxu1 }
 0xca8   : > { %v8933_v7 = vadd.f32 %v8932_v22, %v8931_v39 }
 0xca9   : > { %v8934_v48 = vpop.f32.mrf.mxu1  ;;  %v4609_v28 = vpop.permute.xlu0 %4608 }
 0xcaa   : > { %v3511_v29 = vmul.f32 %v10230_v41, %v8933_v7  ;;  %v4611_v4 = vpop.permute.xlu1 %4610  ;;  %v10242_v7 = vpop.eup %10241 }
 0xcab   : > { %9021 = vmatpush3.bf16.msra.mxu1 %v4611_v4  ;;  %v8935_v53 = vpop.f32.mrf.mxu1  ;;  %v16161_v4 = vld [vmem:[#allocation34_spill] sm:$0xff] }
 0xcac   : > { %v3530_v50 = vpack.c.bf16 %v3511_v29, %v3510_v49  ;;  %v8936_v15 = vadd.f32 %v8935_v53, %v8934_v48  ;;  %v9900_v29 = vld [vmem:[%s15715_s8 + $0x30] sm:$0xff]   ;;  %v1737_v53 = vsub.s32 5, %v16161_v4 }
 0xcad   : > { %v8937_v55 = vpop.f32.mrf.mxu1  ;;  %v4623_v0 = vpop.permute.xlu0 %4622 }
 0xcae   : > { %v4625_v17 = vpop.permute.xlu1 %4624  ;;  %9654 = vmatprep.mubr.msk.bf16.mxu0 %vm505_vm0, %v3530_v50  ;;  %v3512_v36 = vmul.f32 %v10232_v13, %v8936_v15  ;;  %v9901_v50 = vld [vmem:[%s15715_s8 + $0x28] sm:$0xff]   ;;  %v16163_v15 = vld [vmem:[#allocation153_spill] sm:$0xff] }
 0xcaf   : > { %9022 = vmatprep.subr.bf16.mxu1 %v4625_v17  ;;  %v8938_v19 = vpop.f32.mrf.mxu1 }
 0xcb0   : > { %v8939_v52 = vadd.f32 %v8938_v19, %v8937_v55  ;;  %9023 = vmatpush3.bf16.msra.mxu1 %v4609_v28  ;;  %v12974_v55 = vld [vmem:[%s15714_s7] sm:$0x3f] }
 0xcb1   : > { %9024 = vmatprep.subr.bf16.mxu1 %v4623_v0  ;;  %v8940_v26 = vpop.f32.mrf.mxu1  ;;  %v4605_v30 = vpop.permute.xlu0 %4604 }
 0xcb2   : > { %v3513_v1 = vmul.f32 %v10234_v43, %v8939_v52  ;;  %v4607_v44 = vpop.permute.xlu1 %4606 }
 0xcb3   : > { %v8941_v56 = vpop.f32.mrf.mxu1 }
 0xcb4   : > { %v3531_v10 = vpack.c.bf16 %v3513_v1, %v3512_v36  ;;  %9025 = vmatpush3.bf16.msra.mxu1 %v4607_v44  ;;  %v8942_v5 = vadd.f32 %v8941_v56, %v8940_v26 }
 0xcb5   : > { %v8943_v3 = vpop.f32.mrf.mxu1  ;;  %v4619_v25 = vpop.permute.xlu0 %4618 }
 0xcb6   : > { %v4621_v63 = vpop.permute.xlu1 %4620  ;;  %9655 = vmatmul.mubr.msk.bf16.gmra.mxu0 %vm505_vm0, %v3531_v10  ;;  %v3514_v20 = vmul.f32 %v10236_v59, %v8942_v5 }
 0xcb7   : > { %9026 = vmatprep.subr.bf16.mxu1 %v4621_v63  ;;  %v8944_v27 = vpop.f32.mrf.mxu1 }
 0xcb8   : > { %v8945_v21 = vadd.f32 %v8944_v27, %v8943_v3  ;;  %9027 = vmatpush3.bf16.msra.mxu1 %v4605_v30 }
 0xcb9   : > { %9028 = vmatprep.subr.bf16.mxu1 %v4619_v25  ;;  %v8946_v6 = vpop.f32.mrf.mxu1  ;;  %v4601_v11 = vpop.permute.xlu0 %4600 }
 0xcba   : > { %v3515_v42 = vmul.f32 %v10238_v9, %v8945_v21  ;;  %v4603_v62 = vpop.permute.xlu1 %4602 }
 0xcbb   : > { %v8947_v51 = vpop.f32.mrf.mxu1 }
 0xcbc   : > { %v3532_v23 = vpack.c.bf16 %v3515_v42, %v3514_v20  ;;  %9029 = vmatpush3.bf16.msra.mxu1 %v4603_v62  ;;  %v8948_v35 = vadd.f32 %v8947_v51, %v8946_v6 }
 0xcbd   : > { %v8949_v18 = vpop.f32.mrf.mxu1  ;;  %v4615_v22 = vpop.permute.xlu0 %4614 }
 0xcbe   : > { %v4617_v39 = vpop.permute.xlu1 %4616  ;;  %9658 = vmatprep.mubr.msk.bf16.mxu0 %vm505_vm0, %v3532_v23  ;;  %v3516_v41 = vmul.f32 %v10240_v12, %v8948_v35 }
 0xcbf   : > { %9030 = vmatprep.subr.bf16.mxu1 %v4617_v39  ;;  %v8950_v58 = vpop.f32.mrf.mxu1 }
 0xcc0   : > { %v8951_v2 = vadd.f32 %v8950_v58, %v8949_v18  ;;  %9031 = vmatpush3.bf16.msra.mxu1 %v4601_v11 }
 0xcc1   : > { %9032 = vmatprep.subr.bf16.mxu1 %v4615_v22 }
 0xcc2   : > { %v3517_v48 = vmul.f32 %v10242_v7, %v8951_v2  ;;  %v4599_v28 = vpop.permute.xlu1 %4598 }
 0xcc4   : > { %v3533_v49 = vpack.c.bf16 %v3517_v48, %v3516_v41  ;;  %9033 = vmatpush3.bf16.msra.mxu1 %v4599_v28 }
 0xcc6   : > { %9659 = vmatmul.mubr.msk.bf16.gmra.mxu0 %vm505_vm0, %v3533_v49 }
 0xcc7   : > { %8988 = vmatprep.mubr.msk.bf16.mxu0 %vm505_vm0, %v12902_v38 }
 0xcce   : > { %8989 = vmatmul.mubr.msk.bf16.vlgmr.msra.gmra.mxu0 %vm505_vm0, %v12902_v38  ;;  %v12977_v38 = vrot.slane %v12974_v55, %v1737_v53 }
 0xccf   : > { %9663 = vmatpush3.bf16.msra.mxu0 %v12909_v45  ;;  %8990 = vmatprep.mubr.msk.bf16.mxu0 %vm505_vm0, %v12894_v46  ;;  %v9902_v45 = vld [vmem:[%s15715_s8 + $0x20] sm:$0xff]  }
 0xcd0   : > { %9664 = vmatprep.subr.bf16.mxu0 %v9900_v29  ;;  %16162 = vst [vmem:[#allocation161_spill] sm:$0xff] %v12977_v38  ;;  %v2490_v0 = vadd.f32 %v12805_v54, %v12977_v38  ;;  %v2486_v17 = vadd.f32 %v16163_v15, %v12977_v38 }
 0xcd2   : > { %v12990_v19 = vpack.c.bf16 %v2490_v0, %v2486_v17 }
 0xcd3   : > { %9665 = vmatpush3.bf16.msra.mxu0 %v9900_v29 }
 0xcd4   : > { %9666 = vmatprep.subr.bf16.mxu0 %v9901_v50  ;;  %16164 = vst [vmem:[#allocation162_spill] sm:$0xff] %v12990_v19 }
 0xcd6   : > { %8991 = vmatmul.mubr.msk.bf16.gmra.mxu0 %vm505_vm0, %v12894_v46 }
 0xcd7   : > { %9667 = vmatpush3.bf16.msra.mxu0 %v9901_v50  ;;  %8992 = vmatprep.mubr.msk.bf16.mxu0 %vm505_vm0, %v12914_v8 }
 0xcd8   : > { %9668 = vmatprep.subr.bf16.mxu0 %v9902_v45 }
 0xcdb   : > { %9669 = vmatpush3.bf16.msra.mxu0 %v9902_v45 }
 0xcdc   : > { %9200 = vmatprep.subr.bf16.mxu0 %v12990_v19 }
 0xcde   : > { %8993 = vmatmul.mubr.msk.bf16.gmra.mxu0 %vm505_vm0, %v12914_v8 }
 0xcdf   : > { %8994 = vmatprep.mubr.msk.bf16.mxu0 %vm505_vm0, %v12900_v32 }
 0xce6   : > { %8995 = vmatmul.mubr.msk.bf16.gmra.mxu0 %vm505_vm0, %v12900_v32 }
 0xce7   : > { %8996 = vmatprep.mubr.msk.bf16.mxu0 %vm505_vm0, %v12920_v24 }
 0xcee   : > { %8997 = vmatmul.mubr.msk.bf16.gmra.mxu0 %vm505_vm0, %v12920_v24 }
 0xcef   : > { %8998 = vmatprep.mubr.msk.bf16.mxu0 %vm505_vm0, %v12911_v34 }
 0xcf6   : > { %8999 = vmatmul.mubr.msk.bf16.gmra.mxu0 %vm505_vm0, %v12911_v34 }
 0xcf7   : > { %9000 = vmatprep.mubr.msk.bf16.mxu0 %vm505_vm0, %v12926_v57 }
 0xcfe   : > { %9001 = vmatmul.mubr.msk.bf16.gmra.mxu0 %vm505_vm0, %v12926_v57 }
 0xcff   : > { %9002 = vmatprep.mubr.msk.bf16.mxu0 %vm505_vm0, %v12918_v33 }
 0xd06   : > { %9003 = vmatmul.mubr.msk.bf16.gmra.mxu0 %vm505_vm0, %v12918_v33 }
 0xd07   : > { %9004 = vmatprep.mubr.msk.bf16.mxu0 %vm505_vm0, %v12931_v60 }
 0xd0e   : > { %9005 = vmatmul.mubr.msk.bf16.gmra.mxu0 %vm505_vm0, %v12931_v60 }
 0xd0f   : > { %9006 = vmatprep.mubr.msk.bf16.mxu0 %vm505_vm0, %v12924_v40 }
 0xd16   : > { %9007 = vmatmul.mubr.msk.bf16.gmra.mxu0 %vm505_vm0, %v12924_v40  ;;  %v13029_v54 = vpop.f32.mrf.mxu0 }
 0xd17   : > { %9008 = vmatprep.mubr.msk.bf16.mxu0 %vm505_vm0, %v12937_v47  ;;  %16165 = vst [vmem:[#allocation163_spill] sm:$0xff] %v13029_v54 }
 0xd18   : > { %v13035_v46 = vpop.f32.mrf.mxu0 }
 0xd19   : > { %16166 = vst [vmem:[#allocation164_spill] sm:$0xff] %v13035_v46 }
 0xd1a   : > { %v13037_v32 = vpop.f32.mrf.mxu0 }
 0xd1b   : > { %16167 = vst [vmem:[#allocation165_spill] sm:$0xff] %v13037_v32 }
 0xd1c   : > { %v13043_v34 = vpop.f32.mrf.mxu0 }
 0xd1d   : > { %16168 = vst [vmem:[#allocation166_spill] sm:$0xff] %v13043_v34 }
 0xd1e   : > { %9009 = vmatmul.mubr.msk.bf16.gmra.mxu0 %vm505_vm0, %v12937_v47 }
 0xd1f   : > { %9010 = vmatprep.mubr.msk.bf16.mxu0 %vm505_vm0, %v12929_v14 }
 0xd26   : > { %9011 = vmatmul.mubr.msk.bf16.gmra.mxu0 %vm505_vm0, %v12929_v14  ;;  %v13045_v8 = vpop.f32.mrf.mxu0 }
 0xd27   : > { %9012 = vmatprep.mubr.msk.bf16.mxu0 %vm505_vm0, %v12942_v16  ;;  %16169 = vst [vmem:[#allocation167_spill] sm:$0xff] %v13045_v8 }
 0xd28   : > { %v13047_v33 = vpop.f32.mrf.mxu0 }
 0xd29   : > { %16170 = vst [vmem:[#allocation168_spill] sm:$0xff] %v13047_v33 }
 0xd2a   : > { %v13053_v24 = vpop.f32.mrf.mxu0 }
 0xd2b   : > { %16171 = vst [vmem:[#allocation169_spill] sm:$0xff] %v13053_v24 }
 0xd2c   : > { %v13055_v40 = vpop.f32.mrf.mxu0 }
 0xd2d   : > { %16172 = vst [vmem:[#allocation170_spill] sm:$0xff] %v13055_v40 }
 0xd2e   : > { %9013 = vmatmul.mubr.msk.bf16.gmra.mxu0 %vm505_vm0, %v12942_v16 }
 0xd2f   : > { %9014 = vmatprep.mubr.msk.bf16.mxu0 %vm505_vm0, %v12935_v37 }
 0xd36   : > { %9015 = vmatmul.mubr.msk.bf16.gmra.mxu0 %vm505_vm0, %v12935_v37  ;;  %v13061_v57 = vpop.f32.mrf.mxu0 }
 0xd37   : > { %9016 = vmatprep.mubr.msk.bf16.mxu0 %vm505_vm0, %v12946_v31  ;;  %16173 = vst [vmem:[#allocation171_spill] sm:$0xff] %v13061_v57 }
 0xd38   : > { %v13063_v14 = vpop.f32.mrf.mxu0 }
 0xd39   : > { %16174 = vst [vmem:[#allocation172_spill] sm:$0xff] %v13063_v14 }
 0xd3a   : > { %v13067_v60 = vpop.f32.mrf.mxu0 }
 0xd3b   : > { %16175 = vst [vmem:[#allocation173_spill] sm:$0xff] %v13067_v60 }
 0xd3c   : > { %v13069_v37 = vpop.f32.mrf.mxu0 }
 0xd3d   : > { %16176 = vst [vmem:[#allocation174_spill] sm:$0xff] %v13069_v37 }
 0xd3e   : > { %9017 = vmatmul.mubr.msk.bf16.gmra.mxu0 %vm505_vm0, %v12946_v31 }
 0xd3f   : > { %9018 = vmatprep.mubr.msk.bf16.mxu0 %vm505_vm0, %v12940_v61 }
 0xd46   : > { %9019 = vmatmul.mubr.msk.bf16.gmra.mxu0 %vm505_vm0, %v12940_v61  ;;  %v13071_v47 = vpop.f32.mrf.mxu0 }
 0xd47   : > { %16177 = vst [vmem:[#allocation175_spill] sm:$0xff] %v13071_v47 }
 0xd48   : > { %v13073_v16 = vpop.f32.mrf.mxu0 }
 0xd49   : > { %16178 = vst [vmem:[#allocation176_spill] sm:$0xff] %v13073_v16 }
 0xd4a   : > { %v13075_v13 = vpop.f32.mrf.mxu0 }
 0xd4b   : > { %16179 = vst [vmem:[#allocation177_spill] sm:$0xff] %v13075_v13 }
 0xd4c   : > { %v13077_v31 = vpop.f32.mrf.mxu0 }
 0xd4d   : > { %16180 = vst [vmem:[#allocation178_spill] sm:$0xff] %v13077_v31 }
 0xd56   : > { %v13079_v52 = vpop.f32.mrf.mxu0 }
 0xd57   : > { %16181 = vst [vmem:[#allocation179_spill] sm:$0xff] %v13079_v52 }
 0xd58   : > { %v13081_v43 = vpop.f32.mrf.mxu0 }
 0xd59   : > { %16182 = vst [vmem:[#allocation180_spill] sm:$0xff] %v13081_v43 }
 0xd5a   : > { %v13083_v26 = vpop.f32.mrf.mxu0 }
 0xd5b   : > { %16183 = vst [vmem:[#allocation181_spill] sm:$0xff] %v13083_v26 }
 0xd5c   : > { %v13085_v30 = vpop.f32.mrf.mxu0 }
 0xd5d   : > { %16184 = vst [vmem:[#allocation182_spill] sm:$0xff] %v13085_v30 }
 0xd66   : > { %v13087_v61 = vpop.f32.mrf.mxu0 }
 0xd67   : > { %16185 = vst [vmem:[#allocation183_spill] sm:$0xff] %v13087_v61 }
 0xd68   : > { %v13089_v36 = vpop.f32.mrf.mxu0 }
 0xd69   : > { %16186 = vst [vmem:[#allocation184_spill] sm:$0xff] %v13089_v36 }
 0xd6a   : > { %v13091_v1 = vpop.f32.mrf.mxu0 }
 0xd6b   : > { %16187 = vst [vmem:[#allocation39_spill] sm:$0xff] %v13091_v1 }
 0xd6c   : > { %v13093_v44 = vpop.f32.mrf.mxu0 }
 0xd6d   : > { %16188 = vst [vmem:[#allocation78_spill] sm:$0xff] %v13093_v44 }
 0xd76   : > { %v13095_v56 = vpop.f32.mrf.mxu0 }
 0xd77   : > { %16189 = vst [vmem:[#allocation38_spill] sm:$0xff] %v13095_v56 }
 0xd78   : > { %v13097_v10 = vpop.f32.mrf.mxu0 }
 0xd79   : > { %16190 = vst [vmem:[#allocation43_spill] sm:$0xff] %v13097_v10 }
 0xd7a   : > { %v13099_v3 = vpop.f32.mrf.mxu0 }
 0xd7b   : > { %16191 = vst [vmem:[#allocation47_spill] sm:$0xff] %v13099_v3 }
 0xd7c   : > { %v13101_v25 = vpop.f32.mrf.mxu0 }
 0xd7d   : > { %16192 = vst [vmem:[#allocation51_spill] sm:$0xff] %v13101_v25  ;;  %v16198_v25 = vld [vmem:[#allocation115_spill] sm:$0xff] }
 0xd86   : > { %v13103_v5 = vpop.f32.mrf.mxu0 }
 0xd87   : > { %16193 = vst [vmem:[#allocation57_spill] sm:$0xff] %v13103_v5 }
 0xd88   : > { %v13105_v63 = vpop.f32.mrf.mxu0 }
 0xd89   : > { %16194 = vst [vmem:[#allocation62_spill] sm:$0xff] %v13105_v63 }
 0xd8a   : > { %v13107_v27 = vpop.f32.mrf.mxu0 }
 0xd8b   : > { %16195 = vst [vmem:[#allocation67_spill] sm:$0xff] %v13107_v27 }
 0xd8c   : > { %v13109_v59 = vpop.f32.mrf.mxu0 }
 0xd8d   : > { %16196 = vst [vmem:[#allocation72_spill] sm:$0xff] %v13109_v59 }
 0xd8e   : > { %v13111_v21 = vpop.f32.mrf.mxu0 }
 0xd90   : > { %v13113_v9 = vpop.f32.mrf.mxu0 }
 0xd91   : > { %v4164_v6 = vmax.f32 %v13111_v21, %v13113_v9 }
 0xd92   : > { %v13117_v20 = vpop.f32.mrf.mxu0 }
 0xd93   : > { %4165 = vmax.xlane.f32.xlu1 %v4164_v6 }
 0xd94   : > { %v13119_v42 = vpop.f32.mrf.mxu0 }
 0xd95   : > { %v4167_v11 = vmax.f32 %v13117_v20, %v13119_v42 }
 0xd96   : > { %v13123_v62 = vpop.f32.mrf.mxu0 }
 0xd97   : > { %4168 = vmax.xlane.f32.xlu0 %v4167_v11 }
 0xd98   : > { %v13125_v51 = vpop.f32.mrf.mxu0 }
 0xd99   : > { %v4170_v23 = vmax.f32 %v13123_v62, %v13125_v51 }
 0xd9a   : > { %v13129_v18 = vpop.f32.mrf.mxu0 }
 0xd9b   : > { %4171 = vmax.xlane.f32.xlu1 %v4170_v23 }
 0xd9c   : > { %v13131_v35 = vpop.f32.mrf.mxu0 }
 0xd9d   : > { %v4173_v39 = vmax.f32 %v13129_v18, %v13131_v35 }
 0xd9e   : > { %v13135_v58 = vpop.f32.mrf.mxu0 }
 0xd9f   : > { %4174 = vmax.xlane.f32.xlu0 %v4173_v39  ;;  %v16197_v39 = vld [vmem:[#allocation139_spill] sm:$0xff] }
 0xda0   : > { %v13137_v12 = vpop.f32.mrf.mxu0 }
 0xda1   : > { %v4176_v22 = vmax.f32 %v13135_v58, %v13137_v12 }
 0xda2   : > { %v13141_v2 = vpop.f32.mrf.mxu0 }
 0xda3   : > { %4177 = vmax.xlane.f32.xlu1 %v4176_v22 }
 0xda4   : > { %v13143_v7 = vpop.f32.mrf.mxu0 }
 0xda5   : > { %v4179_v41 = vmax.f32 %v13141_v2, %v13143_v7 }
 0xda6   : > { %v13147_v48 = vpop.f32.mrf.mxu0 }
 0xda7   : > { %4180 = vmax.xlane.f32.xlu0 %v4179_v41 }
 0xda8   : > { %v13149_v28 = vpop.f32.mrf.mxu0 }
 0xda9   : > { %v4182_v49 = vmax.f32 %v13147_v48, %v13149_v28 }
 0xdaa   : > { %v13153_v29 = vpop.f32.mrf.mxu0 }
 0xdab   : > { %4183 = vmax.xlane.f32.xlu1 %v4182_v49 }
 0xdac   : > { %v13155_v53 = vpop.f32.mrf.mxu0 }
 0xdad   : > { %v4185_v50 = vmax.f32 %v13153_v29, %v13155_v53 }
 0xdae   : > { %v13159_v45 = vpop.f32.mrf.mxu0 }
 0xdaf   : > { %4186 = vmax.xlane.f32.xlu0 %v4185_v50 }
 0xdb0   : > { %v13161_v0 = vpop.f32.mrf.mxu0 }
 0xdb1   : > { %v4188_v3 = vmax.f32 %v13159_v45, %v13161_v0 }
 0xdb2   : > { %v13163_v15 = vpop.f32.mrf.mxu0 }
 0xdb4   : > { %v13165_v17 = vpop.f32.mrf.mxu0 }
 0xdb5   : > { %v4191_v1 = vmax.f32 %v13163_v15, %v13165_v17 }
 0xdb6   : > { %v13167_v6 = vpop.f32.mrf.mxu0 }
 0xdb8   : > { %v13169_v11 = vpop.f32.mrf.mxu0 }
 0xdb9   : > { %v4194_v43 = vmax.f32 %v13167_v6, %v13169_v11 }
 0xdba   : > { %v13171_v23 = vpop.f32.mrf.mxu0 }
 0xdbc   : > { %4612 = vrot.lane.b32.xlu1 %v16197_v39, %s10897_s16  ;;  %v13175_v22 = vpop.f32.mrf.mxu0 }
 0xdbd   : > { %v4197_v36 = vmax.f32 %v13171_v23, %v13175_v22 }
 0xdbe   : > { %v13177_v41 = vpop.f32.mrf.mxu0 }
 0xdc0   : > { %v13179_v49 = vpop.f32.mrf.mxu0 }
 0xdc1   : > { %v4200_v16 = vmax.f32 %v13177_v41, %v13179_v49 }
 0xdc2   : > { %v13181_v50 = vpop.f32.mrf.mxu0 }
 0xdc4   : > { %v13183_v59 = vpop.f32.mrf.mxu0 }
 0xdc5   : > { %4596 = vrot.lane.b32.xlu0 %v16198_v25, %s10897_s16 }
 0xdc6   : > { %v13187_v44 = vpop.f32.mrf.mxu0 }
 0xdc8   : > { %v13189_v30 = vpop.f32.mrf.mxu0 }
 0xdc9   : > { %v4206_v60 = vmax.f32 %v13187_v44, %v13189_v30 }
 0xdca   : > { %v13191_v31 = vpop.f32.mrf.mxu0 }
 0xdcc   : > { %v13193_v39 = vpop.f32.mrf.mxu0 }
 0xdce   : > { %v13195_v37 = vpop.f32.mrf.mxu0 }
 0xdd0   : > { %v13197_v40 = vpop.f32.mrf.mxu0 }
 0xdd1   : > { %v4212_v57 = vmax.f32 %v13195_v37, %v13197_v40 }
 0xdd2   : > { %v13199_v34 = vpop.f32.mrf.mxu0 }
 0xdd4   : > { %v13201_v19 = vpop.f32.mrf.mxu0 }
 0xdd6   : > { %v13203_v27 = vpop.f32.mrf.mxu0 }
 0xdd8   : > { %v13205_v63 = vpop.f32.mrf.mxu0 }
 0xdd9   : > { %v4218_v33 = vmax.f32 %v13203_v27, %v13205_v63 }
 0xdda   : > { %v13207_v25 = vpop.f32.mrf.mxu0 }
 0xddc   : > { %v13209_v5 = vpop.f32.mrf.mxu0 }
 0xdde   : > { %v13213_v10 = vpop.f32.mrf.mxu0 }
 0xddf   : > { %16199 = vst [vmem:[#allocation77_spill] sm:$0xff] %v13213_v10 }
 0xde0   : > { %4189 = vmax.xlane.f32.xlu1 %v4188_v3  ;;  %v13215_v56 = vpop.f32.mrf.mxu0  ;;  %v4203_v3 = vmax.f32 %v13181_v50, %v13183_v59 }
 0xde1   : > { %16200 = vst [vmem:[#allocation83_spill] sm:$0xff] %v13215_v56  ;;  %v4224_v32 = vmax.f32 %v13213_v10, %v13215_v56 }
 0xde2   : > { %v13221_v61 = vpop.f32.mrf.mxu0 }
 0xde4   : > { %4192 = vmax.xlane.f32.xlu0 %v4191_v1  ;;  %4198 = vmax.xlane.f32.xlu1 %v4197_v36  ;;  %v13223_v26 = vpop.f32.mrf.mxu0  ;;  %v4209_v36 = vmax.f32 %v13191_v31, %v13193_v39 }
 0xde6   : > { %v13229_v52 = vpop.f32.mrf.mxu0 }
 0xde7   : > { %16201 = vst [vmem:[#allocation88_spill] sm:$0xff] %v13229_v52 }
 0xde8   : > { %4195 = vmax.xlane.f32.xlu0 %v4194_v43  ;;  %4204 = vmax.xlane.f32.xlu1 %v4203_v3  ;;  %v13231_v13 = vpop.f32.mrf.mxu0  ;;  %v4215_v43 = vmax.f32 %v13199_v34, %v13201_v19 }
 0xde9   : > { %16202 = vst [vmem:[#allocation93_spill] sm:$0xff] %v13231_v13  ;;  %v4230_v54 = vmax.f32 %v13229_v52, %v13231_v13  ;;  %v16229_v52 = vld [vmem:[#allocation100_spill] sm:$0xff] }
 0xdea   : > { %v13237_v1 = vpop.f32.mrf.mxu0 }
 0xdeb   : > { %16203 = vst [vmem:[#allocation98_spill] sm:$0xff] %v13237_v1 }
 0xdec   : > { %4201 = vmax.xlane.f32.xlu0 %v4200_v16  ;;  %4210 = vmax.xlane.f32.xlu1 %v4209_v36  ;;  %v13239_v47 = vpop.f32.mrf.mxu0  ;;  %v4221_v16 = vmax.f32 %v13207_v25, %v13209_v5 }
 0xded   : > { %16204 = vst [vmem:[#allocation103_spill] sm:$0xff] %v13239_v47 }
 0xdee   : > { %v13245_v3 = vpop.f32.mrf.mxu0 }
 0xdef   : > { %16205 = vst [vmem:[#allocation108_spill] sm:$0xff] %v13245_v3 }
 0xdf0   : > { %4207 = vmax.xlane.f32.xlu0 %v4206_v60  ;;  %4216 = vmax.xlane.f32.xlu1 %v4215_v43  ;;  %v13247_v14 = vpop.f32.mrf.mxu0  ;;  %v4227_v60 = vmax.f32 %v13221_v61, %v13223_v26 }
 0xdf1   : > { %16206 = vst [vmem:[#allocation112_spill] sm:$0xff] %v13247_v14 }
 0xdf2   : > { %v13253_v36 = vpop.f32.mrf.mxu0 }
 0xdf3   : > { %16207 = vst [vmem:[#allocation136_spill] sm:$0xff] %v13253_v36 }
 0xdf4   : > { %4213 = vmax.xlane.f32.xlu0 %v4212_v57  ;;  %4222 = vmax.xlane.f32.xlu1 %v4221_v16  ;;  %v13255_v24 = vpop.f32.mrf.mxu0  ;;  %v4233_v57 = vmax.f32 %v13237_v1, %v13239_v47  ;;  %v4236_v47 = vmax.f32 %v13245_v3, %v13247_v14 }
 0xdf5   : > { %16208 = vst [vmem:[#allocation154_spill] sm:$0xff] %v13255_v24 }
 0xdf6   : > { %v13261_v43 = vpop.f32.mrf.mxu0 }
 0xdf7   : > { %16209 = vst [vmem:[#allocation155_spill] sm:$0xff] %v13261_v43 }
 0xdf8   : > { %4219 = vmax.xlane.f32.xlu0 %v4218_v33  ;;  %4228 = vmax.xlane.f32.xlu1 %v4227_v60  ;;  %v13263_v8 = vpop.f32.mrf.mxu0  ;;  %v4239_v33 = vmax.f32 %v13253_v36, %v13255_v24 }
 0xdf9   : > { %16210 = vst [vmem:[#allocation133_spill] sm:$0xff] %v13263_v8 }
 0xdfa   : > { %v13269_v16 = vpop.f32.mrf.mxu0 }
 0xdfb   : > { %16211 = vst [vmem:[#allocation130_spill] sm:$0xff] %v13269_v16 }
 0xdfc   : > { %4225 = vmax.xlane.f32.xlu0 %v4224_v32  ;;  %4234 = vmax.xlane.f32.xlu1 %v4233_v57  ;;  %v13271_v46 = vpop.f32.mrf.mxu0 }
 0xdfd   : > { %16212 = vst [vmem:[#allocation156_spill] sm:$0xff] %v13271_v46  ;;  %v4245_v32 = vmax.f32 %v13269_v16, %v13271_v46 }
 0xdfe   : > { %v13277_v60 = vpop.f32.mrf.mxu0 }
 0xdff   : > { %16213 = vst [vmem:[#allocation157_spill] sm:$0xff] %v13277_v60 }
 0xe00   : > { %4231 = vmax.xlane.f32.xlu0 %v4230_v54  ;;  %4240 = vmax.xlane.f32.xlu1 %v4239_v33  ;;  %v13279_v38 = vpop.f32.mrf.mxu0  ;;  %v4242_v54 = vmax.f32 %v13261_v43, %v13263_v8 }
 0xe01   : > { %16214 = vst [vmem:[#allocation127_spill] sm:$0xff] %v13279_v38  ;;  %v4248_v46 = vmax.f32 %v13277_v60, %v13279_v38  ;;  %v16221_v38 = vld [vmem:[#allocation160_spill] sm:$0xff] }
 0xe02   : > { %v13285_v57 = vpop.f32.mrf.mxu0 }
 0xe03   : > { %16215 = vst [vmem:[#allocation124_spill] sm:$0xff] %v13285_v57 }
 0xe04   : > { %4237 = vmax.xlane.f32.xlu0 %v4236_v47  ;;  %4246 = vmax.xlane.f32.xlu1 %v4245_v32  ;;  %v13287_v13 = vpop.f32.mrf.mxu0 }
 0xe05   : > { %16216 = vst [vmem:[#allocation158_spill] sm:$0xff] %v13287_v13  ;;  %v4251_v24 = vmax.f32 %v13285_v57, %v13287_v13 }
 0xe06   : > { %v13293_v33 = vpop.f32.mrf.mxu0 }
 0xe07   : > { %16217 = vst [vmem:[#allocation159_spill] sm:$0xff] %v13293_v33 }
 0xe08   : > { %4243 = vmax.xlane.f32.xlu0 %v4242_v54  ;;  %4252 = vmax.xlane.f32.xlu1 %v4251_v24  ;;  %v13295_v14 = vpop.f32.mrf.mxu0  ;;  %v1729_v24 = vsub.s32 3, %v16161_v4 }
 0xe09   : > { %16218 = vst [vmem:[#allocation121_spill] sm:$0xff] %v13295_v14  ;;  %v4254_v13 = vmax.f32 %v13293_v33, %v13295_v14 }
 0xe0a   : > { %v13299_v16 = vpop.f32.mrf.mxu0  ;;  %v13309_v54 = vrot.slane %v12974_v55, %v1729_v24  ;;  %v16225_v55 = vld [vmem:[#allocation105_spill] sm:$0xff] }
 0xe0b   : > { %16219 = vst [vmem:[#allocation118_spill] sm:$0xff] %v13299_v16 }
 0xe0c   : > { %4249 = vmax.xlane.f32.xlu0 %v4248_v46  ;;  %v13301_v47 = vpop.f32.mrf.mxu0  ;;  %v2297_v60 = vadd.f32 %v16221_v38, %v13309_v54  ;;  %v16222_v46 = vld [vmem:[#allocation110_spill] sm:$0xff]  ;;  %v2273_v1 = vadd.f32 %v16229_v52, %v13309_v54  ;;  %v16232_v52 = vld [vmem:[#allocation61_spill] sm:$0xff] }
 0xe0d   : > { %16220 = vst [vmem:[#allocation142_spill] sm:$0xff] %v13301_v47  ;;  %v4257_v32 = vmax.f32 %v13299_v16, %v13301_v47  ;;  %v2293_v57 = vadd.f32 %v16222_v46, %v13309_v54  ;;  %v16223_v47 = vld [vmem:[#allocation107_spill] sm:$0xff] }
 0xe0e   : > { %v2287_v16 = vadd.f32 %v16223_v47, %v13309_v54  ;;  %v16227_v47 = vld [vmem:[#allocation102_spill] sm:$0xff] }
 0xe0f   : > { %4258 = vmax.xlane.f32.xlu1 %v4257_v32  ;;  %v13318_v14 = vpack.c.bf16 %v2297_v60, %v2293_v57  ;;  %v2283_v32 = vadd.f32 %v16225_v55, %v13309_v54  ;;  %v2277_v60 = vadd.f32 %v16227_v47, %v13309_v54 }
 0xe10   : > { %4255 = vmax.xlane.f32.xlu0 %v4254_v13  ;;  %v16224_v13 = vld [vmem:[#allocation71_spill] sm:$0xff] }
 0xe11   : > { %v2217_v4 = vadd.f32 %v16224_v13, %v13309_v54  ;;  %v13331_v57 = vpack.c.bf16 %v2287_v16, %v2283_v32  ;;  %v16228_v13 = vld [vmem:[#allocation66_spill] sm:$0xff]  ;;  %v13345_v32 = vpack.c.bf16 %v2277_v60, %v2273_v1  ;;  %v16235_v60 = vld [vmem:[#allocation59_spill] sm:$0xff] }
 0xe12   : > { %v2207_v36 = vadd.f32 %v16228_v13, %v13309_v54  ;;  %v16233_v13 = vld [vmem:[#allocation95_spill] sm:$0xff] }
 0xe1c   : > { %v4166_v8 = vpop.xlane.xlu1 %4165 }
 0xe1d   : > { %v4261_v43 = vsub.f32 %v13113_v9, %v4166_v8  ;;  %v16226_v9 = vld [vmem:[#allocation69_spill] sm:$0xff] }
 0xe1e   : > { %v2213_v33 = vadd.f32 %v16226_v9, %v13309_v54  ;;  %v16231_v9 = vld [vmem:[#allocation97_spill] sm:$0xff] }
 0xe1f   : > { %v4326_v38 = vmul.f32 1.442695, %v4261_v43  ;;  %v2267_v16 = vadd.f32 %v16231_v9, %v13309_v54 }
 0xe20   : > { %v4169_v24 = vpop.xlane.xlu0 %4168  ;;  %6473 = vrot.lane.b32.xlu1 %v13318_v14, %s10897_s16  ;;  %v13335_v55 = vpack.c.bf16 %v2217_v4, %v2213_v33  ;;  %v2197_v4 = vadd.f32 %v16232_v52, %v13309_v54 }
 0xe21   : > { %v4263_v46 = vsub.f32 %v13119_v42, %v4169_v24  ;;  %v16230_v42 = vld [vmem:[#allocation64_spill] sm:$0xff]  ;;  %10243 = vpow2.f32 %v4326_v38  ;;  %v2263_v38 = vadd.f32 %v16233_v13, %v13309_v54 }
 0xe22   : > { %v2203_v43 = vadd.f32 %v16230_v42, %v13309_v54  ;;  %v4260_v42 = vsub.f32 %v13111_v21, %v4166_v8  ;;  %v16236_v21 = vld [vmem:[#allocation49_spill] sm:$0xff] }
 0xe23   : > { %v4330_v3 = vmul.f32 1.442695, %v4263_v46  ;;  %v4262_v46 = vsub.f32 %v13117_v20, %v4169_v24  ;;  %v2173_v13 = vadd.f32 %v16236_v21, %v13309_v54 }
 0xe24   : > { %6471 = vrot.lane.b32.xlu1 %v13331_v57, %s10897_s16  ;;  %v4172_v33 = vpop.xlane.xlu1 %4171  ;;  %v13352_v47 = vpack.c.bf16 %v2207_v36, %v2203_v43  ;;  %v2193_v36 = vadd.f32 %v16235_v60, %v13309_v54  ;;  %v13365_v43 = vpack.c.bf16 %v2267_v16, %v2263_v38  ;;  %v4324_v10 = vmul.f32 1.442695, %v4260_v42 }
 0xe25   : > { %10245 = vpow2.f32 %v4330_v3  ;;  %v4265_v20 = vsub.f32 %v13125_v51, %v4172_v33  ;;  %v16234_v3 = vld [vmem:[#allocation50_spill] sm:$0xff]  ;;  %v4328_v52 = vmul.f32 1.442695, %v4262_v46  ;;  %v16237_v51 = vld [vmem:[#allocation56_spill] sm:$0xff]  ;;  %v4264_v42 = vsub.f32 %v13123_v62, %v4172_v33 }
 0xe26   : > { %6457 = vrot.lane.b32.xlu0 %v13335_v55, %s10897_s16  ;;  %v2177_v24 = vadd.f32 %v16234_v3, %v13309_v54  ;;  %v2187_v56 = vadd.f32 %v16237_v51, %v13309_v54  ;;  %v16238_v46 = vld [vmem:[#allocation54_spill] sm:$0xff] }
 0xe27   : > { %v4334_v3 = vmul.f32 1.442695, %v4265_v20  ;;  %v2183_v38 = vadd.f32 %v16238_v46, %v13309_v54  ;;  %10247 = vpow2.f32 %v4328_v52  ;;  %v4332_v52 = vmul.f32 1.442695, %v4264_v42 }
 0xe28   : > { %v4175_v9 = vpop.xlane.xlu0 %4174  ;;  %6469 = vrot.lane.b32.xlu1 %v13345_v32, %s10897_s16  ;;  %v13377_v16 = vpack.c.bf16 %v2177_v24, %v2173_v13 }
 0xe29   : > { %v4267_v1 = vsub.f32 %v13131_v35, %v4175_v9  ;;  %v13373_v35 = vpack.c.bf16 %v2197_v4, %v2193_v36  ;;  %v13384_v4 = vpack.c.bf16 %v2187_v56, %v2183_v38 }
 0xe2a   : > { %6455 = vrot.lane.b32.xlu0 %v13352_v47, %s10897_s16 }
 0xe2b   : > { %v4338_v8 = vmul.f32 1.442695, %v4267_v1  ;;  %v4266_v1 = vsub.f32 %v13129_v18, %v4175_v9 }
 0xe2c   : > { %6467 = vrot.lane.b32.xlu1 %v13365_v43, %s10897_s16  ;;  %v4178_v60 = vpop.xlane.xlu1 %4177 }
 0xe2d   : > { %10249 = vpow2.f32 %v4338_v8  ;;  %v4269_v20 = vsub.f32 %v13137_v12, %v4178_v60  ;;  %v4336_v9 = vmul.f32 1.442695, %v4266_v1 }
 0xe2e   : > { %6453 = vrot.lane.b32.xlu0 %v13373_v35, %s10897_s16  ;;  %10251 = vpow2.f32 %v4324_v10  ;;  %v13391_v18 = vpop.eup %10243 }
 0xe2f   : > { %10253 = vpow2.f32 %v4334_v3  ;;  %v4342_v8 = vmul.f32 1.442695, %v4269_v20 }
 0xe30   : > { %v4181_v36 = vpop.xlane.xlu0 %4180  ;;  %6449 = vrot.lane.b32.xlu1 %v13377_v16, %s10897_s16  ;;  %10255 = vpow2.f32 %v4336_v9 }
 0xe31   : > { %v4271_v24 = vsub.f32 %v13143_v7, %v4181_v36  ;;  %v4270_v12 = vsub.f32 %v13141_v2, %v4181_v36  ;;  %v4268_v7 = vsub.f32 %v13135_v58, %v4178_v60 }
 0xe32   : > { %6451 = vrot.lane.b32.xlu0 %v13384_v4, %s10897_s16  ;;  %v13395_v56 = vpop.eup %10245 }
 0xe33   : > { %v4346_v10 = vmul.f32 1.442695, %v4271_v24  ;;  %v4549_v33 = vpack.c.bf16 %v13395_v56, %v13391_v18  ;;  %v4344_v46 = vmul.f32 1.442695, %v4270_v12  ;;  %v4340_v20 = vmul.f32 1.442695, %v4268_v7 }
 0xe34   : > { %v4184_v62 = vpop.xlane.xlu1 %4183  ;;  %v10248_v38 = vpop.eup %10247 }
 0xe35   : > { %4676 = vmatprep.mubr.bf16.mxu1 %v4549_v33  ;;  %10257 = vpow2.f32 %v4346_v10  ;;  %v4273_v51 = vsub.f32 %v13149_v28, %v4184_v62  ;;  %v4272_v60 = vsub.f32 %v13147_v48, %v4184_v62  ;;  %v5229_v10 = vsel %vm505_vm0, %v13335_v55, 0 }
 0xe36   : > { %10259 = vpow2.f32 %v4332_v52  ;;  %v5226_v48 = vsel %vm505_vm0, %v13352_v47, 0  ;;  %v4455_v47 = vadd.f32 %v10248_v38, %v13395_v56 }
 0xe37   : > { %10261 = vpow2.f32 %v4342_v8  ;;  %v4350_v36 = vmul.f32 1.442695, %v4273_v51 }
 0xe38   : > { %v4187_v21 = vpop.xlane.xlu0 %4186  ;;  %v4613_v13 = vpop.permute.xlu1 %4612  ;;  %10263 = vpow2.f32 %v4344_v46 }
 0xe39   : > { %v4275_v3 = vsub.f32 %v13155_v53, %v4187_v21  ;;  %9034 = vmatprep.subr.bf16.mxu1 %v4613_v13  ;;  %v4274_v58 = vsub.f32 %v13153_v29, %v4187_v21 }
 0xe3a   : > { %v10250_v42 = vpop.eup %10249 }
 0xe3b   : > { %v4354_v1 = vmul.f32 1.442695, %v4275_v3  ;;  %v10252_v2 = vpop.eup %10251  ;;  %v4352_v52 = vmul.f32 1.442695, %v4274_v58 }
 0xe3c   : > { %v4597_v24 = vpop.permute.xlu0 %4596  ;;  %v10254_v9 = vpop.eup %10253  ;;  %v4548_v28 = vpack.c.bf16 %v10248_v38, %v10252_v2  ;;  %v4452_v3 = vadd.f32 %v10252_v2, %v13391_v18 }
 0xe3d   : > { %9035 = vmatpush3.bf16.msra.mxu1 %v4597_v24  ;;  %10265 = vpow2.f32 %v4354_v1  ;;  %v4551_v53 = vpack.c.bf16 %v10250_v42, %v10254_v9  ;;  %v10256_v29 = vpop.eup %10255  ;;  %v5223_v1 = vsel %vm505_vm0, %v13373_v35, 0 }
 0xe3e   : > { %9806 = vmatprep.subr.msk.bf16.mxu1 %vm505_vm0, %v13318_v14  ;;  %10267 = vpow2.f32 %v4340_v20  ;;  %v4348_v14 = vmul.f32 1.442695, %v4272_v60  ;;  %v4461_v2 = vadd.f32 %v10256_v29, %v10250_v42  ;;  %v16241_v42 = vld [vmem:[#allocation87_spill] sm:$0xff] }
 0xe3f   : > { %10269 = vpow2.f32 %v4350_v36  ;;  %v16239_v36 = vld [vmem:[#allocation92_spill] sm:$0xff]  ;;  %v2247_v60 = vadd.f32 %v16241_v42, %v13309_v54 }
 0xe40   : > { %4677 = vmatmul.mubr.bf16.vlgmr.msra.gmra.mxu1 %v4548_v28  ;;  %10271 = vpow2.f32 %v4352_v52  ;;  %v2257_v18 = vadd.f32 %v16239_v36, %v13309_v54  ;;  %v16240_v28 = vld [vmem:[#allocation90_spill] sm:$0xff]  ;;  %v16242_v52 = vld [vmem:[#allocation85_spill] sm:$0xff] }
 0xe41   : > { %4684 = vmatprep.mubr.bf16.mxu1 %v4551_v53  ;;  %9153 = vmatpush3.bf16.xpose.msra.mxu1 %v5229_v10  ;;  %10273 = vpow2.f32 %v4348_v14  ;;  %v2253_v53 = vadd.f32 %v16240_v28, %v13309_v54  ;;  %v16243_v14 = vld [vmem:[#allocation46_spill] sm:$0xff] }
 0xe42   : > { %9807 = vmatprep.subr.msk.bf16.mxu1 %vm505_vm0, %v13331_v57  ;;  %v10258_v33 = vpop.eup %10257 }
 0xe43   : > { %v10260_v8 = vpop.eup %10259  ;;  %v13425_v56 = vpack.c.bf16 %v2257_v18, %v2253_v53 }
 0xe44   : > { %v10262_v12 = vpop.eup %10261  ;;  %v4550_v7 = vpack.c.bf16 %v10256_v29, %v10260_v8  ;;  %v2243_v29 = vadd.f32 %v16242_v52, %v13309_v54  ;;  %v16251_v52 = vld [vmem:[#allocation37_spill] sm:$0xff] }
 0xe45   : > { %v4553_v21 = vpack.c.bf16 %v10258_v33, %v10262_v12  ;;  %v10264_v55 = vpop.eup %10263 }
 0xe46   : > { %v4467_v38 = vadd.f32 %v10264_v55, %v10258_v33  ;;  %v5217_v33 = vsel %vm505_vm0, %v13377_v16, 0 }
 0xe48   : > { %4685 = vmatmul.mubr.bf16.gmra.mxu1 %v4550_v7 }
 0xe49   : > { %4692 = vmatprep.mubr.bf16.mxu1 %v4553_v21  ;;  %9155 = vmatpush3.bf16.xpose.msra.mxu1 %v5226_v48  ;;  %v16245_v48 = vld [vmem:[#allocation82_spill] sm:$0xff] }
 0xe4a   : > { %9808 = vmatprep.subr.msk.bf16.mxu1 %vm505_vm0, %v13345_v32  ;;  %v10266_v57 = vpop.eup %10265  ;;  %v4458_v32 = vadd.f32 %v10260_v8, %v10254_v9  ;;  %v2167_v8 = vadd.f32 %v16243_v14, %v13309_v54 }
 0xe4b   : > { %v10268_v62 = vpop.eup %10267 }
 0xe4c   : > { %v10270_v13 = vpop.eup %10269  ;;  %v4552_v51 = vpack.c.bf16 %v10264_v55, %v10268_v62  ;;  %v4464_v35 = vadd.f32 %v10268_v62, %v10262_v12  ;;  %v16244_v12 = vld [vmem:[#allocation45_spill] sm:$0xff]  ;;  %v2237_v55 = vadd.f32 %v16245_v48, %v13309_v54 }
 0xe4d   : > { %v4555_v46 = vpack.c.bf16 %v10266_v57, %v10270_v13  ;;  %v10272_v20 = vpop.eup %10271  ;;  %v2163_v7 = vadd.f32 %v16244_v12, %v13309_v54 }
 0xe4e   : > { %v10274_v24 = vpop.eup %10273  ;;  %v4473_v10 = vadd.f32 %v10272_v20, %v10266_v57  ;;  %v16246_v57 = vld [vmem:[#allocation80_spill] sm:$0xff] }
 0xe4f   : > { %v4554_v58 = vpack.c.bf16 %v10272_v20, %v10274_v24  ;;  %v4470_v9 = vadd.f32 %v10274_v24, %v10270_v13  ;;  %v13445_v21 = vpack.c.bf16 %v2167_v8, %v2163_v7  ;;  %v2233_v62 = vadd.f32 %v16246_v57, %v13309_v54  ;;  %v16247_v13 = vld [vmem:[#allocation42_spill] sm:$0xff]  ;;  %v16248_v20 = vld [vmem:[#allocation41_spill] sm:$0xff]  ;;  %v16252_v7 = vld [vmem:[#allocation35_spill] sm:$0xff] }
 0xe50   : > { %4693 = vmatmul.mubr.bf16.gmra.mxu1 %v4552_v51  ;;  %v2157_v51 = vadd.f32 %v16247_v13, %v13309_v54  ;;  %v2143_v48 = vadd.f32 %v16252_v7, %v13309_v54 }
 0xe51   : > { %4453 = vadd.xlane.f32.xlu0 %v4452_v3  ;;  %4700 = vmatprep.mubr.bf16.mxu1 %v4555_v46  ;;  %v13453_v3 = vpack.c.bf16 %v2237_v55, %v2233_v62  ;;  %v5214_v16 = vsel %vm505_vm0, %v13445_v21, 0 }
 0xe52   : > { %9157 = vmatpush3.bf16.xpose.msra.mxu1 %v5223_v1 }
 0xe53   : > { %9809 = vmatprep.subr.msk.bf16.mxu1 %vm505_vm0, %v13365_v43  ;;  %v5220_v43 = vsel %vm505_vm0, %v13384_v4, 0  ;;  %v13437_v4 = vpack.c.bf16 %v2247_v60, %v2243_v29  ;;  %v2147_v29 = vadd.f32 %v16251_v52, %v13309_v54 }
 0xe54   : > { %4456 = vadd.xlane.f32.xlu1 %v4455_v47 }
 0xe55   : > { %4459 = vadd.xlane.f32.xlu0 %v4458_v32  ;;  %v2153_v32 = vadd.f32 %v16248_v20, %v13309_v54 }
 0xe57   : > { %v13463_v18 = vpack.c.bf16 %v2157_v51, %v2153_v32  ;;  %v13487_v51 = vpack.c.bf16 %v2147_v29, %v2143_v48 }
 0xe58   : > { %4462 = vadd.xlane.f32.xlu1 %v4461_v2  ;;  %4701 = vmatmul.mubr.bf16.gmra.mxu1 %v4554_v58  ;;  %v16249_v2 = vld [vmem:[#allocation76_spill] sm:$0xff] }
 0xe59   : > { %4465 = vadd.xlane.f32.xlu0 %v4464_v35  ;;  %v2227_v58 = vadd.f32 %v16249_v2, %v13309_v54 }
 0xe5a   : > { %9159 = vmatpush3.bf16.xpose.msra.mxu1 %v5220_v43  ;;  %v16250_v43 = vld [vmem:[#allocation74_spill] sm:$0xff] }
 0xe5b   : > { %9810 = vmatprep.subr.msk.bf16.mxu1 %vm505_vm0, %v13425_v56 }
 0xe5c   : > { %4468 = vadd.xlane.f32.xlu1 %v4467_v38  ;;  %v2223_v38 = vadd.f32 %v16250_v43, %v13309_v54 }
 0xe5d   : > { %4471 = vadd.xlane.f32.xlu0 %v4470_v9 }
 0xe5e   : > { %v13475_v14 = vpack.c.bf16 %v2227_v58, %v2223_v38 }
 0xe60   : > { %4474 = vadd.xlane.f32.xlu1 %v4473_v10 }
 0xe62   : > { %9161 = vmatpush3.bf16.xpose.msra.mxu1 %v5217_v33 }
 0xe63   : > { %9811 = vmatprep.subr.msk.bf16.mxu1 %vm505_vm0, %v13437_v4 }
 0xe69   : > { %v4190_v46 = vpop.xlane.xlu1 %4189 }
 0xe6a   : > { %9163 = vmatpush3.bf16.xpose.msra.mxu1 %v5214_v16  ;;  %v4276_v1 = vsub.f32 %v13159_v45, %v4190_v46  ;;  %v4277_v47 = vsub.f32 %v13161_v0, %v4190_v46 }
 0xe6b   : > { %9812 = vmatprep.subr.msk.bf16.mxu1 %vm505_vm0, %v13453_v3 }
 0xe6c   : > { %v4356_v24 = vmul.f32 1.442695, %v4276_v1  ;;  %v4358_v36 = vmul.f32 1.442695, %v4277_v47 }
 0xe6d   : > { %v4193_v28 = vpop.xlane.xlu0 %4192  ;;  %v4199_v53 = vpop.xlane.xlu1 %4198 }
 0xe6e   : > { %10275 = vpow2.f32 %v4356_v24  ;;  %v4278_v45 = vsub.f32 %v13163_v15, %v4193_v28  ;;  %v4279_v0 = vsub.f32 %v13165_v17, %v4193_v28  ;;  %v4282_v35 = vsub.f32 %v13171_v23, %v4199_v53 }
 0xe6f   : > { %10277 = vpow2.f32 %v4358_v36  ;;  %v4283_v9 = vsub.f32 %v13175_v22, %v4199_v53  ;;  %v5211_v17 = vsel %vm505_vm0, %v13463_v18, 0  ;;  %v5208_v36 = vsel %vm505_vm0, %v13487_v51, 0 }
 0xe70   : > { %v4360_v42 = vmul.f32 1.442695, %v4278_v45  ;;  %v4362_v60 = vmul.f32 1.442695, %v4279_v0  ;;  %v4368_v10 = vmul.f32 1.442695, %v4282_v35 }
 0xe71   : > { %v4370_v8 = vmul.f32 1.442695, %v4283_v9  ;;  %v4196_v15 = vpop.xlane.xlu0 %4195  ;;  %v4205_v23 = vpop.xlane.xlu1 %4204 }
 0xe72   : > { %10279 = vpow2.f32 %v4360_v42  ;;  %v4280_v33 = vsub.f32 %v13167_v6, %v4196_v15  ;;  %v4281_v12 = vsub.f32 %v13169_v11, %v4196_v15  ;;  %9165 = vmatpush3.bf16.xpose.msra.mxu1 %v5211_v17  ;;  %v4286_v22 = vsub.f32 %v13181_v50, %v4205_v23 }
 0xe73   : > { %10281 = vpow2.f32 %v4362_v60  ;;  %v4287_v55 = vsub.f32 %v13183_v59, %v4205_v23  ;;  %9813 = vmatprep.subr.msk.bf16.mxu1 %vm505_vm0, %v13475_v14 }
 0xe74   : > { %10283 = vpow2.f32 %v4368_v10  ;;  %v4364_v57 = vmul.f32 1.442695, %v4280_v33  ;;  %v4366_v62 = vmul.f32 1.442695, %v4281_v12  ;;  %v4376_v13 = vmul.f32 1.442695, %v4286_v22 }
 0xe75   : > { %10285 = vpow2.f32 %v4370_v8  ;;  %v4378_v6 = vmul.f32 1.442695, %v4287_v55  ;;  %v4202_v11 = vpop.xlane.xlu0 %4201  ;;  %v4211_v16 = vpop.xlane.xlu1 %4210 }
 0xe76   : > { %10287 = vpow2.f32 %v4364_v57  ;;  %v4284_v50 = vsub.f32 %v13177_v41, %v4202_v11  ;;  %v4285_v54 = vsub.f32 %v13179_v49, %v4202_v11  ;;  %v4290_v59 = vsub.f32 %v13191_v31, %v4211_v16 }
 0xe77   : > { %10289 = vpow2.f32 %v4366_v62  ;;  %v4291_v46 = vsub.f32 %v13193_v39, %v4211_v16 }
 0xe78   : > { %10291 = vpow2.f32 %v4376_v13  ;;  %v4372_v1 = vmul.f32 1.442695, %v4284_v50  ;;  %v4374_v47 = vmul.f32 1.442695, %v4285_v54  ;;  %v4384_v20 = vmul.f32 1.442695, %v4290_v59 }
 0xe79   : > { %10293 = vpow2.f32 %v4378_v6  ;;  %v4386_v32 = vmul.f32 1.442695, %v4291_v46  ;;  %v4208_v24 = vpop.xlane.xlu0 %4207  ;;  %v4217_v2 = vpop.xlane.xlu1 %4216  ;;  %v16253_v54 = vld [vmem:[#allocation77_spill] sm:$0xff]  ;;  %v16254_v46 = vld [vmem:[#allocation83_spill] sm:$0xff] }
 0xe7a   : > { %10295 = vpow2.f32 %v4372_v1  ;;  %v4288_v41 = vsub.f32 %v13187_v44, %v4208_v24  ;;  %v4289_v49 = vsub.f32 %v13189_v30, %v4208_v24  ;;  %9167 = vmatpush3.bf16.xpose.msra.mxu1 %v5208_v36  ;;  %v4294_v31 = vsub.f32 %v13199_v34, %v4217_v2  ;;  %v16256_v24 = vld [vmem:[#allocation103_spill] sm:$0xff] }
 0xe7b   : > { %v10276_v39 = vpop.eup %10275  ;;  %10297 = vpow2.f32 %v4374_v47  ;;  %v4295_v58 = vsub.f32 %v13201_v19, %v4217_v2  ;;  %v16255_v47 = vld [vmem:[#allocation98_spill] sm:$0xff] }
 0xe7c   : > { %v10278_v28 = vpop.eup %10277  ;;  %10299 = vpow2.f32 %v4384_v20  ;;  %v4380_v53 = vmul.f32 1.442695, %v4288_v41  ;;  %v4382_v45 = vmul.f32 1.442695, %v4289_v49  ;;  %v4392_v0 = vmul.f32 1.442695, %v4294_v31 }
 0xe7d   : > { %10301 = vpow2.f32 %v4386_v32  ;;  %v4394_v35 = vmul.f32 1.442695, %v4295_v58  ;;  %v4214_v43 = vpop.xlane.xlu0 %4213  ;;  %v4223_v38 = vpop.xlane.xlu1 %4222  ;;  %v4476_v9 = vadd.f32 %v10278_v28, %v10276_v39 }
 0xe7e   : > { %10303 = vpow2.f32 %v4380_v53  ;;  %v4292_v30 = vsub.f32 %v13195_v37, %v4214_v43  ;;  %v4293_v44 = vsub.f32 %v13197_v40, %v4214_v43  ;;  %v4298_v34 = vsub.f32 %v13207_v25, %v4223_v38  ;;  %v16257_v43 = vld [vmem:[#allocation88_spill] sm:$0xff] }
 0xe7f   : > { %v10280_v42 = vpop.eup %10279  ;;  %10305 = vpow2.f32 %v4382_v45  ;;  %v4299_v19 = vsub.f32 %v13209_v5, %v4223_v38  ;;  %4477 = vadd.xlane.f32.xlu0 %v4476_v9  ;;  %v16258_v9 = vld [vmem:[#allocation93_spill] sm:$0xff] }
 0xe80   : > { %v10282_v60 = vpop.eup %10281  ;;  %10307 = vpow2.f32 %v4392_v0  ;;  %v4388_v10 = vmul.f32 1.442695, %v4292_v30  ;;  %v4390_v52 = vmul.f32 1.442695, %v4293_v44  ;;  %v4400_v29 = vmul.f32 1.442695, %v4298_v34 }
 0xe81   : > { %v13503_v8 = vpop.eup %10283  ;;  %10309 = vpow2.f32 %v4394_v35  ;;  %v4402_v15 = vmul.f32 1.442695, %v4299_v19  ;;  %v4220_v17 = vpop.xlane.xlu0 %4219  ;;  %v4479_v23 = vadd.f32 %v10282_v60, %v10280_v42  ;;  %v4557_v40 = vpack.c.bf16 %v10282_v60, %v10278_v28  ;;  %v16259_v44 = vld [vmem:[#allocation136_spill] sm:$0xff]  ;;  %v16260_v19 = vld [vmem:[#allocation154_spill] sm:$0xff] }
 0xe82   : > { %v4229_v37 = vpop.xlane.xlu1 %4228  ;;  %v10286_v33 = vpop.eup %10285  ;;  %10311 = vpow2.f32 %v4388_v10  ;;  %v4296_v25 = vsub.f32 %v13203_v27, %v4220_v17  ;;  %v4297_v5 = vsub.f32 %v13205_v63, %v4220_v17  ;;  %v4556_v48 = vpack.c.bf16 %v10280_v42, %v10276_v39 }
 0xe83   : > { %v4302_v12 = vsub.f32 %v13221_v61, %v4229_v37  ;;  %v13508_v22 = vpop.eup %10287  ;;  %10313 = vpow2.f32 %v4390_v52  ;;  %v4303_v7 = vsub.f32 %v13223_v26, %v4229_v37  ;;  %4480 = vadd.xlane.f32.xlu1 %v4479_v23  ;;  %4708 = vmatprep.mubr.bf16.mxu1 %v4557_v40  ;;  %v4485_v55 = vadd.f32 %v10286_v33, %v13503_v8 }
 0xe84   : > { %v10290_v57 = vpop.eup %10289  ;;  %10315 = vpow2.f32 %v4400_v29  ;;  %v4396_v62 = vmul.f32 1.442695, %v4296_v25  ;;  %v4398_v13 = vmul.f32 1.442695, %v4297_v5  ;;  %4709 = vmatmul.mubr.bf16.gmra.mxu1 %v4556_v48  ;;  %v4558_v10 = vpack.c.bf16 %v13503_v8, %v13508_v22  ;;  %v16262_v48 = vld [vmem:[#allocation112_spill] sm:$0xff] }
 0xe85   : > { %v4408_v6 = vmul.f32 1.442695, %v4302_v12  ;;  %v13512_v27 = vpop.eup %10291  ;;  %10317 = vpow2.f32 %v4402_v15  ;;  %v4410_v63 = vmul.f32 1.442695, %v4303_v7  ;;  %v4226_v61 = vpop.xlane.xlu0 %4225  ;;  %v4482_v16 = vadd.f32 %v10290_v57, %v13508_v22  ;;  %v16261_v22 = vld [vmem:[#allocation108_spill] sm:$0xff] }
 0xe86   : > { %v4235_v11 = vpop.xlane.xlu1 %4234  ;;  %v4559_v26 = vpack.c.bf16 %v10286_v33, %v10290_v57  ;;  %v10294_v50 = vpop.eup %10293  ;;  %10319 = vpow2.f32 %v4396_v62  ;;  %v4300_v59 = vsub.f32 %v16253_v54, %v4226_v61  ;;  %v4301_v1 = vsub.f32 %v16254_v46, %v4226_v61  ;;  %v16263_v57 = vld [vmem:[#allocation130_spill] sm:$0xff] }
 0xe87   : > { %v4306_v20 = vsub.f32 %v16255_v47, %v4235_v11  ;;  %v13518_v32 = vpop.eup %10295  ;;  %10321 = vpow2.f32 %v4398_v13  ;;  %v4307_v36 = vsub.f32 %v16256_v24, %v4235_v11  ;;  %4483 = vadd.xlane.f32.xlu0 %v4482_v16  ;;  %4486 = vadd.xlane.f32.xlu1 %v4485_v55  ;;  %v4491_v0 = vadd.f32 %v10294_v50, %v13512_v27  ;;  %v16265_v24 = vld [vmem:[#allocation155_spill] sm:$0xff] }
 0xe88   : > { %4716 = vmatprep.mubr.bf16.mxu1 %v4559_v26  ;;  %v10298_v2 = vpop.eup %10297  ;;  %10323 = vpow2.f32 %v4408_v6  ;;  %v4404_v41 = vmul.f32 1.442695, %v4300_v59  ;;  %v4406_v49 = vmul.f32 1.442695, %v4301_v1  ;;  %v16264_v6 = vld [vmem:[#allocation156_spill] sm:$0xff] }
 0xe89   : > { %v4416_v31 = vmul.f32 1.442695, %v4306_v20  ;;  %v13521_v39 = vpop.eup %10299  ;;  %10325 = vpow2.f32 %v4410_v63  ;;  %v4418_v58 = vmul.f32 1.442695, %v4307_v36  ;;  %v4232_v28 = vpop.xlane.xlu0 %4231  ;;  %v4488_v45 = vadd.f32 %v10298_v2, %v13518_v32 }
 0xe8a   : > { %v4241_v53 = vpop.xlane.xlu1 %4240  ;;  %v13525_v35 = vpop.eup %10301  ;;  %10327 = vpow2.f32 %v4404_v41  ;;  %v4304_v38 = vsub.f32 %v16257_v43, %v4232_v28  ;;  %v4305_v30 = vsub.f32 %v16258_v9, %v4232_v28  ;;  %v4561_v52 = vpack.c.bf16 %v10294_v50, %v10298_v2  ;;  %v16266_v2 = vld [vmem:[#allocation133_spill] sm:$0xff]  ;;  %v16268_v28 = vld [vmem:[#allocation158_spill] sm:$0xff] }
 0xe8b   : > { %v4310_v34 = vsub.f32 %v16259_v44, %v4241_v53  ;;  %v13530_v42 = vpop.eup %10303  ;;  %10329 = vpow2.f32 %v4406_v49  ;;  %v4311_v60 = vsub.f32 %v16260_v19, %v4241_v53  ;;  %4489 = vadd.xlane.f32.xlu0 %v4488_v45  ;;  %4492 = vadd.xlane.f32.xlu1 %v4491_v0  ;;  %v4497_v12 = vadd.f32 %v13525_v35, %v13521_v39  ;;  %v16267_v49 = vld [vmem:[#allocation124_spill] sm:$0xff] }
 0xe8c   : > { %v10306_v29 = vpop.eup %10305  ;;  %10331 = vpow2.f32 %v4416_v31  ;;  %v4412_v15 = vmul.f32 1.442695, %v4304_v38  ;;  %v4414_v17 = vmul.f32 1.442695, %v4305_v30  ;;  %4717 = vmatmul.mubr.bf16.gmra.mxu1 %v4558_v10  ;;  %v4560_v45 = vpack.c.bf16 %v13512_v27, %v13518_v32  ;;  %v16269_v27 = vld [vmem:[#allocation157_spill] sm:$0xff] }
 0xe8d   : > { %v4424_v37 = vmul.f32 1.442695, %v4310_v34  ;;  %v13535_v23 = vpop.eup %10307  ;;  %10333 = vpow2.f32 %v4418_v58  ;;  %v4426_v40 = vmul.f32 1.442695, %v4311_v60  ;;  %v4238_v33 = vpop.xlane.xlu0 %4237  ;;  %v4494_v5 = vadd.f32 %v10306_v29, %v13530_v42  ;;  %4724 = vmatprep.mubr.bf16.mxu1 %v4561_v52 }
 0xe8e   : > { %v4247_v25 = vpop.xlane.xlu1 %4246  ;;  %v13540_v8 = vpop.eup %10309  ;;  %10335 = vpow2.f32 %v4412_v15  ;;  %v4308_v7 = vsub.f32 %v16261_v22, %v4238_v33  ;;  %v4309_v55 = vsub.f32 %v16262_v48, %v4238_v33  ;;  %v4563_v0 = vpack.c.bf16 %v13525_v35, %v10306_v29  ;;  %v16270_v35 = vld [vmem:[#allocation127_spill] sm:$0xff]  ;;  %v16272_v22 = vld [vmem:[#allocation142_spill] sm:$0xff] }
 0xe8f   : > { %v4314_v62 = vsub.f32 %v16263_v57, %v4247_v25  ;;  %v13545_v13 = vpop.eup %10311  ;;  %10337 = vpow2.f32 %v4414_v17  ;;  %v4315_v63 = vsub.f32 %v16264_v6, %v4247_v25  ;;  %4495 = vadd.xlane.f32.xlu0 %v4494_v5  ;;  %4498 = vadd.xlane.f32.xlu1 %v4497_v12  ;;  %v4503_v47 = vadd.f32 %v13540_v8, %v13535_v23  ;;  %v16271_v5 = vld [vmem:[#allocation118_spill] sm:$0xff] }
 0xe90   : > { %v13548_v61 = vpop.eup %10313  ;;  %10339 = vpow2.f32 %v4424_v37  ;;  %v4420_v11 = vmul.f32 1.442695, %v4308_v7  ;;  %v4422_v16 = vmul.f32 1.442695, %v4309_v55 }
 0xe91   : > { %v4432_v26 = vmul.f32 1.442695, %v4314_v62  ;;  %v13550_v50 = vpop.eup %10315  ;;  %10341 = vpow2.f32 %v4426_v40  ;;  %v4434_v54 = vmul.f32 1.442695, %v4315_v63  ;;  %v4244_v59 = vpop.xlane.xlu0 %4243  ;;  %v4500_v1 = vadd.f32 %v13548_v61, %v13545_v13  ;;  %v16273_v62 = vld [vmem:[#allocation159_spill] sm:$0xff]  ;;  %v16274_v63 = vld [vmem:[#allocation121_spill] sm:$0xff] }
 0xe92   : > { %v4253_v46 = vpop.xlane.xlu1 %4252  ;;  %v13556_v20 = vpop.eup %10317  ;;  %10343 = vpow2.f32 %v4420_v11  ;;  %v4312_v36 = vsub.f32 %v16265_v24, %v4244_v59  ;;  %v4313_v41 = vsub.f32 %v16266_v2, %v4244_v59 }
 0xe93   : > { %v4318_v31 = vsub.f32 %v16267_v49, %v4253_v46  ;;  %v13561_v58 = vpop.eup %10319  ;;  %10345 = vpow2.f32 %v4422_v16  ;;  %v4319_v53 = vsub.f32 %v16268_v28, %v4253_v46  ;;  %4501 = vadd.xlane.f32.xlu0 %v4500_v1  ;;  %4504 = vadd.xlane.f32.xlu1 %v4503_v47  ;;  %v4509_v29 = vadd.f32 %v13556_v20, %v13550_v50 }
 0xe94   : > { %v13567_v43 = vpop.eup %10321  ;;  %10347 = vpow2.f32 %v4432_v26  ;;  %v4428_v38 = vmul.f32 1.442695, %v4312_v36  ;;  %v4430_v9 = vmul.f32 1.442695, %v4313_v41  ;;  %4725 = vmatmul.mubr.bf16.gmra.mxu1 %v4560_v45  ;;  %v4562_v46 = vpack.c.bf16 %v13521_v39, %v13530_v42 }
 0xe95   : > { %v4440_v30 = vmul.f32 1.442695, %v4318_v31  ;;  %v13569_v44 = vpop.eup %10323  ;;  %10349 = vpow2.f32 %v4434_v54  ;;  %v4442_v34 = vmul.f32 1.442695, %v4319_v53  ;;  %v4250_v19 = vpop.xlane.xlu0 %4249  ;;  %v4506_v60 = vadd.f32 %v13567_v43, %v13561_v58  ;;  %4732 = vmatprep.mubr.bf16.mxu1 %v4563_v0 }
 0xe96   : > { %v13573_v10 = vpop.eup %10325  ;;  %10351 = vpow2.f32 %v4428_v38  ;;  %v4316_v32 = vsub.f32 %v16269_v27, %v4250_v19  ;;  %v4317_v52 = vsub.f32 %v16270_v35, %v4250_v19  ;;  %v4565_v36 = vpack.c.bf16 %v13540_v8, %v13548_v61 }
 0xe97   : > { %v13579_v15 = vpop.eup %10327  ;;  %10353 = vpow2.f32 %v4430_v9  ;;  %4507 = vadd.xlane.f32.xlu0 %v4506_v60  ;;  %4510 = vadd.xlane.f32.xlu1 %v4509_v29  ;;  %v4515_v16 = vadd.f32 %v13573_v10, %v13569_v44  ;;  %v4564_v0 = vpack.c.bf16 %v13535_v23, %v13545_v13  ;;  %v4567_v9 = vpack.c.bf16 %v13556_v20, %v13567_v43 }
 0xe98   : > { %v13581_v17 = vpop.eup %10329  ;;  %10355 = vpow2.f32 %v4440_v30  ;;  %v4436_v37 = vmul.f32 1.442695, %v4316_v32  ;;  %v4438_v40 = vmul.f32 1.442695, %v4317_v52  ;;  %v4259_v33 = vpop.xlane.xlu1 %4258  ;;  %v4566_v23 = vpack.c.bf16 %v13550_v50, %v13561_v58 }
 0xe99   : > { %v13583_v25 = vpop.eup %10331  ;;  %10357 = vpow2.f32 %v4442_v34  ;;  %v4322_v12 = vsub.f32 %v16271_v5, %v4259_v33  ;;  %v4323_v7 = vsub.f32 %v16272_v22, %v4259_v33  ;;  %v4256_v48 = vpop.xlane.xlu0 %4255  ;;  %v4512_v55 = vadd.f32 %v13581_v17, %v13579_v15 }
 0xe9a   : > { %v13589_v57 = vpop.eup %10333  ;;  %10359 = vpow2.f32 %v4436_v37  ;;  %v4320_v6 = vsub.f32 %v16273_v62, %v4256_v48  ;;  %v4321_v11 = vsub.f32 %v16274_v63, %v4256_v48  ;;  %v4569_v20 = vpack.c.bf16 %v13573_v10, %v13581_v17 }
 0xe9b   : > { %v13595_v26 = vpop.eup %10335  ;;  %10361 = vpow2.f32 %v4438_v40  ;;  %v4448_v54 = vmul.f32 1.442695, %v4322_v12  ;;  %v4450_v59 = vmul.f32 1.442695, %v4323_v7  ;;  %4513 = vadd.xlane.f32.xlu0 %v4512_v55  ;;  %4516 = vadd.xlane.f32.xlu1 %v4515_v16  ;;  %v4521_v31 = vadd.f32 %v13589_v57, %v13583_v25 }
 0xe9c   : > { %v10338_v1 = vpop.eup %10337  ;;  %v4444_v47 = vmul.f32 1.442695, %v4320_v6  ;;  %v4446_v24 = vmul.f32 1.442695, %v4321_v11  ;;  %4733 = vmatmul.mubr.bf16.gmra.mxu1 %v4562_v46  ;;  %v4568_v5 = vpack.c.bf16 %v13569_v44, %v13579_v15  ;;  %v4570_v50 = vpack.c.bf16 %v13583_v25, %v13595_v26  ;;  %v13617_v55 = vpop.permute.xlu1 %6473  ;;  %v16275_v25 = vld [vmem:[#allocation40_spill] sm:$0xff] }
 0xe9d   : > { %v10340_v2 = vpop.eup %10339  ;;  %10363 = vpow2.f32 %v4448_v54  ;;  %v4518_v41 = vadd.f32 %v10338_v1, %v13595_v26  ;;  %4740 = vmatprep.mubr.bf16.mxu1 %v4565_v36  ;;  %v4571_v12 = vpack.c.bf16 %v13589_v57, %v10338_v1  ;;  %v13621_v57 = vpop.permute.xlu0 %6457  ;;  %v16276_v6 = vld [vmem:[#allocation44_spill] sm:$0xff]  ;;  %v16280_v36 = vld [vmem:[#allocation55_spill] sm:$0xff] }
 0xe9e   : > { %v10342_v49 = vpop.eup %10341  ;;  %10365 = vpow2.f32 %v4450_v59  ;;  %v16277_v54 = vld [vmem:[#allocation48_spill] sm:$0xff] }
 0xe9f   : > { %v10344_v28 = vpop.eup %10343  ;;  %10367 = vpow2.f32 %v4444_v47  ;;  %4519 = vadd.xlane.f32.xlu0 %v4518_v41  ;;  %4522 = vadd.xlane.f32.xlu1 %v4521_v31  ;;  %v4527_v61 = vadd.f32 %v10342_v49, %v10340_v2  ;;  %v16278_v1 = vld [vmem:[#allocation52_spill] sm:$0xff] }
 0xea0   : > { %v10346_v39 = vpop.eup %10345  ;;  %10369 = vpow2.f32 %v4446_v24  ;;  %v4572_v10 = vpack.c.bf16 %v10340_v2, %v10344_v28  ;;  %v13623_v62 = vpop.permute.xlu1 %6471  ;;  %v16279_v24 = vld [vmem:[#allocation36_spill] sm:$0xff] }
 0xea1   : > { %v10348_v42 = vpop.eup %10347  ;;  %v4524_v53 = vadd.f32 %v10346_v39, %v10344_v28  ;;  %v4573_v58 = vpack.c.bf16 %v10342_v49, %v10346_v39  ;;  %v13629_v63 = vpop.permute.xlu0 %6455  ;;  %v1994_v2 = vadd.f32 %v16280_v36, %v16279_v24  ;;  %v16281_v49 = vld [vmem:[#allocation53_spill] sm:$0xff]  ;;  %v16290_v36 = vld [vmem:[#allocation135_spill] sm:$0xff] }
 0xea2   : > { %v10350_v8 = vpop.eup %10349  ;;  %v1990_v31 = vadd.f32 %v16281_v49, %v16279_v24 }
 0xea3   : > { %v10352_v45 = vpop.eup %10351  ;;  %4525 = vadd.xlane.f32.xlu0 %v4524_v53  ;;  %4528 = vadd.xlane.f32.xlu1 %v4527_v61  ;;  %v4533_v60 = vadd.f32 %v10350_v8, %v10348_v42 }
 0xea4   : > { %v10354_v38 = vpop.eup %10353  ;;  %4741 = vmatmul.mubr.bf16.gmra.mxu1 %v4564_v0  ;;  %v4574_v22 = vpack.c.bf16 %v10348_v42, %v10352_v45  ;;  %v13631_v11 = vpop.permute.xlu1 %6469  ;;  %v13653_v28 = vpack.c.bf16 %v1994_v2, %v1990_v31  ;;  %v16282_v42 = vld [vmem:[#allocation60_spill] sm:$0xff] }
 0xea5   : > { %v10356_v30 = vpop.eup %10355  ;;  %v4530_v34 = vadd.f32 %v10354_v38, %v10352_v45  ;;  %4748 = vmatprep.mubr.bf16.mxu1 %v4567_v9  ;;  %v4575_v17 = vpack.c.bf16 %v10350_v8, %v10354_v38  ;;  %v13633_v16 = vpop.permute.xlu0 %6453  ;;  %v2004_v53 = vadd.f32 %v16282_v42, %v16279_v24  ;;  %v16283_v45 = vld [vmem:[#allocation58_spill] sm:$0xff]  ;;  %v16291_v31 = vld [vmem:[#allocation152_spill] sm:$0xff] }
 0xea6   : > { %v10358_v19 = vpop.eup %10357  ;;  %v2000_v0 = vadd.f32 %v16283_v45, %v16279_v24  ;;  %v16293_v45 = vld [vmem:[#allocation134_spill] sm:$0xff] }
 0xea7   : > { %v10360_v27 = vpop.eup %10359  ;;  %4531 = vadd.xlane.f32.xlu0 %v4530_v34  ;;  %4534 = vadd.xlane.f32.xlu1 %v4533_v60  ;;  %v4539_v29 = vadd.f32 %v10358_v19, %v10356_v30 }
 0xea8   : > { %v10362_v32 = vpop.eup %10361  ;;  %v4576_v48 = vpack.c.bf16 %v10356_v30, %v10360_v27  ;;  %v13637_v26 = vpop.permute.xlu1 %6467  ;;  %v13663_v9 = vpack.c.bf16 %v2004_v53, %v2000_v0 }
 0xea9   : > { %v4536_v35 = vadd.f32 %v10362_v32, %v10360_v27  ;;  %v4577_v7 = vpack.c.bf16 %v10358_v19, %v10362_v32  ;;  %v13641_v59 = vpop.permute.xlu0 %6451 }
 0xeaa   : > { %v10364_v52 = vpop.eup %10363  ;;  %16284 = vst [vmem:[#allocation34_spill] sm:$0xff] %v13663_v9 }
 0xeab   : > { %v10366_v37 = vpop.eup %10365  ;;  %4537 = vadd.xlane.f32.xlu0 %v4536_v35  ;;  %4540 = vadd.xlane.f32.xlu1 %v4539_v29 }
 0xeac   : > { %v10368_v13 = vpop.eup %10367  ;;  %v4545_v43 = vadd.f32 %v10366_v37, %v10364_v52  ;;  %4749 = vmatmul.mubr.bf16.gmra.mxu1 %v4566_v23  ;;  %v13643_v46 = vpop.permute.xlu1 %6449 }
 0xead   : > { %v10370_v40 = vpop.eup %10369  ;;  %4756 = vmatprep.mubr.bf16.mxu1 %v4569_v20  ;;  %v4578_v15 = vpack.c.bf16 %v10364_v52, %v10368_v13  ;;  %v16285_v52 = vld [vmem:[#allocation65_spill] sm:$0xff] }
 0xeae   : > { %v4542_v33 = vadd.f32 %v10370_v40, %v10368_v13  ;;  %v4579_v44 = vpack.c.bf16 %v10366_v37, %v10370_v40  ;;  %v2014_v29 = vadd.f32 %v16285_v52, %v16279_v24 }
 0xeaf   : > { %4546 = vadd.xlane.f32.xlu1 %v4545_v43  ;;  %v16286_v43 = vld [vmem:[#allocation63_spill] sm:$0xff] }
 0xeb0   : > { %4543 = vadd.xlane.f32.xlu0 %v4542_v33  ;;  %v2010_v40 = vadd.f32 %v16286_v43, %v16279_v24 }
 0xeb4   : > { %4757 = vmatmul.mubr.bf16.gmra.mxu1 %v4568_v5 }
 0xeb5   : > { %4764 = vmatprep.mubr.bf16.mxu1 %v4571_v12  ;;  %v13673_v12 = vpack.c.bf16 %v2014_v29, %v2010_v40  ;;  %v16298_v29 = vld [vmem:[#allocation150_spill] sm:$0xff] }
 0xeb7   : > { %16287 = vst [vmem:[#allocation153_spill] sm:$0xff] %v13673_v12 }
 0xebc   : > { %4765 = vmatmul.mubr.bf16.gmra.mxu1 %v4570_v50 }
 0xebd   : > { %4772 = vmatprep.mubr.bf16.mxu1 %v4573_v58 }
 0xec4   : > { %4773 = vmatmul.mubr.bf16.gmra.mxu1 %v4572_v10 }
 0xec5   : > { %4780 = vmatprep.mubr.bf16.mxu1 %v4575_v17 }
 0xecc   : > { %4781 = vmatmul.mubr.bf16.gmra.mxu1 %v4574_v22 }
 0xecd   : > { %4788 = vmatprep.mubr.bf16.mxu1 %v4577_v7 }
 0xed4   : > { %4789 = vmatmul.mubr.bf16.gmra.mxu1 %v4576_v48 }
 0xed5   : > { %4796 = vmatprep.mubr.bf16.mxu1 %v4579_v44  ;;  %v16288_v44 = vld [vmem:[#allocation70_spill] sm:$0xff] }
 0xeda   : > { %v4454_v47 = vpop.xlane.xlu0 %4453 }
 0xedb   : > { %10371 = vrcp.f32 %v4454_v47  ;;  %v16289_v47 = vld [vmem:[#allocation161_spill] sm:$0xff] }
 0xedc   : > { %4797 = vmatmul.mubr.bf16.gmra.mxu1 %v4578_v15  ;;  %v2024_v15 = vadd.f32 %v16288_v44, %v16279_v24  ;;  %v2410_v2 = vadd.f32 %v16290_v36, %v16289_v47  ;;  %v2406_v0 = vadd.f32 %v16293_v45, %v16289_v47  ;;  %v16305_v36 = vld [vmem:[#allocation148_spill] sm:$0xff]  ;;  %v16309_v45 = vld [vmem:[#allocation147_spill] sm:$0xff] }
 0xedd   : > { %9168 = vmatprep.mubr.msk.bf16.mxu1 %vm505_vm0, %v16275_v25  ;;  %v4457_v41 = vpop.xlane.xlu1 %4456 }
 0xede   : > { %10373 = vrcp.f32 %v4457_v41  ;;  %v4460_v39 = vpop.xlane.xlu0 %4459 }
 0xedf   : > { %10375 = vrcp.f32 %v4460_v39  ;;  %v2480_v39 = vadd.f32 %v16291_v31, %v16289_v47 }
 0xee1   : > { %v4463_v8 = vpop.xlane.xlu1 %4462 }
 0xee2   : > { %10377 = vrcp.f32 %v4463_v8  ;;  %v4466_v27 = vpop.xlane.xlu0 %4465  ;;  %v16292_v8 = vld [vmem:[#allocation68_spill] sm:$0xff] }
 0xee3   : > { %10379 = vrcp.f32 %v4466_v27  ;;  %v16296_v27 = vld [vmem:[#allocation132_spill] sm:$0xff] }
 0xee4   : > { %9169 = vmatmul.mubr.msk.bf16.vlgmr.msra.gmra.mxu1 %vm505_vm0, %v16275_v25 }
 0xee5   : > { %9170 = vmatprep.mubr.msk.bf16.mxu1 %vm505_vm0, %v16276_v6  ;;  %v4469_v37 = vpop.xlane.xlu1 %4468 }
 0xee6   : > { %10381 = vrcp.f32 %v4469_v37  ;;  %v4472_v22 = vpop.xlane.xlu0 %4471  ;;  %v2470_v37 = vadd.f32 %v16298_v29, %v16289_v47 }
 0xee7   : > { %10383 = vrcp.f32 %v4472_v22 }
 0xee8   : > { %v10372_v60 = vpop.eup %10371 }
 0xee9   : > { %v4475_v41 = vpop.xlane.xlu1 %4474 }
 0xeea   : > { %10385 = vrcp.f32 %v4475_v41 }
 0xeeb   : > { %v10374_v35 = vpop.eup %10373 }
 0xeec   : > { %9171 = vmatmul.mubr.msk.bf16.gmra.mxu1 %vm505_vm0, %v16276_v6  ;;  %v10376_v17 = vpop.eup %10375 }
 0xeed   : > { %9172 = vmatprep.mubr.msk.bf16.mxu1 %vm505_vm0, %v16277_v54 }
 0xeef   : > { %v10378_v48 = vpop.eup %10377 }
 0xef4   : > { %9173 = vmatmul.mubr.msk.bf16.gmra.mxu1 %vm505_vm0, %v16277_v54 }
 0xef5   : > { %9174 = vmatprep.mubr.msk.bf16.mxu1 %vm505_vm0, %v16278_v1 }
 0xefc   : > { %9175 = vmatmul.mubr.msk.bf16.gmra.mxu1 %vm505_vm0, %v16278_v1 }
 0xefd   : > { %9176 = vmatprep.mubr.msk.bf16.mxu1 %vm505_vm0, %v13653_v28 }
 0xf00   : > { %v9036_v61 = vpop.f32.mrf.mxu1 }
 0xf02   : > { %v9037_v38 = vpop.f32.mrf.mxu1 }
 0xf03   : > { %v9038_v34 = vadd.f32 %v9037_v38, %v9036_v61  ;;  %v2020_v61 = vadd.f32 %v16292_v8, %v16279_v24 }
 0xf04   : > { %v9039_v30 = vpop.f32.mrf.mxu1  ;;  %9177 = vmatmul.mubr.msk.bf16.gmra.mxu1 %vm505_vm0, %v13653_v28 }
 0xf05   : > { %9178 = vmatprep.mubr.msk.bf16.mxu1 %vm505_vm0, %v13663_v9  ;;  %v4837_v13 = vmul.f32 %v10372_v60, %v9038_v34  ;;  %v13692_v60 = vpack.c.bf16 %v2024_v15, %v2020_v61 }
 0xf06   : > { %v9040_v19 = vpop.f32.mrf.mxu1 }
 0xf07   : > { %v9041_v32 = vadd.f32 %v9040_v19, %v9039_v30  ;;  %v16294_v30 = vld [vmem:[#allocation151_spill] sm:$0xff]  ;;  %16295 = vst [vmem:[#allocation139_spill] sm:$0xff] %v13692_v60 }
 0xf08   : > { %v9042_v23 = vpop.f32.mrf.mxu1  ;;  %v2476_v34 = vadd.f32 %v16294_v30, %v16289_v47 }
 0xf09   : > { %v4838_v20 = vmul.f32 %v10374_v35, %v9041_v32  ;;  %v2400_v32 = vadd.f32 %v16296_v27, %v16289_v47  ;;  %v13696_v35 = vpack.c.bf16 %v2410_v2, %v2406_v0  ;;  %v2460_v2 = vadd.f32 %v16305_v36, %v16289_v47  ;;  %v16320_v36 = vld [vmem:[#allocation144_spill] sm:$0xff] }
 0xf0a   : > { %v9043_v33 = vpop.f32.mrf.mxu1  ;;  %v2456_v0 = vadd.f32 %v16309_v45, %v16289_v47  ;;  %v16324_v45 = vld [vmem:[#allocation143_spill] sm:$0xff] }
 0xf0b   : > { %v4869_v5 = vpack.c.bf16 %v4838_v20, %v4837_v13  ;;  %v9044_v58 = vadd.f32 %v9043_v33, %v9042_v23  ;;  %16297 = vst [vmem:[#allocation115_spill] sm:$0xff] %v13696_v35  ;;  %v13700_v23 = vpack.c.bf16 %v2480_v39, %v2476_v34  ;;  %v16300_v20 = vld [vmem:[#allocation131_spill] sm:$0xff]  ;;  %v10380_v33 = vpop.eup %10379  ;;  %v16307_v39 = vld [vmem:[#allocation73_spill] sm:$0xff]  ;;  %v16311_v34 = vld [vmem:[#allocation126_spill] sm:$0xff] }
 0xf0c   : > { %v9045_v50 = vpop.f32.mrf.mxu1  ;;  %9179 = vmatmul.mubr.msk.bf16.gmra.mxu1 %vm505_vm0, %v13663_v9  ;;  %v2396_v43 = vadd.f32 %v16300_v20, %v16289_v47  ;;  %v16315_v20 = vld [vmem:[#allocation125_spill] sm:$0xff] }
 0xf0d   : > { %9670 = vmatprep.mubr.msk.bf16.mxu0 %vm505_vm0, %v4869_v5  ;;  %9180 = vmatprep.mubr.msk.bf16.mxu1 %vm505_vm0, %v13673_v12  ;;  %v4839_v42 = vmul.f32 %v10376_v17, %v9044_v58  ;;  %16299 = vst [vmem:[#allocation160_spill] sm:$0xff] %v13700_v23  ;;  %v16301_v5 = vld [vmem:[#allocation149_spill] sm:$0xff]  ;;  %v16302_v17 = vld [vmem:[#allocation75_spill] sm:$0xff] }
 0xf0e   : > { %v9046_v10 = vpop.f32.mrf.mxu1  ;;  %v2034_v22 = vadd.f32 %v16302_v17, %v16279_v24  ;;  %v13717_v44 = vpack.c.bf16 %v2400_v32, %v2396_v43  ;;  %v2376_v43 = vadd.f32 %v16315_v20, %v16289_v47  ;;  %v16317_v17 = vld [vmem:[#allocation81_spill] sm:$0xff] }
 0xf0f   : > { %v9047_v7 = vadd.f32 %v9046_v10, %v9045_v50  ;;  %v2466_v50 = vadd.f32 %v16301_v5, %v16289_v47  ;;  %v10382_v10 = vpop.eup %10381  ;;  %v16316_v5 = vld [vmem:[#allocation145_spill] sm:$0xff] }
 0xf10   : > { %v9048_v49 = vpop.f32.mrf.mxu1  ;;  %16304 = vst [vmem:[#allocation110_spill] sm:$0xff] %v13717_v44 }
 0xf11   : > { %v4840_v53 = vmul.f32 %v10378_v48, %v9047_v7  ;;  %v16303_v7 = vld [vmem:[#allocation129_spill] sm:$0xff]  ;;  %v13721_v41 = vpack.c.bf16 %v2470_v37, %v2466_v50  ;;  %v13739_v37 = vpack.c.bf16 %v2460_v2, %v2456_v0  ;;  %v2446_v50 = vadd.f32 %v16316_v5, %v16289_v47 }
 0xf12   : > { %v9049_v38 = vpop.f32.mrf.mxu1  ;;  %v2390_v48 = vadd.f32 %v16303_v7, %v16289_v47  ;;  %v16318_v7 = vld [vmem:[#allocation123_spill] sm:$0xff]  ;;  %v2440_v2 = vadd.f32 %v16320_v36, %v16289_v47  ;;  %v2436_v0 = vadd.f32 %v16324_v45, %v16289_v47  ;;  %v16341_v45 = vld [vmem:[#allocation114_spill] sm:$0xff] }
 0xf13   : > { %v4870_v19 = vpack.c.bf16 %v4840_v53, %v4839_v42  ;;  %v9050_v13 = vadd.f32 %v9049_v38, %v9048_v49  ;;  %16306 = vst [vmem:[#allocation107_spill] sm:$0xff] %v13721_v41  ;;  %v2030_v42 = vadd.f32 %v16307_v39, %v16279_v24  ;;  %v16308_v53 = vld [vmem:[#allocation128_spill] sm:$0xff]  ;;  %16314 = vst [vmem:[#allocation69_spill] sm:$0xff] %v13739_v37 }
 0xf14   : > { %v9051_v52 = vpop.f32.mrf.mxu1  ;;  %9181 = vmatmul.mubr.msk.bf16.gmra.mxu1 %vm505_vm0, %v13673_v12  ;;  %v2386_v8 = vadd.f32 %v16308_v53, %v16289_v47  ;;  %v13778_v20 = vpack.c.bf16 %v2440_v2, %v2436_v0  ;;  %v16337_v2 = vld [vmem:[#allocation84_spill] sm:$0xff]  ;;  %v2340_v0 = vadd.f32 %v16341_v45, %v16289_v47 }
 0xf15   : > { %9671 = vmatmul.mubr.msk.bf16.vlgmr.msra.gmra.mxu0 %vm505_vm0, %v4870_v19  ;;  %9182 = vmatprep.mubr.msk.bf16.mxu1 %vm505_vm0, %v13692_v60  ;;  %v4841_v49 = vmul.f32 %v10380_v33, %v9050_v13  ;;  %v13731_v30 = vpack.c.bf16 %v2034_v22, %v2030_v42  ;;  %v2380_v19 = vadd.f32 %v16311_v34, %v16289_v47  ;;  %v10384_v33 = vpop.eup %10383  ;;  %v16322_v42 = vld [vmem:[#allocation79_spill] sm:$0xff] }
 0xf16   : > { %9201 = vmatpush3.bf16.msra.mxu0 %v13696_v35  ;;  %v9052_v40 = vpop.f32.mrf.mxu1  ;;  %v13735_v27 = vpack.c.bf16 %v2390_v48, %v2386_v8  ;;  %v2044_v22 = vadd.f32 %v16317_v17, %v16279_v24  ;;  %v2370_v48 = vadd.f32 %v16318_v7, %v16289_v47  ;;  %v2040_v53 = vadd.f32 %v16322_v42, %v16279_v24  ;;  %v16323_v8 = vld [vmem:[#allocation122_spill] sm:$0xff] }
 0xf17   : > { %v9053_v58 = vadd.f32 %v9052_v40, %v9051_v52  ;;  %9202 = vmatprep.subr.bf16.mxu0 %v13700_v23  ;;  %16310 = vst [vmem:[#allocation71_spill] sm:$0xff] %v13731_v30  ;;  %v16313_v52 = vld [vmem:[#allocation146_spill] sm:$0xff]  ;;  %16329 = vst [vmem:[#allocation97_spill] sm:$0xff] %v13778_v20 }
 0xf18   : > { %v9054_v15 = vpop.f32.mrf.mxu1  ;;  %16312 = vst [vmem:[#allocation105_spill] sm:$0xff] %v13735_v27  ;;  %v2450_v29 = vadd.f32 %v16313_v52, %v16289_v47  ;;  %v13770_v34 = vpack.c.bf16 %v2044_v22, %v2040_v53  ;;  %v16335_v7 = vld [vmem:[#allocation138_spill] sm:$0xff]  ;;  %v16339_v53 = vld [vmem:[#allocation137_spill] sm:$0xff] }
 0xf19   : > { %v4842_v31 = vmul.f32 %v10382_v10, %v9053_v58  ;;  %v10386_v10 = vpop.eup %10385 }
 0xf1a   : > { %9203 = vmatpush3.bf16.msra.mxu0 %v13717_v44  ;;  %v9055_v61 = vpop.f32.mrf.mxu1  ;;  %16325 = vst [vmem:[#allocation100_spill] sm:$0xff] %v13770_v34 }
 0xf1b   : > { %v4871_v38 = vpack.c.bf16 %v4842_v31, %v4841_v49  ;;  %9204 = vmatprep.subr.bf16.mxu0 %v13721_v41  ;;  %v9056_v13 = vadd.f32 %v9055_v61, %v9054_v15  ;;  %v13756_v15 = vpack.c.bf16 %v2380_v19, %v2376_v43  ;;  %v13760_v49 = vpack.c.bf16 %v2450_v29, %v2446_v50  ;;  %v16326_v19 = vld [vmem:[#allocation120_spill] sm:$0xff]  ;;  %v16328_v29 = vld [vmem:[#allocation141_spill] sm:$0xff]  ;;  %v16330_v43 = vld [vmem:[#allocation119_spill] sm:$0xff] }
 0xf1c   : > { %v9057_v32 = vpop.f32.mrf.mxu1  ;;  %9183 = vmatmul.mubr.msk.bf16.gmra.mxu1 %vm505_vm0, %v13692_v60  ;;  %v2366_v61 = vadd.f32 %v16323_v8, %v16289_v47  ;;  %v16332_v50 = vld [vmem:[#allocation86_spill] sm:$0xff]  ;;  %v2416_v8 = vadd.f32 %v16339_v53, %v16289_v47  ;;  %v16365_v41 = vld [vmem:[#allocation164_spill] sm:$0xff] }
 0xf1d   : > { %9674 = vmatprep.mubr.msk.bf16.mxu0 %vm505_vm0, %v4871_v38  ;;  %9184 = vmatprep.mubr.msk.bf16.mxu1 %vm505_vm0, %v13731_v30  ;;  %16319 = vst [vmem:[#allocation102_spill] sm:$0xff] %v13756_v15  ;;  %16321 = vst [vmem:[#allocation66_spill] sm:$0xff] %v13760_v49  ;;  %v4843_v31 = vmul.f32 %v10384_v33, %v9056_v13  ;;  %v2430_v13 = vadd.f32 %v16328_v29, %v16289_v47  ;;  %v16331_v33 = vld [vmem:[#allocation140_spill] sm:$0xff] }
 0xf1e   : > { %9205 = vmatpush3.bf16.msra.mxu0 %v13735_v27  ;;  %v9058_v40 = vpop.f32.mrf.mxu1  ;;  %v13774_v52 = vpack.c.bf16 %v2370_v48, %v2366_v61  ;;  %v2426_v5 = vadd.f32 %v16331_v33, %v16289_v47  ;;  %v2420_v48 = vadd.f32 %v16335_v7, %v16289_v47  ;;  %v16347_v33 = vld [vmem:[#allocation89_spill] sm:$0xff] }
 0xf1f   : > { %v9059_v58 = vadd.f32 %v9058_v40, %v9057_v32  ;;  %9206 = vmatprep.subr.bf16.mxu0 %v13739_v37  ;;  %v2360_v32 = vadd.f32 %v16326_v19, %v16289_v47  ;;  %v2356_v40 = vadd.f32 %v16330_v43, %v16289_v47 }
 0xf20   : > { %16327 = vst [vmem:[#allocation64_spill] sm:$0xff] %v13774_v52  ;;  %v13799_v36 = vpack.c.bf16 %v2430_v13, %v2426_v5  ;;  %v13815_v19 = vpack.c.bf16 %v2420_v48, %v2416_v8  ;;  %v16345_v13 = vld [vmem:[#allocation91_spill] sm:$0xff]  ;;  %v2060_v5 = vadd.f32 %v16347_v33, %v16279_v24  ;;  %v4478_v48 = vpop.xlane.xlu0 %4477  ;;  %v16356_v33 = vld [vmem:[#allocation104_spill] sm:$0xff] }
 0xf21   : > { %v4844_v39 = vmul.f32 %v10386_v10, %v9059_v58  ;;  %v2054_v58 = vadd.f32 %v16332_v50, %v16279_v24  ;;  %v16333_v10 = vld [vmem:[#allocation117_spill] sm:$0xff]  ;;  %v13795_v22 = vpack.c.bf16 %v2360_v32, %v2356_v40  ;;  %v2064_v43 = vadd.f32 %v16345_v13, %v16279_v24  ;;  %v16349_v50 = vld [vmem:[#allocation96_spill] sm:$0xff] }
 0xf22   : > { %9207 = vmatpush3.bf16.msra.mxu0 %v13756_v15  ;;  %v2350_v17 = vadd.f32 %v16333_v10, %v16289_v47  ;;  %16336 = vst [vmem:[#allocation95_spill] sm:$0xff] %v13799_v36  ;;  %16343 = vst [vmem:[#allocation49_spill] sm:$0xff] %v13815_v19  ;;  %v16344_v32 = vld [vmem:[#allocation113_spill] sm:$0xff]  ;;  %v16350_v10 = vld [vmem:[#allocation94_spill] sm:$0xff]  ;;  %10387 = vrcp.f32 %v4478_v48 }
 0xf23   : > { %v4872_v38 = vpack.c.bf16 %v4844_v39, %v4843_v31  ;;  %9208 = vmatprep.subr.bf16.mxu0 %v13760_v49  ;;  %16334 = vst [vmem:[#allocation61_spill] sm:$0xff] %v13795_v22  ;;  %v2050_v31 = vadd.f32 %v16337_v2, %v16279_v24  ;;  %v16338_v39 = vld [vmem:[#allocation116_spill] sm:$0xff]  ;;  %v2336_v29 = vadd.f32 %v16344_v32, %v16289_v47  ;;  %v4481_v2 = vpop.xlane.xlu1 %4480 }
 0xf24   : > { %9185 = vmatmul.mubr.msk.bf16.gmra.mxu1 %vm505_vm0, %v13731_v30  ;;  %v2346_v42 = vadd.f32 %v16338_v39, %v16289_v47  ;;  %v13834_v47 = vpack.c.bf16 %v2064_v43, %v2060_v5  ;;  %10389 = vrcp.f32 %v4481_v2  ;;  %v16353_v39 = vld [vmem:[#allocation99_spill] sm:$0xff]  ;;  %v4484_v8 = vpop.xlane.xlu0 %4483  ;;  %v2090_v5 = vadd.f32 %v16356_v33, %v16279_v24  ;;  %v16379_v30 = vld [vmem:[#allocation169_spill] sm:$0xff] }
 0xf25   : > { %9675 = vmatmul.mubr.msk.bf16.gmra.mxu0 %vm505_vm0, %v4872_v38  ;;  %9186 = vmatprep.mubr.msk.bf16.mxu1 %vm505_vm0, %v13770_v34  ;;  %v13809_v61 = vpack.c.bf16 %v2054_v58, %v2050_v31  ;;  %v13827_v40 = vpack.c.bf16 %v2340_v0, %v2336_v29  ;;  %v2074_v58 = vadd.f32 %v16349_v50, %v16279_v24  ;;  %10391 = vrcp.f32 %v4484_v8  ;;  %v16355_v29 = vld [vmem:[#allocation106_spill] sm:$0xff] }
 0xf26   : > { %9209 = vmatpush3.bf16.msra.mxu0 %v13774_v52  ;;  %v13813_v38 = vpack.c.bf16 %v2350_v17, %v2346_v42  ;;  %16348 = vst [vmem:[#allocation54_spill] sm:$0xff] %v13834_v47  ;;  %v2070_v17 = vadd.f32 %v16350_v10, %v16279_v24  ;;  %v2080_v42 = vadd.f32 %v16353_v39, %v16279_v24 }
 0xf27   : > { %9210 = vmatprep.subr.bf16.mxu0 %v13778_v20  ;;  %16340 = vst [vmem:[#allocation50_spill] sm:$0xff] %v13809_v61  ;;  %16346 = vst [vmem:[#allocation56_spill] sm:$0xff] %v13827_v40  ;;  %v4487_v45 = vpop.xlane.xlu1 %4486  ;;  %v2094_v13 = vadd.f32 %v16355_v29, %v16279_v24 }
 0xf28   : > { %16342 = vst [vmem:[#allocation59_spill] sm:$0xff] %v13813_v38  ;;  %v13844_v7 = vpack.c.bf16 %v2074_v58, %v2070_v17  ;;  %10393 = vrcp.f32 %v4487_v45  ;;  %v4490_v48 = vpop.xlane.xlu0 %4489 }
 0xf29   : > { %v13864_v17 = vpack.c.bf16 %v2094_v13, %v2090_v5  ;;  %10395 = vrcp.f32 %v4490_v48 }
 0xf2a   : > { %9211 = vmatpush3.bf16.msra.mxu0 %v13795_v22  ;;  %16351 = vst [vmem:[#allocation92_spill] sm:$0xff] %v13844_v7 }
 0xf2b   : > { %9212 = vmatprep.subr.bf16.mxu0 %v13799_v36  ;;  %16357 = vst [vmem:[#allocation87_spill] sm:$0xff] %v13864_v17 }
 0xf2c   : > { %9187 = vmatmul.mubr.msk.bf16.gmra.mxu1 %vm505_vm0, %v13770_v34 }
 0xf2d   : > { %9188 = vmatprep.mubr.msk.bf16.mxu1 %vm505_vm0, %v13809_v61 }
 0xf2e   : > { %9213 = vmatpush3.bf16.msra.mxu0 %v13813_v38 }
 0xf2f   : > { %9214 = vmatprep.subr.bf16.mxu0 %v13815_v19  ;;  %v10388_v10 = vpop.eup %10387 }
 0xf32   : > { %9215 = vmatpush3.bf16.msra.mxu0 %v13827_v40 }
 0xf33   : > { %9814 = vmatprep.subr.msk.bf16.mxu0 %vm505_vm0, %v13617_v55  ;;  %v16352_v55 = vld [vmem:[#allocation101_spill] sm:$0xff] }
 0xf34   : > { %9189 = vmatmul.mubr.msk.bf16.gmra.mxu1 %vm505_vm0, %v13809_v61  ;;  %v2084_v31 = vadd.f32 %v16352_v55, %v16279_v24  ;;  %v10390_v55 = vpop.eup %10389 }
 0xf35   : > { %9190 = vmatprep.mubr.msk.bf16.mxu1 %vm505_vm0, %v13834_v47 }
 0xf36   : > { %v13854_v53 = vpack.c.bf16 %v2084_v31, %v2080_v42  ;;  %v4493_v31 = vpop.xlane.xlu1 %4492 }
 0xf37   : > { %10397 = vrcp.f32 %v4493_v31 }
 0xf38   : > { %16354 = vst [vmem:[#allocation90_spill] sm:$0xff] %v13854_v53 }
 0xf3a   : > { %v4499_v40 = vpop.xlane.xlu1 %4498 }
 0xf3c   : > { %9191 = vmatmul.mubr.msk.bf16.gmra.mxu1 %vm505_vm0, %v13834_v47 }
 0xf3d   : > { %9192 = vmatprep.mubr.msk.bf16.mxu1 %vm505_vm0, %v13844_v7 }
 0xf44   : > { %v9060_v0 = vpop.f32.mrf.mxu1  ;;  %9193 = vmatmul.mubr.msk.bf16.gmra.mxu1 %vm505_vm0, %v13844_v7 }
 0xf45   : > { %9194 = vmatprep.mubr.msk.bf16.mxu1 %vm505_vm0, %v13854_v53 }
 0xf46   : > { %v9061_v32 = vpop.f32.mrf.mxu1 }
 0xf47   : > { %v9062_v50 = vadd.f32 %v9061_v32, %v9060_v0  ;;  %v16358_v0 = vld [vmem:[#allocation111_spill] sm:$0xff] }
 0xf48   : > { %v9063_v43 = vpop.f32.mrf.mxu1  ;;  %v2104_v32 = vadd.f32 %v16358_v0, %v16279_v24 }
 0xf49   : > { %v4845_v42 = vmul.f32 %v10388_v10, %v9062_v50  ;;  %v10392_v50 = vpop.eup %10391 }
 0xf4a   : > { %v9064_v58 = vpop.f32.mrf.mxu1  ;;  %v10394_v48 = vpop.eup %10393 }
 0xf4b   : > { %v9065_v2 = vadd.f32 %v9064_v58, %v9063_v43  ;;  %v16359_v43 = vld [vmem:[#allocation109_spill] sm:$0xff] }
 0xf4c   : > { %v9066_v39 = vpop.f32.mrf.mxu1  ;;  %9195 = vmatmul.mubr.msk.bf16.gmra.mxu1 %vm505_vm0, %v13854_v53  ;;  %v2100_v33 = vadd.f32 %v16359_v43, %v16279_v24 }
 0xf4d   : > { %v4846_v8 = vmul.f32 %v10390_v55, %v9065_v2  ;;  %9196 = vmatprep.mubr.msk.bf16.mxu1 %vm505_vm0, %v13864_v17  ;;  %v4496_v2 = vpop.xlane.xlu0 %4495 }
 0xf4e   : > { %v9067_v45 = vpop.f32.mrf.mxu1  ;;  %v13875_v10 = vpack.c.bf16 %v2104_v32, %v2100_v33  ;;  %10399 = vrcp.f32 %v4496_v2  ;;  %v10396_v32 = vpop.eup %10395 }
 0xf4f   : > { %v4873_v29 = vpack.c.bf16 %v4846_v8, %v4845_v42  ;;  %v9068_v5 = vadd.f32 %v9067_v45, %v9066_v39  ;;  %10401 = vrcp.f32 %v4499_v40  ;;  %v10398_v43 = vpop.eup %10397  ;;  %v4505_v33 = vpop.xlane.xlu1 %4504 }
 0xf50   : > { %v9069_v13 = vpop.f32.mrf.mxu1  ;;  %16360 = vst [vmem:[#allocation85_spill] sm:$0xff] %v13875_v10 }
 0xf51   : > { %9678 = vmatprep.mubr.msk.bf16.mxu0 %vm505_vm0, %v4873_v29  ;;  %v4847_v31 = vmul.f32 %v10392_v50, %v9068_v5  ;;  %v4502_v29 = vpop.xlane.xlu0 %4501 }
 0xf52   : > { %v9070_v58 = vpop.f32.mrf.mxu1  ;;  %10403 = vrcp.f32 %v4502_v29 }
 0xf53   : > { %v9071_v55 = vadd.f32 %v9070_v58, %v9069_v13  ;;  %10405 = vrcp.f32 %v4505_v33 }
 0xf54   : > { %v9072_v19 = vpop.f32.mrf.mxu1  ;;  %9197 = vmatmul.mubr.msk.bf16.gmra.mxu1 %vm505_vm0, %v13864_v17 }
 0xf55   : > { %v4848_v42 = vmul.f32 %v10394_v48, %v9071_v55  ;;  %9198 = vmatprep.mubr.msk.bf16.mxu1 %vm505_vm0, %v13875_v10 }
 0xf56   : > { %v9073_v24 = vpop.f32.mrf.mxu1 }
 0xf57   : > { %v4874_v39 = vpack.c.bf16 %v4848_v42, %v4847_v31  ;;  %v9074_v45 = vadd.f32 %v9073_v24, %v9072_v19  ;;  %v4508_v42 = vpop.xlane.xlu0 %4507 }
 0xf58   : > { %v9075_v8 = vpop.f32.mrf.mxu1  ;;  %10407 = vrcp.f32 %v4508_v42 }
 0xf59   : > { %9679 = vmatmul.mubr.msk.bf16.gmra.mxu0 %vm505_vm0, %v4874_v39  ;;  %v4849_v5 = vmul.f32 %v10396_v32, %v9074_v45 }
 0xf5a   : > { %v9076_v0 = vpop.f32.mrf.mxu1 }
 0xf5b   : > { %v9077_v13 = vadd.f32 %v9076_v0, %v9075_v8  ;;  %v10400_v31 = vpop.eup %10399  ;;  %v4511_v8 = vpop.xlane.xlu1 %4510 }
 0xf5c   : > { %v9078_v58 = vpop.f32.mrf.mxu1  ;;  %9199 = vmatmul.mubr.msk.bf16.gmra.mxu1 %vm505_vm0, %v13875_v10  ;;  %v10402_v39 = vpop.eup %10401  ;;  %10409 = vrcp.f32 %v4511_v8  ;;  %v16368_v10 = vld [vmem:[#allocation165_spill] sm:$0xff] }
 0xf5d   : > { %v4850_v50 = vmul.f32 %v10398_v43, %v9077_v13 }
 0xf5e   : > { %v9079_v2 = vpop.f32.mrf.mxu1 }
 0xf5f   : > { %v4875_v40 = vpack.c.bf16 %v4850_v50, %v4849_v5  ;;  %v9080_v19 = vadd.f32 %v9079_v2, %v9078_v58  ;;  %v10404_v33 = vpop.eup %10403  ;;  %v4514_v58 = vpop.xlane.xlu0 %4513 }
 0xf60   : > { %v9081_v55 = vpop.f32.mrf.mxu1  ;;  %v10406_v50 = vpop.eup %10405  ;;  %10411 = vrcp.f32 %v4514_v58 }
 0xf61   : > { %9682 = vmatprep.mubr.msk.bf16.mxu0 %vm505_vm0, %v4875_v40  ;;  %v4851_v36 = vmul.f32 %v10400_v31, %v9080_v19  ;;  %v4517_v2 = vpop.xlane.xlu1 %4516 }
 0xf62   : > { %v9082_v48 = vpop.f32.mrf.mxu1  ;;  %10413 = vrcp.f32 %v4517_v2 }
 0xf63   : > { %v9083_v24 = vadd.f32 %v9082_v48, %v9081_v55 }
 0xf64   : > { %v9084_v0 = vpop.f32.mrf.mxu1 }
 0xf65   : > { %v4852_v22 = vmul.f32 %v10402_v39, %v9083_v24  ;;  %v4520_v39 = vpop.xlane.xlu0 %4519 }
 0xf66   : > { %v9085_v45 = vpop.f32.mrf.mxu1  ;;  %10415 = vrcp.f32 %v4520_v39 }
 0xf67   : > { %v4876_v32 = vpack.c.bf16 %v4852_v22, %v4851_v36  ;;  %v9086_v13 = vadd.f32 %v9085_v45, %v9084_v0  ;;  %v10408_v36 = vpop.eup %10407  ;;  %v4523_v45 = vpop.xlane.xlu1 %4522 }
 0xf68   : > { %v9087_v29 = vpop.f32.mrf.mxu1  ;;  %10417 = vrcp.f32 %v4523_v45 }
 0xf69   : > { %9683 = vmatmul.mubr.msk.bf16.gmra.mxu0 %vm505_vm0, %v4876_v32  ;;  %v4853_v55 = vmul.f32 %v10404_v33, %v9086_v13  ;;  %v10410_v0 = vpop.eup %10409 }
 0xf6a   : > { %v9088_v43 = vpop.f32.mrf.mxu1 }
 0xf6b   : > { %v9089_v5 = vadd.f32 %v9088_v43, %v9087_v29 }
 0xf6c   : > { %v9090_v40 = vpop.f32.mrf.mxu1 }
 0xf6d   : > { %v4854_v48 = vmul.f32 %v10406_v50, %v9089_v5  ;;  %v10412_v2 = vpop.eup %10411 }
 0xf6e   : > { %v9091_v19 = vpop.f32.mrf.mxu1 }
 0xf6f   : > { %v4877_v31 = vpack.c.bf16 %v4854_v48, %v4853_v55  ;;  %v9092_v24 = vadd.f32 %v9091_v19, %v9090_v40  ;;  %v4526_v40 = vpop.xlane.xlu0 %4525  ;;  %v10414_v48 = vpop.eup %10413 }
 0xf70   : > { %v9093_v42 = vpop.f32.mrf.mxu1  ;;  %v4529_v19 = vpop.xlane.xlu1 %4528  ;;  %10419 = vrcp.f32 %v4526_v40 }
 0xf71   : > { %9686 = vmatprep.mubr.msk.bf16.mxu0 %vm505_vm0, %v4877_v31  ;;  %v4855_v29 = vmul.f32 %v10408_v36, %v9092_v24  ;;  %10421 = vrcp.f32 %v4529_v19 }
 0xf72   : > { %v9094_v22 = vpop.f32.mrf.mxu1 }
 0xf73   : > { %v9095_v8 = vadd.f32 %v9094_v22, %v9093_v42  ;;  %v10416_v45 = vpop.eup %10415 }
 0xf74   : > { %v9096_v32 = vpop.f32.mrf.mxu1 }
 0xf75   : > { %v4856_v43 = vmul.f32 %v10410_v0, %v9095_v8 }
 0xf76   : > { %v9097_v13 = vpop.f32.mrf.mxu1 }
 0xf77   : > { %v4878_v33 = vpack.c.bf16 %v4856_v43, %v4855_v29  ;;  %v9098_v5 = vadd.f32 %v9097_v13, %v9096_v32  ;;  %v4532_v32 = vpop.xlane.xlu0 %4531  ;;  %v10418_v43 = vpop.eup %10417 }
 0xf78   : > { %v9099_v58 = vpop.f32.mrf.mxu1  ;;  %v4535_v13 = vpop.xlane.xlu1 %4534  ;;  %10423 = vrcp.f32 %v4532_v32 }
 0xf79   : > { %9687 = vmatmul.mubr.msk.bf16.gmra.mxu0 %vm505_vm0, %v4878_v33  ;;  %v4857_v42 = vmul.f32 %v10412_v2, %v9098_v5  ;;  %10425 = vrcp.f32 %v4535_v13 }
 0xf7a   : > { %v9100_v50 = vpop.f32.mrf.mxu1 }
 0xf7b   : > { %v9101_v55 = vadd.f32 %v9100_v50, %v9099_v58 }
 0xf7c   : > { %v9102_v31 = vpop.f32.mrf.mxu1 }
 0xf7d   : > { %v4858_v22 = vmul.f32 %v10414_v48, %v9101_v55  ;;  %v10420_v19 = vpop.eup %10419 }
 0xf7e   : > { %v9103_v24 = vpop.f32.mrf.mxu1 }
 0xf7f   : > { %v4879_v36 = vpack.c.bf16 %v4858_v22, %v4857_v42  ;;  %v9104_v8 = vadd.f32 %v9103_v24, %v9102_v31  ;;  %v4538_v31 = vpop.xlane.xlu0 %4537  ;;  %v10422_v22 = vpop.eup %10421 }
 0xf80   : > { %v9105_v39 = vpop.f32.mrf.mxu1  ;;  %v4541_v24 = vpop.xlane.xlu1 %4540  ;;  %10427 = vrcp.f32 %v4538_v31 }
 0xf81   : > { %9690 = vmatprep.mubr.msk.bf16.mxu0 %vm505_vm0, %v4879_v36  ;;  %v4859_v58 = vmul.f32 %v10416_v45, %v9104_v8  ;;  %10429 = vrcp.f32 %v4541_v24 }
 0xf82   : > { %v9106_v0 = vpop.f32.mrf.mxu1 }
 0xf83   : > { %v9107_v29 = vadd.f32 %v9106_v0, %v9105_v39 }
 0xf84   : > { %v9108_v33 = vpop.f32.mrf.mxu1 }
 0xf85   : > { %v4860_v50 = vmul.f32 %v10418_v43, %v9107_v29  ;;  %v10424_v13 = vpop.eup %10423 }
 0xf86   : > { %v9109_v5 = vpop.f32.mrf.mxu1 }
 0xf87   : > { %v4880_v2 = vpack.c.bf16 %v4860_v50, %v4859_v58  ;;  %v9110_v55 = vadd.f32 %v9109_v5, %v9108_v33  ;;  %v4544_v33 = vpop.xlane.xlu0 %4543  ;;  %v10426_v50 = vpop.eup %10425 }
 0xf88   : > { %v9111_v40 = vpop.f32.mrf.mxu1  ;;  %v4547_v5 = vpop.xlane.xlu1 %4546  ;;  %10431 = vrcp.f32 %v4544_v33 }
 0xf89   : > { %9691 = vmatmul.mubr.msk.bf16.gmra.mxu0 %vm505_vm0, %v4880_v2  ;;  %v4861_v39 = vmul.f32 %v10420_v19, %v9110_v55  ;;  %10433 = vrcp.f32 %v4547_v5 }
 0xf8a   : > { %v9112_v48 = vpop.f32.mrf.mxu1 }
 0xf8b   : > { %v9113_v42 = vadd.f32 %v9112_v48, %v9111_v40 }
 0xf8c   : > { %v9114_v36 = vpop.f32.mrf.mxu1 }
 0xf8d   : > { %v4862_v0 = vmul.f32 %v10422_v22, %v9113_v42  ;;  %v10428_v24 = vpop.eup %10427 }
 0xf8e   : > { %v9115_v8 = vpop.f32.mrf.mxu1 }
 0xf8f   : > { %v4881_v45 = vpack.c.bf16 %v4862_v0, %v4861_v39  ;;  %v9116_v29 = vadd.f32 %v9115_v8, %v9114_v36  ;;  %v10430_v39 = vpop.eup %10429 }
 0xf90   : > { %v9117_v32 = vpop.f32.mrf.mxu1 }
 0xf91   : > { %9694 = vmatprep.mubr.msk.bf16.mxu0 %vm505_vm0, %v4881_v45  ;;  %v4863_v40 = vmul.f32 %v10424_v13, %v9116_v29 }
 0xf92   : > { %v9118_v43 = vpop.f32.mrf.mxu1 }
 0xf93   : > { %v9119_v58 = vadd.f32 %v9118_v43, %v9117_v32 }
 0xf94   : > { %v9120_v2 = vpop.f32.mrf.mxu1 }
 0xf95   : > { %v4864_v48 = vmul.f32 %v10426_v50, %v9119_v58  ;;  %v10432_v33 = vpop.eup %10431 }
 0xf96   : > { %v9121_v55 = vpop.f32.mrf.mxu1  ;;  %v10434_v50 = vpop.eup %10433 }
 0xf97   : > { %v4882_v19 = vpack.c.bf16 %v4864_v48, %v4863_v40  ;;  %v9122_v42 = vadd.f32 %v9121_v55, %v9120_v2 }
 0xf98   : > { %v9123_v31 = vpop.f32.mrf.mxu1 }
 0xf99   : > { %9695 = vmatmul.mubr.msk.bf16.gmra.mxu0 %vm505_vm0, %v4882_v19  ;;  %v4865_v8 = vmul.f32 %v10428_v24, %v9122_v42 }
 0xf9a   : > { %v9124_v22 = vpop.f32.mrf.mxu1 }
 0xf9b   : > { %v9125_v36 = vadd.f32 %v9124_v22, %v9123_v31 }
 0xf9c   : > { %v9126_v0 = vpop.f32.mrf.mxu1 }
 0xf9d   : > { %v4866_v45 = vmul.f32 %v10430_v39, %v9125_v36 }
 0xf9e   : > { %v9127_v32 = vpop.f32.mrf.mxu1 }
 0xf9f   : > { %v4883_v43 = vpack.c.bf16 %v4866_v45, %v4865_v8  ;;  %v9128_v29 = vadd.f32 %v9127_v32, %v9126_v0 }
 0xfa0   : > { %v9129_v38 = vpop.f32.mrf.mxu1 }
 0xfa1   : > { %9698 = vmatprep.mubr.msk.bf16.mxu0 %vm505_vm0, %v4883_v43  ;;  %v4867_v2 = vmul.f32 %v10432_v33, %v9128_v29 }
 0xfa2   : > { %v9130_v13 = vpop.f32.mrf.mxu1 }
 0xfa3   : > { %v9131_v58 = vadd.f32 %v9130_v13, %v9129_v38 }
 0xfa4   : > { %v13893_v5 = vpop.f32.mrf.mxu1 }
 0xfa5   : > { %v4868_v40 = vmul.f32 %v10434_v50, %v9131_v58 }
 0xfa6   : > { %v13895_v48 = vpop.f32.mrf.mxu1 }
 0xfa7   : > { %v4884_v55 = vpack.c.bf16 %v4868_v40, %v4867_v2  ;;  %v5448_v19 = vmax.f32 %v13893_v5, %v13895_v48 }
 0xfa8   : > { %v13899_v31 = vpop.f32.mrf.mxu1 }
 0xfa9   : > { %5449 = vmax.xlane.f32.xlu0 %v5448_v19  ;;  %9699 = vmatmul.mubr.msk.bf16.gmra.mxu0 %vm505_vm0, %v4884_v55 }
 0xfaa   : > { %v13902_v42 = vpop.f32.mrf.mxu1 }
 0xfab   : > { %v5451_v38 = vmax.f32 %v13899_v31, %v13902_v42 }
 0xfac   : > { %v13906_v22 = vpop.f32.mrf.mxu1 }
 0xfad   : > { %5452 = vmax.xlane.f32.xlu1 %v5451_v38 }
 0xfae   : > { %v13908_v24 = vpop.f32.mrf.mxu1 }
 0xfaf   : > { %v5454_v36 = vmax.f32 %v13906_v22, %v13908_v24 }
 0xfb0   : > { %v13912_v39 = vpop.f32.mrf.mxu1 }
 0xfb1   : > { %5455 = vmax.xlane.f32.xlu0 %v5454_v36 }
 0xfb2   : > { %v13914_v0 = vpop.f32.mrf.mxu1 }
 0xfb3   : > { %v5457_v8 = vmax.f32 %v13912_v39, %v13914_v0 }
 0xfb4   : > { %v13918_v45 = vpop.f32.mrf.mxu1 }
 0xfb5   : > { %5458 = vmax.xlane.f32.xlu1 %v5457_v8  ;;  %v13953_v8 = vld [vmem:[%s15710_s3 + $0x4] ss:$0 sm:$0xff] }
 0xfb6   : > { %v13920_v32 = vpop.f32.mrf.mxu1  ;;  %v3653_v37 = vadd.f32 %v13953_v8, %v16365_v41  ;;  %v3664_v35 = vadd.f32 %v16368_v10, %v13953_v8  ;;  %v3680_v9 = vadd.f32 %v16379_v30, %v13953_v8 }
 0xfb7   : > { %16361 = vst [vmem:[#allocation46_spill] sm:$0xff] %v13920_v32  ;;  %v5460_v10 = vmax.f32 %v13918_v45, %v13920_v32 }
 0xfb8   : > { %v13922_v43 = vpop.f32.mrf.mxu1 }
 0xfba   : > { %v13924_v29 = vpop.f32.mrf.mxu1 }
 0xfbc   : > { %v13926_v13 = vpop.f32.mrf.mxu1 }
 0xfbe   : > { %v13928_v33 = vpop.f32.mrf.mxu1 }
 0xfbf   : > { %v5466_v1 = vmax.f32 %v13926_v13, %v13928_v33 }
 0xfc0   : > { %v13930_v58 = vpop.f32.mrf.mxu1 }
 0xfc2   : > { %v13932_v50 = vpop.f32.mrf.mxu1 }
 0xfc3   : > { %v5469_v30 = vmax.f32 %v13930_v58, %v13932_v50 }
 0xfc4   : > { %v13934_v2 = vpop.f32.mrf.mxu1 }
 0xfc6   : > { %v13936_v40 = vpop.f32.mrf.mxu1  ;;  %6447 = vrot.lane.b32.xlu1 %v13445_v21, %s10897_s16  ;;  %v16363_v21 = vld [vmem:[#allocation163_spill] sm:$0xff] }
 0xfc7   : > { %6465 = vrot.lane.b32.xlu0 %v13425_v56, %s10897_s16  ;;  %v3661_v56 = vadd.f32 %v16363_v21, %v13953_v8 }
 0xfc8   : > { %v13942_v55 = vpop.f32.mrf.mxu1 }
 0xfca   : > { %v13944_v19 = vpop.f32.mrf.mxu1 }
 0xfcb   : > { %16362 = vst [vmem:[#allocation45_spill] sm:$0xff] %v13944_v19 }
 0xfcc   : > { %v13946_v38 = vpop.f32.mrf.mxu1 }
 0xfce   : > { %v13948_v36 = vpop.f32.mrf.mxu1 }
 0xfd0   : > { %v13955_v49 = vpop.f32.mrf.mxu1 }
 0xfd2   : > { %v13957_v20 = vpop.f32.mrf.mxu1 }
 0xfd4   : > { %v13961_v15 = vpop.f32.mrf.mxu1 }
 0xfd5   : > { %16364 = vst [vmem:[#allocation82_spill] sm:$0xff] %v13961_v15  ;;  %v9672_v52 = vpop.f32.mrf.mxu0 }
 0xfd6   : > { %v13965_v44 = vadd.f32 %v9672_v52, %v3661_v56  ;;  %v13967_v27 = vpop.f32.mrf.mxu1 }
 0xfd7   : > { %16367 = vst [vmem:[#allocation42_spill] sm:$0xff] %v13967_v27  ;;  %v5000_v23 = vpop.f32.mrf.mxu0 }
 0xfd8   : > { %16366 = vst [vmem:[#allocation80_spill] sm:$0xff] %v13965_v44  ;;  %v13971_v53 = vadd.f32 %v5000_v23, %v3653_v37  ;;  %v13973_v17 = vpop.f32.mrf.mxu1  ;;  %v16374_v23 = vld [vmem:[#allocation167_spill] sm:$0xff] }
 0xfd9   : > { %v9673_v47 = vpop.f32.mrf.mxu0  ;;  %v3677_v37 = vadd.f32 %v16374_v23, %v13953_v8  ;;  %v5463_v23 = vmax.f32 %v13922_v43, %v13924_v29 }
 0xfda   : > { %16369 = vst [vmem:[#allocation41_spill] sm:$0xff] %v13971_v53  ;;  %v13975_v21 = vadd.f32 %v9673_v47, %v3664_v35  ;;  %v13977_v7 = vpop.f32.mrf.mxu1 }
 0xfdb   : > { %v13985_v56 = vpop.f32.mrf.mxu0 }
 0xfdc   : > { %16370 = vst [vmem:[#allocation76_spill] sm:$0xff] %v13975_v21  ;;  %v13979_v34 = vpop.f32.mrf.mxu1  ;;  %16373 = vst [vmem:[#allocation35_spill] sm:$0xff] %v13985_v56  ;;  %v16376_v21 = vld [vmem:[#allocation168_spill] sm:$0xff] }
 0xfdd   : > { %16371 = vst [vmem:[#allocation74_spill] sm:$0xff] %v13979_v34  ;;  %v3669_v53 = vadd.f32 %v13953_v8, %v16376_v21 }
 0xfde   : > { %v13981_v41 = vpop.f32.mrf.mxu1 }
 0xfdf   : > { %16372 = vst [vmem:[#allocation37_spill] sm:$0xff] %v13981_v41 }
 0xfe0   : > { %v13983_v52 = vpop.f32.mrf.mxu1 }
 0xfe2   : > { %v13987_v44 = vpop.f32.mrf.mxu1 }
 0xfe4   : > { %v13993_v35 = vpop.f32.mrf.mxu1 }
 0xfe5   : > { %16375 = vst [vmem:[#allocation77_spill] sm:$0xff] %v13993_v35  ;;  %v9676_v47 = vpop.f32.mrf.mxu0 }
 0xfe6   : > { %v13997_v61 = vadd.f32 %v9676_v47, %v3677_v37  ;;  %5461 = vmax.xlane.f32.xlu0 %v5460_v10  ;;  %v13999_v60 = vpop.f32.mrf.mxu1 }
 0xfe7   : > { %16378 = vst [vmem:[#allocation98_spill] sm:$0xff] %v13999_v60  ;;  %v5016_v56 = vpop.f32.mrf.mxu0 }
 0xfe8   : > { %16377 = vst [vmem:[#allocation83_spill] sm:$0xff] %v13997_v61  ;;  %v14003_v12 = vadd.f32 %v5016_v56, %v3669_v53  ;;  %v14009_v32 = vpop.f32.mrf.mxu1  ;;  %v5472_v53 = vmax.f32 %v13934_v2, %v13936_v40  ;;  %v5487_v61 = vmax.f32 %v13973_v17, %v13977_v7 }
 0xfe9   : > { %v9677_v21 = vpop.f32.mrf.mxu0 }
 0xfea   : > { %16380 = vst [vmem:[#allocation103_spill] sm:$0xff] %v14003_v12  ;;  %v14011_v37 = vadd.f32 %v9677_v21, %v3680_v9  ;;  %5467 = vmax.xlane.f32.xlu0 %v5466_v1  ;;  %v14013_v10 = vpop.f32.mrf.mxu1  ;;  %5464 = vmax.xlane.f32.xlu1 %v5463_v23  ;;  %v5475_v9 = vmax.f32 %v13942_v55, %v13944_v19 }
 0xfeb   : > { %v5478_v1 = vmax.f32 %v13946_v38, %v13948_v36 }
 0xfec   : > { %16381 = vst [vmem:[#allocation88_spill] sm:$0xff] %v14011_v37  ;;  %v14019_v56 = vpop.f32.mrf.mxu1  ;;  %v5481_v37 = vmax.f32 %v13955_v49, %v13957_v20 }
 0xfed   : > { %16382 = vst [vmem:[#allocation93_spill] sm:$0xff] %v14019_v56 }
 0xfee   : > { %5473 = vmax.xlane.f32.xlu0 %v5472_v53  ;;  %v14021_v47 = vpop.f32.mrf.mxu1  ;;  %5470 = vmax.xlane.f32.xlu1 %v5469_v30  ;;  %v5484_v53 = vmax.f32 %v13961_v15, %v13967_v27  ;;  %v5493_v15 = vmax.f32 %v13983_v52, %v13987_v44 }
 0xfef   : > { %16383 = vst [vmem:[#allocation136_spill] sm:$0xff] %v14021_v47 }
 0xff0   : > { %v14027_v21 = vpop.f32.mrf.mxu1 }
 0xff1   : > { %16384 = vst [vmem:[#allocation154_spill] sm:$0xff] %v14027_v21 }
 0xff2   : > { %5479 = vmax.xlane.f32.xlu0 %v5478_v1  ;;  %v14029_v23 = vpop.f32.mrf.mxu1  ;;  %5476 = vmax.xlane.f32.xlu1 %v5475_v9  ;;  %v5490_v1 = vmax.f32 %v13979_v34, %v13981_v41  ;;  %v5499_v34 = vmax.f32 %v14009_v32, %v14013_v10 }
 0xff4   : > { %v14035_v12 = vpop.f32.mrf.mxu1 }
 0xff5   : > { %16385 = vst [vmem:[#allocation108_spill] sm:$0xff] %v14035_v12 }
 0xff6   : > { %5485 = vmax.xlane.f32.xlu0 %v5484_v53  ;;  %v14037_v30 = vpop.f32.mrf.mxu1  ;;  %5482 = vmax.xlane.f32.xlu1 %v5481_v37  ;;  %v5496_v53 = vmax.f32 %v13993_v35, %v13999_v60  ;;  %v5505_v35 = vmax.f32 %v14027_v21, %v14029_v23  ;;  %v16411_v21 = vld [vmem:[#allocation176_spill] sm:$0xff] }
 0xff7   : > { %16386 = vst [vmem:[#allocation112_spill] sm:$0xff] %v14037_v30 }
 0xff8   : > { %v14043_v19 = vpop.f32.mrf.mxu1 }
 0xff9   : > { %16387 = vst [vmem:[#allocation130_spill] sm:$0xff] %v14043_v19 }
 0xffa   : > { %5491 = vmax.xlane.f32.xlu0 %v5490_v1  ;;  %v14045_v9 = vpop.f32.mrf.mxu1  ;;  %5488 = vmax.xlane.f32.xlu1 %v5487_v61  ;;  %v5502_v1 = vmax.f32 %v14019_v56, %v14021_v47 }
 0xffb   : > { %16388 = vst [vmem:[#allocation156_spill] sm:$0xff] %v14045_v9  ;;  %v5511_v56 = vmax.f32 %v14043_v19, %v14045_v9 }
 0xffc   : > { %v14051_v27 = vpop.f32.mrf.mxu1 }
 0xffd   : > { %16389 = vst [vmem:[#allocation155_spill] sm:$0xff] %v14051_v27 }
 0xffe   : > { %5497 = vmax.xlane.f32.xlu0 %v5496_v53  ;;  %v14053_v37 = vpop.f32.mrf.mxu1  ;;  %5494 = vmax.xlane.f32.xlu1 %v5493_v15  ;;  %v5508_v53 = vmax.f32 %v14035_v12, %v14037_v30 }
 0xfff   : > { %16390 = vst [vmem:[#allocation133_spill] sm:$0xff] %v14053_v37 }
0x1000   : > { %v14059_v41 = vpop.f32.mrf.mxu1 }
0x1001   : > { %16391 = vst [vmem:[#allocation124_spill] sm:$0xff] %v14059_v41 }
0x1002   : > { %5503 = vmax.xlane.f32.xlu0 %v5502_v1  ;;  %v14061_v61 = vpop.f32.mrf.mxu1  ;;  %5500 = vmax.xlane.f32.xlu1 %v5499_v34  ;;  %v5514_v1 = vmax.f32 %v14051_v27, %v14053_v37 }
0x1003   : > { %16392 = vst [vmem:[#allocation158_spill] sm:$0xff] %v14061_v61  ;;  %v5517_v12 = vmax.f32 %v14059_v41, %v14061_v61  ;;  %v16405_v61 = vld [vmem:[#allocation172_spill] sm:$0xff] }
0x1004   : > { %v14067_v60 = vpop.f32.mrf.mxu1 }
0x1005   : > { %16393 = vst [vmem:[#allocation157_spill] sm:$0xff] %v14067_v60 }
0x1006   : > { %5509 = vmax.xlane.f32.xlu0 %v5508_v53  ;;  %v14069_v15 = vpop.f32.mrf.mxu1  ;;  %5506 = vmax.xlane.f32.xlu1 %v5505_v35 }
0x1007   : > { %16394 = vst [vmem:[#allocation127_spill] sm:$0xff] %v14069_v15  ;;  %v5520_v53 = vmax.f32 %v14067_v60, %v14069_v15 }
0x1008   : > { %v14075_v47 = vpop.f32.mrf.mxu1 }
0x1009   : > { %16395 = vst [vmem:[#allocation118_spill] sm:$0xff] %v14075_v47 }
0x100a   : > { %5515 = vmax.xlane.f32.xlu0 %v5514_v1  ;;  %v14077_v34 = vpop.f32.mrf.mxu1  ;;  %5512 = vmax.xlane.f32.xlu1 %v5511_v56 }
0x100b   : > { %16396 = vst [vmem:[#allocation142_spill] sm:$0xff] %v14077_v34  ;;  %v5523_v27 = vmax.f32 %v14075_v47, %v14077_v34  ;;  %v16404_v34 = vld [vmem:[#allocation171_spill] sm:$0xff] }
0x100c   : > { %v14083_v30 = vpop.f32.mrf.mxu1 }
0x100d   : > { %16397 = vst [vmem:[#allocation159_spill] sm:$0xff] %v14083_v30 }
0x100e   : > { %5521 = vmax.xlane.f32.xlu0 %v5520_v53  ;;  %v14085_v35 = vpop.f32.mrf.mxu1  ;;  %5518 = vmax.xlane.f32.xlu1 %v5517_v12  ;;  %v14101_v12 = vpop.f32.mrf.mxu0 }
0x100f   : > { %16398 = vst [vmem:[#allocation121_spill] sm:$0xff] %v14085_v35  ;;  %v5526_v60 = vmax.f32 %v14083_v30, %v14085_v35  ;;  %16403 = vst [vmem:[#allocation55_spill] sm:$0xff] %v14101_v12 }
0x1010   : > { %v14089_v37 = vpop.f32.mrf.mxu1 }
0x1011   : > { %16399 = vst [vmem:[#allocation40_spill] sm:$0xff] %v14089_v37 }
0x1012   : > { %v14091_v1 = vpop.f32.mrf.mxu1  ;;  %5524 = vmax.xlane.f32.xlu1 %v5523_v27  ;;  %v3693_v27 = vadd.f32 %v16404_v34, %v13953_v8  ;;  %v16410_v34 = vld [vmem:[#allocation175_spill] sm:$0xff] }
0x1013   : > { %16400 = vst [vmem:[#allocation44_spill] sm:$0xff] %v14091_v1  ;;  %v5529_v56 = vmax.f32 %v14089_v37, %v14091_v1  ;;  %v3685_v37 = vadd.f32 %v13953_v8, %v16405_v61 }
0x1014   : > { %v14097_v15 = vpop.f32.mrf.mxu1 }
0x1015   : > { %16401 = vst [vmem:[#allocation48_spill] sm:$0xff] %v14097_v15  ;;  %5530 = vmax.xlane.f32.xlu0 %v5529_v56  ;;  %v16406_v56 = vld [vmem:[#allocation173_spill] sm:$0xff] }
0x1016   : > { %v14099_v53 = vpop.f32.mrf.mxu1  ;;  %5527 = vmax.xlane.f32.xlu1 %v5526_v60  ;;  %v3696_v35 = vadd.f32 %v16406_v56, %v13953_v8 }
0x1017   : > { %16402 = vst [vmem:[#allocation36_spill] sm:$0xff] %v14099_v53  ;;  %v5532_v47 = vmax.f32 %v14097_v15, %v14099_v53  ;;  %v3709_v53 = vadd.f32 %v16410_v34, %v13953_v8 }
0x1019   : > { %v9680_v41 = vpop.f32.mrf.mxu0 }
0x101a   : > { %v14109_v1 = vadd.f32 %v9680_v41, %v3693_v27  ;;  %5533 = vmax.xlane.f32.xlu1 %v5532_v47  ;;  %v3701_v41 = vadd.f32 %v13953_v8, %v16411_v21 }
0x101b   : > { %v5032_v30 = vpop.f32.mrf.mxu0 }
0x101c   : > { %v14113_v60 = vadd.f32 %v5032_v30, %v3685_v37  ;;  %v16413_v30 = vld [vmem:[#allocation177_spill] sm:$0xff] }
0x101d   : > { %v9681_v12 = vpop.f32.mrf.mxu0  ;;  %v3712_v37 = vadd.f32 %v16413_v30, %v13953_v8 }
0x101e   : > { %16407 = vst [vmem:[#allocation53_spill] sm:$0xff] %v14113_v60  ;;  %v14115_v19 = vadd.f32 %v9681_v12, %v3696_v35 }
0x101f   : > { %v14117_v15 = vpop.f32.mrf.mxu0 }
0x1020   : > { %16408 = vst [vmem:[#allocation60_spill] sm:$0xff] %v14115_v19  ;;  %16409 = vst [vmem:[#allocation58_spill] sm:$0xff] %v14117_v15 }
0x1029   : > { %v9684_v9 = vpop.f32.mrf.mxu0 }
0x102a   : > { %v14123_v61 = vadd.f32 %v9684_v9, %v3709_v53  ;;  %v14137_v53 = vpop.f32.mrf.mxu1 }
0x102b   : > { %6463 = vrot.lane.b32.xlu0 %v13437_v4, %s10897_s16  ;;  %6445 = vrot.lane.b32.xlu1 %v13463_v18, %s10897_s16  ;;  %v5048_v47 = vpop.f32.mrf.mxu0 }
0x102c   : > { %16412 = vst [vmem:[#allocation65_spill] sm:$0xff] %v14123_v61  ;;  %v14131_v35 = vadd.f32 %v5048_v47, %v3701_v41  ;;  %v16417_v47 = vld [vmem:[#allocation179_spill] sm:$0xff] }
0x102d   : > { %v9685_v12 = vpop.f32.mrf.mxu0 }
0x102e   : > { %16414 = vst [vmem:[#allocation63_spill] sm:$0xff] %v14131_v35  ;;  %v14133_v27 = vadd.f32 %v9685_v12, %v3712_v37  ;;  %v3725_v37 = vadd.f32 %v16417_v47, %v13953_v8  ;;  %v14145_v12 = vpop.f32.mrf.mxu1 }
0x102f   : > { %v14139_v18 = vpop.f32.mrf.mxu0 }
0x1030   : > { %16415 = vst [vmem:[#allocation70_spill] sm:$0xff] %v14133_v27  ;;  %16416 = vst [vmem:[#allocation161_spill] sm:$0xff] %v14139_v18  ;;  %v16418_v27 = vld [vmem:[#allocation180_spill] sm:$0xff] }
0x1032   : > { %v5450_v56 = vpop.xlane.xlu0 %5449 }
0x1033   : > { %v5544_v21 = vsub.f32 %v13893_v5, %v5450_v56  ;;  %v5545_v9 = vsub.f32 %v13895_v48, %v5450_v56 }
0x1035   : > { %v5608_v4 = vmul.f32 1.442695, %v5544_v21  ;;  %v5610_v34 = vmul.f32 1.442695, %v5545_v9  ;;  %v3717_v21 = vadd.f32 %v13953_v8, %v16418_v27 }
0x1036   : > { %v5453_v15 = vpop.xlane.xlu1 %5452 }
0x1037   : > { %10435 = vpow2.f32 %v5608_v4  ;;  %v5546_v30 = vsub.f32 %v13899_v31, %v5453_v15  ;;  %v5547_v41 = vsub.f32 %v13902_v42, %v5453_v15  ;;  %v16420_v4 = vld [vmem:[#allocation181_spill] sm:$0xff] }
0x1038   : > { %10437 = vpow2.f32 %v5610_v34  ;;  %v3728_v34 = vadd.f32 %v16420_v4, %v13953_v8 }
0x1039   : > { %v5612_v5 = vmul.f32 1.442695, %v5546_v30  ;;  %v5614_v48 = vmul.f32 1.442695, %v5547_v41  ;;  %v9688_v56 = vpop.f32.mrf.mxu0  ;;  %v14157_v30 = vpop.f32.mrf.mxu1 }
0x103a   : > { %v14149_v9 = vadd.f32 %v9688_v56, %v3725_v37  ;;  %v5456_v18 = vpop.xlane.xlu0 %5455 }
0x103b   : > { %10439 = vpow2.f32 %v5612_v5  ;;  %v5548_v31 = vsub.f32 %v13906_v22, %v5456_v18  ;;  %v5549_v42 = vsub.f32 %v13908_v24, %v5456_v18  ;;  %v5064_v15 = vpop.f32.mrf.mxu0  ;;  %v14163_v18 = vpop.f32.mrf.mxu1 }
0x103c   : > { %16419 = vst [vmem:[#allocation135_spill] sm:$0xff] %v14149_v9  ;;  %10441 = vpow2.f32 %v5614_v48  ;;  %v14155_v47 = vadd.f32 %v5064_v15, %v3717_v21 }
0x103d   : > { %v5616_v41 = vmul.f32 1.442695, %v5548_v31  ;;  %v5618_v35 = vmul.f32 1.442695, %v5549_v42  ;;  %v9689_v27 = vpop.f32.mrf.mxu0  ;;  %v14165_v31 = vpop.f32.mrf.mxu1 }
0x103e   : > { %16421 = vst [vmem:[#allocation152_spill] sm:$0xff] %v14155_v47  ;;  %v14159_v37 = vadd.f32 %v9689_v27, %v3728_v34  ;;  %v5459_v56 = vpop.xlane.xlu1 %5458 }
0x103f   : > { %10443 = vpow2.f32 %v5616_v41  ;;  %v5550_v22 = vsub.f32 %v13912_v39, %v5459_v56  ;;  %v5551_v24 = vsub.f32 %v13914_v0, %v5459_v56  ;;  %v14169_v4 = vpop.f32.mrf.mxu0  ;;  %v16424_v39 = vld [vmem:[#allocation183_spill] sm:$0xff]  ;;  %v5535_v0 = vmax.f32 %v14137_v53, %v14145_v12  ;;  %v14175_v27 = vpop.f32.mrf.mxu1 }
0x1040   : > { %16422 = vst [vmem:[#allocation68_spill] sm:$0xff] %v14159_v37  ;;  %10445 = vpow2.f32 %v5618_v35  ;;  %16423 = vst [vmem:[#allocation134_spill] sm:$0xff] %v14169_v4  ;;  %v3741_v41 = vadd.f32 %v16424_v39, %v13953_v8  ;;  %v16426_v39 = vld [vmem:[#allocation39_spill] sm:$0xff]  ;;  %v5541_v19 = vmax.f32 %v14165_v31, %v14175_v27 }
0x1041   : > { %v5620_v5 = vmul.f32 1.442695, %v5550_v22  ;;  %v5622_v48 = vmul.f32 1.442695, %v5551_v24  ;;  %v16425_v24 = vld [vmem:[#allocation184_spill] sm:$0xff]  ;;  %v3744_v61 = vadd.f32 %v16426_v39, %v13953_v8  ;;  %v16429_v39 = vld [vmem:[#allocation43_spill] sm:$0xff] }
0x1043   : > { %10447 = vpow2.f32 %v5620_v5  ;;  %v3733_v5 = vadd.f32 %v13953_v8, %v16425_v24 }
0x1044   : > { %v10436_v21 = vpop.eup %10435  ;;  %10449 = vpow2.f32 %v5622_v48 }
0x1045   : > { %v10438_v15 = vpop.eup %10437 }
0x1046   : > { %v14167_v42 = vadd.f32 %v10438_v15, %v10436_v21 }
0x1048   : > { %v10440_v34 = vpop.eup %10439 }
0x1049   : > { %v10442_v35 = vpop.eup %10441  ;;  %v9692_v56 = vpop.f32.mrf.mxu0  ;;  %v5832_v22 = vpack.c.bf16 %v10440_v34, %v10436_v21 }
0x104a   : > { %v14179_v48 = vadd.f32 %v9692_v56, %v3741_v41  ;;  %5536 = vmax.xlane.f32.xlu0 %v5535_v0  ;;  %v5833_v37 = vpack.c.bf16 %v10442_v35, %v10438_v15  ;;  %v14181_v4 = vadd.f32 %v10442_v35, %v10440_v34  ;;  %v6545_v41 = vsel %vm505_vm0, %v13621_v57, 0 }
0x104b   : > { %v5080_v47 = vpop.f32.mrf.mxu0  ;;  %v5538_v15 = vmax.f32 %v14157_v30, %v14163_v18 }
0x104c   : > { %v10444_v9 = vpop.eup %10443  ;;  %v14187_v60 = vadd.f32 %v5080_v47, %v3733_v5  ;;  %5896 = vmatprep.mubr.bf16.mxu0 %v5833_v37 }
0x104d   : > { %v10446_v21 = vpop.eup %10445  ;;  %5897 = vmatmul.mubr.bf16.vlgmr.msra.gmra.mxu0 %v5832_v22  ;;  %v9693_v34 = vpop.f32.mrf.mxu0  ;;  %v6542_v22 = vsel %vm505_vm0, %v13629_v63, 0 }
0x104e   : > { %9333 = vmatpush3.bf16.xpose.msra.mxu0 %v6545_v41  ;;  %v14193_v0 = vadd.f32 %v9693_v34, %v3744_v61  ;;  %5542 = vmax.xlane.f32.xlu0 %v5541_v19  ;;  %v14195_v35 = vadd.f32 %v10446_v21, %v10444_v9 }
0x104f   : > { %9815 = vmatprep.subr.msk.bf16.mxu0 %vm505_vm0, %v13623_v62  ;;  %5539 = vmax.xlane.f32.xlu1 %v5538_v15  ;;  %v14203_v61 = vpop.f32.mrf.mxu0  ;;  %v16428_v62 = vld [vmem:[#allocation38_spill] sm:$0xff]  ;;  %v16430_v15 = vld [vmem:[#allocation47_spill] sm:$0xff] }
0x1050   : > { %v10448_v47 = vpop.eup %10447  ;;  %16427 = vst [vmem:[#allocation151_spill] sm:$0xff] %v14203_v61  ;;  %v3757_v19 = vadd.f32 %v16428_v62, %v13953_v8  ;;  %v3760_v63 = vadd.f32 %v16430_v15, %v13953_v8 }
0x1051   : > { %v10450_v37 = vpop.eup %10449  ;;  %v5834_v56 = vpack.c.bf16 %v10448_v47, %v10444_v9  ;;  %v3749_v9 = vadd.f32 %v13953_v8, %v16429_v39 }
0x1052   : > { %v5835_v24 = vpack.c.bf16 %v10450_v37, %v10446_v21  ;;  %v14199_v57 = vadd.f32 %v10450_v37, %v10448_v47  ;;  %v6539_v47 = vsel %vm505_vm0, %v13633_v16, 0  ;;  %v6466_v16 = vpop.permute.xlu0 %6465 }
0x1054   : > { %5904 = vmatprep.mubr.bf16.mxu0 %v5835_v24 }
0x1055   : > { %5905 = vmatmul.mubr.bf16.gmra.mxu0 %v5834_v56  ;;  %v6536_v56 = vsel %vm505_vm0, %v13641_v59, 0 }
0x1056   : > { %9335 = vmatpush3.bf16.xpose.msra.mxu0 %v6542_v22 }
0x1057   : > { %9816 = vmatprep.subr.msk.bf16.mxu0 %vm505_vm0, %v13631_v11 }
0x1059   : > { %v9696_v5 = vpop.f32.mrf.mxu0 }
0x105a   : > { %v14211_v21 = vadd.f32 %v9696_v5, %v3757_v19  ;;  %v16434_v19 = vld [vmem:[#allocation67_spill] sm:$0xff] }
0x105b   : > { %v5096_v41 = vpop.f32.mrf.mxu0  ;;  %v3776_v5 = vadd.f32 %v16434_v19, %v13953_v8 }
0x105c   : > { %v14215_v34 = vadd.f32 %v5096_v41, %v3749_v9  ;;  %v14256_v41 = vpop.permute.xlu1 %6447 }
0x105d   : > { %v9697_v37 = vpop.f32.mrf.mxu0 }
0x105e   : > { %9337 = vmatpush3.bf16.xpose.msra.mxu0 %v6539_v47  ;;  %v14219_v11 = vadd.f32 %v9697_v37, %v3760_v63  ;;  %v16437_v63 = vld [vmem:[#allocation46_spill] sm:$0xff]  ;;  %v16438_v37 = vld [vmem:[#allocation52_spill] sm:$0xff] }
0x105f   : > { %9817 = vmatprep.subr.msk.bf16.mxu0 %vm505_vm0, %v13637_v26  ;;  %v14231_v24 = vpop.f32.mrf.mxu0  ;;  %v16432_v26 = vld [vmem:[#allocation57_spill] sm:$0xff] }
0x1060   : > { %6443 = vrot.lane.b32.xlu1 %v13487_v51, %s10897_s16  ;;  %16431 = vst [vmem:[#allocation132_spill] sm:$0xff] %v14231_v24  ;;  %v3773_v22 = vadd.f32 %v16432_v26, %v13953_v8  ;;  %v16433_v51 = vld [vmem:[#allocation62_spill] sm:$0xff] }
0x1064   : > { %6461 = vrot.lane.b32.xlu0 %v13453_v3, %s10897_s16  ;;  %6395 = vrot.lane.b32.xlu1 %v16275_v25, %s10897_s16  ;;  %v3765_v25 = vadd.f32 %v13953_v8, %v16433_v51  ;;  %v16441_v51 = vld [vmem:[#allocation71_spill] sm:$0xff] }
0x1066   : > { %9339 = vmatpush3.bf16.xpose.msra.mxu0 %v6536_v56 }
0x1067   : > { %9818 = vmatprep.subr.msk.bf16.mxu0 %vm505_vm0, %v6466_v16 }
0x1068   : > { %6459 = vrot.lane.b32.xlu0 %v13475_v14, %s10897_s16  ;;  %6399 = vrot.lane.b32.xlu1 %v16277_v54, %s10897_s16  ;;  %v6533_v14 = vsel %vm505_vm0, %v13643_v46, 0 }
0x1069   : > { %v9700_v3 = vpop.f32.mrf.mxu0 }
0x106a   : > { %v14242_v59 = vadd.f32 %v9700_v3, %v3773_v22 }
0x106b   : > { %v5112_v62 = vpop.f32.mrf.mxu0 }
0x106c   : > { %v14246_v39 = vadd.f32 %v5112_v62, %v3765_v25  ;;  %6397 = vrot.lane.b32.xlu0 %v16276_v6, %s10897_s16  ;;  %6403 = vrot.lane.b32.xlu1 %v13653_v28, %s10897_s16  ;;  %v16439_v6 = vld [vmem:[#allocation153_spill] sm:$0xff] }
0x106d   : > { %v9701_v54 = vpop.f32.mrf.mxu0  ;;  %v9903_v62 = vld [vmem:[%s15715_s8 + $0x58] sm:$0xff]  }
0x106e   : > { %16435 = vst [vmem:[#allocation150_spill] sm:$0xff] %v14246_v39  ;;  %9341 = vmatpush3.bf16.xpose.msra.mxu0 %v6533_v14  ;;  %v14254_v9 = vadd.f32 %v9701_v54, %v3776_v5  ;;  %9702 = vmatprep.subr.bf16.mxu1 %v9903_v62 }
0x106f   : > { %v5462_v15 = vpop.xlane.xlu0 %5461  ;;  %9703 = vmatpush3.bf16.msra.mxu1 %v9903_v62 }
0x1070   : > { %16436 = vst [vmem:[#allocation131_spill] sm:$0xff] %v14254_v9  ;;  %v5552_v8 = vsub.f32 %v13918_v45, %v5462_v15  ;;  %v5553_v47 = vsub.f32 %v16437_v63, %v5462_v15  ;;  %6401 = vrot.lane.b32.xlu0 %v16438_v37, %s10897_s16  ;;  %6407 = vrot.lane.b32.xlu1 %v16439_v6, %s10897_s16  ;;  %v16440_v45 = vld [vmem:[#allocation34_spill] sm:$0xff] }
0x1071   : > { %v16443_v63 = vld [vmem:[#allocation50_spill] sm:$0xff] }
0x1072   : > { %v5624_v28 = vmul.f32 1.442695, %v5552_v8  ;;  %v5626_v56 = vmul.f32 1.442695, %v5553_v47  ;;  %v16484_v9 = vld [vmem:[#allocation118_spill] sm:$0xff] }
0x1073   : > { %v5468_v46 = vpop.xlane.xlu0 %5467  ;;  %v5465_v16 = vpop.xlane.xlu1 %5464 }
0x1074   : > { %10451 = vpow2.f32 %v5624_v28  ;;  %v5556_v26 = vsub.f32 %v13926_v13, %v5468_v46  ;;  %v5557_v22 = vsub.f32 %v13928_v33, %v5468_v46  ;;  %v5554_v3 = vsub.f32 %v13922_v43, %v5465_v16  ;;  %6405 = vrot.lane.b32.xlu0 %v16440_v45, %s10897_s16  ;;  %6411 = vrot.lane.b32.xlu1 %v16441_v51, %s10897_s16 }
0x1075   : > { %10453 = vpow2.f32 %v5626_v56  ;;  %v5555_v25 = vsub.f32 %v13924_v29, %v5465_v16  ;;  %v16442_v29 = vld [vmem:[#allocation139_spill] sm:$0xff] }
0x1076   : > { %v5632_v19 = vmul.f32 1.442695, %v5556_v26  ;;  %v5634_v5 = vmul.f32 1.442695, %v5557_v22  ;;  %v5628_v13 = vmul.f32 1.442695, %v5554_v3 }
0x1077   : > { %v5630_v14 = vmul.f32 1.442695, %v5555_v25  ;;  %v5474_v33 = vpop.xlane.xlu0 %5473  ;;  %v5471_v54 = vpop.xlane.xlu1 %5470  ;;  %v16444_v26 = vld [vmem:[#allocation100_spill] sm:$0xff]  ;;  %v16446_v3 = vld [vmem:[#allocation45_spill] sm:$0xff] }
0x1078   : > { %10455 = vpow2.f32 %v5632_v19  ;;  %v5560_v43 = vsub.f32 %v13934_v2, %v5474_v33  ;;  %v5561_v15 = vsub.f32 %v13936_v40, %v5474_v33  ;;  %v5558_v8 = vsub.f32 %v13930_v58, %v5471_v54  ;;  %6409 = vrot.lane.b32.xlu0 %v16442_v29, %s10897_s16  ;;  %6415 = vrot.lane.b32.xlu1 %v16443_v63, %s10897_s16  ;;  %v9904_v22 = vld [vmem:[%s15715_s8 + $0x50] sm:$0xff]   ;;  %v16450_v29 = vld [vmem:[#allocation115_spill] sm:$0xff]  ;;  %v9906_v63 = vld [vmem:[%s15715_s8 + $0x40] sm:$0xff]  }
0x1079   : > { %10457 = vpow2.f32 %v5634_v5  ;;  %v5559_v47 = vsub.f32 %v13932_v50, %v5471_v54  ;;  %v16445_v50 = vld [vmem:[#allocation92_spill] sm:$0xff]  ;;  %9704 = vmatprep.subr.bf16.mxu1 %v9904_v22  ;;  %v16447_v5 = vld [vmem:[#allocation54_spill] sm:$0xff] }
0x107a   : > { %10459 = vpow2.f32 %v5628_v13  ;;  %v5640_v37 = vmul.f32 1.442695, %v5560_v43  ;;  %v5642_v6 = vmul.f32 1.442695, %v5561_v15  ;;  %v5636_v28 = vmul.f32 1.442695, %v5558_v8  ;;  %9705 = vmatpush3.bf16.msra.mxu1 %v9904_v22 }
0x107b   : > { %10461 = vpow2.f32 %v5630_v14  ;;  %v5638_v2 = vmul.f32 1.442695, %v5559_v47  ;;  %v5480_v56 = vpop.xlane.xlu0 %5479  ;;  %v5477_v40 = vpop.xlane.xlu1 %5476  ;;  %v16448_v13 = vld [vmem:[#allocation87_spill] sm:$0xff]  ;;  %v16449_v8 = vld [vmem:[#allocation90_spill] sm:$0xff] }
0x107c   : > { %10463 = vpow2.f32 %v5640_v37  ;;  %v5564_v58 = vsub.f32 %v13946_v38, %v5480_v56  ;;  %v5565_v46 = vsub.f32 %v13948_v36, %v5480_v56  ;;  %v5562_v16 = vsub.f32 %v13942_v55, %v5477_v40  ;;  %6413 = vrot.lane.b32.xlu0 %v16444_v26, %s10897_s16  ;;  %6419 = vrot.lane.b32.xlu1 %v16445_v50, %s10897_s16  ;;  %v9905_v38 = vld [vmem:[%s15715_s8 + $0x48] sm:$0xff]  }
0x107d   : > { %10465 = vpow2.f32 %v5642_v6  ;;  %v5563_v45 = vsub.f32 %v16446_v3, %v5477_v40  ;;  %9706 = vmatprep.subr.bf16.mxu1 %v9905_v38 }
0x107e   : > { %10467 = vpow2.f32 %v5636_v28  ;;  %v5648_v36 = vmul.f32 1.442695, %v5564_v58  ;;  %v5650_v55 = vmul.f32 1.442695, %v5565_v46  ;;  %v5644_v51 = vmul.f32 1.442695, %v5562_v16  ;;  %9707 = vmatpush3.bf16.msra.mxu1 %v9905_v38 }
0x107f   : > { %10469 = vpow2.f32 %v5638_v2  ;;  %v5646_v25 = vmul.f32 1.442695, %v5563_v45  ;;  %v14297_v62 = vpop.xlane.xlu0 %5485  ;;  %v5483_v19 = vpop.xlane.xlu1 %5482  ;;  %9708 = vmatprep.subr.bf16.mxu1 %v9906_v63  ;;  %v16451_v58 = vld [vmem:[#allocation85_spill] sm:$0xff]  ;;  %v16452_v46 = vld [vmem:[#allocation160_spill] sm:$0xff] }
0x1080   : > { %10471 = vpow2.f32 %v5648_v36  ;;  %6417 = vrot.lane.b32.xlu0 %v16447_v5, %s10897_s16  ;;  %6423 = vrot.lane.b32.xlu1 %v16448_v13, %s10897_s16  ;;  %v5567_v54 = vsub.f32 %v13957_v20, %v5483_v19  ;;  %v5566_v3 = vsub.f32 %v13955_v49, %v5483_v19  ;;  %v16453_v5 = vld [vmem:[#allocation162_spill] sm:$0xff] }
0x1081   : > { %v10452_v14 = vpop.eup %10451  ;;  %10473 = vpow2.f32 %v5650_v55  ;;  %v16454_v49 = vld [vmem:[#allocation42_spill] sm:$0xff] }
0x1082   : > { %v10454_v33 = vpop.eup %10453  ;;  %10475 = vpow2.f32 %v5644_v51  ;;  %v5654_v20 = vmul.f32 1.442695, %v5567_v54  ;;  %9709 = vmatpush3.bf16.msra.mxu1 %v9906_v63  ;;  %v5569_v19 = vsub.f32 %v16454_v49, %v14297_v62  ;;  %v5652_v54 = vmul.f32 1.442695, %v5566_v3  ;;  %v16458_v49 = vld [vmem:[#allocation82_spill] sm:$0xff] }
0x1083   : > { %10477 = vpow2.f32 %v5646_v25  ;;  %v14304_v43 = vpop.xlane.xlu0 %5491  ;;  %v14306_v15 = vadd.f32 %v10454_v33, %v10452_v14  ;;  %v5489_v40 = vpop.xlane.xlu1 %5488 }
0x1084   : > { %6421 = vrot.lane.b32.xlu0 %v16449_v8, %s10897_s16  ;;  %7210 = vrot.lane.b32.xlu1 %v16450_v29, %s10897_s16  ;;  %10479 = vpow2.f32 %v5654_v20  ;;  %v5571_v38 = vsub.f32 %v13977_v7, %v5489_v40  ;;  %v16455_v7 = vld [vmem:[#allocation105_spill] sm:$0xff] }
0x1085   : > { %v10456_v47 = vpop.eup %10455  ;;  %10481 = vpow2.f32 %v5652_v54  ;;  %v16460_v54 = vld [vmem:[#allocation37_spill] sm:$0xff] }
0x1086   : > { %v10458_v37 = vpop.eup %10457  ;;  %v5662_v29 = vmul.f32 1.442695, %v5571_v38 }
0x1087   : > { %v10460_v6 = vpop.eup %10459  ;;  %v14315_v28 = vpop.xlane.xlu0 %5497  ;;  %v14317_v2 = vadd.f32 %v10458_v37, %v10456_v47 }
0x1088   : > { %v10462_v56 = vpop.eup %10461  ;;  %6425 = vrot.lane.b32.xlu0 %v16451_v58, %s10897_s16  ;;  %7224 = vrot.lane.b32.xlu1 %v16452_v46, %s10897_s16  ;;  %v5836_v50 = vpack.c.bf16 %v10460_v6, %v10452_v14  ;;  %v5495_v58 = vpop.xlane.xlu1 %5494  ;;  %v16456_v46 = vld [vmem:[#allocation110_spill] sm:$0xff]  ;;  %10483 = vpow2.f32 %v5662_v29 }
0x1089   : > { %v14323_v16 = vpop.eup %10463  ;;  %v5837_v26 = vpack.c.bf16 %v10462_v56, %v10454_v33  ;;  %v14329_v55 = vadd.f32 %v10462_v56, %v10460_v6  ;;  %v5575_v38 = vsub.f32 %v13987_v44, %v5495_v58  ;;  %v16462_v29 = vld [vmem:[#allocation102_spill] sm:$0xff] }
0x108a   : > { %v10466_v22 = vpop.eup %10465 }
0x108b   : > { %v10468_v45 = vpop.eup %10467  ;;  %5912 = vmatprep.mubr.bf16.mxu0 %v5837_v26  ;;  %v14327_v36 = vpop.xlane.xlu0 %5503  ;;  %v14332_v51 = vadd.f32 %v10466_v22, %v14323_v16  ;;  %v5658_v26 = vmul.f32 1.442695, %v5569_v19  ;;  %v16459_v19 = vld [vmem:[#allocation107_spill] sm:$0xff] }
0x108c   : > { %v10470_v25 = vpop.eup %10469  ;;  %5913 = vmatmul.mubr.bf16.gmra.mxu0 %v5836_v50  ;;  %7226 = vrot.lane.b32.xlu0 %v16453_v5, %s10897_s16  ;;  %v5570_v50 = vsub.f32 %v13973_v17, %v5489_v40  ;;  %v5838_v3 = vpack.c.bf16 %v10468_v45, %v10456_v47  ;;  %v5573_v17 = vsub.f32 %v16460_v54, %v14304_v43  ;;  %v16461_v47 = vld [vmem:[#allocation64_spill] sm:$0xff]  ;;  %v5670_v40 = vmul.f32 1.442695, %v5575_v38 }
0x108d   : > { %v14336_v13 = vpop.eup %10471  ;;  %7206 = vrot.lane.b32.xlu1 %v16455_v7, %s10897_s16  ;;  %v5839_v14 = vpack.c.bf16 %v10470_v25, %v10458_v37  ;;  %v14344_v6 = vadd.f32 %v10470_v25, %v10468_v45  ;;  %v16457_v37 = vld [vmem:[#allocation69_spill] sm:$0xff]  ;;  %v5568_v7 = vsub.f32 %v16458_v49, %v14297_v62  ;;  %10485 = vpow2.f32 %v5658_v26  ;;  %v5501_v62 = vpop.xlane.xlu1 %5500 }
0x108e   : > { %v10474_v33 = vpop.eup %10473  ;;  %v5660_v44 = vmul.f32 1.442695, %v5570_v50  ;;  %v5574_v26 = vsub.f32 %v13983_v52, %v5495_v58  ;;  %v5579_v50 = vsub.f32 %v14013_v10, %v5501_v62  ;;  %v16466_v52 = vld [vmem:[#allocation98_spill] sm:$0xff] }
0x108f   : > { %v10476_v8 = vpop.eup %10475  ;;  %5920 = vmatprep.mubr.bf16.mxu0 %v5839_v14  ;;  %v14342_v63 = vpop.xlane.xlu0 %5509  ;;  %v14347_v20 = vadd.f32 %v10474_v33, %v14336_v13  ;;  %v5656_v45 = vmul.f32 1.442695, %v5568_v7  ;;  %v16465_v7 = vld [vmem:[#allocation66_spill] sm:$0xff]  ;;  %v5577_v58 = vsub.f32 %v16466_v52, %v14315_v28 }
0x1090   : > { %v10478_v56 = vpop.eup %10477  ;;  %7208 = vrot.lane.b32.xlu0 %v16456_v46, %s10897_s16  ;;  %v16463_v46 = vld [vmem:[#allocation97_spill] sm:$0xff]  ;;  %10487 = vpow2.f32 %v5660_v44 }
0x1091   : > { %7220 = vrot.lane.b32.xlu1 %v16457_v37, %s10897_s16  ;;  %v5841_v25 = vpack.c.bf16 %v10478_v56, %v10466_v22  ;;  %v14355_v5 = vadd.f32 %v10478_v56, %v10476_v8  ;;  %v14367_v22 = vpop.eup %10479  ;;  %v5666_v56 = vmul.f32 1.442695, %v5573_v17  ;;  %10489 = vpow2.f32 %v5670_v40  ;;  %v5507_v17 = vpop.xlane.xlu1 %5506 }
0x1092   : > { %v5843_v38 = vpack.c.bf16 %v14367_v22, %v10474_v33  ;;  %10491 = vpow2.f32 %v5656_v45  ;;  %v14389_v33 = vpop.eup %10481  ;;  %v5674_v44 = vmul.f32 1.442695, %v5577_v58  ;;  %v5578_v45 = vsub.f32 %v14009_v32, %v5501_v62  ;;  %v16470_v32 = vld [vmem:[#allocation95_spill] sm:$0xff] }
0x1093   : > { %v14359_v14 = vpop.xlane.xlu0 %5515  ;;  %10493 = vpow2.f32 %v5666_v56 }
0x1094   : > { %5921 = vmatmul.mubr.bf16.gmra.mxu0 %v5838_v3  ;;  %7222 = vrot.lane.b32.xlu0 %v16459_v19, %s10897_s16  ;;  %v5840_v3 = vpack.c.bf16 %v10476_v8, %v14323_v16  ;;  %v16467_v16 = vld [vmem:[#allocation59_spill] sm:$0xff]  ;;  %v5668_v8 = vmul.f32 1.442695, %v5574_v26  ;;  %v5678_v19 = vmul.f32 1.442695, %v5579_v50  ;;  %v16469_v50 = vld [vmem:[#allocation77_spill] sm:$0xff] }
0x1095   : > { %5928 = vmatprep.mubr.bf16.mxu0 %v5841_v25  ;;  %7202 = vrot.lane.b32.xlu1 %v16461_v47, %s10897_s16  ;;  %v16464_v25 = vld [vmem:[#allocation74_spill] sm:$0xff]  ;;  %v14391_v54 = vpop.eup %10483  ;;  %v16468_v47 = vld [vmem:[#allocation61_spill] sm:$0xff]  ;;  %v5676_v62 = vmul.f32 1.442695, %v5578_v45  ;;  %v5513_v52 = vpop.xlane.xlu1 %5512 }
0x1096   : > { %v5572_v49 = vsub.f32 %v16464_v25, %v14304_v43  ;;  %10495 = vpow2.f32 %v5668_v8  ;;  %v16472_v8 = vld [vmem:[#allocation154_spill] sm:$0xff] }
0x1097   : > { %v14374_v37 = vpop.xlane.xlu0 %5521  ;;  %10497 = vpow2.f32 %v5678_v19  ;;  %v5582_v19 = vsub.f32 %v16472_v8, %v5507_v17  ;;  %v16477_v8 = vld [vmem:[#allocation158_spill] sm:$0xff] }
0x1098   : > { %7204 = vrot.lane.b32.xlu0 %v16462_v29, %s10897_s16  ;;  %v5664_v43 = vmul.f32 1.442695, %v5572_v49  ;;  %v5842_v29 = vpack.c.bf16 %v14389_v33, %v14336_v13  ;;  %v16471_v13 = vld [vmem:[#allocation136_spill] sm:$0xff] }
0x1099   : > { %7216 = vrot.lane.b32.xlu1 %v16463_v46, %s10897_s16  ;;  %v5583_v46 = vsub.f32 %v14029_v23, %v5507_v17  ;;  %v5581_v23 = vsub.f32 %v16471_v13, %v14327_v36  ;;  %v5684_v17 = vmul.f32 1.442695, %v5582_v19  ;;  %v5519_v13 = vpop.xlane.xlu1 %5518 }
0x109a   : > { %v14395_v40 = vpop.eup %10485  ;;  %10499 = vpow2.f32 %v5664_v43  ;;  %v5591_v19 = vsub.f32 %v16477_v8, %v5519_v13 }
0x109b   : > { %v5845_v26 = vpack.c.bf16 %v14391_v54, %v14395_v40  ;;  %10501 = vpow2.f32 %v5674_v44  ;;  %v5686_v49 = vmul.f32 1.442695, %v5583_v46  ;;  %v16475_v46 = vld [vmem:[#allocation112_spill] sm:$0xff] }
0x109c   : > { %5929 = vmatmul.mubr.bf16.gmra.mxu0 %v5840_v3  ;;  %7218 = vrot.lane.b32.xlu0 %v16465_v7, %s10897_s16  ;;  %v6530_v3 = vsel %vm505_vm0, %v14256_v41, 0  ;;  %10503 = vpow2.f32 %v5676_v62 }
0x109d   : > { %5936 = vmatprep.mubr.bf16.mxu0 %v5843_v38  ;;  %7198 = vrot.lane.b32.xlu1 %v16467_v16, %s10897_s16  ;;  %v5576_v38 = vsub.f32 %v16469_v50, %v14315_v28  ;;  %v14412_v25 = vpop.eup %10487  ;;  %v5682_v28 = vmul.f32 1.442695, %v5581_v23  ;;  %10505 = vpow2.f32 %v5686_v49 }
0x109e   : > { %v14387_v10 = vpop.xlane.xlu0 %5530  ;;  %v14414_v7 = vpop.eup %10489 }
0x109f   : > { %v5672_v41 = vmul.f32 1.442695, %v5576_v38  ;;  %v14416_v58 = vpop.eup %10491 }
0x10a0   : > { %7200 = vrot.lane.b32.xlu0 %v16468_v47, %s10897_s16  ;;  %v14418_v16 = vpop.eup %10493  ;;  %v5844_v43 = vpack.c.bf16 %v14412_v25, %v14416_v58  ;;  %v16473_v47 = vld [vmem:[#allocation156_spill] sm:$0xff] }
0x10a1   : > { %v5587_v44 = vsub.f32 %v16473_v47, %v5513_v52  ;;  %v5847_v45 = vpack.c.bf16 %v14414_v7, %v14418_v16  ;;  %10507 = vpow2.f32 %v5672_v41  ;;  %v16478_v47 = vld [vmem:[#allocation108_spill] sm:$0xff] }
0x10a2   : > { %v6464_v56 = vpop.permute.xlu0 %6463  ;;  %10509 = vpow2.f32 %v5682_v28 }
0x10a3   : > { %9819 = vmatprep.subr.msk.bf16.mxu0 %vm505_vm0, %v6464_v56  ;;  %v5694_v50 = vmul.f32 1.442695, %v5587_v44  ;;  %10511 = vpow2.f32 %v5684_v17  ;;  %v5584_v44 = vsub.f32 %v16478_v47, %v14342_v63  ;;  %v16482_v47 = vld [vmem:[#allocation155_spill] sm:$0xff] }
0x10a4   : > { %5937 = vmatmul.mubr.bf16.gmra.mxu0 %v5842_v29  ;;  %7214 = vrot.lane.b32.xlu0 %v16470_v32, %s10897_s16  ;;  %v16474_v29 = vld [vmem:[#allocation93_spill] sm:$0xff] }
0x10a5   : > { %5944 = vmatprep.mubr.bf16.mxu0 %v5845_v26  ;;  %9343 = vmatpush3.bf16.xpose.msra.mxu0 %v6530_v3  ;;  %v5580_v56 = vsub.f32 %v16474_v29, %v14327_v36  ;;  %v5585_v26 = vsub.f32 %v16475_v46, %v14342_v63  ;;  %v14430_v3 = vpop.eup %10495  ;;  %v16476_v36 = vld [vmem:[#allocation130_spill] sm:$0xff]  ;;  %10513 = vpow2.f32 %v5694_v50  ;;  %v5702_v46 = vmul.f32 1.442695, %v5591_v19  ;;  %v5525_v50 = vpop.xlane.xlu1 %5524  ;;  %v16480_v63 = vld [vmem:[#allocation124_spill] sm:$0xff] }
0x10a6   : > { %v14432_v38 = vpop.eup %10497  ;;  %v5586_v41 = vsub.f32 %v16476_v36, %v5513_v52  ;;  %v5688_v17 = vmul.f32 1.442695, %v5584_v44  ;;  %v5588_v44 = vsub.f32 %v16482_v47, %v14359_v14  ;;  %v5594_v39 = vsub.f32 %v16484_v9, %v5525_v50 }
0x10a7   : > { %v5680_v32 = vmul.f32 1.442695, %v5580_v56  ;;  %v14434_v23 = vpop.eup %10499  ;;  %v5690_v62 = vmul.f32 1.442695, %v5585_v26 }
0x10a8   : > { %v14436_v49 = vpop.eup %10501  ;;  %v5846_v28 = vpack.c.bf16 %v14430_v3, %v14434_v23  ;;  %v5692_v52 = vmul.f32 1.442695, %v5586_v41  ;;  %v16481_v41 = vld [vmem:[#allocation142_spill] sm:$0xff] }
0x10a9   : > { %10515 = vpow2.f32 %v5680_v32  ;;  %v14448_v56 = vpop.eup %10503  ;;  %v5528_v24 = vpop.xlane.xlu1 %5527 }
0x10aa   : > { %10517 = vpow2.f32 %v5690_v62  ;;  %v14450_v26 = vpop.eup %10505  ;;  %v5590_v62 = vsub.f32 %v16480_v63, %v5519_v13 }
0x10ab   : > { %10519 = vpow2.f32 %v5692_v52 }
0x10ac   : > { %5945 = vmatmul.mubr.bf16.gmra.mxu0 %v5844_v43  ;;  %v5849_v43 = vpack.c.bf16 %v14432_v38, %v14436_v49  ;;  %10521 = vpow2.f32 %v5702_v46  ;;  %v5700_v13 = vmul.f32 1.442695, %v5590_v62 }
0x10ad   : > { %5952 = vmatprep.mubr.bf16.mxu0 %v5847_v45  ;;  %v16479_v45 = vld [vmem:[#allocation133_spill] sm:$0xff]  ;;  %10523 = vpow2.f32 %v5688_v17 }
0x10ae   : > { %v5589_v29 = vsub.f32 %v16479_v45, %v14359_v14  ;;  %v14452_v36 = vpop.eup %10507  ;;  %v16483_v45 = vld [vmem:[#allocation127_spill] sm:$0xff] }
0x10af   : > { %v14454_v8 = vpop.eup %10509 }
0x10b0   : > { %v5698_v32 = vmul.f32 1.442695, %v5589_v29  ;;  %v5851_v19 = vpack.c.bf16 %v14450_v26, %v14454_v8  ;;  %v5593_v29 = vsub.f32 %v16483_v45, %v14374_v37  ;;  %v14466_v52 = vpop.eup %10511 }
0x10b2   : > { %10525 = vpow2.f32 %v5698_v32  ;;  %v14468_v46 = vpop.eup %10513  ;;  %v5706_v17 = vmul.f32 1.442695, %v5593_v29  ;;  %v16485_v32 = vld [vmem:[#allocation44_spill] sm:$0xff] }
0x10b3   : > { %10527 = vpow2.f32 %v5700_v13  ;;  %v5599_v62 = vsub.f32 %v16485_v32, %v14387_v10 }
0x10b4   : > { %5953 = vmatmul.mubr.bf16.gmra.mxu0 %v5846_v28  ;;  %v5848_v28 = vpack.c.bf16 %v14448_v56, %v14452_v36 }
0x10b5   : > { %5960 = vmatprep.mubr.bf16.mxu0 %v5849_v43  ;;  %v5595_v43 = vsub.f32 %v16481_v41, %v5525_v50  ;;  %v5696_v41 = vmul.f32 1.442695, %v5588_v44  ;;  %v5708_v50 = vmul.f32 1.442695, %v5594_v39  ;;  %v5718_v44 = vmul.f32 1.442695, %v5599_v62  ;;  %v5534_v62 = vpop.xlane.xlu1 %5533 }
0x10b6   : > { %v14470_v61 = vpop.eup %10515 }
0x10b7   : > { %v5710_v63 = vmul.f32 1.442695, %v5595_v43  ;;  %v14474_v14 = vpop.eup %10517  ;;  %v16486_v43 = vld [vmem:[#allocation121_spill] sm:$0xff] }
0x10b8   : > { %v5853_v47 = vpack.c.bf16 %v14468_v46, %v14474_v14  ;;  %v14487_v45 = vpop.eup %10519 }
0x10b9   : > { %10529 = vpow2.f32 %v5710_v63  ;;  %v14490_v13 = vpop.eup %10521 }
0x10ba   : > { %10531 = vpow2.f32 %v5696_v41 }
0x10bb   : > { %10533 = vpow2.f32 %v5706_v17 }
0x10bc   : > { %5961 = vmatmul.mubr.bf16.gmra.mxu0 %v5848_v28  ;;  %v5850_v28 = vpack.c.bf16 %v14466_v52, %v14470_v61  ;;  %10535 = vpow2.f32 %v5708_v50 }
0x10bd   : > { %5968 = vmatprep.mubr.bf16.mxu0 %v5851_v19  ;;  %v5597_v19 = vsub.f32 %v16486_v43, %v5528_v24  ;;  %10537 = vpow2.f32 %v5718_v44 }
0x10bf   : > { %v5714_v29 = vmul.f32 1.442695, %v5597_v19 }
0x10c1   : > { %5737 = vadd.xlane.f32.xlu1 %v14167_v42  ;;  %v16487_v42 = vld [vmem:[#allocation157_spill] sm:$0xff]  ;;  %10539 = vpow2.f32 %v5714_v29  ;;  %v5769_v29 = vadd.f32 %v14389_v33, %v14367_v22  ;;  %v5775_v22 = vadd.f32 %v14412_v25, %v14391_v54 }
0x10c2   : > { %v5592_v9 = vsub.f32 %v16487_v42, %v14374_v37  ;;  %v16488_v37 = vld [vmem:[#allocation40_spill] sm:$0xff] }
0x10c3   : > { %5740 = vadd.xlane.f32.xlu0 %v14181_v4  ;;  %v14492_v4 = vpop.eup %10523  ;;  %v5598_v41 = vsub.f32 %v16488_v37, %v14387_v10  ;;  %v16491_v42 = vld [vmem:[#allocation48_spill] sm:$0xff] }
0x10c4   : > { %5969 = vmatmul.mubr.bf16.gmra.mxu0 %v5850_v28  ;;  %v5704_v63 = vmul.f32 1.442695, %v5592_v9  ;;  %v14497_v39 = vpop.eup %10525  ;;  %v5852_v32 = vpack.c.bf16 %v14487_v45, %v14492_v4  ;;  %v5600_v9 = vsub.f32 %v16491_v42, %v5534_v62 }
0x10c5   : > { %5976 = vmatprep.mubr.bf16.mxu0 %v5853_v47  ;;  %5746 = vadd.xlane.f32.xlu1 %v14199_v57  ;;  %v16489_v57 = vld [vmem:[#allocation159_spill] sm:$0xff]  ;;  %v5716_v10 = vmul.f32 1.442695, %v5598_v41  ;;  %v14506_v28 = vpop.eup %10527 }
0x10c6   : > { %v5596_v17 = vsub.f32 %v16489_v57, %v5528_v24  ;;  %10541 = vpow2.f32 %v5704_v63  ;;  %v16490_v24 = vld [vmem:[#allocation36_spill] sm:$0xff]  ;;  %v14510_v19 = vpop.eup %10529  ;;  %v6446_v63 = vpop.permute.xlu1 %6445  ;;  %v5720_v57 = vmul.f32 1.442695, %v5600_v9 }
0x10c7   : > { %5743 = vadd.xlane.f32.xlu0 %v14195_v35  ;;  %v5855_v35 = vpack.c.bf16 %v14490_v13, %v14497_v39  ;;  %v5601_v43 = vsub.f32 %v16490_v24, %v5534_v62  ;;  %v14512_v47 = vpop.eup %10531  ;;  %10543 = vpow2.f32 %v5716_v10 }
0x10c9   : > { %5752 = vadd.xlane.f32.xlu1 %v14329_v55  ;;  %v5712_v55 = vmul.f32 1.442695, %v5596_v17  ;;  %v5722_v50 = vmul.f32 1.442695, %v5601_v43 }
0x10cb   : > { %5749 = vadd.xlane.f32.xlu0 %v14306_v15  ;;  %v14515_v15 = vpop.eup %10533  ;;  %10545 = vpow2.f32 %v5712_v55 }
0x10cc   : > { %5977 = vmatmul.mubr.bf16.gmra.mxu0 %v5852_v32  ;;  %v5857_v44 = vpack.c.bf16 %v14510_v19, %v14515_v15  ;;  %v14527_v41 = vpop.eup %10535  ;;  %10547 = vpow2.f32 %v5722_v50 }
0x10cd   : > { %5984 = vmatprep.mubr.bf16.mxu0 %v5855_v35  ;;  %5758 = vadd.xlane.f32.xlu1 %v14344_v6  ;;  %v5854_v6 = vpack.c.bf16 %v14506_v28, %v14512_v47  ;;  %v14529_v35 = vpop.eup %10537 }
0x10ce   : > { %v14534_v33 = vpop.eup %10539 }
0x10cf   : > { %5755 = vadd.xlane.f32.xlu0 %v14317_v2  ;;  %v5859_v43 = vpack.c.bf16 %v14529_v35, %v14534_v33 }
0x10d1   : > { %5764 = vadd.xlane.f32.xlu1 %v14355_v5 }
0x10d3   : > { %v5537_v2 = vpop.xlane.xlu0 %5536  ;;  %5761 = vadd.xlane.f32.xlu0 %v14332_v51  ;;  %v14537_v62 = vpop.eup %10541 }
0x10d4   : > { %5985 = vmatmul.mubr.bf16.gmra.mxu0 %v5854_v6  ;;  %v5602_v5 = vsub.f32 %v14137_v53, %v5537_v2  ;;  %v5603_v37 = vsub.f32 %v14145_v12, %v5537_v2  ;;  %v5856_v25 = vpack.c.bf16 %v14527_v41, %v14537_v62  ;;  %v5793_v2 = vadd.f32 %v14466_v52, %v14450_v26 }
0x10d5   : > { %5992 = vmatprep.mubr.bf16.mxu0 %v5857_v44  ;;  %5770 = vadd.xlane.f32.xlu1 %v5769_v29  ;;  %v5796_v26 = vadd.f32 %v14492_v4, %v14474_v14  ;;  %v5811_v14 = vadd.f32 %v14527_v41, %v14510_v19  ;;  %v5808_v4 = vadd.f32 %v14537_v62, %v14515_v15 }
0x10d6   : > { %v5724_v17 = vmul.f32 1.442695, %v5602_v5  ;;  %v5726_v32 = vmul.f32 1.442695, %v5603_v37  ;;  %v5799_v37 = vadd.f32 %v14487_v45, %v14468_v46  ;;  %v5802_v46 = vadd.f32 %v14512_v47, %v14497_v39 }
0x10d7   : > { %v5543_v51 = vpop.xlane.xlu0 %5542  ;;  %5767 = vadd.xlane.f32.xlu0 %v14347_v20  ;;  %v5772_v20 = vadd.f32 %v14416_v58, %v14395_v40  ;;  %v10544_v58 = vpop.eup %10543 }
0x10d8   : > { %10549 = vpow2.f32 %v5724_v17  ;;  %v5607_v53 = vsub.f32 %v14175_v27, %v5543_v51  ;;  %v5540_v12 = vpop.xlane.xlu1 %5539  ;;  %v5606_v10 = vsub.f32 %v14165_v31, %v5543_v51  ;;  %v5781_v31 = vadd.f32 %v14430_v3, %v14414_v7  ;;  %v10546_v6 = vpop.eup %10545 }
0x10d9   : > { %10551 = vpow2.f32 %v5726_v32  ;;  %5776 = vadd.xlane.f32.xlu1 %v5775_v22  ;;  %v5605_v55 = vsub.f32 %v14163_v18, %v5540_v12  ;;  %v5604_v54 = vsub.f32 %v14157_v30, %v5540_v12  ;;  %v6527_v18 = vsel %vm505_vm0, %v6446_v63, 0  ;;  %v10548_v29 = vpop.eup %10547 }
0x10da   : > { %10553 = vpow2.f32 %v5720_v57  ;;  %v5734_v24 = vmul.f32 1.442695, %v5607_v53  ;;  %v5732_v40 = vmul.f32 1.442695, %v5606_v10  ;;  %v5778_v30 = vadd.f32 %v14434_v23, %v14418_v16 }
0x10db   : > { %v5730_v27 = vmul.f32 1.442695, %v5605_v55  ;;  %v6462_v42 = vpop.permute.xlu0 %6461  ;;  %5773 = vadd.xlane.f32.xlu0 %v5772_v20  ;;  %v5728_v9 = vmul.f32 1.442695, %v5604_v54  ;;  %v5787_v7 = vadd.f32 %v14448_v56, %v14432_v38  ;;  %v5784_v3 = vadd.f32 %v14452_v36, %v14436_v49 }
0x10dc   : > { %5993 = vmatmul.mubr.bf16.gmra.mxu0 %v5856_v25  ;;  %9820 = vmatprep.subr.msk.bf16.mxu0 %vm505_vm0, %v6462_v42  ;;  %10555 = vpow2.f32 %v5734_v24  ;;  %v6444_v44 = vpop.permute.xlu1 %6443  ;;  %v5858_v16 = vpack.c.bf16 %v10544_v58, %v10546_v6  ;;  %v5790_v56 = vadd.f32 %v14470_v61, %v14454_v8  ;;  %v5805_v61 = vadd.f32 %v14506_v28, %v14490_v13 }
0x10dd   : > { %6000 = vmatprep.mubr.bf16.mxu0 %v5859_v43  ;;  %5782 = vadd.xlane.f32.xlu1 %v5781_v31  ;;  %10557 = vpow2.f32 %v5730_v27  ;;  %v6524_v38 = vsel %vm505_vm0, %v6444_v44, 0  ;;  %v5817_v10 = vadd.f32 %v10544_v58, %v14529_v35  ;;  %v5814_v39 = vadd.f32 %v10546_v6, %v14534_v33 }
0x10de   : > { %9345 = vmatpush3.bf16.xpose.msra.mxu0 %v6527_v18  ;;  %10559 = vpow2.f32 %v5732_v40 }
0x10df   : > { %v6460_v50 = vpop.permute.xlu0 %6459  ;;  %5779 = vadd.xlane.f32.xlu0 %v5778_v30  ;;  %10561 = vpow2.f32 %v5728_v9  ;;  %v14613_v30 = vpop.f32.mrf.mxu0 }
0x10e0   : > { %9821 = vmatprep.subr.msk.bf16.mxu0 %vm505_vm0, %v6460_v50  ;;  %v6396_v13 = vpop.permute.xlu1 %6395  ;;  %16492 = vst [vmem:[#allocation149_spill] sm:$0xff] %v14613_v30 }
0x10e1   : > { %5788 = vadd.xlane.f32.xlu1 %v5787_v7 }
0x10e3   : > { %v14559_v23 = vpop.permute.xlu0 %6397  ;;  %5785 = vadd.xlane.f32.xlu0 %v5784_v3 }
0x10e4   : > { %6001 = vmatmul.mubr.bf16.gmra.mxu0 %v5858_v16  ;;  %v6400_v41 = vpop.permute.xlu1 %6399 }
0x10e5   : > { %v10550_v63 = vpop.eup %10549  ;;  %5794 = vadd.xlane.f32.xlu1 %v5793_v2 }
0x10e6   : > { %v10552_v5 = vpop.eup %10551  ;;  %9347 = vmatpush3.bf16.xpose.msra.mxu0 %v6524_v38 }
0x10e7   : > { %v10554_v49 = vpop.eup %10553  ;;  %v6402_v36 = vpop.permute.xlu0 %6401  ;;  %5791 = vadd.xlane.f32.xlu0 %v5790_v56  ;;  %v5861_v57 = vpack.c.bf16 %v10552_v5, %v10548_v29  ;;  %v5823_v19 = vadd.f32 %v10552_v5, %v10550_v63 }
0x10e8   : > { %v5860_v17 = vpack.c.bf16 %v10550_v63, %v10554_v49  ;;  %v5820_v15 = vadd.f32 %v10554_v49, %v10548_v29  ;;  %v6404_v20 = vpop.permute.xlu1 %6403 }
0x10e9   : > { %5800 = vadd.xlane.f32.xlu1 %v5799_v37  ;;  %6008 = vmatprep.mubr.bf16.mxu0 %v5861_v57  ;;  %v10556_v52 = vpop.eup %10555 }
0x10ea   : > { %v10558_v8 = vpop.eup %10557 }
0x10eb   : > { %v6406_v32 = vpop.permute.xlu0 %6405  ;;  %5797 = vadd.xlane.f32.xlu0 %v5796_v26  ;;  %v5863_v51 = vpack.c.bf16 %v10556_v52, %v10558_v8  ;;  %v10560_v45 = vpop.eup %10559 }
0x10ec   : > { %6009 = vmatmul.mubr.bf16.gmra.mxu0 %v5860_v17  ;;  %v10562_v22 = vpop.eup %10561  ;;  %v5829_v55 = vadd.f32 %v10560_v45, %v10556_v52  ;;  %v6408_v54 = vpop.permute.xlu1 %6407 }
0x10ed   : > { %5806 = vadd.xlane.f32.xlu1 %v5805_v61  ;;  %6016 = vmatprep.mubr.bf16.mxu0 %v5863_v51  ;;  %v5862_v28 = vpack.c.bf16 %v10560_v45, %v10562_v22  ;;  %v5826_v35 = vadd.f32 %v10562_v22, %v10558_v8 }
0x10ef   : > { %v6410_v53 = vpop.permute.xlu0 %6409  ;;  %5803 = vadd.xlane.f32.xlu0 %v5802_v46 }
0x10f0   : > { %v6412_v25 = vpop.permute.xlu1 %6411 }
0x10f1   : > { %5812 = vadd.xlane.f32.xlu1 %v5811_v14 }
0x10f3   : > { %v14578_v12 = vpop.permute.xlu0 %6413  ;;  %5809 = vadd.xlane.f32.xlu0 %v5808_v4 }
0x10f4   : > { %6017 = vmatmul.mubr.bf16.gmra.mxu0 %v5862_v28  ;;  %v6416_v27 = vpop.permute.xlu1 %6415 }
0x10f5   : > { %9348 = vmatprep.mubr.msk.bf16.mxu0 %vm505_vm0, %v6396_v13  ;;  %5818 = vadd.xlane.f32.xlu1 %v5817_v10 }
0x10f7   : > { %v14583_v47 = vpop.permute.xlu0 %6417  ;;  %5815 = vadd.xlane.f32.xlu0 %v5814_v39 }
0x10f8   : > { %v14599_v43 = vpop.permute.xlu1 %6419 }
0x10f9   : > { %5824 = vadd.xlane.f32.xlu1 %v5823_v19 }
0x10fb   : > { %v14585_v62 = vpop.permute.xlu0 %6421  ;;  %5821 = vadd.xlane.f32.xlu0 %v5820_v15 }
0x10fc   : > { %9349 = vmatmul.mubr.msk.bf16.vlgmr.msra.gmra.mxu0 %vm505_vm0, %v6396_v13  ;;  %v14601_v42 = vpop.permute.xlu1 %6423 }
0x10fd   : > { %9350 = vmatprep.mubr.msk.bf16.mxu0 %vm505_vm0, %v14559_v23  ;;  %5830 = vadd.xlane.f32.xlu1 %v5829_v55 }
0x10ff   : > { %v14590_v33 = vpop.permute.xlu0 %6425  ;;  %5827 = vadd.xlane.f32.xlu0 %v5826_v35 }
0x1100   : > { %v14605_v31 = vpop.permute.xlu1 %7210 }
0x1103   : > { %v7227_v24 = vpop.permute.xlu0 %7226 }
0x1104   : > { %9351 = vmatmul.mubr.msk.bf16.gmra.mxu0 %vm505_vm0, %v14559_v23  ;;  %9380 = vmatprep.subr.bf16.mxu1 %v7227_v24  ;;  %v14609_v18 = vpop.permute.xlu1 %7224 }
0x1105   : > { %9352 = vmatprep.mubr.msk.bf16.mxu0 %vm505_vm0, %v6400_v41 }
0x1107   : > { %v14611_v40 = vpop.permute.xlu0 %7208 }
0x1108   : > { %v14617_v58 = vpop.permute.xlu1 %7206 }
0x110b   : > { %v14619_v6 = vpop.permute.xlu0 %7222 }
0x110c   : > { %9353 = vmatmul.mubr.msk.bf16.gmra.mxu0 %vm505_vm0, %v6400_v41  ;;  %v14621_v7 = vpop.permute.xlu1 %7220 }
0x110d   : > { %9354 = vmatprep.mubr.msk.bf16.mxu0 %vm505_vm0, %v6402_v36  ;;  %v9216_v9 = vpop.f32.mrf.mxu0 }
0x110f   : > { %v9217_v50 = vpop.f32.mrf.mxu0  ;;  %v14625_v3 = vpop.permute.xlu0 %7204 }
0x1110   : > { %v14627_v16 = vpop.permute.xlu1 %7202 }
0x1111   : > { %v9219_v44 = vpop.f32.mrf.mxu0 }
0x1113   : > { %v9220_v23 = vpop.f32.mrf.mxu0  ;;  %v14629_v2 = vpop.permute.xlu0 %7218 }
0x1114   : > { %9355 = vmatmul.mubr.msk.bf16.gmra.mxu0 %vm505_vm0, %v6402_v36  ;;  %v14634_v63 = vpop.permute.xlu1 %7216  ;;  %v9221_v10 = vadd.f32 %v9220_v23, %v9219_v44 }
0x1115   : > { %9356 = vmatprep.mubr.msk.bf16.mxu0 %vm505_vm0, %v6404_v20  ;;  %v9222_v29 = vpop.f32.mrf.mxu0 }
0x1117   : > { %v9223_v38 = vpop.f32.mrf.mxu0  ;;  %v14636_v56 = vpop.permute.xlu0 %7200 }
0x1118   : > { %v14641_v49 = vpop.permute.xlu1 %7198  ;;  %v9224_v24 = vadd.f32 %v9223_v38, %v9222_v29 }
0x1119   : > { %v9225_v5 = vpop.f32.mrf.mxu0 }
0x111b   : > { %v14643_v36 = vpop.permute.xlu0 %7214  ;;  %v9226_v37 = vpop.f32.mrf.mxu0 }
0x111c   : > { %9357 = vmatmul.mubr.msk.bf16.gmra.mxu0 %vm505_vm0, %v6404_v20 }
0x111d   : > { %9358 = vmatprep.mubr.msk.bf16.mxu0 %vm505_vm0, %v6406_v32 }
0x1124   : > { %9359 = vmatmul.mubr.msk.bf16.gmra.mxu0 %vm505_vm0, %v6406_v32 }
0x1125   : > { %9360 = vmatprep.mubr.msk.bf16.mxu0 %vm505_vm0, %v6408_v54 }
0x112c   : > { %9361 = vmatmul.mubr.msk.bf16.gmra.mxu0 %vm505_vm0, %v6408_v54  ;;  %v9227_v54 = vadd.f32 %v9226_v37, %v9225_v5 }
0x112d   : > { %9362 = vmatprep.mubr.msk.bf16.mxu0 %vm505_vm0, %v6410_v53 }
0x1134   : > { %9363 = vmatmul.mubr.msk.bf16.gmra.mxu0 %vm505_vm0, %v6410_v53 }
0x1135   : > { %9364 = vmatprep.mubr.msk.bf16.mxu0 %vm505_vm0, %v6412_v25 }
0x113c   : > { %9365 = vmatmul.mubr.msk.bf16.gmra.mxu0 %vm505_vm0, %v6412_v25 }
0x113d   : > { %9366 = vmatprep.mubr.msk.bf16.mxu0 %vm505_vm0, %v14578_v12 }
0x1144   : > { %9367 = vmatmul.mubr.msk.bf16.gmra.mxu0 %vm505_vm0, %v14578_v12  ;;  %v9218_v12 = vadd.f32 %v9217_v50, %v9216_v9 }
0x1145   : > { %9368 = vmatprep.mubr.msk.bf16.mxu0 %vm505_vm0, %v6416_v27 }
0x114a   : > { %v5738_v57 = vpop.xlane.xlu1 %5737 }
0x114b   : > { %10563 = vrcp.f32 %v5738_v57 }
0x114c   : > { %v9228_v17 = vpop.f32.mrf.mxu0  ;;  %9369 = vmatmul.mubr.msk.bf16.gmra.mxu0 %vm505_vm0, %v6416_v27  ;;  %v5741_v26 = vpop.xlane.xlu0 %5740 }
0x114d   : > { %9370 = vmatprep.mubr.msk.bf16.mxu0 %vm505_vm0, %v14583_v47  ;;  %10565 = vrcp.f32 %v5741_v26 }
0x114e   : > { %v9229_v52 = vpop.f32.mrf.mxu0  ;;  %v5747_v32 = vpop.xlane.xlu1 %5746 }
0x114f   : > { %10567 = vrcp.f32 %v5747_v32 }
0x1150   : > { %v9231_v61 = vpop.f32.mrf.mxu0  ;;  %v5744_v8 = vpop.xlane.xlu0 %5743 }
0x1151   : > { %10569 = vrcp.f32 %v5744_v8 }
0x1152   : > { %v9232_v51 = vpop.f32.mrf.mxu0  ;;  %v5753_v46 = vpop.xlane.xlu1 %5752 }
0x1153   : > { %10571 = vrcp.f32 %v5753_v46  ;;  %v9233_v8 = vadd.f32 %v9232_v51, %v9231_v61 }
0x1154   : > { %v9234_v45 = vpop.f32.mrf.mxu0  ;;  %9371 = vmatmul.mubr.msk.bf16.gmra.mxu0 %vm505_vm0, %v14583_v47  ;;  %v5750_v22 = vpop.xlane.xlu0 %5749 }
0x1155   : > { %9372 = vmatprep.mubr.msk.bf16.mxu0 %vm505_vm0, %v14599_v43  ;;  %10573 = vrcp.f32 %v5750_v22 }
0x1156   : > { %v9235_v53 = vpop.f32.mrf.mxu0  ;;  %v5759_v14 = vpop.xlane.xlu1 %5758 }
0x1157   : > { %10575 = vrcp.f32 %v5759_v14 }
0x1158   : > { %v10564_v4 = vpop.eup %10563  ;;  %v9237_v13 = vpop.f32.mrf.mxu0 }
0x1159   : > { %v5756_v28 = vpop.xlane.xlu0 %5755  ;;  %v6057_v15 = vmul.f32 %v10564_v4, %v9218_v12  ;;  %v9236_v12 = vadd.f32 %v9235_v53, %v9234_v45 }
0x115a   : > { %10577 = vrcp.f32 %v5756_v28  ;;  %v10566_v39 = vpop.eup %10565  ;;  %v9238_v19 = vpop.f32.mrf.mxu0 }
0x115b   : > { %v5765_v41 = vpop.xlane.xlu1 %5764  ;;  %v6058_v47 = vmul.f32 %v10566_v39, %v9221_v10 }
0x115c   : > { %10579 = vrcp.f32 %v5765_v41  ;;  %v10568_v55 = vpop.eup %10567  ;;  %v9240_v35 = vpop.f32.mrf.mxu0  ;;  %9373 = vmatmul.mubr.msk.bf16.gmra.mxu0 %vm505_vm0, %v14599_v43  ;;  %v9230_v43 = vadd.f32 %v9229_v52, %v9228_v17  ;;  %v9239_v17 = vadd.f32 %v9238_v19, %v9237_v13 }
0x115d   : > { %v5762_v20 = vpop.xlane.xlu0 %5761  ;;  %9374 = vmatprep.mubr.msk.bf16.mxu0 %vm505_vm0, %v14585_v62  ;;  %v6089_v25 = vpack.c.bf16 %v6058_v47, %v6057_v15  ;;  %v6060_v44 = vmul.f32 %v10568_v55, %v9227_v54 }
0x115e   : > { %10581 = vrcp.f32 %v5762_v20  ;;  %v10570_v27 = vpop.eup %10569  ;;  %v9241_v9 = vpop.f32.mrf.mxu0 }
0x115f   : > { %v5771_v50 = vpop.xlane.xlu1 %5770  ;;  %v6059_v23 = vmul.f32 %v10570_v27, %v9224_v24  ;;  %9710 = vmatprep.mubr.msk.bf16.mxu1 %vm505_vm0, %v6089_v25 }
0x1160   : > { %10583 = vrcp.f32 %v5771_v50  ;;  %v10572_v57 = vpop.eup %10571  ;;  %v9243_v26 = vpop.f32.mrf.mxu0 }
0x1161   : > { %v5768_v32 = vpop.xlane.xlu0 %5767  ;;  %v6090_v29 = vpack.c.bf16 %v6060_v44, %v6059_v23  ;;  %v6062_v22 = vmul.f32 %v10572_v57, %v9233_v8 }
0x1162   : > { %10585 = vrcp.f32 %v5768_v32  ;;  %v10574_v38 = vpop.eup %10573  ;;  %v9244_v5 = vpop.f32.mrf.mxu0 }
0x1163   : > { %v5777_v37 = vpop.xlane.xlu1 %5776  ;;  %9711 = vmatmul.mubr.msk.bf16.vlgmr.msra.gmra.mxu1 %vm505_vm0, %v6090_v29  ;;  %v6061_v46 = vmul.f32 %v10574_v38, %v9230_v43  ;;  %v9245_v45 = vadd.f32 %v9244_v5, %v9243_v26 }
0x1164   : > { %v10576_v14 = vpop.eup %10575  ;;  %v9246_v4 = vpop.f32.mrf.mxu0  ;;  %9375 = vmatmul.mubr.msk.bf16.gmra.mxu0 %vm505_vm0, %v14585_v62  ;;  %9381 = vmatpush3.bf16.msra.mxu1 %v14605_v31  ;;  %v9242_v31 = vadd.f32 %v9241_v9, %v9240_v35 }
0x1165   : > { %v5774_v28 = vpop.xlane.xlu0 %5773  ;;  %9376 = vmatprep.mubr.msk.bf16.mxu0 %vm505_vm0, %v14601_v42  ;;  %9382 = vmatprep.subr.bf16.mxu1 %v14609_v18  ;;  %v6091_v52 = vpack.c.bf16 %v6062_v22, %v6061_v46  ;;  %v6064_v10 = vmul.f32 %v10576_v14, %v9239_v17 }
0x1166   : > { %10587 = vrcp.f32 %v5774_v28  ;;  %v9247_v51 = vpop.f32.mrf.mxu0 }
0x1167   : > { %v10578_v61 = vpop.eup %10577  ;;  %10589 = vrcp.f32 %v5777_v37  ;;  %9714 = vmatprep.mubr.msk.bf16.mxu1 %vm505_vm0, %v6091_v52  ;;  %v5783_v20 = vpop.xlane.xlu1 %5782  ;;  %v9248_v35 = vadd.f32 %v9247_v51, %v9246_v4 }
0x1168   : > { %v6063_v39 = vmul.f32 %v10578_v61, %v9236_v12  ;;  %v9249_v41 = vpop.f32.mrf.mxu0  ;;  %9383 = vmatpush3.bf16.msra.mxu1 %v14611_v40 }
0x1169   : > { %v10580_v62 = vpop.eup %10579  ;;  %9384 = vmatprep.subr.bf16.mxu1 %v14619_v6  ;;  %v5780_v18 = vpop.xlane.xlu0 %5779 }
0x116a   : > { %v6092_v53 = vpack.c.bf16 %v6064_v10, %v6063_v39  ;;  %v9250_v19 = vpop.f32.mrf.mxu0  ;;  %v6066_v47 = vmul.f32 %v10580_v62, %v9245_v45  ;;  %10591 = vrcp.f32 %v5780_v18 }
0x116b   : > { %v10582_v13 = vpop.eup %10581  ;;  %v9251_v54 = vadd.f32 %v9250_v19, %v9249_v41  ;;  %10593 = vrcp.f32 %v5783_v20  ;;  %v5789_v57 = vpop.xlane.xlu1 %5788 }
0x116c   : > { %v6065_v15 = vmul.f32 %v10582_v13, %v9242_v31  ;;  %9715 = vmatmul.mubr.msk.bf16.gmra.mxu1 %vm505_vm0, %v6092_v53  ;;  %v9252_v24 = vpop.f32.mrf.mxu0  ;;  %9377 = vmatmul.mubr.msk.bf16.gmra.mxu0 %vm505_vm0, %v14601_v42  ;;  %10595 = vrcp.f32 %v5789_v57 }
0x116d   : > { %v10584_v55 = vpop.eup %10583  ;;  %9385 = vmatpush3.bf16.msra.mxu1 %v14617_v58  ;;  %9378 = vmatprep.mubr.msk.bf16.mxu0 %vm505_vm0, %v14590_v33  ;;  %v5786_v43 = vpop.xlane.xlu0 %5785 }
0x116e   : > { %v6093_v40 = vpack.c.bf16 %v6066_v47, %v6065_v15  ;;  %9386 = vmatprep.subr.bf16.mxu1 %v14621_v7  ;;  %v9253_v25 = vpop.f32.mrf.mxu0  ;;  %v6068_v9 = vmul.f32 %v10584_v55, %v9251_v54  ;;  %10597 = vrcp.f32 %v5786_v43 }
0x116f   : > { %v10586_v6 = vpop.eup %10585  ;;  %v9254_v58 = vadd.f32 %v9253_v25, %v9252_v24 }
0x1170   : > { %v6067_v27 = vmul.f32 %v10586_v6, %v9248_v35  ;;  %9718 = vmatprep.mubr.msk.bf16.mxu1 %vm505_vm0, %v6093_v40  ;;  %v9255_v50 = vpop.f32.mrf.mxu0 }
0x1171   : > { %9387 = vmatpush3.bf16.msra.mxu1 %v14625_v3  ;;  %v5792_v14 = vpop.xlane.xlu0 %5791 }
0x1172   : > { %v6094_v42 = vpack.c.bf16 %v6068_v9, %v6067_v27  ;;  %9388 = vmatprep.subr.bf16.mxu1 %v14629_v2  ;;  %v9256_v23 = vpop.f32.mrf.mxu0 }
0x1173   : > { %v10588_v44 = vpop.eup %10587  ;;  %v9257_v32 = vadd.f32 %v9256_v23, %v9255_v50 }
0x1174   : > { %v6069_v26 = vmul.f32 %v10588_v44, %v9254_v58  ;;  %9719 = vmatmul.mubr.msk.bf16.gmra.mxu1 %vm505_vm0, %v6094_v42  ;;  %v10590_v7 = vpop.eup %10589  ;;  %v9258_v8 = vpop.f32.mrf.mxu0  ;;  %9379 = vmatmul.mubr.msk.bf16.gmra.mxu0 %vm505_vm0, %v14590_v33 }
0x1175   : > { %9389 = vmatpush3.bf16.msra.mxu1 %v14627_v16  ;;  %v6070_v3 = vmul.f32 %v10590_v7, %v9257_v32  ;;  %v5795_v33 = vpop.xlane.xlu1 %5794  ;;  %v5798_v62 = vpop.xlane.xlu0 %5797 }
0x1176   : > { %9390 = vmatprep.subr.bf16.mxu1 %v14634_v63  ;;  %v9259_v2 = vpop.f32.mrf.mxu0  ;;  %10599 = vrcp.f32 %v5795_v33 }
0x1177   : > { %v6095_v29 = vpack.c.bf16 %v6070_v3, %v6069_v26  ;;  %v9260_v5 = vadd.f32 %v9259_v2, %v9258_v8  ;;  %v10592_v37 = vpop.eup %10591  ;;  %10601 = vrcp.f32 %v5792_v14 }
0x1178   : > { %v9261_v38 = vpop.f32.mrf.mxu0  ;;  %v10594_v16 = vpop.eup %10593 }
0x1179   : > { %9391 = vmatpush3.bf16.msra.mxu1 %v14636_v56  ;;  %9722 = vmatprep.mubr.msk.bf16.mxu1 %vm505_vm0, %v6095_v29  ;;  %v6071_v63 = vmul.f32 %v10592_v37, %v9260_v5  ;;  %v10596_v61 = vpop.eup %10595  ;;  %v5801_v51 = vpop.xlane.xlu1 %5800 }
0x117a   : > { %9392 = vmatprep.subr.bf16.mxu1 %v14643_v36  ;;  %v9262_v46 = vpop.f32.mrf.mxu0  ;;  %10603 = vrcp.f32 %v5801_v51  ;;  %v5804_v24 = vpop.xlane.xlu0 %5803 }
0x117b   : > { %v9263_v22 = vadd.f32 %v9262_v46, %v9261_v38  ;;  %v10598_v39 = vpop.eup %10597  ;;  %10605 = vrcp.f32 %v5798_v62 }
0x117c   : > { %v9264_v4 = vpop.f32.mrf.mxu0 }
0x117d   : > { %9393 = vmatpush3.bf16.msra.mxu1 %v14641_v49  ;;  %v6072_v28 = vmul.f32 %v10594_v16, %v9263_v22  ;;  %v5807_v47 = vpop.xlane.xlu1 %5806 }
0x117e   : > { %v9265_v12 = vpop.f32.mrf.mxu0  ;;  %10607 = vrcp.f32 %v5807_v47  ;;  %v5810_v57 = vpop.xlane.xlu0 %5809 }
0x117f   : > { %v6096_v56 = vpack.c.bf16 %v6072_v28, %v6071_v63  ;;  %v9266_v52 = vadd.f32 %v9265_v12, %v9264_v4  ;;  %10609 = vrcp.f32 %v5804_v24 }
0x1180   : > { %v9267_v17 = vpop.f32.mrf.mxu0 }
0x1181   : > { %9723 = vmatmul.mubr.msk.bf16.gmra.mxu1 %vm505_vm0, %v6096_v56  ;;  %v6073_v31 = vmul.f32 %v10598_v39, %v9266_v52  ;;  %v5813_v58 = vpop.xlane.xlu1 %5812 }
0x1182   : > { %v9268_v36 = vpop.f32.mrf.mxu0  ;;  %10611 = vrcp.f32 %v5813_v58  ;;  %v5816_v33 = vpop.xlane.xlu0 %5815 }
0x1183   : > { %v9269_v10 = vadd.f32 %v9268_v36, %v9267_v17  ;;  %v10600_v15 = vpop.eup %10599  ;;  %10613 = vrcp.f32 %v5810_v57 }
0x1184   : > { %v9270_v41 = vpop.f32.mrf.mxu0  ;;  %v10602_v20 = vpop.eup %10601 }
0x1185   : > { %v6074_v45 = vmul.f32 %v10596_v61, %v9269_v10  ;;  %v5819_v5 = vpop.xlane.xlu1 %5818 }
0x1186   : > { %v9271_v49 = vpop.f32.mrf.mxu0  ;;  %10615 = vrcp.f32 %v5819_v5  ;;  %v5822_v51 = vpop.xlane.xlu0 %5821 }
0x1187   : > { %v6097_v53 = vpack.c.bf16 %v6074_v45, %v6073_v31  ;;  %v9272_v19 = vadd.f32 %v9271_v49, %v9270_v41  ;;  %v10604_v42 = vpop.eup %10603  ;;  %10617 = vrcp.f32 %v5816_v33 }
0x1188   : > { %v9273_v13 = vpop.f32.mrf.mxu0  ;;  %v10606_v23 = vpop.eup %10605 }
0x1189   : > { %9726 = vmatprep.mubr.msk.bf16.mxu1 %vm505_vm0, %v6097_v53  ;;  %v6075_v35 = vmul.f32 %v10602_v20, %v9272_v19  ;;  %v5825_v52 = vpop.xlane.xlu1 %5824 }
0x118a   : > { %v9274_v18 = vpop.f32.mrf.mxu0  ;;  %10619 = vrcp.f32 %v5825_v52  ;;  %v5828_v47 = vpop.xlane.xlu0 %5827 }
0x118b   : > { %v9275_v55 = vadd.f32 %v9274_v18, %v9273_v13  ;;  %v10608_v38 = vpop.eup %10607  ;;  %10621 = vrcp.f32 %v5822_v51 }
0x118c   : > { %v9276_v40 = vpop.f32.mrf.mxu0  ;;  %v10610_v46 = vpop.eup %10609 }
0x118d   : > { %v6076_v54 = vmul.f32 %v10600_v15, %v9275_v55  ;;  %v5831_v19 = vpop.xlane.xlu1 %5830 }
0x118e   : > { %v9277_v6 = vpop.f32.mrf.mxu0  ;;  %10623 = vrcp.f32 %v5831_v19 }
0x118f   : > { %v6098_v25 = vpack.c.bf16 %v6076_v54, %v6075_v35  ;;  %v9278_v9 = vadd.f32 %v9277_v6, %v9276_v40  ;;  %v10612_v17 = vpop.eup %10611  ;;  %10625 = vrcp.f32 %v5828_v47 }
0x1190   : > { %v9279_v27 = vpop.f32.mrf.mxu0  ;;  %v10614_v61 = vpop.eup %10613 }
0x1191   : > { %9727 = vmatmul.mubr.msk.bf16.gmra.mxu1 %vm505_vm0, %v6098_v25  ;;  %v6077_v32 = vmul.f32 %v10606_v23, %v9278_v9 }
0x1192   : > { %v9280_v50 = vpop.f32.mrf.mxu0 }
0x1193   : > { %v9281_v44 = vadd.f32 %v9280_v50, %v9279_v27  ;;  %v10616_v13 = vpop.eup %10615 }
0x1194   : > { %v9282_v26 = vpop.f32.mrf.mxu0  ;;  %v10618_v15 = vpop.eup %10617 }
0x1195   : > { %v6078_v7 = vmul.f32 %v10604_v42, %v9281_v44 }
0x1196   : > { %v9283_v43 = vpop.f32.mrf.mxu0 }
0x1197   : > { %v6099_v8 = vpack.c.bf16 %v6078_v7, %v6077_v32  ;;  %v9284_v2 = vadd.f32 %v9283_v43, %v9282_v26  ;;  %v10620_v27 = vpop.eup %10619 }
0x1198   : > { %v9285_v3 = vpop.f32.mrf.mxu0  ;;  %v10622_v50 = vpop.eup %10621 }
0x1199   : > { %9730 = vmatprep.mubr.msk.bf16.mxu1 %vm505_vm0, %v6099_v8  ;;  %v6079_v16 = vmul.f32 %v10610_v46, %v9284_v2 }
0x119a   : > { %v9286_v29 = vpop.f32.mrf.mxu0 }
0x119b   : > { %v9287_v37 = vadd.f32 %v9286_v29, %v9285_v3  ;;  %v10624_v43 = vpop.eup %10623 }
0x119c   : > { %v9288_v22 = vpop.f32.mrf.mxu0  ;;  %v10626_v3 = vpop.eup %10625 }
0x119d   : > { %v6080_v14 = vmul.f32 %v10608_v38, %v9287_v37 }
0x119e   : > { %v9289_v4 = vpop.f32.mrf.mxu0 }
0x119f   : > { %v6100_v63 = vpack.c.bf16 %v6080_v14, %v6079_v16  ;;  %v9290_v12 = vadd.f32 %v9289_v4, %v9288_v22 }
0x11a0   : > { %v9291_v28 = vpop.f32.mrf.mxu0 }
0x11a1   : > { %9731 = vmatmul.mubr.msk.bf16.gmra.mxu1 %vm505_vm0, %v6100_v63  ;;  %v6081_v39 = vmul.f32 %v10614_v61, %v9290_v12 }
0x11a2   : > { %v9292_v56 = vpop.f32.mrf.mxu0 }
0x11a3   : > { %v9293_v36 = vadd.f32 %v9292_v56, %v9291_v28 }
0x11a4   : > { %v9294_v10 = vpop.f32.mrf.mxu0 }
0x11a5   : > { %v6082_v62 = vmul.f32 %v10612_v17, %v9293_v36 }
0x11a6   : > { %v9295_v41 = vpop.f32.mrf.mxu0 }
0x11a7   : > { %v6101_v31 = vpack.c.bf16 %v6082_v62, %v6081_v39  ;;  %v9296_v49 = vadd.f32 %v9295_v41, %v9294_v10 }
0x11a8   : > { %v9297_v45 = vpop.f32.mrf.mxu0 }
0x11a9   : > { %9734 = vmatprep.mubr.msk.bf16.mxu1 %vm505_vm0, %v6101_v31  ;;  %v6083_v20 = vmul.f32 %v10618_v15, %v9296_v49 }
0x11aa   : > { %v9298_v53 = vpop.f32.mrf.mxu0 }
0x11ab   : > { %v9299_v18 = vadd.f32 %v9298_v53, %v9297_v45 }
0x11ac   : > { %v9300_v55 = vpop.f32.mrf.mxu0 }
0x11ad   : > { %v6084_v24 = vmul.f32 %v10616_v13, %v9299_v18 }
0x11ae   : > { %v9301_v40 = vpop.f32.mrf.mxu0 }
0x11af   : > { %v6102_v35 = vpack.c.bf16 %v6084_v24, %v6083_v20  ;;  %v9302_v6 = vadd.f32 %v9301_v40, %v9300_v55  ;;  %v16493_v20 = vld [vmem:[#allocation49_spill] sm:$0xff] }
0x11b0   : > { %v9303_v54 = vpop.f32.mrf.mxu0 }
0x11b1   : > { %9735 = vmatmul.mubr.msk.bf16.gmra.mxu1 %vm505_vm0, %v6102_v35  ;;  %v6085_v58 = vmul.f32 %v10622_v50, %v9302_v6 }
0x11b2   : > { %v9304_v25 = vpop.f32.mrf.mxu0 }
0x11b3   : > { %v9305_v9 = vadd.f32 %v9304_v25, %v9303_v54  ;;  %v16494_v25 = vld [vmem:[#allocation56_spill] sm:$0xff] }
0x11b4   : > { %v9306_v42 = vpop.f32.mrf.mxu0 }
0x11b5   : > { %v6086_v44 = vmul.f32 %v10620_v27, %v9305_v9 }
0x11b6   : > { %v9307_v23 = vpop.f32.mrf.mxu0 }
0x11b7   : > { %v6103_v57 = vpack.c.bf16 %v6086_v44, %v6085_v58  ;;  %v9308_v32 = vadd.f32 %v9307_v23, %v9306_v42 }
0x11b8   : > { %v9309_v26 = vpop.f32.mrf.mxu0 }
0x11b9   : > { %9738 = vmatprep.mubr.msk.bf16.mxu1 %vm505_vm0, %v6103_v57  ;;  %v6087_v29 = vmul.f32 %v10626_v3, %v9308_v32 }
0x11ba   : > { %v9310_v7 = vpop.f32.mrf.mxu0 }
0x11bb   : > { %v9311_v8 = vadd.f32 %v9310_v7, %v9309_v26 }
0x11bc   : > { %v14694_v2 = vpop.f32.mrf.mxu0 }
0x11bd   : > { %v6088_v38 = vmul.f32 %v10624_v43, %v9311_v8 }
0x11be   : > { %v14696_v5 = vpop.f32.mrf.mxu0 }
0x11bf   : > { %v6104_v37 = vpack.c.bf16 %v6088_v38, %v6087_v29  ;;  %v6764_v46 = vmax.f32 %v14694_v2, %v14696_v5 }
0x11c0   : > { %v14700_v33 = vpop.f32.mrf.mxu0 }
0x11c1   : > { %6765 = vmax.xlane.f32.xlu0 %v6764_v46  ;;  %9739 = vmatmul.mubr.msk.bf16.gmra.mxu1 %vm505_vm0, %v6104_v37 }
0x11c2   : > { %v14703_v22 = vpop.f32.mrf.mxu0 }
0x11c3   : > { %v6767_v16 = vmax.f32 %v14700_v33, %v14703_v22 }
0x11c4   : > { %v14707_v14 = vpop.f32.mrf.mxu0 }
0x11c5   : > { %6768 = vmax.xlane.f32.xlu1 %v6767_v16 }
0x11c6   : > { %v14709_v4 = vpop.f32.mrf.mxu0 }
0x11c7   : > { %v6770_v63 = vmax.f32 %v14707_v14, %v14709_v4 }
0x11c8   : > { %v14713_v28 = vpop.f32.mrf.mxu0 }
0x11c9   : > { %6771 = vmax.xlane.f32.xlu1 %v6770_v63 }
0x11ca   : > { %v14715_v12 = vpop.f32.mrf.mxu0 }
0x11cb   : > { %v6773_v56 = vmax.f32 %v14713_v28, %v14715_v12 }
0x11cc   : > { %v14719_v17 = vpop.f32.mrf.mxu0 }
0x11cd   : > { %6774 = vmax.xlane.f32.xlu0 %v6773_v56 }
0x11ce   : > { %v14721_v52 = vpop.f32.mrf.mxu0 }
0x11cf   : > { %v6776_v36 = vmax.f32 %v14719_v17, %v14721_v52 }
0x11d0   : > { %v14725_v61 = vpop.f32.mrf.mxu0 }
0x11d1   : > { %6777 = vmax.xlane.f32.xlu1 %v6776_v36 }
0x11d2   : > { %v14727_v51 = vpop.f32.mrf.mxu0 }
0x11d3   : > { %v6779_v10 = vmax.f32 %v14725_v61, %v14727_v51 }
0x11d4   : > { %v14731_v39 = vpop.f32.mrf.mxu0 }
0x11d5   : > { %6780 = vmax.xlane.f32.xlu0 %v6779_v10 }
0x11d6   : > { %v14733_v62 = vpop.f32.mrf.mxu0 }
0x11d7   : > { %v6782_v41 = vmax.f32 %v14731_v39, %v14733_v62 }
0x11d8   : > { %v14737_v31 = vpop.f32.mrf.mxu0 }
0x11d9   : > { %6783 = vmax.xlane.f32.xlu1 %v6782_v41 }
0x11da   : > { %v14739_v45 = vpop.f32.mrf.mxu0 }
0x11db   : > { %v6785_v49 = vmax.f32 %v14737_v31, %v14739_v45 }
0x11dc   : > { %v14743_v53 = vpop.f32.mrf.mxu0 }
0x11dd   : > { %6786 = vmax.xlane.f32.xlu0 %v6785_v49 }
0x11de   : > { %v14745_v13 = vpop.f32.mrf.mxu0 }
0x11df   : > { %v6788_v8 = vmax.f32 %v14743_v53, %v14745_v13 }
0x11e0   : > { %v14747_v19 = vpop.f32.mrf.mxu0 }
0x11e2   : > { %v14749_v18 = vpop.f32.mrf.mxu0 }
0x11e3   : > { %v6791_v38 = vmax.f32 %v14747_v19, %v14749_v18 }
0x11e4   : > { %v14751_v15 = vpop.f32.mrf.mxu0 }
0x11e6   : > { %v14753_v47 = vpop.f32.mrf.mxu0 }
0x11e7   : > { %v6794_v63 = vmax.f32 %v14751_v15, %v14753_v47 }
0x11e8   : > { %v14755_v55 = vpop.f32.mrf.mxu0 }
0x11ea   : > { %7212 = vrot.lane.b32.xlu1 %v16493_v20, %s10897_s16  ;;  %v14759_v24 = vpop.f32.mrf.mxu0 }
0x11eb   : > { %v6797_v37 = vmax.f32 %v14755_v55, %v14759_v24 }
0x11ec   : > { %v14761_v40 = vpop.f32.mrf.mxu0 }
0x11ee   : > { %v14763_v35 = vpop.f32.mrf.mxu0 }
0x11ef   : > { %v6800_v41 = vmax.f32 %v14761_v40, %v14763_v35 }
0x11f0   : > { %v14765_v54 = vpop.f32.mrf.mxu0 }
0x11f2   : > { %v14767_v6 = vpop.f32.mrf.mxu0 }
0x11f3   : > { %7196 = vrot.lane.b32.xlu0 %v16494_v25, %s10897_s16  ;;  %v6803_v56 = vmax.f32 %v14765_v54, %v14767_v6 }
0x11f4   : > { %v14771_v27 = vpop.f32.mrf.mxu0 }
0x11f6   : > { %v14773_v9 = vpop.f32.mrf.mxu0 }
0x11f7   : > { %16495 = vst [vmem:[#allocation75_spill] sm:$0xff] %v14773_v9 }
0x11f8   : > { %v14775_v50 = vpop.f32.mrf.mxu0 }
0x11fa   : > { %v14777_v42 = vpop.f32.mrf.mxu0 }
0x11fb   : > { %v6809_v49 = vmax.f32 %v14775_v50, %v14777_v42 }
0x11fc   : > { %v14779_v58 = vpop.f32.mrf.mxu0 }
0x11fd   : > { %16496 = vst [vmem:[#allocation129_spill] sm:$0xff] %v14779_v58 }
0x11fe   : > { %v14781_v44 = vpop.f32.mrf.mxu0 }
0x11ff   : > { %16497 = vst [vmem:[#allocation148_spill] sm:$0xff] %v14781_v44 }
0x1200   : > { %v14783_v23 = vpop.f32.mrf.mxu0 }
0x1201   : > { %16498 = vst [vmem:[#allocation73_spill] sm:$0xff] %v14783_v23 }
0x1202   : > { %v14785_v57 = vpop.f32.mrf.mxu0 }
0x1203   : > { %16499 = vst [vmem:[#allocation128_spill] sm:$0xff] %v14785_v57 }
0x1204   : > { %v14787_v26 = vpop.f32.mrf.mxu0 }
0x1205   : > { %16500 = vst [vmem:[#allocation147_spill] sm:$0xff] %v14787_v26 }
0x1206   : > { %v14789_v32 = vpop.f32.mrf.mxu0 }
0x1207   : > { %16501 = vst [vmem:[#allocation126_spill] sm:$0xff] %v14789_v32 }
0x1208   : > { %v14791_v7 = vpop.f32.mrf.mxu0 }
0x1209   : > { %16502 = vst [vmem:[#allocation146_spill] sm:$0xff] %v14791_v7 }
0x120a   : > { %v14793_v43 = vpop.f32.mrf.mxu0 }
0x120b   : > { %16503 = vst [vmem:[#allocation125_spill] sm:$0xff] %v14793_v43 }
0x120c   : > { %v14797_v3 = vpop.f32.mrf.mxu0 }
0x120e   : > { %6789 = vmax.xlane.f32.xlu1 %v6788_v8  ;;  %v14799_v29 = vpop.f32.mrf.mxu0  ;;  %v6806_v8 = vmax.f32 %v14771_v27, %v14773_v9 }
0x1210   : > { %v14805_v46 = vpop.f32.mrf.mxu0 }
0x1211   : > { %16504 = vst [vmem:[#allocation145_spill] sm:$0xff] %v14805_v46 }
0x1212   : > { %6792 = vmax.xlane.f32.xlu0 %v6791_v38  ;;  %6798 = vmax.xlane.f32.xlu1 %v6797_v37  ;;  %v14807_v16 = vpop.f32.mrf.mxu0  ;;  %v6815_v38 = vmax.f32 %v14783_v23, %v14785_v57  ;;  %v6818_v57 = vmax.f32 %v14787_v26, %v14789_v32  ;;  %v16510_v23 = vld [vmem:[#allocation80_spill] sm:$0xff]  ;;  %v6824_v32 = vmax.f32 %v14797_v3, %v14799_v29 }
0x1213   : > { %16505 = vst [vmem:[#allocation81_spill] sm:$0xff] %v14807_v16  ;;  %v16515_v26 = vld [vmem:[#allocation76_spill] sm:$0xff] }
0x1214   : > { %v14813_v36 = vpop.f32.mrf.mxu0 }
0x1216   : > { %6795 = vmax.xlane.f32.xlu0 %v6794_v63  ;;  %6804 = vmax.xlane.f32.xlu1 %v6803_v56  ;;  %v14815_v10 = vpop.f32.mrf.mxu0  ;;  %v6812_v56 = vmax.f32 %v14779_v58, %v14781_v44 }
0x1217   : > { %16506 = vst [vmem:[#allocation123_spill] sm:$0xff] %v14815_v10 }
0x1218   : > { %v14821_v20 = vpop.f32.mrf.mxu0 }
0x121a   : > { %6801 = vmax.xlane.f32.xlu0 %v6800_v41  ;;  %6810 = vmax.xlane.f32.xlu1 %v6809_v49  ;;  %v14823_v25 = vpop.f32.mrf.mxu0  ;;  %v6821_v41 = vmax.f32 %v14791_v7, %v14793_v43 }
0x121b   : > { %16507 = vst [vmem:[#allocation144_spill] sm:$0xff] %v14823_v25 }
0x121c   : > { %v14829_v37 = vpop.f32.mrf.mxu0 }
0x121e   : > { %6807 = vmax.xlane.f32.xlu0 %v6806_v8  ;;  %6816 = vmax.xlane.f32.xlu1 %v6815_v38  ;;  %v14831_v63 = vpop.f32.mrf.mxu0  ;;  %v6827_v8 = vmax.f32 %v14805_v46, %v14807_v16  ;;  %v6833_v16 = vmax.f32 %v14821_v20, %v14823_v25 }
0x1220   : > { %v14837_v49 = vpop.f32.mrf.mxu0 }
0x1221   : > { %16508 = vst [vmem:[#allocation79_spill] sm:$0xff] %v14837_v49 }
0x1222   : > { %6813 = vmax.xlane.f32.xlu0 %v6812_v56  ;;  %6822 = vmax.xlane.f32.xlu1 %v6821_v41  ;;  %v14839_v30 = vpop.f32.mrf.mxu0  ;;  %v16513_v56 = vld [vmem:[#allocation41_spill] sm:$0xff] }
0x1223   : > { %16509 = vst [vmem:[#allocation122_spill] sm:$0xff] %v14839_v30  ;;  %v9712_v9 = vpop.f32.mrf.mxu1 }
0x1224   : > { %v14845_v38 = vpop.f32.mrf.mxu0  ;;  %v14848_v44 = vadd.f32 %v9712_v9, %v16510_v23 }
0x1225   : > { %v6220_v58 = vpop.f32.mrf.mxu1 }
0x1226   : > { %16511 = vst [vmem:[#allocation143_spill] sm:$0xff] %v14848_v44  ;;  %6819 = vmax.xlane.f32.xlu0 %v6818_v57  ;;  %6828 = vmax.xlane.f32.xlu1 %v6827_v8  ;;  %v14850_v43 = vpop.f32.mrf.mxu0  ;;  %v14853_v41 = vadd.f32 %v6220_v58, %v16513_v56  ;;  %v6830_v8 = vmax.f32 %v14813_v36, %v14815_v10  ;;  %v16518_v44 = vld [vmem:[#allocation83_spill] sm:$0xff]  ;;  %v16524_v10 = vld [vmem:[#allocation88_spill] sm:$0xff] }
0x1227   : > { %16512 = vst [vmem:[#allocation120_spill] sm:$0xff] %v14850_v43  ;;  %v9713_v7 = vpop.f32.mrf.mxu1  ;;  %v6839_v56 = vmax.f32 %v14837_v49, %v14839_v30 }
0x1228   : > { %16514 = vst [vmem:[#allocation141_spill] sm:$0xff] %v14853_v41  ;;  %v14859_v46 = vpop.f32.mrf.mxu0  ;;  %v14862_v9 = vadd.f32 %v9713_v7, %v16515_v26 }
0x1229   : > { %v14864_v23 = vpop.f32.mrf.mxu1 }
0x122a   : > { %16516 = vst [vmem:[#allocation119_spill] sm:$0xff] %v14862_v9  ;;  %16517 = vst [vmem:[#allocation140_spill] sm:$0xff] %v14864_v23  ;;  %6825 = vmax.xlane.f32.xlu0 %v6824_v32  ;;  %6834 = vmax.xlane.f32.xlu1 %v6833_v16  ;;  %v14866_v57 = vpop.f32.mrf.mxu0  ;;  %v16521_v32 = vld [vmem:[#allocation103_spill] sm:$0xff]  ;;  %v6836_v9 = vmax.f32 %v14829_v37, %v14831_v63 }
0x122b   : > { %v6845_v30 = vmax.f32 %v14859_v46, %v14866_v57 }
0x122c   : > { %v9716_v58 = vpop.f32.mrf.mxu1  ;;  %v14872_v41 = vpop.f32.mrf.mxu0 }
0x122d   : > { %v14875_v25 = vadd.f32 %v9716_v58, %v16518_v44 }
0x122e   : > { %v6236_v26 = vpop.f32.mrf.mxu1  ;;  %6831 = vmax.xlane.f32.xlu0 %v6830_v8  ;;  %6840 = vmax.xlane.f32.xlu1 %v6839_v56  ;;  %v14877_v7 = vpop.f32.mrf.mxu0 }
0x122f   : > { %16519 = vst [vmem:[#allocation86_spill] sm:$0xff] %v14875_v25  ;;  %16520 = vst [vmem:[#allocation117_spill] sm:$0xff] %v14877_v7  ;;  %v14880_v16 = vadd.f32 %v6236_v26, %v16521_v32  ;;  %v6842_v32 = vmax.f32 %v14845_v38, %v14850_v43 }
0x1230   : > { %v9717_v23 = vpop.f32.mrf.mxu1  ;;  %v14886_v49 = vpop.f32.mrf.mxu0 }
0x1231   : > { %16522 = vst [vmem:[#allocation138_spill] sm:$0xff] %v14880_v16  ;;  %16523 = vst [vmem:[#allocation84_spill] sm:$0xff] %v14886_v49  ;;  %v14889_v44 = vadd.f32 %v9717_v23, %v16524_v10 }
0x1232   : > { %v14891_v58 = vpop.f32.mrf.mxu1  ;;  %6837 = vmax.xlane.f32.xlu0 %v6836_v9  ;;  %6846 = vmax.xlane.f32.xlu1 %v6845_v30  ;;  %v14893_v8 = vpop.f32.mrf.mxu0  ;;  %v16531_v30 = vld [vmem:[#allocation53_spill] sm:$0xff] }
0x1233   : > { %16525 = vst [vmem:[#allocation116_spill] sm:$0xff] %v14889_v44  ;;  %16526 = vst [vmem:[#allocation137_spill] sm:$0xff] %v14891_v58  ;;  %v6851_v56 = vmax.f32 %v14886_v49, %v14893_v8  ;;  %v6848_v44 = vmax.f32 %v14872_v41, %v14877_v7  ;;  %v16534_v49 = vld [vmem:[#allocation60_spill] sm:$0xff] }
0x1234   : > { %16527 = vst [vmem:[#allocation114_spill] sm:$0xff] %v14893_v8  ;;  %v9720_v26 = vpop.f32.mrf.mxu1  ;;  %v14899_v16 = vpop.f32.mrf.mxu0 }
0x1235   : > { %16528 = vst [vmem:[#allocation113_spill] sm:$0xff] %v14899_v16  ;;  %v14902_v25 = vadd.f32 %v9720_v26, %v14109_v1 }
0x1236   : > { %v6252_v10 = vpop.f32.mrf.mxu1  ;;  %6843 = vmax.xlane.f32.xlu0 %v6842_v32  ;;  %6852 = vmax.xlane.f32.xlu1 %v6851_v56  ;;  %v14904_v23 = vpop.f32.mrf.mxu0 }
0x1237   : > { %16529 = vst [vmem:[#allocation91_spill] sm:$0xff] %v14902_v25  ;;  %16530 = vst [vmem:[#allocation89_spill] sm:$0xff] %v14904_v23  ;;  %v14907_v9 = vadd.f32 %v6252_v10, %v16531_v30  ;;  %v6854_v26 = vmax.f32 %v14899_v16, %v14904_v23  ;;  %v16538_v30 = vld [vmem:[#allocation65_spill] sm:$0xff] }
0x1238   : > { %v9721_v58 = vpop.f32.mrf.mxu1  ;;  %v14911_v8 = vpop.f32.mrf.mxu0 }
0x1239   : > { %16532 = vst [vmem:[#allocation96_spill] sm:$0xff] %v14907_v9  ;;  %16533 = vst [vmem:[#allocation94_spill] sm:$0xff] %v14911_v8  ;;  %v14914_v43 = vadd.f32 %v9721_v58, %v16534_v49  ;;  %v16539_v49 = vld [vmem:[#allocation63_spill] sm:$0xff] }
0x123a   : > { %6849 = vmax.xlane.f32.xlu0 %v6848_v44  ;;  %v14916_v1 = vpop.f32.mrf.mxu0  ;;  %v14922_v32 = vpop.f32.mrf.mxu1 }
0x123b   : > { %16535 = vst [vmem:[#allocation101_spill] sm:$0xff] %v14914_v43  ;;  %16536 = vst [vmem:[#allocation99_spill] sm:$0xff] %v14916_v1  ;;  %v6857_v56 = vmax.f32 %v14911_v8, %v14916_v1  ;;  %v16540_v43 = vld [vmem:[#allocation70_spill] sm:$0xff] }
0x123c   : > { %16537 = vst [vmem:[#allocation106_spill] sm:$0xff] %v14922_v32 }
0x123d   : > { %6858 = vmax.xlane.f32.xlu1 %v6857_v56 }
0x123e   : > { %6855 = vmax.xlane.f32.xlu0 %v6854_v26 }
0x1241   : > { %v9724_v10 = vpop.f32.mrf.mxu1 }
0x1242   : > { %v14925_v9 = vadd.f32 %v9724_v10, %v16538_v30 }
0x1243   : > { %v6268_v25 = vpop.f32.mrf.mxu1 }
0x1244   : > { %v14928_v58 = vadd.f32 %v6268_v25, %v16539_v49 }
0x1245   : > { %v9725_v44 = vpop.f32.mrf.mxu1 }
0x1246   : > { %v14931_v7 = vadd.f32 %v9725_v44, %v16540_v43  ;;  %v16542_v44 = vld [vmem:[#allocation135_spill] sm:$0xff] }
0x1247   : > { %v14935_v16 = vpop.f32.mrf.mxu1 }
0x1248   : > { %16541 = vst [vmem:[#allocation104_spill] sm:$0xff] %v14931_v7 }
0x124a   : > { %v6766_v1 = vpop.xlane.xlu0 %6765 }
0x124b   : > { %v6860_v8 = vsub.f32 %v14694_v2, %v6766_v1  ;;  %v6861_v56 = vsub.f32 %v14696_v5, %v6766_v1 }
0x124d   : > { %v6924_v26 = vmul.f32 1.442695, %v6860_v8  ;;  %v6926_v23 = vmul.f32 1.442695, %v6861_v56  ;;  %v16543_v56 = vld [vmem:[#allocation152_spill] sm:$0xff] }
0x124e   : > { %v6769_v32 = vpop.xlane.xlu1 %6768 }
0x124f   : > { %10627 = vpow2.f32 %v6924_v26  ;;  %v6862_v10 = vsub.f32 %v14700_v33, %v6769_v32  ;;  %v6863_v25 = vsub.f32 %v14703_v22, %v6769_v32  ;;  %v16544_v32 = vld [vmem:[#allocation68_spill] sm:$0xff] }
0x1250   : > { %10629 = vpow2.f32 %v6926_v23 }
0x1251   : > { %v6928_v30 = vmul.f32 1.442695, %v6862_v10  ;;  %v6930_v49 = vmul.f32 1.442695, %v6863_v25  ;;  %v9728_v43 = vpop.f32.mrf.mxu1 }
0x1252   : > { %v14940_v7 = vadd.f32 %v9728_v43, %v16542_v44  ;;  %v6772_v2 = vpop.xlane.xlu1 %6771 }
0x1253   : > { %10631 = vpow2.f32 %v6928_v30  ;;  %v6864_v5 = vsub.f32 %v14707_v14, %v6772_v2  ;;  %v6865_v8 = vsub.f32 %v14709_v4, %v6772_v2  ;;  %v6284_v1 = vpop.f32.mrf.mxu1 }
0x1254   : > { %10633 = vpow2.f32 %v6930_v49  ;;  %v14945_v26 = vadd.f32 %v6284_v1, %v16543_v56 }
0x1255   : > { %v6932_v33 = vmul.f32 1.442695, %v6864_v5  ;;  %v6934_v22 = vmul.f32 1.442695, %v6865_v8  ;;  %v9729_v23 = vpop.f32.mrf.mxu1 }
0x1256   : > { %v14948_v10 = vadd.f32 %v9729_v23, %v16544_v32  ;;  %v6775_v25 = vpop.xlane.xlu0 %6774 }
0x1257   : > { %10635 = vpow2.f32 %v6932_v33  ;;  %v6866_v43 = vsub.f32 %v14713_v28, %v6775_v25  ;;  %v6867_v30 = vsub.f32 %v14715_v12, %v6775_v25  ;;  %v14954_v32 = vpop.f32.mrf.mxu1 }
0x1258   : > { %10637 = vpow2.f32 %v6934_v22 }
0x1259   : > { %v6936_v14 = vmul.f32 1.442695, %v6866_v43  ;;  %v6938_v4 = vmul.f32 1.442695, %v6867_v30 }
0x125a   : > { %v6778_v44 = vpop.xlane.xlu1 %6777 }
0x125b   : > { %10639 = vpow2.f32 %v6936_v14  ;;  %v6868_v49 = vsub.f32 %v14719_v17, %v6778_v44  ;;  %v6869_v2 = vsub.f32 %v14721_v52, %v6778_v44 }
0x125c   : > { %v10628_v5 = vpop.eup %10627  ;;  %10641 = vpow2.f32 %v6938_v4 }
0x125d   : > { %v10630_v8 = vpop.eup %10629  ;;  %v6940_v1 = vmul.f32 1.442695, %v6868_v49  ;;  %v6942_v56 = vmul.f32 1.442695, %v6869_v2 }
0x125e   : > { %v6781_v23 = vpop.xlane.xlu0 %6780  ;;  %v7052_v33 = vadd.f32 %v10630_v8, %v10628_v5 }
0x125f   : > { %10643 = vpow2.f32 %v6940_v1  ;;  %v6870_v28 = vsub.f32 %v14725_v61, %v6781_v23  ;;  %v6871_v12 = vsub.f32 %v14727_v51, %v6781_v23 }
0x1260   : > { %v10632_v22 = vpop.eup %10631  ;;  %10645 = vpow2.f32 %v6942_v56  ;;  %7053 = vadd.xlane.f32.xlu0 %v7052_v33 }
0x1261   : > { %v10634_v17 = vpop.eup %10633  ;;  %v6944_v25 = vmul.f32 1.442695, %v6870_v28  ;;  %v6946_v52 = vmul.f32 1.442695, %v6871_v12  ;;  %v9732_v43 = vpop.f32.mrf.mxu1 }
0x1262   : > { %v14959_v30 = vadd.f32 %v9732_v43, %v14179_v48  ;;  %v6784_v14 = vpop.xlane.xlu1 %6783  ;;  %v7149_v4 = vpack.c.bf16 %v10634_v17, %v10630_v8  ;;  %v7055_v44 = vadd.f32 %v10634_v17, %v10632_v22 }
0x1263   : > { %10647 = vpow2.f32 %v6944_v25  ;;  %v6872_v49 = vsub.f32 %v14731_v39, %v6784_v14  ;;  %v6873_v61 = vsub.f32 %v14733_v62, %v6784_v14  ;;  %v6300_v2 = vpop.f32.mrf.mxu1 }
0x1264   : > { %v10636_v51 = vpop.eup %10635  ;;  %10649 = vpow2.f32 %v6946_v52  ;;  %v14964_v1 = vadd.f32 %v6300_v2, %v14187_v60  ;;  %7276 = vmatprep.mubr.bf16.mxu1 %v7149_v4  ;;  %7056 = vadd.xlane.f32.xlu1 %v7055_v44  ;;  %v7148_v44 = vpack.c.bf16 %v10632_v22, %v10628_v5 }
0x1265   : > { %v10638_v56 = vpop.eup %10637  ;;  %v6948_v23 = vmul.f32 1.442695, %v6872_v49  ;;  %v6950_v48 = vmul.f32 1.442695, %v6873_v61  ;;  %v9733_v33 = vpop.f32.mrf.mxu1 }
0x1266   : > { %v14967_v8 = vadd.f32 %v9733_v33, %v14193_v0  ;;  %v6787_v28 = vpop.xlane.xlu0 %6786  ;;  %v7213_v12 = vpop.permute.xlu1 %7212  ;;  %v7058_v39 = vadd.f32 %v10638_v56, %v10636_v51 }
0x1267   : > { %10651 = vpow2.f32 %v6948_v23  ;;  %v6874_v62 = vsub.f32 %v14737_v31, %v6787_v28  ;;  %v6875_v17 = vsub.f32 %v14739_v45, %v6787_v28  ;;  %9394 = vmatprep.subr.bf16.mxu1 %v7213_v12  ;;  %v14971_v45 = vpop.f32.mrf.mxu1 }
0x1268   : > { %v10640_v60 = vpop.eup %10639  ;;  %10653 = vpow2.f32 %v6950_v48  ;;  %7059 = vadd.xlane.f32.xlu0 %v7058_v39 }
0x1269   : > { %v10642_v25 = vpop.eup %10641  ;;  %v6952_v52 = vmul.f32 1.442695, %v6874_v62  ;;  %v6954_v43 = vmul.f32 1.442695, %v6875_v17  ;;  %v7150_v5 = vpack.c.bf16 %v10640_v60, %v10636_v51 }
0x126a   : > { %v7197_v14 = vpop.permute.xlu0 %7196  ;;  %v7061_v4 = vadd.f32 %v10642_v25, %v10640_v60  ;;  %v7151_v61 = vpack.c.bf16 %v10642_v25, %v10638_v56 }
0x126b   : > { %10655 = vpow2.f32 %v6952_v52  ;;  %9395 = vmatpush3.bf16.msra.mxu1 %v7197_v14 }
0x126c   : > { %v10644_v0 = vpop.eup %10643  ;;  %10657 = vpow2.f32 %v6954_v43  ;;  %7062 = vadd.xlane.f32.xlu1 %v7061_v4 }
0x126d   : > { %v10646_v49 = vpop.eup %10645 }
0x126e   : > { %7277 = vmatmul.mubr.bf16.vlgmr.msra.gmra.mxu1 %v7148_v44  ;;  %v7064_v31 = vadd.f32 %v10646_v49, %v10644_v0 }
0x126f   : > { %7284 = vmatprep.mubr.bf16.mxu1 %v7151_v61 }
0x1270   : > { %v10648_v2 = vpop.eup %10647  ;;  %7065 = vadd.xlane.f32.xlu0 %v7064_v31 }
0x1271   : > { %v10650_v23 = vpop.eup %10649  ;;  %v9736_v48 = vpop.f32.mrf.mxu1  ;;  %v7152_v4 = vpack.c.bf16 %v10648_v2, %v10644_v0 }
0x1272   : > { %v14974_v33 = vadd.f32 %v9736_v48, %v14211_v21  ;;  %v7067_v28 = vadd.f32 %v10650_v23, %v10648_v2  ;;  %v7153_v17 = vpack.c.bf16 %v10650_v23, %v10646_v49  ;;  %v16545_v49 = vld [vmem:[#allocation150_spill] sm:$0xff]  ;;  %v16546_v48 = vld [vmem:[#allocation131_spill] sm:$0xff] }
0x1273   : > { %v6316_v12 = vpop.f32.mrf.mxu1 }
0x1274   : > { %v10652_v39 = vpop.eup %10651  ;;  %v14977_v62 = vadd.f32 %v6316_v12, %v14215_v34  ;;  %7068 = vadd.xlane.f32.xlu1 %v7067_v28 }
0x1275   : > { %v10654_v22 = vpop.eup %10653  ;;  %v9737_v56 = vpop.f32.mrf.mxu1 }
0x1276   : > { %v14980_v25 = vadd.f32 %v9737_v56, %v14219_v11  ;;  %7285 = vmatmul.mubr.bf16.gmra.mxu1 %v7150_v5  ;;  %v7070_v52 = vadd.f32 %v10654_v22, %v10652_v39 }
0x1277   : > { %7292 = vmatprep.mubr.bf16.mxu1 %v7153_v17  ;;  %v14982_v34 = vpop.f32.mrf.mxu1 }
0x1278   : > { %v10656_v43 = vpop.eup %10655  ;;  %7071 = vadd.xlane.f32.xlu0 %v7070_v52 }
0x1279   : > { %v10658_v21 = vpop.eup %10657  ;;  %v7154_v31 = vpack.c.bf16 %v10656_v43, %v10652_v39 }
0x127a   : > { %v7073_v14 = vadd.f32 %v10658_v21, %v10656_v43  ;;  %v7155_v44 = vpack.c.bf16 %v10658_v21, %v10654_v22 }
0x127c   : > { %7074 = vadd.xlane.f32.xlu1 %v7073_v14 }
0x127e   : > { %7293 = vmatmul.mubr.bf16.gmra.mxu1 %v7152_v4 }
0x127f   : > { %7300 = vmatprep.mubr.bf16.mxu1 %v7155_v44 }
0x1281   : > { %v9740_v51 = vpop.f32.mrf.mxu1 }
0x1282   : > { %v14985_v60 = vadd.f32 %v9740_v51, %v14242_v59 }
0x1283   : > { %v6332_v11 = vpop.f32.mrf.mxu1 }
0x1284   : > { %v14988_v61 = vadd.f32 %v6332_v11, %v16545_v49 }
0x1285   : > { %v9741_v23 = vpop.f32.mrf.mxu1 }
0x1286   : > { %v14991_v28 = vadd.f32 %v9741_v23, %v16546_v48  ;;  %7301 = vmatmul.mubr.bf16.gmra.mxu1 %v7154_v31 }
0x1297   : > { %v6790_v0 = vpop.xlane.xlu1 %6789 }
0x1298   : > { %v6876_v2 = vsub.f32 %v14743_v53, %v6790_v0  ;;  %v6877_v12 = vsub.f32 %v14745_v13, %v6790_v0 }
0x129a   : > { %v6956_v5 = vmul.f32 1.442695, %v6876_v2  ;;  %v6958_v22 = vmul.f32 1.442695, %v6877_v12 }
0x129b   : > { %v6793_v56 = vpop.xlane.xlu0 %6792  ;;  %v6799_v59 = vpop.xlane.xlu1 %6798 }
0x129c   : > { %10659 = vpow2.f32 %v6956_v5  ;;  %v6878_v17 = vsub.f32 %v14747_v19, %v6793_v56  ;;  %v6879_v52 = vsub.f32 %v14749_v18, %v6793_v56  ;;  %v6882_v39 = vsub.f32 %v14755_v55, %v6799_v59 }
0x129d   : > { %10661 = vpow2.f32 %v6958_v22  ;;  %v6883_v43 = vsub.f32 %v14759_v24, %v6799_v59 }
0x129e   : > { %v6960_v21 = vmul.f32 1.442695, %v6878_v17  ;;  %v6962_v14 = vmul.f32 1.442695, %v6879_v52  ;;  %v6968_v4 = vmul.f32 1.442695, %v6882_v39 }
0x129f   : > { %v6970_v53 = vmul.f32 1.442695, %v6883_v43  ;;  %v6796_v44 = vpop.xlane.xlu0 %6795  ;;  %v6805_v13 = vpop.xlane.xlu1 %6804  ;;  %v16547_v17 = vld [vmem:[#allocation75_spill] sm:$0xff]  ;;  %v16548_v52 = vld [vmem:[#allocation73_spill] sm:$0xff] }
0x12a0   : > { %10663 = vpow2.f32 %v6960_v21  ;;  %v6880_v51 = vsub.f32 %v14751_v15, %v6796_v44  ;;  %v6881_v11 = vsub.f32 %v14753_v47, %v6796_v44  ;;  %v6886_v19 = vsub.f32 %v14765_v54, %v6805_v13 }
0x12a1   : > { %10665 = vpow2.f32 %v6962_v14  ;;  %v6887_v18 = vsub.f32 %v14767_v6, %v6805_v13 }
0x12a2   : > { %10667 = vpow2.f32 %v6968_v4  ;;  %v6964_v55 = vmul.f32 1.442695, %v6880_v51  ;;  %v6966_v49 = vmul.f32 1.442695, %v6881_v11  ;;  %v6976_v24 = vmul.f32 1.442695, %v6886_v19 }
0x12a3   : > { %10669 = vpow2.f32 %v6970_v53  ;;  %v6978_v31 = vmul.f32 1.442695, %v6887_v18  ;;  %v6802_v23 = vpop.xlane.xlu0 %6801  ;;  %v6811_v48 = vpop.xlane.xlu1 %6810  ;;  %v16551_v19 = vld [vmem:[#allocation148_spill] sm:$0xff] }
0x12a4   : > { %10671 = vpow2.f32 %v6964_v55  ;;  %v6884_v0 = vsub.f32 %v14761_v40, %v6802_v23  ;;  %v6885_v15 = vsub.f32 %v14763_v35, %v6802_v23  ;;  %v6890_v47 = vsub.f32 %v14775_v50, %v6811_v48  ;;  %v16549_v50 = vld [vmem:[#allocation128_spill] sm:$0xff]  ;;  %v16552_v55 = vld [vmem:[#allocation146_spill] sm:$0xff] }
0x12a5   : > { %10673 = vpow2.f32 %v6966_v49  ;;  %v6891_v54 = vsub.f32 %v14777_v42, %v6811_v48 }
0x12a6   : > { %10675 = vpow2.f32 %v6976_v24  ;;  %v6972_v6 = vmul.f32 1.442695, %v6884_v0  ;;  %v6974_v2 = vmul.f32 1.442695, %v6885_v15  ;;  %v6984_v12 = vmul.f32 1.442695, %v6890_v47 }
0x12a7   : > { %10677 = vpow2.f32 %v6978_v31  ;;  %v6986_v5 = vmul.f32 1.442695, %v6891_v54  ;;  %v6808_v22 = vpop.xlane.xlu0 %6807  ;;  %v6817_v56 = vpop.xlane.xlu1 %6816  ;;  %v16553_v31 = vld [vmem:[#allocation125_spill] sm:$0xff] }
0x12a8   : > { %10679 = vpow2.f32 %v6972_v6  ;;  %v6888_v59 = vsub.f32 %v14771_v27, %v6808_v22  ;;  %v6889_v40 = vsub.f32 %v16547_v17, %v6808_v22  ;;  %v6894_v35 = vsub.f32 %v16548_v52, %v6817_v56  ;;  %v16550_v27 = vld [vmem:[#allocation129_spill] sm:$0xff] }
0x12a9   : > { %v10660_v39 = vpop.eup %10659  ;;  %10681 = vpow2.f32 %v6974_v2  ;;  %v6895_v43 = vsub.f32 %v16549_v50, %v6817_v56 }
0x12aa   : > { %v10662_v42 = vpop.eup %10661  ;;  %10683 = vpow2.f32 %v6984_v12  ;;  %v6980_v21 = vmul.f32 1.442695, %v6888_v59  ;;  %v6982_v14 = vmul.f32 1.442695, %v6889_v40  ;;  %v6992_v4 = vmul.f32 1.442695, %v6894_v35 }
0x12ab   : > { %10685 = vpow2.f32 %v6986_v5  ;;  %v6994_v53 = vmul.f32 1.442695, %v6895_v43  ;;  %v6814_v44 = vpop.xlane.xlu0 %6813  ;;  %v6823_v13 = vpop.xlane.xlu1 %6822  ;;  %v7076_v51 = vadd.f32 %v10662_v42, %v10660_v39  ;;  %v16554_v59 = vld [vmem:[#allocation147_spill] sm:$0xff]  ;;  %v16555_v40 = vld [vmem:[#allocation126_spill] sm:$0xff]  ;;  %v16556_v35 = vld [vmem:[#allocation145_spill] sm:$0xff] }
0x12ac   : > { %10687 = vpow2.f32 %v6980_v21  ;;  %v6892_v11 = vsub.f32 %v16550_v27, %v6814_v44  ;;  %v6893_v18 = vsub.f32 %v16551_v19, %v6814_v44  ;;  %v6898_v49 = vsub.f32 %v16552_v55, %v6823_v13  ;;  %v16557_v21 = vld [vmem:[#allocation81_spill] sm:$0xff] }
0x12ad   : > { %v10664_v24 = vpop.eup %10663  ;;  %10689 = vpow2.f32 %v6982_v14  ;;  %v6899_v23 = vsub.f32 %v16553_v31, %v6823_v13  ;;  %7077 = vadd.xlane.f32.xlu0 %v7076_v51 }
0x12ae   : > { %v10666_v48 = vpop.eup %10665  ;;  %10691 = vpow2.f32 %v6992_v4  ;;  %v6988_v0 = vmul.f32 1.442695, %v6892_v11  ;;  %v6990_v15 = vmul.f32 1.442695, %v6893_v18  ;;  %v7000_v47 = vmul.f32 1.442695, %v6898_v49 }
0x12af   : > { %v15015_v54 = vpop.eup %10667  ;;  %10693 = vpow2.f32 %v6994_v53  ;;  %v7002_v6 = vmul.f32 1.442695, %v6899_v23  ;;  %v6820_v2 = vpop.xlane.xlu0 %6819  ;;  %v7079_v5 = vadd.f32 %v10666_v48, %v10664_v24  ;;  %v7157_v22 = vpack.c.bf16 %v10666_v48, %v10662_v42 }
0x12b0   : > { %v6829_v12 = vpop.xlane.xlu1 %6828  ;;  %v10670_v56 = vpop.eup %10669  ;;  %10695 = vpow2.f32 %v6988_v0  ;;  %v6896_v17 = vsub.f32 %v16554_v59, %v6820_v2  ;;  %v6897_v52 = vsub.f32 %v16555_v40, %v6820_v2  ;;  %v7156_v4 = vpack.c.bf16 %v10664_v24, %v10660_v39  ;;  %v9907_v39 = vld [vmem:[%s15715_s8 + $0x78] sm:$0xff]  }
0x12b1   : > { %v6902_v50 = vsub.f32 %v16556_v35, %v6829_v12  ;;  %v15020_v43 = vpop.eup %10671  ;;  %10697 = vpow2.f32 %v6990_v15  ;;  %v6903_v14 = vsub.f32 %v16557_v21, %v6829_v12  ;;  %7080 = vadd.xlane.f32.xlu1 %v7079_v5  ;;  %7308 = vmatprep.mubr.bf16.mxu1 %v7157_v22  ;;  %v7085_v53 = vadd.f32 %v10670_v56, %v15015_v54  ;;  %v16558_v15 = vld [vmem:[#allocation144_spill] sm:$0xff] }
0x12b2   : > { %v10674_v44 = vpop.eup %10673  ;;  %10699 = vpow2.f32 %v7000_v47  ;;  %v6996_v42 = vmul.f32 1.442695, %v6896_v17  ;;  %v6998_v13 = vmul.f32 1.442695, %v6897_v52  ;;  %7309 = vmatmul.mubr.bf16.gmra.mxu1 %v7156_v4  ;;  %9742 = vmatprep.subr.bf16.mxu0 %v9907_v39  ;;  %v16559_v52 = vld [vmem:[#allocation123_spill] sm:$0xff] }
0x12b3   : > { %v7008_v51 = vmul.f32 1.442695, %v6902_v50  ;;  %v15024_v27 = vpop.eup %10675  ;;  %10701 = vpow2.f32 %v7002_v6  ;;  %v7010_v11 = vmul.f32 1.442695, %v6903_v14  ;;  %v6826_v19 = vpop.xlane.xlu0 %6825  ;;  %v7082_v55 = vadd.f32 %v10674_v44, %v15020_v43  ;;  %9743 = vmatpush3.bf16.msra.mxu0 %v9907_v39  ;;  %v16560_v50 = vld [vmem:[#allocation79_spill] sm:$0xff]  ;;  %v9908_v14 = vld [vmem:[%s15715_s8 + $0x70] sm:$0xff]  }
0x12b4   : > { %v6835_v18 = vpop.xlane.xlu1 %6834  ;;  %v7159_v49 = vpack.c.bf16 %v10670_v56, %v10674_v44  ;;  %v10678_v24 = vpop.eup %10677  ;;  %10703 = vpow2.f32 %v6996_v42  ;;  %v6900_v31 = vsub.f32 %v14797_v3, %v6826_v19  ;;  %v6901_v23 = vsub.f32 %v14799_v29, %v6826_v19  ;;  %9744 = vmatprep.subr.bf16.mxu0 %v9908_v14 }
0x12b5   : > { %v6906_v48 = vsub.f32 %v14821_v20, %v6835_v18  ;;  %v15033_v0 = vpop.eup %10679  ;;  %10705 = vpow2.f32 %v6998_v13  ;;  %v6907_v47 = vsub.f32 %v16558_v15, %v6835_v18  ;;  %7083 = vadd.xlane.f32.xlu0 %v7082_v55  ;;  %7086 = vadd.xlane.f32.xlu1 %v7085_v53  ;;  %v7091_v59 = vadd.f32 %v10678_v24, %v15024_v27  ;;  %v16561_v53 = vld [vmem:[#allocation122_spill] sm:$0xff] }
0x12b6   : > { %7316 = vmatprep.mubr.bf16.mxu1 %v7159_v49  ;;  %v10682_v6 = vpop.eup %10681  ;;  %10707 = vpow2.f32 %v7008_v51  ;;  %v7004_v2 = vmul.f32 1.442695, %v6900_v31  ;;  %v7006_v12 = vmul.f32 1.442695, %v6901_v23  ;;  %v7158_v42 = vpack.c.bf16 %v15015_v54, %v15020_v43  ;;  %v9909_v43 = vld [vmem:[%s15715_s8 + $0x68] sm:$0xff]  }
0x12b7   : > { %v7016_v5 = vmul.f32 1.442695, %v6906_v48  ;;  %v15036_v22 = vpop.eup %10683  ;;  %10709 = vpow2.f32 %v7010_v11  ;;  %v7018_v3 = vmul.f32 1.442695, %v6907_v47  ;;  %v6832_v29 = vpop.xlane.xlu0 %6831  ;;  %v7088_v56 = vadd.f32 %v10682_v6, %v15033_v0  ;;  %9745 = vmatpush3.bf16.msra.mxu0 %v9908_v14 }
0x12b8   : > { %v6841_v20 = vpop.xlane.xlu1 %6840  ;;  %v15040_v17 = vpop.eup %10685  ;;  %10711 = vpow2.f32 %v7004_v2  ;;  %v6904_v40 = vsub.f32 %v14813_v36, %v6832_v29  ;;  %v6905_v35 = vsub.f32 %v16559_v52, %v6832_v29  ;;  %v7161_v13 = vpack.c.bf16 %v10678_v24, %v10682_v6  ;;  %9746 = vmatprep.subr.bf16.mxu0 %v9909_v43 }
0x12b9   : > { %v6910_v21 = vsub.f32 %v16560_v50, %v6841_v20  ;;  %v15048_v4 = vpop.eup %10687  ;;  %10713 = vpow2.f32 %v7006_v12  ;;  %v6911_v44 = vsub.f32 %v16561_v53, %v6841_v20  ;;  %7089 = vadd.xlane.f32.xlu0 %v7088_v56  ;;  %7092 = vadd.xlane.f32.xlu1 %v7091_v59  ;;  %v7097_v54 = vadd.f32 %v15040_v17, %v15036_v22  ;;  %v16564_v53 = vld [vmem:[#allocation114_spill] sm:$0xff] }
0x12ba   : > { %v15053_v51 = vpop.eup %10689  ;;  %10715 = vpow2.f32 %v7016_v5  ;;  %v7012_v36 = vmul.f32 1.442695, %v6904_v40  ;;  %v7014_v11 = vmul.f32 1.442695, %v6905_v35  ;;  %7317 = vmatmul.mubr.bf16.gmra.mxu1 %v7158_v42  ;;  %v16562_v40 = vld [vmem:[#allocation120_spill] sm:$0xff]  ;;  %v7160_v42 = vpack.c.bf16 %v15024_v27, %v15033_v0 }
0x12bb   : > { %v7024_v19 = vmul.f32 1.442695, %v6910_v21  ;;  %v15055_v18 = vpop.eup %10691  ;;  %10717 = vpow2.f32 %v7018_v3  ;;  %v7026_v55 = vmul.f32 1.442695, %v6911_v44  ;;  %v6838_v49 = vpop.xlane.xlu0 %6837  ;;  %v7094_v31 = vadd.f32 %v15053_v51, %v15048_v4  ;;  %7324 = vmatprep.mubr.bf16.mxu1 %v7161_v13  ;;  %9747 = vmatpush3.bf16.msra.mxu0 %v9909_v43  ;;  %v16563_v35 = vld [vmem:[#allocation84_spill] sm:$0xff]  ;;  %v9910_v21 = vld [vmem:[%s15715_s8 + $0x60] sm:$0xff]  }
0x12bc   : > { %v6847_v39 = vpop.xlane.xlu1 %6846  ;;  %v15064_v24 = vpop.eup %10693  ;;  %10719 = vpow2.f32 %v7012_v36  ;;  %v6908_v23 = vsub.f32 %v14829_v37, %v6838_v49  ;;  %v6909_v48 = vsub.f32 %v14831_v63, %v6838_v49  ;;  %9748 = vmatprep.subr.bf16.mxu0 %v9910_v21 }
0x12bd   : > { %v6914_v15 = vsub.f32 %v14859_v46, %v6847_v39  ;;  %v15069_v47 = vpop.eup %10695  ;;  %10721 = vpow2.f32 %v7014_v11  ;;  %v6915_v6 = vsub.f32 %v14866_v57, %v6847_v39  ;;  %7095 = vadd.xlane.f32.xlu0 %v7094_v31  ;;  %7098 = vadd.xlane.f32.xlu1 %v7097_v54  ;;  %v7103_v57 = vadd.f32 %v15064_v24, %v15055_v18 }
0x12be   : > { %v15072_v2 = vpop.eup %10697  ;;  %10723 = vpow2.f32 %v7024_v19  ;;  %v7020_v12 = vmul.f32 1.442695, %v6908_v23  ;;  %v7022_v5 = vmul.f32 1.442695, %v6909_v48 }
0x12bf   : > { %v7032_v3 = vmul.f32 1.442695, %v6914_v15  ;;  %v15074_v29 = vpop.eup %10699  ;;  %10725 = vpow2.f32 %v7026_v55  ;;  %v7034_v37 = vmul.f32 1.442695, %v6915_v6  ;;  %v6844_v63 = vpop.xlane.xlu0 %6843  ;;  %v7100_v20 = vadd.f32 %v15072_v2, %v15069_v47  ;;  %9749 = vmatpush3.bf16.msra.mxu0 %v9910_v21 }
0x12c0   : > { %v6853_v46 = vpop.xlane.xlu1 %6852  ;;  %v15080_v56 = vpop.eup %10701  ;;  %10727 = vpow2.f32 %v7020_v12  ;;  %v6912_v59 = vsub.f32 %v14845_v38, %v6844_v63  ;;  %v6913_v52 = vsub.f32 %v16562_v40, %v6844_v63  ;;  %v7163_v38 = vpack.c.bf16 %v15040_v17, %v15053_v51  ;;  %v16565_v51 = vld [vmem:[#allocation117_spill] sm:$0xff] }
0x12c1   : > { %v6918_v50 = vsub.f32 %v16563_v35, %v6853_v46  ;;  %v15088_v14 = vpop.eup %10703  ;;  %10729 = vpow2.f32 %v7022_v5  ;;  %v6919_v44 = vsub.f32 %v16564_v53, %v6853_v46  ;;  %7101 = vadd.xlane.f32.xlu0 %v7100_v20  ;;  %7104 = vadd.xlane.f32.xlu1 %v7103_v57  ;;  %v7109_v54 = vadd.f32 %v15080_v56, %v15074_v29  ;;  %v16568_v57 = vld [vmem:[#allocation113_spill] sm:$0xff] }
0x12c2   : > { %v15095_v13 = vpop.eup %10705  ;;  %10731 = vpow2.f32 %v7032_v3  ;;  %v7028_v36 = vmul.f32 1.442695, %v6912_v59  ;;  %v7030_v11 = vmul.f32 1.442695, %v6913_v52  ;;  %7325 = vmatmul.mubr.bf16.gmra.mxu1 %v7160_v42  ;;  %v16567_v3 = vld [vmem:[#allocation99_spill] sm:$0xff]  ;;  %v16569_v40 = vld [vmem:[#allocation89_spill] sm:$0xff] }
0x12c3   : > { %v7040_v19 = vmul.f32 1.442695, %v6918_v50  ;;  %v15097_v55 = vpop.eup %10707  ;;  %10733 = vpow2.f32 %v7034_v37  ;;  %v7042_v49 = vmul.f32 1.442695, %v6919_v44  ;;  %v6850_v39 = vpop.xlane.xlu0 %6849  ;;  %v7106_v27 = vadd.f32 %v15095_v13, %v15088_v14  ;;  %7332 = vmatprep.mubr.bf16.mxu1 %v7163_v38 }
0x12c4   : > { %v15101_v0 = vpop.eup %10709  ;;  %10735 = vpow2.f32 %v7028_v36  ;;  %v6916_v17 = vsub.f32 %v14872_v41, %v6850_v39  ;;  %v6917_v31 = vsub.f32 %v16565_v51, %v6850_v39  ;;  %v16566_v41 = vld [vmem:[#allocation94_spill] sm:$0xff]  ;;  %v7162_v44 = vpack.c.bf16 %v15036_v22, %v15048_v4 }
0x12c5   : > { %v15107_v43 = vpop.eup %10711  ;;  %10737 = vpow2.f32 %v7030_v11  ;;  %7107 = vadd.xlane.f32.xlu0 %v7106_v27  ;;  %7110 = vadd.xlane.f32.xlu1 %v7109_v54  ;;  %v7115_v35 = vadd.f32 %v15101_v0, %v15097_v55  ;;  %v7165_v11 = vpack.c.bf16 %v15064_v24, %v15072_v2  ;;  %v7164_v54 = vpack.c.bf16 %v15055_v18, %v15069_v47 }
0x12c6   : > { %v15109_v23 = vpop.eup %10713  ;;  %10739 = vpow2.f32 %v7040_v19  ;;  %v7036_v48 = vmul.f32 1.442695, %v6916_v17  ;;  %v7038_v15 = vmul.f32 1.442695, %v6917_v31  ;;  %v6859_v6 = vpop.xlane.xlu1 %6858  ;;  %v7166_v18 = vpack.c.bf16 %v15074_v29, %v15088_v14 }
0x12c7   : > { %v15111_v12 = vpop.eup %10715  ;;  %10741 = vpow2.f32 %v7042_v49  ;;  %v6922_v5 = vsub.f32 %v16566_v41, %v6859_v6  ;;  %v6923_v37 = vsub.f32 %v16567_v3, %v6859_v6  ;;  %v6856_v63 = vpop.xlane.xlu0 %6855  ;;  %v7112_v46 = vadd.f32 %v15109_v23, %v15107_v43 }
0x12c8   : > { %v15117_v20 = vpop.eup %10717  ;;  %10743 = vpow2.f32 %v7036_v48  ;;  %v6920_v59 = vsub.f32 %v16568_v57, %v6856_v63  ;;  %v6921_v52 = vsub.f32 %v16569_v40, %v6856_v63 }
0x12c9   : > { %v15123_v50 = vpop.eup %10719  ;;  %10745 = vpow2.f32 %v7038_v15  ;;  %v7048_v21 = vmul.f32 1.442695, %v6922_v5  ;;  %v7050_v53 = vmul.f32 1.442695, %v6923_v37  ;;  %7113 = vadd.xlane.f32.xlu0 %v7112_v46  ;;  %7116 = vadd.xlane.f32.xlu1 %v7115_v35  ;;  %v7121_v27 = vadd.f32 %v15117_v20, %v15111_v12 }
0x12ca   : > { %v10722_v42 = vpop.eup %10721  ;;  %v7044_v38 = vmul.f32 1.442695, %v6920_v59  ;;  %v7046_v36 = vmul.f32 1.442695, %v6921_v52  ;;  %7333 = vmatmul.mubr.bf16.gmra.mxu1 %v7162_v44  ;;  %v7167_v15 = vpack.c.bf16 %v15080_v56, %v15095_v13  ;;  %v7169_v56 = vpack.c.bf16 %v15101_v0, %v15109_v23 }
0x12cb   : > { %v10724_v19 = vpop.eup %10723  ;;  %10747 = vpow2.f32 %v7048_v21  ;;  %v7118_v49 = vadd.f32 %v10722_v42, %v15123_v50  ;;  %7340 = vmatprep.mubr.bf16.mxu1 %v7165_v11  ;;  %v7168_v21 = vpack.c.bf16 %v15097_v55, %v15107_v43  ;;  %v7170_v29 = vpack.c.bf16 %v15111_v12, %v15123_v50  ;;  %v15145_v12 = vpop.f32.mrf.mxu1 }
0x12cc   : > { %v10726_v39 = vpop.eup %10725  ;;  %10749 = vpow2.f32 %v7050_v53  ;;  %v7171_v53 = vpack.c.bf16 %v15117_v20, %v10722_v42 }
0x12cd   : > { %v10728_v17 = vpop.eup %10727  ;;  %10751 = vpow2.f32 %v7044_v38  ;;  %7119 = vadd.xlane.f32.xlu0 %v7118_v49  ;;  %7122 = vadd.xlane.f32.xlu1 %v7121_v27  ;;  %v7127_v2 = vadd.f32 %v10726_v39, %v10724_v19 }
0x12ce   : > { %v10730_v22 = vpop.eup %10729  ;;  %10753 = vpow2.f32 %v7046_v36  ;;  %v7172_v0 = vpack.c.bf16 %v10724_v19, %v10728_v17 }
0x12cf   : > { %v10732_v4 = vpop.eup %10731  ;;  %v7124_v51 = vadd.f32 %v10730_v22, %v10728_v17  ;;  %v7173_v14 = vpack.c.bf16 %v10726_v39, %v10730_v22 }
0x12d0   : > { %v10734_v24 = vpop.eup %10733 }
0x12d1   : > { %v10736_v31 = vpop.eup %10735  ;;  %7125 = vadd.xlane.f32.xlu0 %v7124_v51  ;;  %7128 = vadd.xlane.f32.xlu1 %v7127_v2  ;;  %v7133_v3 = vadd.f32 %v10734_v24, %v10732_v4 }
0x12d2   : > { %v10738_v48 = vpop.eup %10737  ;;  %7341 = vmatmul.mubr.bf16.gmra.mxu1 %v7164_v54  ;;  %v7174_v44 = vpack.c.bf16 %v10732_v4, %v10736_v31 }
0x12d3   : > { %v10740_v6 = vpop.eup %10739  ;;  %v7130_v41 = vadd.f32 %v10738_v48, %v10736_v31  ;;  %7348 = vmatprep.mubr.bf16.mxu1 %v7167_v15  ;;  %v7175_v23 = vpack.c.bf16 %v10734_v24, %v10738_v48 }
0x12d4   : > { %v10742_v5 = vpop.eup %10741 }
0x12d5   : > { %v10744_v37 = vpop.eup %10743  ;;  %7131 = vadd.xlane.f32.xlu0 %v7130_v41  ;;  %7134 = vadd.xlane.f32.xlu1 %v7133_v3  ;;  %v7139_v59 = vadd.f32 %v10742_v5, %v10740_v6 }
0x12d6   : > { %v10746_v63 = vpop.eup %10745  ;;  %v7176_v36 = vpack.c.bf16 %v10740_v6, %v10744_v37 }
0x12d7   : > { %v7136_v46 = vadd.f32 %v10746_v63, %v10744_v37  ;;  %v7177_v38 = vpack.c.bf16 %v10742_v5, %v10746_v63 }
0x12d8   : > { %v10748_v57 = vpop.eup %10747 }
0x12d9   : > { %v10750_v40 = vpop.eup %10749  ;;  %7137 = vadd.xlane.f32.xlu0 %v7136_v46  ;;  %7140 = vadd.xlane.f32.xlu1 %v7139_v59 }
0x12da   : > { %v10752_v47 = vpop.eup %10751  ;;  %v7145_v13 = vadd.f32 %v10750_v40, %v10748_v57  ;;  %7349 = vmatmul.mubr.bf16.gmra.mxu1 %v7166_v18 }
0x12db   : > { %v10754_v52 = vpop.eup %10753  ;;  %7356 = vmatprep.mubr.bf16.mxu1 %v7169_v56  ;;  %v7178_v43 = vpack.c.bf16 %v10748_v57, %v10752_v47 }
0x12dc   : > { %v7142_v35 = vadd.f32 %v10754_v52, %v10752_v47  ;;  %v7179_v55 = vpack.c.bf16 %v10750_v40, %v10754_v52 }
0x12dd   : > { %7146 = vadd.xlane.f32.xlu1 %v7145_v13 }
0x12de   : > { %7143 = vadd.xlane.f32.xlu0 %v7142_v35 }
0x12e2   : > { %7357 = vmatmul.mubr.bf16.gmra.mxu1 %v7168_v21 }
0x12e3   : > { %7364 = vmatprep.mubr.bf16.mxu1 %v7171_v53 }
0x12e9   : > { %v7054_v20 = vpop.xlane.xlu0 %7053 }
0x12ea   : > { %7365 = vmatmul.mubr.bf16.gmra.mxu1 %v7170_v29  ;;  %10755 = vrcp.f32 %v7054_v20 }
0x12eb   : > { %7372 = vmatprep.mubr.bf16.mxu1 %v7173_v14 }
0x12ed   : > { %v7057_v42 = vpop.xlane.xlu1 %7056 }
0x12ee   : > { %10757 = vrcp.f32 %v7057_v42 }
0x12f1   : > { %v7060_v50 = vpop.xlane.xlu0 %7059 }
0x12f2   : > { %7373 = vmatmul.mubr.bf16.gmra.mxu1 %v7172_v0  ;;  %10759 = vrcp.f32 %v7060_v50 }
0x12f3   : > { %7380 = vmatprep.mubr.bf16.mxu1 %v7175_v23 }
0x12f5   : > { %v7063_v11 = vpop.xlane.xlu1 %7062 }
0x12f6   : > { %10761 = vrcp.f32 %v7063_v11 }
0x12f7   : > { %v10756_v22 = vpop.eup %10755 }
0x12f9   : > { %v7066_v4 = vpop.xlane.xlu0 %7065 }
0x12fa   : > { %7381 = vmatmul.mubr.bf16.gmra.mxu1 %v7174_v44  ;;  %10763 = vrcp.f32 %v7066_v4 }
0x12fb   : > { %7388 = vmatprep.mubr.bf16.mxu1 %v7177_v38  ;;  %v10758_v24 = vpop.eup %10757 }
0x12fd   : > { %v7069_v2 = vpop.xlane.xlu1 %7068 }
0x12fe   : > { %10765 = vrcp.f32 %v7069_v2 }
0x12ff   : > { %v10760_v37 = vpop.eup %10759 }
0x1301   : > { %v7072_v63 = vpop.xlane.xlu0 %7071 }
0x1302   : > { %7389 = vmatmul.mubr.bf16.gmra.mxu1 %v7176_v36  ;;  %10767 = vrcp.f32 %v7072_v63 }
0x1303   : > { %7396 = vmatprep.mubr.bf16.mxu1 %v7179_v55  ;;  %v10762_v57 = vpop.eup %10761 }
0x1305   : > { %v7075_v59 = vpop.xlane.xlu1 %7074 }
0x1306   : > { %10769 = vrcp.f32 %v7075_v59 }
0x1307   : > { %v10764_v53 = vpop.eup %10763 }
0x130a   : > { %7397 = vmatmul.mubr.bf16.gmra.mxu1 %v7178_v43 }
0x130b   : > { %v10766_v14 = vpop.eup %10765 }
0x130f   : > { %v10768_v42 = vpop.eup %10767 }
0x1313   : > { %v10770_v11 = vpop.eup %10769 }
0x132e   : > { %v9396_v19 = vpop.f32.mrf.mxu1 }
0x1330   : > { %v9397_v49 = vpop.f32.mrf.mxu1 }
0x1331   : > { %v9398_v27 = vadd.f32 %v9397_v49, %v9396_v19 }
0x1332   : > { %v9399_v39 = vpop.f32.mrf.mxu1 }
0x1333   : > { %v7437_v54 = vmul.f32 %v10756_v22, %v9398_v27 }
0x1334   : > { %v9400_v17 = vpop.f32.mrf.mxu1 }
0x1335   : > { %v9401_v51 = vadd.f32 %v9400_v17, %v9399_v39 }
0x1336   : > { %v9402_v31 = vpop.f32.mrf.mxu1  ;;  %v7078_v27 = vpop.xlane.xlu0 %7077 }
0x1337   : > { %v7438_v48 = vmul.f32 %v10758_v24, %v9401_v51  ;;  %10771 = vrcp.f32 %v7078_v27 }
0x1338   : > { %v9403_v15 = vpop.f32.mrf.mxu1 }
0x1339   : > { %v7469_v6 = vpack.c.bf16 %v7438_v48, %v7437_v54  ;;  %v9404_v5 = vadd.f32 %v9403_v15, %v9402_v31 }
0x133a   : > { %v9405_v41 = vpop.f32.mrf.mxu1  ;;  %v7081_v17 = vpop.xlane.xlu1 %7080 }
0x133b   : > { %9750 = vmatprep.mubr.msk.bf16.mxu0 %vm505_vm0, %v7469_v6  ;;  %v7439_v18 = vmul.f32 %v10760_v37, %v9404_v5  ;;  %10773 = vrcp.f32 %v7081_v17 }
0x133c   : > { %v9406_v3 = vpop.f32.mrf.mxu1 }
0x133d   : > { %v9407_v46 = vadd.f32 %v9406_v3, %v9405_v41 }
0x133e   : > { %v9408_v40 = vpop.f32.mrf.mxu1  ;;  %v7084_v22 = vpop.xlane.xlu0 %7083 }
0x133f   : > { %v7440_v47 = vmul.f32 %v10762_v57, %v9407_v46  ;;  %v7087_v4 = vpop.xlane.xlu1 %7086  ;;  %10775 = vrcp.f32 %v7084_v22 }
0x1340   : > { %v9409_v56 = vpop.f32.mrf.mxu1  ;;  %10777 = vrcp.f32 %v7087_v4 }
0x1341   : > { %v7470_v13 = vpack.c.bf16 %v7440_v47, %v7439_v18  ;;  %v9410_v35 = vadd.f32 %v9409_v56, %v9408_v40 }
0x1342   : > { %v9411_v52 = vpop.f32.mrf.mxu1  ;;  %v7090_v15 = vpop.xlane.xlu0 %7089 }
0x1343   : > { %9751 = vmatmul.mubr.msk.bf16.vlgmr.msra.gmra.mxu0 %vm505_vm0, %v7470_v13  ;;  %v7441_v23 = vmul.f32 %v10764_v53, %v9410_v35  ;;  %v7093_v5 = vpop.xlane.xlu1 %7092  ;;  %10779 = vrcp.f32 %v7090_v15 }
0x1344   : > { %v9412_v21 = vpop.f32.mrf.mxu1  ;;  %v10772_v48 = vpop.eup %10771  ;;  %10781 = vrcp.f32 %v7093_v5 }
0x1345   : > { %v9413_v29 = vadd.f32 %v9412_v21, %v9411_v52 }
0x1346   : > { %v9414_v0 = vpop.f32.mrf.mxu1  ;;  %v7096_v56 = vpop.xlane.xlu0 %7095 }
0x1347   : > { %v7442_v44 = vmul.f32 %v10766_v14, %v9413_v29  ;;  %v7099_v35 = vpop.xlane.xlu1 %7098  ;;  %10783 = vrcp.f32 %v7096_v56 }
0x1348   : > { %v9415_v38 = vpop.f32.mrf.mxu1  ;;  %v10774_v41 = vpop.eup %10773  ;;  %10785 = vrcp.f32 %v7099_v35 }
0x1349   : > { %v7471_v36 = vpack.c.bf16 %v7442_v44, %v7441_v23  ;;  %v9416_v43 = vadd.f32 %v9415_v38, %v9414_v0 }
0x134a   : > { %v9417_v55 = vpop.f32.mrf.mxu1 }
0x134b   : > { %9754 = vmatprep.mubr.msk.bf16.mxu0 %vm505_vm0, %v7471_v36  ;;  %v7443_v19 = vmul.f32 %v10768_v42, %v9416_v43  ;;  %v7105_v42 = vpop.xlane.xlu1 %7104 }
0x134c   : > { %v9418_v20 = vpop.f32.mrf.mxu1  ;;  %v10776_v47 = vpop.eup %10775 }
0x134d   : > { %v9419_v50 = vadd.f32 %v9418_v20, %v9417_v55  ;;  %v10778_v52 = vpop.eup %10777  ;;  %v7102_v55 = vpop.xlane.xlu0 %7101 }
0x134e   : > { %10787 = vrcp.f32 %v7102_v55 }
0x134f   : > { %v7444_v49 = vmul.f32 %v10770_v11, %v9419_v50  ;;  %10789 = vrcp.f32 %v7105_v42 }
0x1350   : > { %v10780_v36 = vpop.eup %10779 }
0x1351   : > { %v7472_v39 = vpack.c.bf16 %v7444_v49, %v7443_v19  ;;  %v10782_v20 = vpop.eup %10781 }
0x1353   : > { %9755 = vmatmul.mubr.msk.bf16.gmra.mxu0 %vm505_vm0, %v7472_v39 }
0x1354   : > { %v10784_v4 = vpop.eup %10783 }
0x1372   : > { %v9420_v51 = vpop.f32.mrf.mxu1 }
0x1374   : > { %v9421_v24 = vpop.f32.mrf.mxu1 }
0x1375   : > { %v9422_v31 = vadd.f32 %v9421_v24, %v9420_v51  ;;  %v7108_v51 = vpop.xlane.xlu0 %7107 }
0x1376   : > { %v9423_v2 = vpop.f32.mrf.mxu1  ;;  %10791 = vrcp.f32 %v7108_v51 }
0x1377   : > { %v7445_v37 = vmul.f32 %v10772_v48, %v9422_v31  ;;  %v7111_v31 = vpop.xlane.xlu1 %7110 }
0x1378   : > { %v9424_v54 = vpop.f32.mrf.mxu1  ;;  %10793 = vrcp.f32 %v7111_v31 }
0x1379   : > { %v9425_v6 = vadd.f32 %v9424_v54, %v9423_v2  ;;  %v10786_v2 = vpop.eup %10785 }
0x137a   : > { %v9426_v3 = vpop.f32.mrf.mxu1 }
0x137b   : > { %v7446_v63 = vmul.f32 %v10774_v41, %v9425_v6 }
0x137c   : > { %v9427_v46 = vpop.f32.mrf.mxu1 }
0x137d   : > { %v7473_v57 = vpack.c.bf16 %v7446_v63, %v7445_v37  ;;  %v9428_v40 = vadd.f32 %v9427_v46, %v9426_v3  ;;  %v10788_v63 = vpop.eup %10787  ;;  %v7114_v46 = vpop.xlane.xlu0 %7113 }
0x137e   : > { %v9429_v59 = vpop.f32.mrf.mxu1  ;;  %10795 = vrcp.f32 %v7114_v46 }
0x137f   : > { %9758 = vmatprep.mubr.msk.bf16.mxu0 %vm505_vm0, %v7473_v57  ;;  %v7447_v53 = vmul.f32 %v10776_v47, %v9428_v40  ;;  %v7117_v40 = vpop.xlane.xlu1 %7116 }
0x1380   : > { %v9430_v18 = vpop.f32.mrf.mxu1  ;;  %10797 = vrcp.f32 %v7117_v40 }
0x1381   : > { %v9431_v13 = vadd.f32 %v9430_v18, %v9429_v59  ;;  %v10790_v59 = vpop.eup %10789 }
0x1382   : > { %v9432_v21 = vpop.f32.mrf.mxu1 }
0x1383   : > { %v7448_v29 = vmul.f32 %v10778_v52, %v9431_v13 }
0x1384   : > { %v9433_v14 = vpop.f32.mrf.mxu1 }
0x1385   : > { %v7474_v0 = vpack.c.bf16 %v7448_v29, %v7447_v53  ;;  %v9434_v44 = vadd.f32 %v9433_v14, %v9432_v21  ;;  %v10792_v29 = vpop.eup %10791  ;;  %v7120_v14 = vpop.xlane.xlu0 %7119 }
0x1386   : > { %v9435_v23 = vpop.f32.mrf.mxu1  ;;  %10799 = vrcp.f32 %v7120_v14 }
0x1387   : > { %9759 = vmatmul.mubr.msk.bf16.gmra.mxu0 %vm505_vm0, %v7474_v0  ;;  %v7449_v11 = vmul.f32 %v10780_v36, %v9434_v44  ;;  %v7123_v44 = vpop.xlane.xlu1 %7122 }
0x1388   : > { %v9436_v38 = vpop.f32.mrf.mxu1  ;;  %10801 = vrcp.f32 %v7123_v44 }
0x1389   : > { %v9437_v43 = vadd.f32 %v9436_v38, %v9435_v23  ;;  %v10794_v23 = vpop.eup %10793 }
0x138a   : > { %v9438_v50 = vpop.f32.mrf.mxu1 }
0x138b   : > { %v7450_v19 = vmul.f32 %v10782_v20, %v9437_v43 }
0x138c   : > { %v9439_v49 = vpop.f32.mrf.mxu1 }
0x138d   : > { %v7475_v39 = vpack.c.bf16 %v7450_v19, %v7449_v11  ;;  %v9440_v17 = vadd.f32 %v9439_v49, %v9438_v50  ;;  %v10796_v19 = vpop.eup %10795  ;;  %v7126_v49 = vpop.xlane.xlu0 %7125 }
0x138e   : > { %v9441_v27 = vpop.f32.mrf.mxu1  ;;  %10803 = vrcp.f32 %v7126_v49 }
0x138f   : > { %9762 = vmatprep.mubr.msk.bf16.mxu0 %vm505_vm0, %v7475_v39  ;;  %v7451_v48 = vmul.f32 %v10784_v4, %v9440_v17  ;;  %v7129_v17 = vpop.xlane.xlu1 %7128 }
0x1390   : > { %v9442_v22 = vpop.f32.mrf.mxu1  ;;  %10805 = vrcp.f32 %v7129_v17 }
0x1391   : > { %v9443_v24 = vadd.f32 %v9442_v22, %v9441_v27  ;;  %v10798_v27 = vpop.eup %10797 }
0x1392   : > { %v9444_v54 = vpop.f32.mrf.mxu1 }
0x1393   : > { %v7452_v15 = vmul.f32 %v10786_v2, %v9443_v24 }
0x1394   : > { %v9445_v6 = vpop.f32.mrf.mxu1 }
0x1395   : > { %v7476_v41 = vpack.c.bf16 %v7452_v15, %v7451_v48  ;;  %v9446_v3 = vadd.f32 %v9445_v6, %v9444_v54  ;;  %v10800_v15 = vpop.eup %10799  ;;  %v7132_v6 = vpop.xlane.xlu0 %7131 }
0x1396   : > { %v9447_v5 = vpop.f32.mrf.mxu1  ;;  %10807 = vrcp.f32 %v7132_v6 }
0x1397   : > { %9763 = vmatmul.mubr.msk.bf16.gmra.mxu0 %vm505_vm0, %v7476_v41  ;;  %v7453_v47 = vmul.f32 %v10788_v63, %v9446_v3  ;;  %v7135_v3 = vpop.xlane.xlu1 %7134 }
0x1398   : > { %v9448_v37 = vpop.f32.mrf.mxu1  ;;  %10809 = vrcp.f32 %v7135_v3 }
0x1399   : > { %v9449_v57 = vadd.f32 %v9448_v37, %v9447_v5  ;;  %v10802_v5 = vpop.eup %10801 }
0x139a   : > { %v9450_v18 = vpop.f32.mrf.mxu1 }
0x139b   : > { %v7454_v56 = vmul.f32 %v10790_v59, %v9449_v57 }
0x139c   : > { %v9451_v13 = vpop.f32.mrf.mxu1 }
0x139d   : > { %v7477_v52 = vpack.c.bf16 %v7454_v56, %v7453_v47  ;;  %v9452_v21 = vadd.f32 %v9451_v13, %v9450_v18  ;;  %v10804_v56 = vpop.eup %10803  ;;  %v7138_v13 = vpop.xlane.xlu0 %7137 }
0x139e   : > { %v9453_v35 = vpop.f32.mrf.mxu1  ;;  %10811 = vrcp.f32 %v7138_v13 }
0x139f   : > { %9766 = vmatprep.mubr.msk.bf16.mxu0 %vm505_vm0, %v7477_v52  ;;  %v7455_v36 = vmul.f32 %v10792_v29, %v9452_v21  ;;  %v7141_v21 = vpop.xlane.xlu1 %7140 }
0x13a0   : > { %v9454_v53 = vpop.f32.mrf.mxu1  ;;  %10813 = vrcp.f32 %v7141_v21 }
0x13a1   : > { %v9455_v0 = vadd.f32 %v9454_v53, %v9453_v35  ;;  %v10806_v35 = vpop.eup %10805 }
0x13a2   : > { %v9456_v38 = vpop.f32.mrf.mxu1 }
0x13a3   : > { %v7456_v55 = vmul.f32 %v10794_v23, %v9455_v0 }
0x13a4   : > { %v9457_v43 = vpop.f32.mrf.mxu1 }
0x13a5   : > { %v7478_v20 = vpack.c.bf16 %v7456_v55, %v7455_v36  ;;  %v9458_v50 = vadd.f32 %v9457_v43, %v9456_v38  ;;  %v10808_v55 = vpop.eup %10807  ;;  %v7144_v43 = vpop.xlane.xlu0 %7143 }
0x13a6   : > { %v9459_v42 = vpop.f32.mrf.mxu1  ;;  %10815 = vrcp.f32 %v7144_v43  ;;  %v16576_v43 = vld [vmem:[#allocation119_spill] sm:$0xff] }
0x13a7   : > { %9767 = vmatmul.mubr.msk.bf16.gmra.mxu0 %vm505_vm0, %v7478_v20  ;;  %v7457_v4 = vmul.f32 %v10796_v19, %v9458_v50  ;;  %v7147_v50 = vpop.xlane.xlu1 %7146 }
0x13a8   : > { %v9460_v11 = vpop.f32.mrf.mxu1  ;;  %10817 = vrcp.f32 %v7147_v50 }
0x13a9   : > { %v9461_v39 = vadd.f32 %v9460_v11, %v9459_v42  ;;  %v10810_v42 = vpop.eup %10809 }
0x13aa   : > { %v9462_v22 = vpop.f32.mrf.mxu1 }
0x13ab   : > { %v7458_v51 = vmul.f32 %v10798_v27, %v9461_v39 }
0x13ac   : > { %v9463_v24 = vpop.f32.mrf.mxu1 }
0x13ad   : > { %v7479_v2 = vpack.c.bf16 %v7458_v51, %v7457_v4  ;;  %v9464_v54 = vadd.f32 %v9463_v24, %v9462_v22  ;;  %v10812_v51 = vpop.eup %10811 }
0x13ae   : > { %v9465_v31 = vpop.f32.mrf.mxu1 }
0x13af   : > { %9770 = vmatprep.mubr.msk.bf16.mxu0 %vm505_vm0, %v7479_v2  ;;  %v7459_v63 = vmul.f32 %v10800_v15, %v9464_v54  ;;  %v10814_v2 = vpop.eup %10813 }
0x13b0   : > { %v9466_v48 = vpop.f32.mrf.mxu1 }
0x13b1   : > { %v9467_v41 = vadd.f32 %v9466_v48, %v9465_v31 }
0x13b2   : > { %v9468_v37 = vpop.f32.mrf.mxu1 }
0x13b3   : > { %v7460_v46 = vmul.f32 %v10802_v5, %v9467_v41 }
0x13b4   : > { %v9469_v57 = vpop.f32.mrf.mxu1 }
0x13b5   : > { %v7480_v59 = vpack.c.bf16 %v7460_v46, %v7459_v63  ;;  %v9470_v18 = vadd.f32 %v9469_v57, %v9468_v37  ;;  %v10816_v37 = vpop.eup %10815 }
0x13b6   : > { %v9471_v40 = vpop.f32.mrf.mxu1  ;;  %v10818_v46 = vpop.eup %10817 }
0x13b7   : > { %9771 = vmatmul.mubr.msk.bf16.gmra.mxu0 %vm505_vm0, %v7480_v59  ;;  %v7461_v29 = vmul.f32 %v10804_v56, %v9470_v18 }
0x13b8   : > { %v9472_v47 = vpop.f32.mrf.mxu1 }
0x13b9   : > { %v9473_v52 = vadd.f32 %v9472_v47, %v9471_v40  ;;  %v16570_v47 = vld [vmem:[#allocation143_spill] sm:$0xff] }
0x13ba   : > { %v9474_v53 = vpop.f32.mrf.mxu1 }
0x13bb   : > { %v7462_v14 = vmul.f32 %v10806_v35, %v9473_v52  ;;  %v15167_v52 = vld [vmem:[%s15710_s3 + $0x4] ss:$0 sm:$0xff] }
0x13bc   : > { %v9475_v0 = vpop.f32.mrf.mxu1  ;;  %v16571_v35 = vld [vmem:[#allocation166_spill] sm:$0xff] }
0x13bd   : > { %v7481_v23 = vpack.c.bf16 %v7462_v14, %v7461_v29  ;;  %v9476_v38 = vadd.f32 %v9475_v0, %v9474_v53  ;;  %v3656_v21 = vadd.f32 %v15167_v52, %v16571_v35  ;;  %v16572_v53 = vld [vmem:[#allocation5_spill] sm:$0xff] }
0x13be   : > { %v9477_v44 = vpop.f32.mrf.mxu1  ;;  %v16573_v14 = vld [vmem:[#allocation141_spill] sm:$0xff] }
0x13bf   : > { %9774 = vmatprep.mubr.msk.bf16.mxu0 %vm505_vm0, %v7481_v23  ;;  %v7463_v19 = vmul.f32 %v10808_v55, %v9476_v38  ;;  %v16587_v35 = vld [vmem:[#allocation137_spill] sm:$0xff] }
0x13c0   : > { %v9478_v36 = vpop.f32.mrf.mxu1 }
0x13c1   : > { %v9479_v20 = vadd.f32 %v9478_v36, %v9477_v44  ;;  %v16574_v44 = vld [vmem:[#allocation35_spill] sm:$0xff]  ;;  %v16575_v36 = vld [vmem:[#allocation2_spill] sm:$0xff] }
0x13c2   : > { %v9480_v11 = vpop.f32.mrf.mxu1  ;;  %v5128_v38 = vadd.f32 %v16574_v44, %v3656_v21  ;;  %v16589_v44 = vld [vmem:[#allocation7_spill] sm:$0xff] }
0x13c3   : > { %v7464_v49 = vmul.f32 %v10810_v42, %v9479_v20 }
0x13c4   : > { %v9481_v39 = vpop.f32.mrf.mxu1 }
0x13c5   : > { %v7482_v27 = vpack.c.bf16 %v7464_v49, %v7463_v19  ;;  %v9482_v22 = vadd.f32 %v9481_v39, %v9480_v11  ;;  %v16577_v11 = vld [vmem:[#allocation140_spill] sm:$0xff] }
0x13c6   : > { %v9483_v17 = vpop.f32.mrf.mxu1  ;;  %v6348_v19 = vadd.f32 %v16577_v11, %v5128_v38  ;;  %v16578_v49 = vld [vmem:[#allocation4_spill] sm:$0xff] }
0x13c7   : > { %9775 = vmatmul.mubr.msk.bf16.gmra.mxu0 %vm505_vm0, %v7482_v27  ;;  %v7465_v54 = vmul.f32 %v10812_v51, %v9482_v22  ;;  %v16579_v22 = vld [vmem:[#allocation3_spill] sm:$0xff] }
0x13c8   : > { %v9484_v4 = vpop.f32.mrf.mxu1 }
0x13c9   : > { %v9485_v24 = vadd.f32 %v9484_v4, %v9483_v17 }
0x13ca   : > { %v9486_v31 = vpop.f32.mrf.mxu1 }
0x13cb   : > { %v7466_v48 = vmul.f32 %v10814_v2, %v9485_v24  ;;  %v16580_v2 = vld [vmem:[#allocation86_spill] sm:$0xff] }
0x13cc   : > { %v9487_v15 = vpop.f32.mrf.mxu1 }
0x13cd   : > { %v7483_v6 = vpack.c.bf16 %v7466_v48, %v7465_v54  ;;  %v9488_v5 = vadd.f32 %v9487_v15, %v9486_v31  ;;  %v16581_v15 = vld [vmem:[#allocation170_spill] sm:$0xff] }
0x13ce   : > { %v9489_v41 = vpop.f32.mrf.mxu1 }
0x13cf   : > { %9778 = vmatprep.mubr.msk.bf16.mxu0 %vm505_vm0, %v7483_v6  ;;  %v7467_v57 = vmul.f32 %v10816_v37, %v9488_v5  ;;  %v3672_v6 = vadd.f32 %v15167_v52, %v16581_v15  ;;  %v16596_v15 = vld [vmem:[#allocation101_spill] sm:$0xff] }
0x13d0   : > { %v9490_v3 = vpop.f32.mrf.mxu1 }
0x13d1   : > { %v9491_v63 = vadd.f32 %v9490_v3, %v9489_v41  ;;  %v16582_v41 = vld [vmem:[#allocation9_spill] sm:$0xff]  ;;  %v16583_v3 = vld [vmem:[#allocation138_spill] sm:$0xff] }
0x13d3   : > { %v7468_v59 = vmul.f32 %v10818_v46, %v9491_v63  ;;  %v16584_v46 = vld [vmem:[#allocation55_spill] sm:$0xff] }
0x13d5   : > { %v7484_v40 = vpack.c.bf16 %v7468_v59, %v7467_v57  ;;  %v5132_v57 = vadd.f32 %v16584_v46, %v3672_v6  ;;  %v16585_v59 = vld [vmem:[#allocation6_spill] sm:$0xff]  ;;  %v16598_v46 = vld [vmem:[#allocation12_spill] sm:$0xff] }
0x13d7   : > { %9779 = vmatmul.mubr.msk.bf16.gmra.mxu0 %vm505_vm0, %v7484_v40  ;;  %v6352_v21 = vadd.f32 %v16587_v35, %v5132_v57 }
0x1403   : > { %v9752_v18 = vpop.f32.mrf.mxu0 }
0x1404   : > { %v7729_v56 = vadd.f32 %v9752_v18, %v16570_v47  ;;  %v16586_v18 = vld [vmem:[#allocation116_spill] sm:$0xff] }
0x1405   : > { %v7600_v13 = vpop.f32.mrf.mxu0 }
0x1406   : > { %v15172_v29 = vadd.f32 %v7729_v56, %v16572_v53  ;;  %v7727_v0 = vadd.f32 %v7600_v13, %v16573_v14  ;;  %v16588_v53 = vld [vmem:[#allocation8_spill] sm:$0xff] }
0x1407   : > { %v9753_v23 = vpop.f32.mrf.mxu0 }
0x1408   : > { %v15177_v55 = vadd.f32 %v7727_v0, %v16575_v36  ;;  %v7730_v20 = vadd.f32 %v9753_v23, %v16576_v43  ;;  %v7797_v42 = vsel %vm505_vm0, %v15172_v29, 0.0 }
0x1409   : > { %7798 = vadd.xlane.f32.xlu0 %v7797_v42  ;;  %v7603_v50 = vpop.f32.mrf.mxu0  ;;  %v16590_v42 = vld [vmem:[#allocation91_spill] sm:$0xff] }
0x140a   : > { %v15184_v39 = vadd.f32 %v7730_v20, %v16578_v49  ;;  %v7728_v27 = vadd.f32 %v7603_v50, %v6348_v19  ;;  %v7791_v17 = vsel %vm505_vm0, %v15177_v55, 0.0  ;;  %v16591_v19 = vld [vmem:[#allocation174_spill] sm:$0xff] }
0x140b   : > { %v3688_v49 = vadd.f32 %v15167_v52, %v16591_v19 }
0x140c   : > { %v15189_v4 = vadd.f32 %v7728_v27, %v16579_v22  ;;  %v7800_v51 = vsel %vm505_vm0, %v15184_v39, 0.0  ;;  %v16592_v27 = vld [vmem:[#allocation13_spill] sm:$0xff]  ;;  %v16593_v22 = vld [vmem:[#allocation96_spill] sm:$0xff] }
0x140d   : > { %7792 = vadd.xlane.f32.xlu0 %v7791_v17 }
0x140e   : > { %v7794_v54 = vsel %vm505_vm0, %v15189_v4, 0.0 }
0x1411   : > { %7801 = vadd.xlane.f32.xlu0 %v7800_v51 }
0x1413   : > { %v9756_v24 = vpop.f32.mrf.mxu0 }
0x1414   : > { %v7733_v31 = vadd.f32 %v9756_v24, %v16580_v2  ;;  %v16594_v2 = vld [vmem:[#allocation58_spill] sm:$0xff] }
0x1415   : > { %7795 = vadd.xlane.f32.xlu0 %v7794_v54  ;;  %v7616_v48 = vpop.f32.mrf.mxu0  ;;  %v16595_v54 = vld [vmem:[#allocation11_spill] sm:$0xff] }
0x1416   : > { %v15199_v5 = vadd.f32 %v7733_v31, %v16582_v41  ;;  %v7731_v37 = vadd.f32 %v7616_v48, %v16583_v3  ;;  %v5136_v31 = vadd.f32 %v16594_v2, %v3688_v49  ;;  %v16603_v49 = vld [vmem:[#allocation15_spill] sm:$0xff] }
0x1417   : > { %v9757_v63 = vpop.f32.mrf.mxu0 }
0x1418   : > { %v15204_v40 = vadd.f32 %v7731_v37, %v16585_v59  ;;  %v7734_v47 = vadd.f32 %v9757_v63, %v16586_v18  ;;  %v7809_v56 = vsel %vm505_vm0, %v15199_v5, 0.0  ;;  %v16597_v37 = vld [vmem:[#allocation106_spill] sm:$0xff] }
0x1419   : > { %7810 = vadd.xlane.f32.xlu0 %v7809_v56  ;;  %v7619_v13 = vpop.f32.mrf.mxu0  ;;  %v6356_v63 = vadd.f32 %v16597_v37, %v5136_v31  ;;  %v16605_v31 = vld [vmem:[#allocation14_spill] sm:$0xff] }
0x141a   : > { %v15211_v14 = vadd.f32 %v7734_v47, %v16588_v53  ;;  %v7732_v0 = vadd.f32 %v7619_v13, %v6352_v21  ;;  %v7803_v23 = vsel %vm505_vm0, %v15204_v40, 0.0  ;;  %v16599_v47 = vld [vmem:[#allocation10_spill] sm:$0xff] }
0x141b   : > { %v16600_v21 = vld [vmem:[#allocation178_spill] sm:$0xff] }
0x141c   : > { %v15216_v38 = vadd.f32 %v7732_v0, %v16589_v44  ;;  %v7812_v36 = vsel %vm505_vm0, %v15211_v14, 0.0  ;;  %v3704_v53 = vadd.f32 %v15167_v52, %v16600_v21  ;;  %v16609_v21 = vld [vmem:[#allocation134_spill] sm:$0xff] }
0x141d   : > { %7804 = vadd.xlane.f32.xlu0 %v7803_v23 }
0x141e   : > { %v7806_v43 = vsel %vm505_vm0, %v15216_v38, 0.0 }
0x1421   : > { %7813 = vadd.xlane.f32.xlu0 %v7812_v36  ;;  %v16601_v36 = vld [vmem:[#allocation161_spill] sm:$0xff] }
0x1425   : > { %7807 = vadd.xlane.f32.xlu0 %v7806_v43  ;;  %v5140_v43 = vadd.f32 %v16601_v36, %v3704_v53 }
0x1427   : > { %v6360_v19 = vadd.f32 %v14935_v16, %v5140_v43 }
0x1447   : > { %v9760_v20 = vpop.f32.mrf.mxu0 }
0x1448   : > { %v7737_v50 = vadd.f32 %v9760_v20, %v16590_v42  ;;  %v16602_v20 = vld [vmem:[#allocation17_spill] sm:$0xff] }
0x1449   : > { %v7632_v11 = vpop.f32.mrf.mxu0 }
0x144a   : > { %v15226_v17 = vadd.f32 %v7737_v50, %v16592_v27  ;;  %v7735_v51 = vadd.f32 %v7632_v11, %v16593_v22 }
0x144b   : > { %v9761_v24 = vpop.f32.mrf.mxu0 }
0x144c   : > { %v15231_v48 = vadd.f32 %v7735_v51, %v16595_v54  ;;  %v7738_v6 = vadd.f32 %v9761_v24, %v16596_v15  ;;  %v7821_v41 = vsel %vm505_vm0, %v15226_v17, 0.0  ;;  %v16604_v24 = vld [vmem:[#allocation104_spill] sm:$0xff] }
0x144d   : > { %7822 = vadd.xlane.f32.xlu0 %v7821_v41  ;;  %v7635_v3 = vpop.f32.mrf.mxu0  ;;  %v16606_v15 = vld [vmem:[#allocation16_spill] sm:$0xff] }
0x144e   : > { %v15238_v57 = vadd.f32 %v7738_v6, %v16598_v46  ;;  %v7736_v59 = vadd.f32 %v7635_v3, %v6356_v63  ;;  %v7815_v18 = vsel %vm505_vm0, %v15231_v48, 0.0  ;;  %v16607_v46 = vld [vmem:[#allocation182_spill] sm:$0xff] }
0x1450   : > { %v15243_v56 = vadd.f32 %v7736_v59, %v16599_v47  ;;  %v7824_v13 = vsel %vm505_vm0, %v15238_v57, 0.0  ;;  %v3720_v59 = vadd.f32 %v15167_v52, %v16607_v46 }
0x1451   : > { %7816 = vadd.xlane.f32.xlu0 %v7815_v18  ;;  %v16608_v18 = vld [vmem:[#allocation21_spill] sm:$0xff] }
0x1452   : > { %v7818_v23 = vsel %vm505_vm0, %v15243_v56, 0.0  ;;  %v5144_v53 = vadd.f32 %v16609_v21, %v3720_v59 }
0x1454   : > { %v6364_v43 = vadd.f32 %v14954_v32, %v5144_v53  ;;  %v16618_v53 = vld [vmem:[#allocation22_spill] sm:$0xff] }
0x1455   : > { %7825 = vadd.xlane.f32.xlu0 %v7824_v13 }
0x1457   : > { %v9764_v35 = vpop.f32.mrf.mxu0 }
0x1458   : > { %v7741_v0 = vadd.f32 %v9764_v35, %v14925_v9 }
0x1459   : > { %7819 = vadd.xlane.f32.xlu0 %v7818_v23  ;;  %v7648_v44 = vpop.f32.mrf.mxu0 }
0x145a   : > { %v15254_v42 = vadd.f32 %v7741_v0, %v16602_v20  ;;  %v7739_v50 = vadd.f32 %v7648_v44, %v14928_v58  ;;  %v16610_v0 = vld [vmem:[#allocation19_spill] sm:$0xff]  ;;  %v16611_v20 = vld [vmem:[#allocation20_spill] sm:$0xff] }
0x145b   : > { %v9765_v11 = vpop.f32.mrf.mxu0 }
0x145c   : > { %v15259_v27 = vadd.f32 %v7739_v50, %v16603_v49  ;;  %v7833_v9 = vsel %vm505_vm0, %v15254_v42, 0.0  ;;  %v7742_v2 = vadd.f32 %v9765_v11, %v16604_v24  ;;  %v16613_v24 = vld [vmem:[#allocation78_spill] sm:$0xff] }
0x145d   : > { %7834 = vadd.xlane.f32.xlu0 %v7833_v9  ;;  %v7651_v22 = vpop.f32.mrf.mxu0 }
0x145e   : > { %v7740_v51 = vadd.f32 %v7651_v22, %v6360_v19  ;;  %v7827_v58 = vsel %vm505_vm0, %v15259_v27, 0.0  ;;  %v15270_v16 = vadd.f32 %v7742_v2, %v16606_v15  ;;  %v16612_v19 = vld [vmem:[#allocation18_spill] sm:$0xff]  ;;  %v3736_v2 = vadd.f32 %v15167_v52, %v16613_v24 }
0x1460   : > { %v15265_v54 = vadd.f32 %v7740_v51, %v16605_v31  ;;  %v7836_v37 = vsel %vm505_vm0, %v15270_v16, 0.0  ;;  %v16614_v31 = vld [vmem:[#allocation25_spill] sm:$0xff] }
0x1461   : > { %7828 = vadd.xlane.f32.xlu0 %v7827_v58 }
0x1462   : > { %v7830_v6 = vsel %vm505_vm0, %v15265_v54, 0.0 }
0x1465   : > { %7831 = vadd.xlane.f32.xlu0 %v7830_v6 }
0x1467   : > { %v9768_v41 = vpop.f32.mrf.mxu0 }
0x1468   : > { %v7745_v3 = vadd.f32 %v9768_v41, %v14940_v7  ;;  %v16615_v41 = vld [vmem:[#allocation151_spill] sm:$0xff] }
0x1469   : > { %7837 = vadd.xlane.f32.xlu0 %v7836_v37  ;;  %v7664_v63 = vpop.f32.mrf.mxu0  ;;  %v16616_v37 = vld [vmem:[#allocation23_spill] sm:$0xff] }
0x146a   : > { %v15280_v47 = vadd.f32 %v7745_v3, %v16608_v18  ;;  %v7743_v13 = vadd.f32 %v7664_v63, %v14945_v26  ;;  %v5148_v3 = vadd.f32 %v16615_v41, %v3736_v2 }
0x146b   : > { %v9769_v35 = vpop.f32.mrf.mxu0 }
0x146c   : > { %v15285_v23 = vadd.f32 %v7743_v13, %v16610_v0  ;;  %v7746_v7 = vadd.f32 %v9769_v35, %v14948_v10  ;;  %v7845_v44 = vsel %vm505_vm0, %v15280_v47, 0.0  ;;  %v6368_v18 = vadd.f32 %v14971_v45, %v5148_v3  ;;  %v16617_v13 = vld [vmem:[#allocation24_spill] sm:$0xff] }
0x146d   : > { %7846 = vadd.xlane.f32.xlu1 %v7845_v44  ;;  %v7667_v36 = vpop.f32.mrf.mxu0 }
0x146e   : > { %v15292_v50 = vadd.f32 %v7746_v7, %v16611_v20  ;;  %v7744_v11 = vadd.f32 %v7667_v36, %v6364_v43  ;;  %v7839_v26 = vsel %vm505_vm0, %v15285_v23, 0.0  ;;  %v16619_v43 = vld [vmem:[#allocation51_spill] sm:$0xff] }
0x146f   : > { %v3752_v20 = vadd.f32 %v15167_v52, %v16619_v43  ;;  %v16626_v43 = vld [vmem:[#allocation33_spill] sm:$0xff] }
0x1470   : > { %v15297_v49 = vadd.f32 %v7744_v11, %v16612_v19  ;;  %v7848_v10 = vsel %vm505_vm0, %v15292_v50, 0.0  ;;  %v16620_v11 = vld [vmem:[#allocation29_spill] sm:$0xff] }
0x1471   : > { %7840 = vadd.xlane.f32.xlu1 %v7839_v26 }
0x1472   : > { %v7842_v32 = vsel %vm505_vm0, %v15297_v49, 0.0 }
0x1475   : > { %7849 = vadd.xlane.f32.xlu1 %v7848_v10 }
0x1477   : > { %v9772_v9 = vpop.f32.mrf.mxu0 }
0x1478   : > { %v7749_v22 = vadd.f32 %v9772_v9, %v14959_v30  ;;  %v16621_v9 = vld [vmem:[#allocation132_spill] sm:$0xff] }
0x1479   : > { %7843 = vadd.xlane.f32.xlu1 %v7842_v32  ;;  %v7680_v51 = vpop.f32.mrf.mxu0  ;;  %v16622_v32 = vld [vmem:[#allocation27_spill] sm:$0xff] }
0x147a   : > { %v15307_v58 = vadd.f32 %v7749_v22, %v16614_v31  ;;  %v7747_v15 = vadd.f32 %v7680_v51, %v14964_v1  ;;  %v5152_v22 = vadd.f32 %v16621_v9, %v3752_v20 }
0x147b   : > { %v9773_v6 = vpop.f32.mrf.mxu0 }
0x147c   : > { %v15312_v63 = vadd.f32 %v7747_v15, %v16616_v37  ;;  %v7750_v30 = vadd.f32 %v9773_v6, %v14967_v8  ;;  %v7857_v46 = vsel %vm505_vm0, %v15307_v58, 0.0  ;;  %v6372_v31 = vadd.f32 %v14982_v34, %v5152_v22  ;;  %v16623_v15 = vld [vmem:[#allocation28_spill] sm:$0xff]  ;;  %v16628_v22 = vld [vmem:[#allocation31_spill] sm:$0xff] }
0x147d   : > { %7858 = vadd.xlane.f32.xlu1 %v7857_v46  ;;  %v7683_v59 = vpop.f32.mrf.mxu0 }
0x147e   : > { %v15319_v35 = vadd.f32 %v7750_v30, %v16617_v13  ;;  %v7748_v21 = vadd.f32 %v7683_v59, %v6368_v18  ;;  %v7851_v1 = vsel %vm505_vm0, %v15312_v63, 0.0  ;;  %v16624_v30 = vld [vmem:[#allocation26_spill] sm:$0xff] }
0x1480   : > { %v15324_v0 = vadd.f32 %v7748_v21, %v16618_v53  ;;  %v7860_v8 = vsel %vm505_vm0, %v15319_v35, 0.0 }
0x1481   : > { %7852 = vadd.xlane.f32.xlu1 %v7851_v1 }
0x1482   : > { %v7854_v45 = vsel %vm505_vm0, %v15324_v0, 0.0 }
0x1485   : > { %7861 = vadd.xlane.f32.xlu1 %v7860_v8 }
0x1487   : > { %v9776_v7 = vpop.f32.mrf.mxu0 }
0x1488   : > { %v7753_v44 = vadd.f32 %v9776_v7, %v14974_v33  ;;  %v16625_v7 = vld [vmem:[#allocation72_spill] sm:$0xff] }
0x1489   : > { %7855 = vadd.xlane.f32.xlu1 %v7854_v45  ;;  %v7696_v36 = vpop.f32.mrf.mxu0 }
0x148a   : > { %v15334_v26 = vadd.f32 %v7753_v44, %v16620_v11  ;;  %v7751_v19 = vadd.f32 %v7696_v36, %v14977_v62  ;;  %v3768_v44 = vadd.f32 %v15167_v52, %v16625_v7 }
0x148b   : > { %v9777_v10 = vpop.f32.mrf.mxu0 }
0x148c   : > { %v15339_v51 = vadd.f32 %v7751_v19, %v16622_v32  ;;  %v7754_v33 = vadd.f32 %v9777_v10, %v14980_v25  ;;  %v7869_v24 = vsel %vm505_vm0, %v15334_v26, 0.0  ;;  %v16627_v19 = vld [vmem:[#allocation149_spill] sm:$0xff] }
0x148d   : > { %7870 = vadd.xlane.f32.xlu1 %v7869_v24  ;;  %v7699_v2 = vpop.f32.mrf.mxu0  ;;  %v5156_v10 = vadd.f32 %v16627_v19, %v3768_v44 }
0x148e   : > { %v15346_v6 = vadd.f32 %v7754_v33, %v16623_v15  ;;  %v7752_v41 = vadd.f32 %v7699_v2, %v6372_v31  ;;  %v7863_v62 = vsel %vm505_vm0, %v15339_v51, 0.0 }
0x148f   : > { %v6376_v15 = vadd.f32 %v15145_v12, %v5156_v10 }
0x1490   : > { %v15351_v46 = vadd.f32 %v7752_v41, %v16624_v30  ;;  %v7872_v59 = vsel %vm505_vm0, %v15346_v6, 0.0 }
0x1491   : > { %7864 = vadd.xlane.f32.xlu1 %v7863_v62 }
0x1492   : > { %v7799_v3 = vpop.xlane.xlu0 %7798  ;;  %v7866_v8 = vsel %vm505_vm0, %v15351_v46, 0.0 }
0x1493   : > { %v7889_v37 = vmul.f32 0.015625, %v7799_v3  ;;  %v16629_v3 = vld [vmem:[#allocation32_spill] sm:$0xff] }
0x1495   : > { %v15354_v25 = vsub.f32 %v15172_v29, %v7889_v37  ;;  %7873 = vadd.xlane.f32.xlu1 %v7872_v59 }
0x1496   : > { %v7793_v34 = vpop.xlane.xlu0 %7792 }
0x1497   : > { %v7887_v18 = vmul.f32 0.015625, %v7793_v34  ;;  %v7953_v13 = vmul.f32 %v15354_v25, %v15354_v25  ;;  %v9780_v21 = vpop.f32.mrf.mxu0 }
0x1498   : > { %v7757_v53 = vadd.f32 %v9780_v21, %v14985_v60 }
0x1499   : > { %v15361_v1 = vsub.f32 %v15177_v55, %v7887_v18  ;;  %v7989_v29 = vsel %vm505_vm0, %v7953_v13, 0.0  ;;  %7867 = vadd.xlane.f32.xlu1 %v7866_v8  ;;  %v7712_v45 = vpop.f32.mrf.mxu0  ;;  %v16630_v13 = vld [vmem:[#allocation30_spill] sm:$0xff] }
0x149a   : > { %v7802_v36 = vpop.xlane.xlu0 %7801  ;;  %7990 = vadd.xlane.f32.xlu0 %v7989_v29  ;;  %v15370_v20 = vadd.f32 %v7757_v53, %v16626_v43  ;;  %v7755_v55 = vadd.f32 %v7712_v45, %v14988_v61 }
0x149b   : > { %v7890_v11 = vmul.f32 0.015625, %v7802_v36  ;;  %v7951_v60 = vmul.f32 %v15361_v1, %v15361_v1  ;;  %v9781_v9 = vpop.f32.mrf.mxu0 }
0x149c   : > { %v15377_v32 = vadd.f32 %v7755_v55, %v16628_v22  ;;  %v7758_v33 = vadd.f32 %v9781_v9, %v14991_v28  ;;  %v7881_v24 = vsel %vm505_vm0, %v15370_v20, 0.0 }
0x149d   : > { %v15380_v52 = vsub.f32 %v15184_v39, %v7890_v11  ;;  %7882 = vadd.xlane.f32.xlu1 %v7881_v24  ;;  %v7715_v61 = vpop.f32.mrf.mxu0  ;;  %v7983_v31 = vsel %vm505_vm0, %v7951_v60, 0.0 }
0x149e   : > { %v7796_v2 = vpop.xlane.xlu0 %7795  ;;  %7984 = vadd.xlane.f32.xlu0 %v7983_v31  ;;  %v15390_v39 = vadd.f32 %v7758_v33, %v16629_v3  ;;  %v7756_v37 = vadd.f32 %v7715_v61, %v6376_v15  ;;  %v7875_v30 = vsel %vm505_vm0, %v15377_v32, 0.0 }
0x149f   : > { %v7888_v41 = vmul.f32 0.015625, %v7796_v2  ;;  %v7954_v62 = vmul.f32 %v15380_v52, %v15380_v52 }
0x14a0   : > { %v15401_v21 = vadd.f32 %v7756_v37, %v16630_v13 }
0x14a1   : > { %v15393_v28 = vsub.f32 %v15189_v4, %v7888_v41  ;;  %7876 = vadd.xlane.f32.xlu1 %v7875_v30  ;;  %v7992_v34 = vsel %vm505_vm0, %v7954_v62, 0.0  ;;  %v7884_v4 = vsel %vm505_vm0, %v15390_v39, 0.0 }
0x14a2   : > { %v7811_v59 = vpop.xlane.xlu0 %7810  ;;  %7993 = vadd.xlane.f32.xlu0 %v7992_v34  ;;  %v7878_v36 = vsel %vm505_vm0, %v15401_v21, 0.0 }
0x14a3   : > { %v7893_v12 = vmul.f32 0.015625, %v7811_v59  ;;  %v7952_v18 = vmul.f32 %v15393_v28, %v15393_v28 }
0x14a5   : > { %v15404_v53 = vsub.f32 %v15199_v5, %v7893_v12  ;;  %v7986_v8 = vsel %vm505_vm0, %v7952_v18, 0.0  ;;  %7885 = vadd.xlane.f32.xlu1 %v7884_v4 }
0x14a6   : > { %v7805_v29 = vpop.xlane.xlu0 %7804  ;;  %7987 = vadd.xlane.f32.xlu0 %v7986_v8 }
0x14a7   : > { %v7891_v7 = vmul.f32 0.015625, %v7805_v29  ;;  %v7957_v44 = vmul.f32 %v15404_v53, %v15404_v53 }
0x14a9   : > { %v15412_v45 = vsub.f32 %v15204_v40, %v7891_v7  ;;  %v8001_v5 = vsel %vm505_vm0, %v7957_v44, 0.0  ;;  %7879 = vadd.xlane.f32.xlu1 %v7878_v36 }
0x14aa   : > { %v7814_v43 = vpop.xlane.xlu0 %7813  ;;  %8002 = vadd.xlane.f32.xlu0 %v8001_v5 }
0x14ab   : > { %v7894_v55 = vmul.f32 0.015625, %v7814_v43  ;;  %v7955_v11 = vmul.f32 %v15412_v45, %v15412_v45 }
0x14ad   : > { %v15420_v60 = vsub.f32 %v15211_v14, %v7894_v55  ;;  %v7995_v19 = vsel %vm505_vm0, %v7955_v11, 0.0 }
0x14ae   : > { %v7808_v10 = vpop.xlane.xlu0 %7807  ;;  %7996 = vadd.xlane.f32.xlu0 %v7995_v19 }
0x14af   : > { %v7892_v40 = vmul.f32 0.015625, %v7808_v10  ;;  %v7958_v9 = vmul.f32 %v15420_v60, %v15420_v60 }
0x14b1   : > { %v15426_v22 = vsub.f32 %v15216_v38, %v7892_v40  ;;  %v8004_v33 = vsel %vm505_vm0, %v7958_v9, 0.0 }
0x14b2   : > { %8005 = vadd.xlane.f32.xlu0 %v8004_v33 }
0x14b3   : > { %v7956_v24 = vmul.f32 %v15426_v22, %v15426_v22 }
0x14b5   : > { %v7998_v14 = vsel %vm505_vm0, %v7956_v24, 0.0 }
0x14b6   : > { %7999 = vadd.xlane.f32.xlu0 %v7998_v14 }
0x14d6   : > { %v7823_v61 = vpop.xlane.xlu0 %7822 }
0x14d7   : > { %v7897_v2 = vmul.f32 0.015625, %v7823_v61 }
0x14d9   : > { %v15433_v31 = vsub.f32 %v15226_v17, %v7897_v2 }
0x14da   : > { %v7817_v15 = vpop.xlane.xlu0 %7816 }
0x14db   : > { %v7895_v41 = vmul.f32 0.015625, %v7817_v15  ;;  %v7961_v38 = vmul.f32 %v15433_v31, %v15433_v31 }
0x14dd   : > { %v15438_v62 = vsub.f32 %v15231_v48, %v7895_v41  ;;  %v8013_v3 = vsel %vm505_vm0, %v7961_v38, 0.0 }
0x14de   : > { %v7826_v37 = vpop.xlane.xlu0 %7825  ;;  %8014 = vadd.xlane.f32.xlu0 %v8013_v3 }
0x14df   : > { %v7898_v30 = vmul.f32 0.015625, %v7826_v37  ;;  %v7959_v59 = vmul.f32 %v15438_v62, %v15438_v62 }
0x14e1   : > { %v15444_v34 = vsub.f32 %v15238_v57, %v7898_v30  ;;  %v8007_v17 = vsel %vm505_vm0, %v7959_v59, 0.0 }
0x14e2   : > { %v7820_v12 = vpop.xlane.xlu0 %7819  ;;  %8008 = vadd.xlane.f32.xlu0 %v8007_v17 }
0x14e3   : > { %v7896_v18 = vmul.f32 0.015625, %v7820_v12  ;;  %v7962_v48 = vmul.f32 %v15444_v34, %v15444_v34 }
0x14e5   : > { %v15450_v13 = vsub.f32 %v15243_v56, %v7896_v18  ;;  %v8016_v4 = vsel %vm505_vm0, %v7962_v48, 0.0 }
0x14e6   : > { %v7835_v8 = vpop.xlane.xlu0 %7834  ;;  %8017 = vadd.xlane.f32.xlu0 %v8016_v4 }
0x14e7   : > { %v7901_v29 = vmul.f32 0.015625, %v7835_v8  ;;  %v7960_v57 = vmul.f32 %v15450_v13, %v15450_v13 }
0x14e9   : > { %v15456_v7 = vsub.f32 %v15254_v42, %v7901_v29  ;;  %v8010_v44 = vsel %vm505_vm0, %v7960_v57, 0.0 }
0x14ea   : > { %v7829_v36 = vpop.xlane.xlu0 %7828  ;;  %8011 = vadd.xlane.f32.xlu0 %v8010_v44 }
0x14eb   : > { %v7899_v5 = vmul.f32 0.015625, %v7829_v36  ;;  %v7965_v56 = vmul.f32 %v15456_v7, %v15456_v7 }
0x14ed   : > { %v15462_v43 = vsub.f32 %v15259_v27, %v7899_v5  ;;  %v8025_v55 = vsel %vm505_vm0, %v7965_v56, 0.0 }
0x14ee   : > { %8026 = vadd.xlane.f32.xlu0 %v8025_v55  ;;  %v7832_v11 = vpop.xlane.xlu0 %7831 }
0x14ef   : > { %v7963_v19 = vmul.f32 %v15462_v43, %v15462_v43  ;;  %v7900_v42 = vmul.f32 0.015625, %v7832_v11 }
0x14f1   : > { %v8019_v10 = vsel %vm505_vm0, %v7963_v19, 0.0  ;;  %v15469_v33 = vsub.f32 %v15265_v54, %v7900_v42 }
0x14f2   : > { %8020 = vadd.xlane.f32.xlu0 %v8019_v10  ;;  %v7838_v40 = vpop.xlane.xlu0 %7837 }
0x14f3   : > { %v7902_v9 = vmul.f32 0.015625, %v7838_v40  ;;  %v7964_v41 = vmul.f32 %v15469_v33, %v15469_v33 }
0x14f5   : > { %v15472_v24 = vsub.f32 %v15270_v16, %v7902_v9  ;;  %v8022_v37 = vsel %vm505_vm0, %v7964_v41, 0.0 }
0x14f6   : > { %v7847_v27 = vpop.xlane.xlu1 %7846 }
0x14f7   : > { %v7905_v14 = vmul.f32 0.015625, %v7847_v27  ;;  %v7966_v61 = vmul.f32 %v15472_v24, %v15472_v24 }
0x14f9   : > { %v15477_v2 = vsub.f32 %v15280_v47, %v7905_v14  ;;  %v8028_v15 = vsel %vm505_vm0, %v7966_v61, 0.0 }
0x14fa   : > { %8029 = vadd.xlane.f32.xlu0 %v8028_v15  ;;  %v7841_v38 = vpop.xlane.xlu1 %7840 }
0x14fb   : > { %v7903_v54 = vmul.f32 0.015625, %v7841_v38  ;;  %v7969_v16 = vmul.f32 %v15477_v2, %v15477_v2 }
0x14fd   : > { %v15485_v3 = vsub.f32 %v15285_v23, %v7903_v54  ;;  %v8037_v30 = vsel %vm505_vm0, %v7969_v16, 0.0 }
0x14fe   : > { %8023 = vadd.xlane.f32.xlu0 %v8022_v37  ;;  %8038 = vadd.xlane.f32.xlu1 %v8037_v30  ;;  %v7850_v47 = vpop.xlane.xlu1 %7849 }
0x14ff   : > { %v7906_v59 = vmul.f32 0.015625, %v7850_v47  ;;  %v7967_v17 = vmul.f32 %v15485_v3, %v15485_v3 }
0x1501   : > { %v15492_v12 = vsub.f32 %v15292_v50, %v7906_v59  ;;  %v8031_v18 = vsel %vm505_vm0, %v7967_v17, 0.0 }
0x1502   : > { %8032 = vadd.xlane.f32.xlu1 %v8031_v18  ;;  %v7844_v48 = vpop.xlane.xlu1 %7843 }
0x1503   : > { %v7904_v23 = vmul.f32 0.015625, %v7844_v48  ;;  %v7970_v4 = vmul.f32 %v15492_v12, %v15492_v12 }
0x1505   : > { %v15498_v8 = vsub.f32 %v15297_v49, %v7904_v23  ;;  %v8040_v29 = vsel %vm505_vm0, %v7970_v4, 0.0 }
0x1506   : > { %8041 = vadd.xlane.f32.xlu1 %v8040_v29  ;;  %v7859_v57 = vpop.xlane.xlu1 %7858 }
0x1507   : > { %v7909_v44 = vmul.f32 0.015625, %v7859_v57  ;;  %v7968_v50 = vmul.f32 %v15498_v8, %v15498_v8 }
0x1509   : > { %v15504_v36 = vsub.f32 %v15307_v58, %v7909_v44  ;;  %v8034_v5 = vsel %vm505_vm0, %v7968_v50, 0.0 }
0x150a   : > { %8035 = vadd.xlane.f32.xlu1 %v8034_v5  ;;  %v7853_v56 = vpop.xlane.xlu1 %7852 }
0x150b   : > { %v7907_v55 = vmul.f32 0.015625, %v7853_v56  ;;  %v7973_v49 = vmul.f32 %v15504_v36, %v15504_v36 }
0x150d   : > { %v15510_v11 = vsub.f32 %v15312_v63, %v7907_v55  ;;  %v8049_v19 = vsel %vm505_vm0, %v7973_v49, 0.0 }
0x150e   : > { %8050 = vadd.xlane.f32.xlu1 %v8049_v19  ;;  %v7862_v42 = vpop.xlane.xlu1 %7861 }
0x150f   : > { %v7910_v10 = vmul.f32 0.015625, %v7862_v42  ;;  %v7971_v58 = vmul.f32 %v15510_v11, %v15510_v11 }
0x1511   : > { %v15516_v40 = vsub.f32 %v15319_v35, %v7910_v10  ;;  %v8043_v9 = vsel %vm505_vm0, %v7971_v58, 0.0 }
0x1512   : > { %8044 = vadd.xlane.f32.xlu1 %v8043_v9  ;;  %v7856_v27 = vpop.xlane.xlu1 %7855 }
0x1513   : > { %v7908_v14 = vmul.f32 0.015625, %v7856_v27  ;;  %v7974_v63 = vmul.f32 %v15516_v40, %v15516_v40 }
0x1515   : > { %v15522_v61 = vsub.f32 %v15324_v0, %v7908_v14  ;;  %v8052_v15 = vsel %vm505_vm0, %v7974_v63, 0.0 }
0x1516   : > { %8053 = vadd.xlane.f32.xlu1 %v8052_v15  ;;  %v7871_v41 = vpop.xlane.xlu1 %7870 }
0x1517   : > { %v7913_v38 = vmul.f32 0.015625, %v7871_v41  ;;  %v7972_v35 = vmul.f32 %v15522_v61, %v15522_v61 }
0x1519   : > { %v15528_v54 = vsub.f32 %v15334_v26, %v7913_v38  ;;  %v8046_v16 = vsel %vm505_vm0, %v7972_v35, 0.0 }
0x151a   : > { %8047 = vadd.xlane.f32.xlu1 %v8046_v16  ;;  %v7865_v37 = vpop.xlane.xlu1 %7864 }
0x151b   : > { %v7911_v30 = vmul.f32 0.015625, %v7865_v37  ;;  %v7977_v0 = vmul.f32 %v15528_v54, %v15528_v54 }
0x151d   : > { %v15534_v47 = vsub.f32 %v15339_v51, %v7911_v30  ;;  %v8061_v59 = vsel %vm505_vm0, %v7977_v0, 0.0 }
0x151e   : > { %8062 = vadd.xlane.f32.xlu1 %v8061_v59  ;;  %v7874_v17 = vpop.xlane.xlu1 %7873 }
0x151f   : > { %v7914_v18 = vmul.f32 0.015625, %v7874_v17  ;;  %v7975_v26 = vmul.f32 %v15534_v47, %v15534_v47 }
0x1521   : > { %v15540_v48 = vsub.f32 %v15346_v6, %v7914_v18  ;;  %v8055_v23 = vsel %vm505_vm0, %v7975_v26, 0.0 }
0x1522   : > { %8056 = vadd.xlane.f32.xlu1 %v8055_v23  ;;  %v7868_v4 = vpop.xlane.xlu1 %7867 }
0x1523   : > { %v7991_v29 = vpop.xlane.xlu0 %7990  ;;  %v7912_v57 = vmul.f32 0.015625, %v7868_v4  ;;  %v7978_v51 = vmul.f32 %v15540_v48, %v15540_v48 }
0x1524   : > { %v8081_v19 = vmul.f32 0.015625, %v7991_v29 }
0x1525   : > { %v15546_v44 = vsub.f32 %v15351_v46, %v7912_v57  ;;  %v8064_v50 = vsel %vm505_vm0, %v7978_v51, 0.0 }
0x1526   : > { %8065 = vadd.xlane.f32.xlu1 %v8064_v50  ;;  %v7883_v5 = vpop.xlane.xlu1 %7882  ;;  %v8113_v63 = vadd.f32 1e-05, %v8081_v19 }
0x1527   : > { %v7917_v56 = vmul.f32 0.015625, %v7883_v5  ;;  %v7985_v55 = vpop.xlane.xlu0 %7984  ;;  %v7976_v6 = vmul.f32 %v15546_v44, %v15546_v44 }
0x1528   : > { %v8079_v49 = vmul.f32 0.015625, %v7985_v55 }
0x1529   : > { %v15552_v42 = vsub.f32 %v15370_v20, %v7917_v56  ;;  %v8058_v10 = vsel %vm505_vm0, %v7976_v6, 0.0 }
0x152a   : > { %v8111_v58 = vadd.f32 1e-05, %v8079_v49  ;;  %8059 = vadd.xlane.f32.xlu1 %v8058_v10  ;;  %v7877_v46 = vpop.xlane.xlu1 %7876 }
0x152b   : > { %v7915_v9 = vmul.f32 0.015625, %v7877_v46  ;;  %v7994_v27 = vpop.xlane.xlu0 %7993  ;;  %v7981_v14 = vmul.f32 %v15552_v42, %v15552_v42 }
0x152c   : > { %10819 = vrsqrt.f32 %v8111_v58  ;;  %v8082_v38 = vmul.f32 0.015625, %v7994_v27  ;;  %v15586_v58 = vld [vmem:[%s15710_s3 + $0x6] ss:$0 sm:$0xff] }
0x152d   : > { %v15558_v15 = vsub.f32 %v15377_v32, %v7915_v9  ;;  %v8073_v41 = vsel %vm505_vm0, %v7981_v14, 0.0  ;;  %10821 = vrsqrt.f32 %v8113_v63 }
0x152e   : > { %8074 = vadd.xlane.f32.xlu1 %v8073_v41  ;;  %v7886_v20 = vpop.xlane.xlu1 %7885  ;;  %v8114_v17 = vadd.f32 1e-05, %v8082_v38 }
0x152f   : > { %v7918_v35 = vmul.f32 0.015625, %v7886_v20  ;;  %v7988_v16 = vpop.xlane.xlu0 %7987  ;;  %v7979_v37 = vmul.f32 %v15558_v15, %v15558_v15 }
0x1530   : > { %v8080_v30 = vmul.f32 0.015625, %v7988_v16 }
0x1531   : > { %v15564_v0 = vsub.f32 %v15390_v39, %v7918_v35  ;;  %v8067_v59 = vsel %vm505_vm0, %v7979_v37, 0.0 }
0x1532   : > { %v8112_v32 = vadd.f32 1e-05, %v8080_v30  ;;  %8068 = vadd.xlane.f32.xlu1 %v8067_v59  ;;  %v7880_v18 = vpop.xlane.xlu1 %7879 }
0x1533   : > { %v7916_v26 = vmul.f32 0.015625, %v7880_v18  ;;  %v8003_v23 = vpop.xlane.xlu0 %8002  ;;  %v7982_v4 = vmul.f32 %v15564_v0, %v15564_v0 }
0x1534   : > { %10823 = vrsqrt.f32 %v8112_v32  ;;  %v8085_v55 = vmul.f32 0.015625, %v8003_v23 }
0x1535   : > { %v15570_v29 = vsub.f32 %v15401_v21, %v7916_v26  ;;  %v8076_v57 = vsel %vm505_vm0, %v7982_v4, 0.0  ;;  %10825 = vrsqrt.f32 %v8114_v17  ;;  %v15580_v21 = vld [vmem:[%s15710_s3 + $0x5] ss:$0 sm:$0xff] }
0x1536   : > { %8077 = vadd.xlane.f32.xlu1 %v8076_v57  ;;  %v8117_v9 = vadd.f32 1e-05, %v8085_v55 }
0x1537   : > { %v7997_v39 = vpop.xlane.xlu0 %7996  ;;  %v7980_v51 = vmul.f32 %v15570_v29, %v15570_v29 }
0x1538   : > { %v8083_v50 = vmul.f32 0.015625, %v7997_v39 }
0x1539   : > { %v10820_v5 = vpop.eup %10819  ;;  %v8070_v56 = vsel %vm505_vm0, %v7980_v51, 0.0 }
0x153a   : > { %v8115_v6 = vadd.f32 1e-05, %v8083_v50  ;;  %8071 = vadd.xlane.f32.xlu1 %v8070_v56  ;;  %v8175_v49 = vmul.f32 %v10820_v5, %v15361_v1  ;;  %v10822_v46 = vpop.eup %10821 }
0x153b   : > { %v8006_v19 = vpop.xlane.xlu0 %8005  ;;  %v8177_v38 = vmul.f32 %v10822_v46, %v15354_v25 }
0x153c   : > { %10827 = vrsqrt.f32 %v8115_v6  ;;  %v8211_v10 = vmul.f32 %v15580_v21, %v8175_v49  ;;  %v8086_v27 = vmul.f32 0.015625, %v8006_v19 }
0x153d   : > { %10829 = vrsqrt.f32 %v8117_v9  ;;  %v8213_v17 = vmul.f32 %v15580_v21, %v8177_v38 }
0x153e   : > { %v8247_v14 = vadd.f32 %v15586_v58, %v8211_v10  ;;  %v8118_v20 = vadd.f32 1e-05, %v8086_v27 }
0x153f   : > { %v8000_v1 = vpop.xlane.xlu0 %7999  ;;  %v8249_v25 = vadd.f32 %v15586_v58, %v8213_v17 }
0x1540   : > { %v8084_v63 = vmul.f32 0.015625, %v8000_v1  ;;  %8279 = vxpose.xlu0.b32.start [1/16] (narrow) %v8247_v14, 64 }
0x1541   : > { %v10824_v41 = vpop.eup %10823 }
0x1542   : > { %v8116_v35 = vadd.f32 1e-05, %v8084_v63  ;;  %v8176_v16 = vmul.f32 %v10824_v41, %v15393_v28  ;;  %v10826_v37 = vpop.eup %10825 }
0x1543   : > { %v8178_v32 = vmul.f32 %v10826_v37, %v15380_v52 }
0x1544   : > { %10831 = vrsqrt.f32 %v8116_v35  ;;  %v8212_v30 = vmul.f32 %v15580_v21, %v8176_v16 }
0x1545   : > { %10833 = vrsqrt.f32 %v8118_v20  ;;  %v8214_v26 = vmul.f32 %v15580_v21, %v8178_v32 }
0x1546   : > { %v8248_v59 = vadd.f32 %v15586_v58, %v8212_v30 }
0x1547   : > { %v8250_v28 = vadd.f32 %v15586_v58, %v8214_v26 }
0x1548   : > { %8280 = vxpose.xlu0.b32.cont [2/16] (narrow) %v8248_v59, 64 }
0x1549   : > { %v10828_v18 = vpop.eup %10827 }
0x154a   : > { %v8179_v23 = vmul.f32 %v10828_v18, %v15412_v45  ;;  %v10830_v57 = vpop.eup %10829 }
0x154b   : > { %v8181_v50 = vmul.f32 %v10830_v57, %v15404_v53 }
0x154c   : > { %8281 = vxpose.xlu0.b32.cont [3/16] (narrow) %v8249_v25, 64  ;;  %v8215_v4 = vmul.f32 %v15580_v21, %v8179_v23 }
0x154d   : > { %v8217_v55 = vmul.f32 %v15580_v21, %v8181_v50 }
0x154e   : > { %v8251_v51 = vadd.f32 %v15586_v58, %v8215_v4 }
0x154f   : > { %v8253_v49 = vadd.f32 %v15586_v58, %v8217_v55 }
0x1550   : > { %8282 = vxpose.xlu0.b32.cont [4/16] (narrow) %v8250_v28, 64 }
0x1551   : > { %v10832_v39 = vpop.eup %10831 }
0x1552   : > { %v8180_v52 = vmul.f32 %v10832_v39, %v15426_v22  ;;  %v10834_v5 = vpop.eup %10833 }
0x1553   : > { %v8182_v6 = vmul.f32 %v10834_v5, %v15420_v60 }
0x1554   : > { %8283 = vxpose.xlu0.b32.cont [5/16] (narrow) %v8251_v51, 64  ;;  %v8216_v56 = vmul.f32 %v15580_v21, %v8180_v52 }
0x1555   : > { %v8218_v19 = vmul.f32 %v15580_v21, %v8182_v6 }
0x1556   : > { %v8252_v45 = vadd.f32 %v15586_v58, %v8216_v56 }
0x1557   : > { %v8254_v22 = vadd.f32 %v15586_v58, %v8218_v19 }
0x1558   : > { %8284 = vxpose.xlu0.b32.cont [6/16] (narrow) %v8252_v45, 64 }
0x155c   : > { %8285 = vxpose.xlu0.b32.cont [7/16] (narrow) %v8253_v49, 64 }
0x1560   : > { %8286 = vxpose.xlu0.b32.cont [8/16] (narrow) %v8254_v22, 64 }
0x1567   : > { %v8015_v53 = vpop.xlane.xlu0 %8014 }
0x1568   : > { %v8089_v9 = vmul.f32 0.015625, %v8015_v53 }
0x156a   : > { %v8121_v1 = vadd.f32 1e-05, %v8089_v9 }
0x156b   : > { %v8009_v10 = vpop.xlane.xlu0 %8008 }
0x156c   : > { %v8087_v46 = vmul.f32 0.015625, %v8009_v10 }
0x156e   : > { %v8119_v27 = vadd.f32 1e-05, %v8087_v46 }
0x156f   : > { %v8018_v14 = vpop.xlane.xlu0 %8017 }
0x1570   : > { %10835 = vrsqrt.f32 %v8119_v27  ;;  %v8090_v63 = vmul.f32 0.015625, %v8018_v14 }
0x1571   : > { %10837 = vrsqrt.f32 %v8121_v1 }
0x1572   : > { %v8122_v38 = vadd.f32 1e-05, %v8090_v63 }
0x1573   : > { %v8012_v41 = vpop.xlane.xlu0 %8011 }
0x1574   : > { %v8088_v60 = vmul.f32 0.015625, %v8012_v41 }
0x1576   : > { %v8120_v20 = vadd.f32 1e-05, %v8088_v60 }
0x1577   : > { %v8027_v35 = vpop.xlane.xlu0 %8026 }
0x1578   : > { %10839 = vrsqrt.f32 %v8120_v20  ;;  %v8093_v25 = vmul.f32 0.015625, %v8027_v35 }
0x1579   : > { %10841 = vrsqrt.f32 %v8122_v38 }
0x157a   : > { %v8125_v39 = vadd.f32 1e-05, %v8093_v25 }
0x157b   : > { %v8021_v16 = vpop.xlane.xlu0 %8020 }
0x157c   : > { %v8091_v37 = vmul.f32 0.015625, %v8021_v16 }
0x157d   : > { %v10836_v30 = vpop.eup %10835 }
0x157e   : > { %v8123_v59 = vadd.f32 1e-05, %v8091_v37  ;;  %v8183_v17 = vmul.f32 %v10836_v30, %v15438_v62  ;;  %v10838_v18 = vpop.eup %10837 }
0x157f   : > { %v8185_v57 = vmul.f32 %v10838_v18, %v15433_v31 }
0x1580   : > { %10843 = vrsqrt.f32 %v8123_v59  ;;  %v8219_v32 = vmul.f32 %v15580_v21, %v8183_v17 }
0x1581   : > { %v8221_v55 = vmul.f32 %v15580_v21, %v8185_v57  ;;  %10845 = vrsqrt.f32 %v8125_v39 }
0x1582   : > { %v8255_v26 = vadd.f32 %v15586_v58, %v8219_v32 }
0x1583   : > { %v8030_v23 = vpop.xlane.xlu0 %8029  ;;  %v8257_v53 = vadd.f32 %v15586_v58, %v8221_v55 }
0x1584   : > { %8287 = vxpose.xlu0.b32.cont [9/16] (narrow) %v8255_v26, 64  ;;  %v8094_v4 = vmul.f32 0.015625, %v8030_v23 }
0x1585   : > { %v10840_v28 = vpop.eup %10839 }
0x1586   : > { %v8184_v51 = vmul.f32 %v10840_v28, %v15450_v13  ;;  %v10842_v52 = vpop.eup %10841  ;;  %v8126_v45 = vadd.f32 1e-05, %v8094_v4 }
0x1587   : > { %v8024_v50 = vpop.xlane.xlu0 %8023  ;;  %v8039_v5 = vpop.xlane.xlu1 %8038  ;;  %v8186_v19 = vmul.f32 %v10842_v52, %v15444_v34 }
0x1588   : > { %v8092_v62 = vmul.f32 0.015625, %v8024_v50  ;;  %v8220_v56 = vmul.f32 %v15580_v21, %v8184_v51  ;;  %v8097_v10 = vmul.f32 0.015625, %v8039_v5 }
0x1589   : > { %v8222_v9 = vmul.f32 %v15580_v21, %v8186_v19 }
0x158a   : > { %v8124_v6 = vadd.f32 1e-05, %v8092_v62  ;;  %v8256_v49 = vadd.f32 %v15586_v58, %v8220_v56  ;;  %v8129_v1 = vadd.f32 1e-05, %v8097_v10 }
0x158b   : > { %v8033_v22 = vpop.xlane.xlu1 %8032  ;;  %v8258_v34 = vadd.f32 %v15586_v58, %v8222_v9 }
0x158c   : > { %10847 = vrsqrt.f32 %v8124_v6  ;;  %v8095_v31 = vmul.f32 0.015625, %v8033_v22  ;;  %8288 = vxpose.xlu0.b32.cont [10/16] (narrow) %v8256_v49, 64 }
0x158d   : > { %v10844_v13 = vpop.eup %10843  ;;  %10849 = vrsqrt.f32 %v8126_v45 }
0x158e   : > { %v8127_v46 = vadd.f32 1e-05, %v8095_v31  ;;  %v8187_v27 = vmul.f32 %v10844_v13, %v15462_v43  ;;  %v10846_v37 = vpop.eup %10845 }
0x158f   : > { %v8042_v14 = vpop.xlane.xlu1 %8041  ;;  %v8189_v32 = vmul.f32 %v10846_v37, %v15456_v7 }
0x1590   : > { %10851 = vrsqrt.f32 %v8127_v46  ;;  %8289 = vxpose.xlu0.b32.cont [11/16] (narrow) %v8257_v53, 64  ;;  %v8098_v63 = vmul.f32 0.015625, %v8042_v14  ;;  %v8223_v41 = vmul.f32 %v15580_v21, %v8187_v27 }
0x1591   : > { %10853 = vrsqrt.f32 %v8129_v1  ;;  %v8225_v51 = vmul.f32 %v15580_v21, %v8189_v32 }
0x1592   : > { %v8130_v20 = vadd.f32 1e-05, %v8098_v63  ;;  %v8259_v16 = vadd.f32 %v15586_v58, %v8223_v41 }
0x1593   : > { %v8036_v60 = vpop.xlane.xlu1 %8035  ;;  %v8261_v56 = vadd.f32 %v15586_v58, %v8225_v51 }
0x1594   : > { %v8096_v38 = vmul.f32 0.015625, %v8036_v60  ;;  %8290 = vxpose.xlu0.b32.cont [12/16] (narrow) %v8258_v34, 64 }
0x1596   : > { %v8128_v35 = vadd.f32 1e-05, %v8096_v38 }
0x1597   : > { %v8051_v30 = vpop.xlane.xlu1 %8050 }
0x1598   : > { %10855 = vrsqrt.f32 %v8128_v35  ;;  %8291 = vxpose.xlu0.b32.cont [13/16] (narrow) %v8259_v16, 64  ;;  %v8101_v28 = vmul.f32 0.015625, %v8051_v30 }
0x1599   : > { %v10848_v43 = vpop.eup %10847  ;;  %10857 = vrsqrt.f32 %v8130_v20 }
0x159a   : > { %v10850_v59 = vpop.eup %10849  ;;  %v8188_v17 = vmul.f32 %v10848_v43, %v15469_v33  ;;  %v8133_v33 = vadd.f32 1e-05, %v8101_v28 }
0x159b   : > { %v8045_v18 = vpop.xlane.xlu1 %8044  ;;  %v8190_v4 = vmul.f32 %v10850_v59, %v15472_v24 }
0x159c   : > { %v8099_v25 = vmul.f32 0.015625, %v8045_v18  ;;  %v8224_v26 = vmul.f32 %v15580_v21, %v8188_v17 }
0x159d   : > { %v10852_v23 = vpop.eup %10851  ;;  %v8226_v5 = vmul.f32 %v15580_v21, %v8190_v4 }
0x159e   : > { %v8131_v57 = vadd.f32 1e-05, %v8099_v25  ;;  %v8260_v39 = vadd.f32 %v15586_v58, %v8224_v26  ;;  %v8191_v52 = vmul.f32 %v10852_v23, %v15485_v3  ;;  %v10854_v45 = vpop.eup %10853 }
0x159f   : > { %v8054_v50 = vpop.xlane.xlu1 %8053  ;;  %v8262_v3 = vadd.f32 %v15586_v58, %v8226_v5  ;;  %v8193_v13 = vmul.f32 %v10854_v45, %v15477_v2 }
0x15a0   : > { %10859 = vrsqrt.f32 %v8131_v57  ;;  %8292 = vxpose.xlu0.b32.cont [14/16] (narrow) %v8260_v39, 64  ;;  %v8227_v7 = vmul.f32 %v15580_v21, %v8191_v52  ;;  %v8102_v62 = vmul.f32 0.015625, %v8054_v50 }
0x15a1   : > { %10861 = vrsqrt.f32 %v8133_v33  ;;  %v8229_v27 = vmul.f32 %v15580_v21, %v8193_v13 }
0x15a2   : > { %v8263_v24 = vadd.f32 %v15586_v58, %v8227_v7  ;;  %v8134_v19 = vadd.f32 1e-05, %v8102_v62 }
0x15a3   : > { %v8048_v55 = vpop.xlane.xlu1 %8047  ;;  %v8265_v2 = vadd.f32 %v15586_v58, %v8229_v27 }
0x15a4   : > { %v8100_v6 = vmul.f32 0.015625, %v8048_v55  ;;  %8293 = vxpose.xlu0.b32.cont [15/16] (narrow) %v8261_v56, 64  ;;  %8311 = vxpose.xlu1.b32.start [1/16] (narrow) %v8263_v24, 64 }
0x15a5   : > { %v10856_v49 = vpop.eup %10855 }
0x15a6   : > { %v8132_v22 = vadd.f32 1e-05, %v8100_v6  ;;  %v8192_v31 = vmul.f32 %v10856_v49, %v15498_v8  ;;  %v10858_v53 = vpop.eup %10857 }
0x15a7   : > { %v8063_v10 = vpop.xlane.xlu1 %8062  ;;  %v8194_v14 = vmul.f32 %v10858_v53, %v15492_v12 }
0x15a8   : > { %10863 = vrsqrt.f32 %v8132_v22  ;;  %8294 = vxpose.xlu0.b32.end [16/16] (narrow) %v8262_v3, 64  ;;  %v8228_v46 = vmul.f32 %v15580_v21, %v8192_v31  ;;  %v8105_v8 = vmul.f32 0.015625, %v8063_v10 }
0x15a9   : > { %10865 = vrsqrt.f32 %v8134_v19  ;;  %v8230_v60 = vmul.f32 %v15580_v21, %v8194_v14 }
0x15aa   : > { %v8264_v9 = vadd.f32 %v15586_v58, %v8228_v46  ;;  %v8137_v35 = vadd.f32 1e-05, %v8105_v8 }
0x15ab   : > { %v8057_v1 = vpop.xlane.xlu1 %8056  ;;  %v8266_v12 = vadd.f32 %v15586_v58, %v8230_v60 }
0x15ac   : > { %v8103_v63 = vmul.f32 0.015625, %v8057_v1  ;;  %8312 = vxpose.xlu1.b32.cont [2/16] (narrow) %v8264_v9, 64 }
0x15ad   : > { %v10860_v34 = vpop.eup %10859 }
0x15ae   : > { %v8135_v41 = vadd.f32 1e-05, %v8103_v63  ;;  %v8195_v38 = vmul.f32 %v10860_v34, %v15510_v11  ;;  %v10862_v16 = vpop.eup %10861 }
0x15af   : > { %v8066_v20 = vpop.xlane.xlu1 %8065  ;;  %v8197_v32 = vmul.f32 %v10862_v16, %v15504_v36 }
0x15b0   : > { %10867 = vrsqrt.f32 %v8135_v41  ;;  %8313 = vxpose.xlu1.b32.cont [3/16] (narrow) %v8265_v2, 64  ;;  %v8106_v37 = vmul.f32 0.015625, %v8066_v20  ;;  %v8231_v30 = vmul.f32 %v15580_v21, %v8195_v38 }
0x15b1   : > { %10869 = vrsqrt.f32 %v8137_v35  ;;  %v8233_v39 = vmul.f32 %v15580_v21, %v8197_v32 }
0x15b2   : > { %v8138_v18 = vadd.f32 1e-05, %v8106_v37  ;;  %v8267_v11 = vadd.f32 %v15586_v58, %v8231_v30 }
0x15b3   : > { %v8060_v43 = vpop.xlane.xlu1 %8059 }
0x15b4   : > { %v8104_v59 = vmul.f32 0.015625, %v8060_v43  ;;  %8314 = vxpose.xlu1.b32.cont [4/16] (narrow) %v8266_v12, 64 }
0x15b5   : > { %v10864_v17 = vpop.eup %10863 }
0x15b6   : > { %v8136_v25 = vadd.f32 1e-05, %v8104_v59  ;;  %v8196_v26 = vmul.f32 %v10864_v17, %v15522_v61  ;;  %v10866_v23 = vpop.eup %10865  ;;  %v8269_v61 = vadd.f32 %v15586_v58, %v8233_v39 }
0x15b7   : > { %v8075_v28 = vpop.xlane.xlu1 %8074  ;;  %v8198_v51 = vmul.f32 %v10866_v23, %v15516_v40 }
0x15b8   : > { %10871 = vrsqrt.f32 %v8136_v25  ;;  %8315 = vxpose.xlu1.b32.cont [5/16] (narrow) %v8267_v11, 64  ;;  %v8232_v4 = vmul.f32 %v15580_v21, %v8196_v26  ;;  %v8109_v7 = vmul.f32 0.015625, %v8075_v28 }
0x15b9   : > { %10873 = vrsqrt.f32 %v8138_v18  ;;  %v8234_v5 = vmul.f32 %v15580_v21, %v8198_v51 }
0x15ba   : > { %v8268_v57 = vadd.f32 %v15586_v58, %v8232_v4  ;;  %v8141_v24 = vadd.f32 1e-05, %v8109_v7 }
0x15bb   : > { %v8069_v36 = vpop.xlane.xlu1 %8068  ;;  %v8270_v40 = vadd.f32 %v15586_v58, %v8234_v5 }
0x15bc   : > { %v8107_v52 = vmul.f32 0.015625, %v8069_v36  ;;  %8316 = vxpose.xlu1.b32.cont [6/16] (narrow) %v8268_v57, 64 }
0x15bd   : > { %v10868_v50 = vpop.eup %10867 }
0x15be   : > { %v8139_v33 = vadd.f32 1e-05, %v8107_v52  ;;  %v8199_v62 = vmul.f32 %v10868_v50, %v15534_v47  ;;  %v10870_v45 = vpop.eup %10869 }
0x15bf   : > { %v8078_v56 = vpop.xlane.xlu1 %8077  ;;  %v8201_v22 = vmul.f32 %v10870_v45, %v15528_v54 }
0x15c0   : > { %10875 = vrsqrt.f32 %v8139_v33  ;;  %8317 = vxpose.xlu1.b32.cont [7/16] (narrow) %v8269_v61, 64  ;;  %v8110_v55 = vmul.f32 0.015625, %v8078_v56  ;;  %v8235_v6 = vmul.f32 %v15580_v21, %v8199_v62 }
0x15c1   : > { %10877 = vrsqrt.f32 %v8141_v24  ;;  %v8237_v27 = vmul.f32 %v15580_v21, %v8201_v22 }
0x15c2   : > { %v8142_v31 = vadd.f32 1e-05, %v8110_v55  ;;  %v8271_v47 = vadd.f32 %v15586_v58, %v8235_v6 }
0x15c3   : > { %v8072_v49 = vpop.xlane.xlu1 %8071  ;;  %v8273_v1 = vadd.f32 %v15586_v58, %v8237_v27 }
0x15c4   : > { %v8108_v3 = vmul.f32 0.015625, %v8072_v49  ;;  %8318 = vxpose.xlu1.b32.cont [8/16] (narrow) %v8270_v40, 64 }
0x15c5   : > { %v10872_v19 = vpop.eup %10871 }
0x15c6   : > { %v8140_v13 = vadd.f32 1e-05, %v8108_v3  ;;  %v8200_v53 = vmul.f32 %v10872_v19, %v15546_v44  ;;  %v10874_v10 = vpop.eup %10873 }
0x15c7   : > { %v8202_v14 = vmul.f32 %v10874_v10, %v15540_v48 }
0x15c8   : > { %10879 = vrsqrt.f32 %v8140_v13  ;;  %8319 = vxpose.xlu1.b32.cont [9/16] (narrow) %v8271_v47, 64  ;;  %v8236_v46 = vmul.f32 %v15580_v21, %v8200_v53 }
0x15c9   : > { %10881 = vrsqrt.f32 %v8142_v31  ;;  %v8238_v63 = vmul.f32 %v15580_v21, %v8202_v14 }
0x15ca   : > { %v8272_v9 = vadd.f32 %v15586_v58, %v8236_v46 }
0x15cb   : > { %v8274_v8 = vadd.f32 %v15586_v58, %v8238_v63 }
0x15cc   : > { %8320 = vxpose.xlu1.b32.cont [10/16] (narrow) %v8272_v9, 64 }
0x15cd   : > { %v10876_v54 = vpop.eup %10875 }
0x15ce   : > { %v8203_v44 = vmul.f32 %v10876_v54, %v15558_v15  ;;  %v10878_v34 = vpop.eup %10877 }
0x15cf   : > { %v8205_v38 = vmul.f32 %v10878_v34, %v15552_v42 }
0x15d0   : > { %8321 = vxpose.xlu1.b32.cont [11/16] (narrow) %v8273_v1, 64  ;;  %v8239_v41 = vmul.f32 %v15580_v21, %v8203_v44 }
0x15d1   : > { %v8241_v16 = vmul.f32 %v15580_v21, %v8205_v38 }
0x15d2   : > { %v8275_v60 = vadd.f32 %v15586_v58, %v8239_v41 }
0x15d3   : > { %v8277_v12 = vadd.f32 %v15586_v58, %v8241_v16 }
0x15d4   : > { %8322 = vxpose.xlu1.b32.cont [12/16] (narrow) %v8274_v8, 64 }
0x15d5   : > { %v10880_v2 = vpop.eup %10879 }
0x15d6   : > { %v8204_v48 = vmul.f32 %v10880_v2, %v15570_v29  ;;  %v10882_v20 = vpop.eup %10881 }
0x15d7   : > { %v8206_v37 = vmul.f32 %v10882_v20, %v15564_v0 }
0x15d8   : > { %8323 = vxpose.xlu1.b32.cont [13/16] (narrow) %v8275_v60, 64  ;;  %v8240_v35 = vmul.f32 %v15580_v21, %v8204_v48 }
0x15d9   : > { %v8242_v30 = vmul.f32 %v15580_v21, %v8206_v37 }
0x15da   : > { %v8276_v15 = vadd.f32 %v15586_v58, %v8240_v35 }
0x15db   : > { %v8278_v29 = vadd.f32 %v15586_v58, %v8242_v30 }
0x15dc   : > { %8324 = vxpose.xlu1.b32.cont [14/16] (narrow) %v8276_v15, 64 }
0x15e0   : > { %8325 = vxpose.xlu1.b32.cont [15/16] (narrow) %v8277_v12, 64 }
0x15e4   : > { %8326 = vxpose.xlu1.b32.end [16/16] (narrow) %v8278_v29, 64 }
0x15e8   : > { %v8295_v42 = vpop.trf.xlu0 }
0x15e9   : > { %8343 = vst [vmem:[%s15686_s17] sm:$0xff] %v8295_v42 }
0x15ec   : > { %v8296_v0 = vpop.trf.xlu0 }
0x15ed   : > { %8345 = vst [vmem:[%s15686_s17 + $0x10] sm:$0xff] %v8296_v0 }
0x15f0   : > { %v8297_v21 = vpop.trf.xlu0 }
0x15f1   : > { %8347 = vst [vmem:[%s15686_s17 + $0x20] sm:$0xff] %v8297_v21 }
0x15f4   : > { %v8298_v58 = vpop.trf.xlu0 }
0x15f5   : > { %8349 = vst [vmem:[%s15686_s17 + $0x30] sm:$0xff] %v8298_v58 }
0x15f8   : > { %v8299_v43 = vpop.trf.xlu0 }
0x15f9   : > { %8351 = vst [vmem:[%s15686_s17 + $0x40] sm:$0xff] %v8299_v43 }
0x15fc   : > { %v8300_v59 = vpop.trf.xlu0 }
0x15fd   : > { %8353 = vst [vmem:[%s15686_s17 + $0x50] sm:$0xff] %v8300_v59 }
0x1600   : > { %v8301_v17 = vpop.trf.xlu0 }
0x1601   : > { %8355 = vst [vmem:[%s15686_s17 + $0x60] sm:$0xff] %v8301_v17 }
0x1604   : > { %v8302_v32 = vpop.trf.xlu0 }
0x1605   : > { %8357 = vst [vmem:[%s15686_s17 + $0x70] sm:$0xff] %v8302_v32 }
0x1624   : > { %v8327_v18 = vpop.trf.xlu1 }
0x1625   : > { %8344 = vst [vmem:[%s15686_s17 + $0x8] sm:$0xff] %v8327_v18 }
0x1628   : > { %v8328_v25 = vpop.trf.xlu1 }
0x1629   : > { %8346 = vst [vmem:[%s15686_s17 + $0x18] sm:$0xff] %v8328_v25 }
0x162c   : > { %v8329_v11 = vpop.trf.xlu1 }
0x162d   : > { %8348 = vst [vmem:[%s15686_s17 + $0x28] sm:$0xff] %v8329_v11 }
0x1630   : > { %v8330_v26 = vpop.trf.xlu1 }
0x1631   : > { %8350 = vst [vmem:[%s15686_s17 + $0x38] sm:$0xff] %v8330_v26 }
0x1634   : > { %v8331_v23 = vpop.trf.xlu1 }
0x1635   : > { %8352 = vst [vmem:[%s15686_s17 + $0x48] sm:$0xff] %v8331_v23 }
0x1638   : > { %v8332_v28 = vpop.trf.xlu1 }
0x1639   : > { %8354 = vst [vmem:[%s15686_s17 + $0x58] sm:$0xff] %v8332_v28 }
0x163c   : > { %v8333_v4 = vpop.trf.xlu1 }
0x163d   : > { %8356 = vst [vmem:[%s15686_s17 + $0x68] sm:$0xff] %v8333_v4 }
0x1640   : > { %v8334_v57 = vpop.trf.xlu1 }
0x1641   : > { %8358 = vst [vmem:[%s15686_s17 + $0x78] sm:$0xff] %v8334_v57 }
0x1642 PF: > { %s19_s30 = sadd.s32 1, %s10891_s30  }
0x1643   : > { %p16_p4 = scmp.ge.s32.totalorder %s19_s30, 4  }
0x1645   :  { %18 = sbr.rel (!%p16_p4) target bundleno = 1 (0x1), region = 91 }

</bundles_post_ra>
